<compile_context>
chip_gen: v5e
topology: v5e:2x2
jax: 0.10.0
libtpu: 0.0.40
codegen_flags: <defaults>
</compile_context>

<pallas_src>
import functools

import jax
import jax.numpy as jnp
from jax import lax
from jax.experimental import pallas as pl
from jax.experimental.pallas import tpu as pltpu

H0, H1, H2 = 32, 64, 128
_T_CHUNK_MAX = 32          # timesteps per grid step
_UNROLL = 8                # partial unroll of the in-kernel time loop
_B_BLK_MAX = 32            # batch rows per block (keeps a step in-registers)


def _round_up(x, m):
    return (x + m - 1) // m * m


def _cell(gates, c_prev, H):
    """LSTM cell pointwise math; gate columns already ordered [i, f, o, g]."""
    sig = jax.nn.sigmoid(gates[:, : 3 * H])      # one contiguous wide sigmoid
    g = jnp.tanh(gates[:, 3 * H:])               # one contiguous tanh
    i = sig[:, 0 * H:1 * H]
    f = sig[:, 1 * H:2 * H]
    o = sig[:, 2 * H:3 * H]
    c_new = f * c_prev + i * g
    h_new = o * jnp.tanh(c_new)
    return h_new, c_new


def decoder_kernel(
    pre_ref,                                   # (T, Bb, 4*H0): x@Wih0 + b0 (precomputed, mxu dtype)
    whh0_ref,                                  # (H0, 4*H0)        mxu dtype
    w1_ref,                                    # (H0+H1, 4*H1)     mxu dtype, fused [Wih1; Whh1]
    b1_ref,                                    # (1, 4*H1)         f32
    w2_ref,                                    # (H1+H2, 4*H2)     mxu dtype, fused [Wih2; Whh2]
    b2_ref,                                    # (1, 4*H2)         f32
    rec_ref,                                   # (T, Bb, H2)       f32 output
    h0s, c0s, h1s, c1s, h2s, c2s,              # VMEM state scratch (persists across chunks)
    *, t_chunk, unroll,
):
    tc = pl.program_id(1)                      # time-chunk index (inner, "arbitrary")

    @pl.when(tc == 0)
    def _():
        h0s[...] = jnp.zeros_like(h0s)
        c0s[...] = jnp.zeros_like(c0s)
        h1s[...] = jnp.zeros_like(h1s)
        c1s[...] = jnp.zeros_like(c1s)
        h2s[...] = jnp.zeros_like(h2s)
        c2s[...] = jnp.zeros_like(c2s)

    # Hoist weight / bias loads out of the time loop.
    whh0 = whh0_ref[...]
    w1 = w1_ref[...]
    w2 = w2_ref[...]
    b1 = b1_ref[...]          # (1, 4*H1): sublane-broadcast add, no materialized broadcast
    b2 = b2_ref[...]          # (1, 4*H2)
    mxu = whh0.dtype

    def l0(t, h0, c0):
        g = pre_ref[t].astype(jnp.float32) + jnp.dot(
            h0.astype(mxu), whh0, preferred_element_type=jnp.float32)
        return _cell(g, c0, H0)

    def l1(h0_in, h1, c1):
        xin = jnp.concatenate([h0_in, h1], axis=-1).astype(mxu)      # (Bb, 96)
        g = jnp.dot(xin, w1, preferred_element_type=jnp.float32) + b1
        return _cell(g, c1, H1)

    def l2(t, h1_in, h2, c2):
        xin = jnp.concatenate([h1_in, h2], axis=-1).astype(mxu)      # (Bb, 192)
        g = jnp.dot(xin, w2, preferred_element_type=jnp.float32) + b2
        h2n, c2n = _cell(g, c2, H2)
        rec_ref[t] = h2n                                             # lane-dense (Bb, 128) store
        return h2n, c2n

    h0, c0 = h0s[...], c0s[...]
    h1, c1 = h1s[...], c1s[...]
    h2, c2 = h2s[...], c2s[...]

    if t_chunk >= 2:
        # ---- pipeline fill (layer skew): layer0@0, layer1@0, layer0@1 ----
        h0_a, c0_a = l0(0, h0, c0)                 # h0[0]
        h1_a, c1_a = l1(h0_a, h1, c1)              # h1[0]
        h0_b, c0_b = l0(1, h0_a, c0_a)             # h0[1]

        # ---- steady state: layer0@j, layer1@j-1, layer2@j-2 are independent ----
        def skew(j, carry):
            h0, c0, h1, c1, h2, c2 = carry         # h0[j-1], h1[j-2], h2[j-3]
            nh0, nc0 = l0(j, h0, c0)               # h0[j]
            nh1, nc1 = l1(h0, h1, c1)              # h1[j-1]
            nh2, nc2 = l2(j - 2, h1, h2, c2)       # h2[j-2] (+ rec write)
            return nh0, nc0, nh1, nc1, nh2, nc2

        carry = (h0_b, c0_b, h1_a, c1_a, h2, c2)
        h0, c0, h1, c1, h2, c2 = lax.fori_loop(
            2, t_chunk, skew, carry, unroll=unroll)

        # ---- pipeline drain ----
        nh1, nc1 = l1(h0, h1, c1)                  # h1[T-1]
        nh2, nc2 = l2(t_chunk - 2, h1, h2, c2)     # h2[T-2]
        h1, c1, h2, c2 = nh1, nc1, nh2, nc2
        h2, c2 = l2(t_chunk - 1, h1, h2, c2)       # h2[T-1]
    else:
        # t_chunk == 1: plain step (no skew possible)
        h0, c0 = l0(0, h0, c0)
        h1, c1 = l1(h0, h1, c1)
        h2, c2 = l2(0, h1, h2, c2)

    # Persist drained state for the next time chunk of this batch block.
    h0s[...] = h0
    c0s[...] = c0
    h1s[...] = h1
    c1s[...] = c1
    h2s[...] = h2
    c2s[...] = c2


def _prep_lstm(w_ih, w_hh, b_ih, b_hh, H):
    """PyTorch-layout LSTM params -> kernel layout.

    Transpose to (in, 4H) so the kernel computes x @ W on the MXU, fold the
    two biases, and permute gate columns [i,f,g,o] -> [i,f,o,g].
    """
    perm = jnp.concatenate([jnp.arange(0, 2 * H),
                            jnp.arange(3 * H, 4 * H),
                            jnp.arange(2 * H, 3 * H)])
    w_ih_t = jnp.transpose(w_ih[perm], (1, 0))
    w_hh_t = jnp.transpose(w_hh[perm], (1, 0))
    b = (b_ih + b_hh)[perm].reshape(1, 4 * H)
    return w_ih_t, w_hh_t, b


@functools.partial(jax.jit, static_argnames=("mxu_dtype",))
def decoder_forward(x_bsf, params, mxu_dtype=jnp.bfloat16):
    """x_bsf: (B, S, in_dim) f32 -> (outputs (B,S,out_dim), rec (B,S,128))."""
    B, S, _ = x_bsf.shape

    wih0, whh0, b0 = _prep_lstm(params["w_ih0"], params["w_hh0"],
                                params["b_ih0"], params["b_hh0"], H0)
    wih1, whh1, b1 = _prep_lstm(params["w_ih1"], params["w_hh1"],
                                params["b_ih1"], params["b_hh1"], H1)
    wih2, whh2, b2 = _prep_lstm(params["w_ih2"], params["w_hh2"],
                                params["b_ih2"], params["b_hh2"], H2)
    w_lin, b_lin = params["w_lin"], params["b_lin"]        # (out_dim, 128), (out_dim,)

    # Fused per-layer weights (one MXU pass per layer on the serial chain),
    # cast once to the MXU operand dtype.
    whh0_k = whh0.astype(mxu_dtype)                              # (32, 128)
    w1_cat = jnp.concatenate([wih1, whh1], axis=0).astype(mxu_dtype)   # (96, 256)
    w2_cat = jnp.concatenate([wih2, whh2], axis=0).astype(mxu_dtype)   # (192, 512)

    # Batch blocking: small blocks keep a whole step in registers; >=2 blocks
    # on the "parallel" axis when B is large enough so a v7x megacore can
    # split batch rows across its two TensorCores.  Sublane multiple matches
    # the packed-dtype tile (16 for bf16 blocks, 8 for f32).
    sub = 16 if jnp.dtype(mxu_dtype).itemsize < 4 else 8
    b_blk = min(_B_BLK_MAX, _round_up(max(1, -(-B // 2)), sub))
    Bp = _round_up(B, b_blk)
    n_b = Bp // b_blk

    t_chunk = min(S, _T_CHUNK_MAX)
    n_t = -(-S // t_chunk)
    Sp = n_t * t_chunk
    unroll = max(1, min(_UNROLL, t_chunk - 2))

    # Time-major layout + padding (padded rows/steps are sliced off below).
    x_t = jnp.transpose(x_bsf, (1, 0, 2))                  # (S, B, in_dim)
    x_t = jnp.pad(x_t, ((0, Sp - S), (0, Bp - B), (0, 0)))

    # Hoisted layer-0 input projection: one big lane-dense matmul off the
    # serial critical path; stored in the MXU dtype to halve HBM traffic.
    gates0 = (jnp.einsum("sbi,ig->sbg", x_t, wih0,
                         preferred_element_type=jnp.float32) + b0
              ).astype(mxu_dtype)                          # (Sp, Bp, 4*H0)

    full = lambda a: pl.BlockSpec(a.shape, lambda bi, ti: (0,) * a.ndim)

    grid_spec = pltpu.PrefetchScalarGridSpec(
        num_scalar_prefetch=0,
        grid=(n_b, n_t),
        in_specs=[
            pl.BlockSpec((t_chunk, b_blk, 4 * H0), lambda bi, ti: (ti, bi, 0)),
            full(whh0_k),
            full(w1_cat), full(b1),
            full(w2_cat), full(b2),
        ],
        out_specs=pl.BlockSpec((t_chunk, b_blk, H2), lambda bi, ti: (ti, bi, 0)),
        scratch_shapes=[
            pltpu.VMEM((b_blk, H0), jnp.float32), pltpu.VMEM((b_blk, H0), jnp.float32),
            pltpu.VMEM((b_blk, H1), jnp.float32), pltpu.VMEM((b_blk, H1), jnp.float32),
            pltpu.VMEM((b_blk, H2), jnp.float32), pltpu.VMEM((b_blk, H2), jnp.float32),
        ],
    )

    rec_t = pl.pallas_call(
        functools.partial(decoder_kernel, t_chunk=t_chunk, unroll=unroll),
        out_shape=jax.ShapeDtypeStruct((Sp, Bp, H2), jnp.float32),
        grid_spec=grid_spec,
        compiler_params=pltpu.CompilerParams(
            # Batch blocks are independent; time recurrence is sequential.
            dimension_semantics=("parallel", "arbitrary")),
    )(gates0, whh0_k, w1_cat, b1, w2_cat, b2)

    rec = jnp.transpose(rec_t[:S, :B], (1, 0, 2))           # (B, S, 128)

    # Hoisted epilogue: Linear(128 -> out_dim) + Tanh as one batched matmul.
    out = jnp.tanh(jnp.einsum("bsh,oh->bso", rec, w_lin,
                              preferred_element_type=jnp.float32) + b_lin)
    return out, rec


def init_params(key, in_dim, out_dim):
    """PyTorch-layout params: weight_ih (4H,in), weight_hh (4H,H), biases (4H,),
    linear weight (out_dim,128) / bias (out_dim,); U(-1/sqrt(H), 1/sqrt(H))."""
    keys = jax.random.split(key, 14)
    ki = iter(keys)

    def unif(shape, bound):
        return jax.random.uniform(next(ki), shape, jnp.float32, -bound, bound)

    params = {}
    for idx, (kin, H) in enumerate([(in_dim, H0), (H0, H1), (H1, H2)]):
        bound = 1.0 / float(H) ** 0.5
        params[f"w_ih{idx}"] = unif((4 * H, kin), bound)
        params[f"w_hh{idx}"] = unif((4 * H, H), bound)
        params[f"b_ih{idx}"] = unif((4 * H,), bound)
        params[f"b_hh{idx}"] = unif((4 * H,), bound)
    bound = 1.0 / float(H2) ** 0.5
    params["w_lin"] = unif((out_dim, H2), bound)
    params["b_lin"] = unif((out_dim,), bound)
    return params


def decoder_reference(x_bsf, params):
    """Pure-JAX reference with PyTorch LSTM semantics (gate order i,f,g,o)."""
    p = params

    def cell(x_t, h, c, w_ih, w_hh, b_ih, b_hh, H):
        gates = x_t @ w_ih.T + h @ w_hh.T + b_ih + b_hh
        i = jax.nn.sigmoid(gates[:, 0 * H:1 * H])
        f = jax.nn.sigmoid(gates[:, 1 * H:2 * H])
        g = jnp.tanh(gates[:, 2 * H:3 * H])
        o = jax.nn.sigmoid(gates[:, 3 * H:4 * H])
        c_new = f * c + i * g
        return o * jnp.tanh(c_new), c_new

    B = x_bsf.shape[0]

    def step(carry, x_t):
        h0, c0, h1, c1, h2, c2 = carry
        h0, c0 = cell(x_t, h0, c0, p["w_ih0"], p["w_hh0"], p["b_ih0"], p["b_hh0"], H0)
        h1, c1 = cell(h0, h1, c1, p["w_ih1"], p["w_hh1"], p["b_ih1"], p["b_hh1"], H1)
        h2, c2 = cell(h1, h2, c2, p["w_ih2"], p["w_hh2"], p["b_ih2"], p["b_hh2"], H2)
        return (h0, c0, h1, c1, h2, c2), h2

    init = tuple(jnp.zeros((B, h), jnp.float32) for h in (H0, H0, H1, H1, H2, H2))
    _, recs = jax.lax.scan(step, init, jnp.transpose(x_bsf, (1, 0, 2)))
    rec = jnp.transpose(recs, (1, 0, 2))
    out = jnp.tanh(jnp.einsum("bsh,oh->bso", rec, p["w_lin"]) + p["b_lin"])
    return out, rec


if __name__ == "__main__":
    B, S, IN_DIM, OUT_DIM = 2, 8, 4, 3

    key = jax.random.PRNGKey(0)
    k_x, k_p = jax.random.split(key)
    x = jax.random.normal(k_x, (B, S, IN_DIM), jnp.float32)
    params = init_params(k_p, IN_DIM, OUT_DIM)

    ref_out, ref_rec = decoder_reference(x, params)

    # f32 MXU path: tight numerical check of kernel semantics.
    out_f32, rec_f32 = decoder_forward(x, params, mxu_dtype=jnp.float32)
    out_f32 = jax.block_until_ready(out_f32)
    rec_f32 = jax.block_until_ready(rec_f32)
    assert out_f32.shape == (B, S, OUT_DIM) and rec_f32.shape == (B, S, H2)
    assert jnp.allclose(rec_f32, ref_rec, atol=5e-4, rtol=5e-4)
    assert jnp.allclose(out_f32, ref_out, atol=5e-4, rtol=5e-4)

    # bf16 MXU-operand path (production default): looser tolerance.
    out_bf, rec_bf = decoder_forward(x, params)
    out_bf = jax.block_until_ready(out_bf)
    rec_bf = jax.block_until_ready(rec_bf)
    assert out_bf.shape == (B, S, OUT_DIM) and rec_bf.shape == (B, S, H2)
    assert float(jnp.max(jnp.abs(rec_bf - ref_rec))) < 5e-2
    assert float(jnp.max(jnp.abs(out_bf - ref_out))) < 5e-2

    print("KERNEL_OK")
</pallas_src>

<mosaic_0001>
module attributes {stable_mosaic.version = 11 : i64} {
  func.func @decoder_kernel(%arg0: i32, %arg1: i32, %arg2: memref<8x8x128xf32, #tpu.memory_space<vmem>>, %arg3: memref<32x128xf32, #tpu.memory_space<vmem>>, %arg4: memref<96x256xf32, #tpu.memory_space<vmem>>, %arg5: memref<1x256xf32, #tpu.memory_space<vmem>>, %arg6: memref<192x512xf32, #tpu.memory_space<vmem>>, %arg7: memref<1x512xf32, #tpu.memory_space<vmem>>, %arg8: memref<8x8x128xf32, #tpu.memory_space<vmem>>, %arg9: memref<8x32xf32, #tpu.memory_space<vmem>>, %arg10: memref<8x32xf32, #tpu.memory_space<vmem>>, %arg11: memref<8x64xf32, #tpu.memory_space<vmem>>, %arg12: memref<8x64xf32, #tpu.memory_space<vmem>>, %arg13: memref<8x128xf32, #tpu.memory_space<vmem>>, %arg14: memref<8x128xf32, #tpu.memory_space<vmem>>) attributes {dimension_semantics = [#tpu.dimension_semantics<parallel>, #tpu.dimension_semantics<arbitrary>], iteration_bounds = array<i64: 1, 1>, scalar_prefetch = 0 : i64, scratch_operands = 6 : i64, tpu.core_type = #tpu.core_type<tc>, window_params = [{transform_indices = @transform_0, window_bounds = array<i64: 8, 8, 128>}, {pipeline_mode = #tpu.pipeline_mode<synchronous>, transform_indices = @transform_1, window_bounds = array<i64: 32, 128>}, {pipeline_mode = #tpu.pipeline_mode<synchronous>, transform_indices = @transform_2, window_bounds = array<i64: 96, 256>}, {pipeline_mode = #tpu.pipeline_mode<synchronous>, transform_indices = @transform_3, window_bounds = array<i64: 1, 256>}, {pipeline_mode = #tpu.pipeline_mode<synchronous>, transform_indices = @transform_4, window_bounds = array<i64: 192, 512>}, {pipeline_mode = #tpu.pipeline_mode<synchronous>, transform_indices = @transform_5, window_bounds = array<i64: 1, 512>}, {transform_indices = @transform_6, window_bounds = array<i64: 8, 8, 128>}]} {
    %c0_i32 = arith.constant 0 : i32
    %0 = arith.cmpi eq, %arg1, %c0_i32 : i32
    %1 = arith.extui %0 : i1 to i32
    %c0_i32_0 = arith.constant 0 : i32
    %2 = arith.cmpi ne, %1, %c0_i32_0 : i32
    scf.if %2 {
      %cst_121 = arith.constant 0.000000e+00 : f32
      %542 = vector.broadcast %cst_121 : f32 to vector<8x32xf32>
      %c0_122 = arith.constant 0 : index
      %c0_123 = arith.constant 0 : index
      %543 = vector.load %arg9[%c0_122, %c0_123] : memref<8x32xf32, #tpu.memory_space<vmem>>, vector<8x32xf32>
      tpu.vector_store %arg9[%c0_122, %c0_123], %542 {strides = array<i32>} : memref<8x32xf32, #tpu.memory_space<vmem>>, vector<8x32xf32>,
      %cst_124 = arith.constant 0.000000e+00 : f32
      %544 = vector.broadcast %cst_124 : f32 to vector<8x32xf32>
      %c0_125 = arith.constant 0 : index
      %c0_126 = arith.constant 0 : index
      %545 = vector.load %arg10[%c0_125, %c0_126] : memref<8x32xf32, #tpu.memory_space<vmem>>, vector<8x32xf32>
      tpu.vector_store %arg10[%c0_125, %c0_126], %544 {strides = array<i32>} : memref<8x32xf32, #tpu.memory_space<vmem>>, vector<8x32xf32>,
      %cst_127 = arith.constant 0.000000e+00 : f32
      %546 = vector.broadcast %cst_127 : f32 to vector<8x64xf32>
      %c0_128 = arith.constant 0 : index
      %c0_129 = arith.constant 0 : index
      %547 = vector.load %arg11[%c0_128, %c0_129] : memref<8x64xf32, #tpu.memory_space<vmem>>, vector<8x64xf32>
      tpu.vector_store %arg11[%c0_128, %c0_129], %546 {strides = array<i32>} : memref<8x64xf32, #tpu.memory_space<vmem>>, vector<8x64xf32>,
      %cst_130 = arith.constant 0.000000e+00 : f32
      %548 = vector.broadcast %cst_130 : f32 to vector<8x64xf32>
      %c0_131 = arith.constant 0 : index
      %c0_132 = arith.constant 0 : index
      %549 = vector.load %arg12[%c0_131, %c0_132] : memref<8x64xf32, #tpu.memory_space<vmem>>, vector<8x64xf32>
      tpu.vector_store %arg12[%c0_131, %c0_132], %548 {strides = array<i32>} : memref<8x64xf32, #tpu.memory_space<vmem>>, vector<8x64xf32>,
      %cst_133 = arith.constant 0.000000e+00 : f32
      %550 = vector.broadcast %cst_133 : f32 to vector<8x128xf32>
      %c0_134 = arith.constant 0 : index
      %c0_135 = arith.constant 0 : index
      %551 = vector.load %arg13[%c0_134, %c0_135] : memref<8x128xf32, #tpu.memory_space<vmem>>, vector<8x128xf32>
      tpu.vector_store %arg13[%c0_134, %c0_135], %550 {strides = array<i32>} : memref<8x128xf32, #tpu.memory_space<vmem>>, vector<8x128xf32>,
      %cst_136 = arith.constant 0.000000e+00 : f32
      %552 = vector.broadcast %cst_136 : f32 to vector<8x128xf32>
      %c0_137 = arith.constant 0 : index
      %c0_138 = arith.constant 0 : index
      %553 = vector.load %arg14[%c0_137, %c0_138] : memref<8x128xf32, #tpu.memory_space<vmem>>, vector<8x128xf32>
      tpu.vector_store %arg14[%c0_137, %c0_138], %552 {strides = array<i32>} : memref<8x128xf32, #tpu.memory_space<vmem>>, vector<8x128xf32>,
    } else {
    }
    %c0 = arith.constant 0 : index
    %c0_1 = arith.constant 0 : index
    %3 = vector.load %arg3[%c0, %c0_1] : memref<32x128xf32, #tpu.memory_space<vmem>>, vector<32x128xf32>
    %c0_2 = arith.constant 0 : index
    %c0_3 = arith.constant 0 : index
    %4 = vector.load %arg4[%c0_2, %c0_3] : memref<96x256xf32, #tpu.memory_space<vmem>>, vector<96x256xf32>
    %c0_4 = arith.constant 0 : index
    %c0_5 = arith.constant 0 : index
    %5 = vector.load %arg6[%c0_4, %c0_5] : memref<192x512xf32, #tpu.memory_space<vmem>>, vector<192x512xf32>
    %c0_6 = arith.constant 0 : index
    %c0_7 = arith.constant 0 : index
    %6 = vector.load %arg5[%c0_6, %c0_7] : memref<1x256xf32, #tpu.memory_space<vmem>>, vector<1x256xf32>
    %c0_8 = arith.constant 0 : index
    %c0_9 = arith.constant 0 : index
    %7 = vector.load %arg7[%c0_8, %c0_9] : memref<1x512xf32, #tpu.memory_space<vmem>>, vector<1x512xf32>
    %c0_10 = arith.constant 0 : index
    %c0_11 = arith.constant 0 : index
    %8 = vector.load %arg9[%c0_10, %c0_11] : memref<8x32xf32, #tpu.memory_space<vmem>>, vector<8x32xf32>
    %c0_12 = arith.constant 0 : index
    %c0_13 = arith.constant 0 : index
    %9 = vector.load %arg10[%c0_12, %c0_13] : memref<8x32xf32, #tpu.memory_space<vmem>>, vector<8x32xf32>
    %c0_14 = arith.constant 0 : index
    %c0_15 = arith.constant 0 : index
    %10 = vector.load %arg11[%c0_14, %c0_15] : memref<8x64xf32, #tpu.memory_space<vmem>>, vector<8x64xf32>
    %c0_16 = arith.constant 0 : index
    %c0_17 = arith.constant 0 : index
    %11 = vector.load %arg12[%c0_16, %c0_17] : memref<8x64xf32, #tpu.memory_space<vmem>>, vector<8x64xf32>
    %c0_18 = arith.constant 0 : index
    %c0_19 = arith.constant 0 : index
    %12 = vector.load %arg13[%c0_18, %c0_19] : memref<8x128xf32, #tpu.memory_space<vmem>>, vector<8x128xf32>
    %c0_20 = arith.constant 0 : index
    %c0_21 = arith.constant 0 : index
    %13 = vector.load %arg14[%c0_20, %c0_21] : memref<8x128xf32, #tpu.memory_space<vmem>>, vector<8x128xf32>
    %c0_22 = arith.constant 0 : index
    %c0_23 = arith.constant 0 : index
    %c0_24 = arith.constant 0 : index
    %14 = vector.load %arg2[%c0_22, %c0_23, %c0_24] : memref<8x8x128xf32, #tpu.memory_space<vmem>>, vector<1x8x128xf32>
    %15 = vector.shape_cast %14 : vector<1x8x128xf32> to vector<8x128xf32>
    %cst = arith.constant dense<0.000000e+00> : vector<8x128xf32>
    %16 = tpu.matmul %8, %3, %cst {dimension_numbers = #tpu.dot_dimension_numbers<[1], [0], [0], [1], [0, 0, 1, 1], [], []>} : vector<8x32xf32>, vector<32x128xf32>, vector<8x128xf32> -> vector<8x128xf32>
    %17 = arith.addf %15, %16 : vector<8x128xf32>
    %18 = vector.extract_strided_slice %17 {offsets = [0, 0], sizes = [8, 96], strides = [1, 1]} : vector<8x128xf32> to vector<8x96xf32>
    %19 = arith.negf %18 : vector<8x96xf32>
    %20 = math.exp %19 : vector<8x96xf32>
    %cst_25 = arith.constant 1.000000e+00 : f32
    %21 = vector.broadcast %cst_25 : f32 to vector<8x96xf32>
    %22 = arith.addf %21, %20 : vector<8x96xf32>
    %23 = arith.divf %21, %22 : vector<8x96xf32>
    %24 = vector.extract_strided_slice %17 {offsets = [0, 96], sizes = [8, 32], strides = [1, 1]} : vector<8x128xf32> to vector<8x32xf32>
    %25 = math.tanh %24 : vector<8x32xf32>
    %26 = vector.extract_strided_slice %23 {offsets = [0, 0], sizes = [8, 32], strides = [1, 1]} : vector<8x96xf32> to vector<8x32xf32>
    %27 = vector.extract_strided_slice %23 {offsets = [0, 32], sizes = [8, 32], strides = [1, 1]} : vector<8x96xf32> to vector<8x32xf32>
    %28 = vector.extract_strided_slice %23 {offsets = [0, 64], sizes = [8, 32], strides = [1, 1]} : vector<8x96xf32> to vector<8x32xf32>
    %29 = arith.mulf %27, %9 : vector<8x32xf32>
    %30 = arith.mulf %26, %25 : vector<8x32xf32>
    %31 = arith.addf %29, %30 : vector<8x32xf32>
    %32 = math.tanh %31 : vector<8x32xf32>
    %33 = arith.mulf %28, %32 : vector<8x32xf32>
    %34 = tpu.concatenate %33, %10 in 1 : vector<8x32xf32>, vector<8x64xf32> -> vector<8x96xf32>
    %cst_26 = arith.constant dense<0.000000e+00> : vector<8x256xf32>
    %35 = tpu.matmul %34, %4, %cst_26 {dimension_numbers = #tpu.dot_dimension_numbers<[1], [0], [0], [1], [0, 0, 1, 1], [], []>} : vector<8x96xf32>, vector<96x256xf32>, vector<8x256xf32> -> vector<8x256xf32>
    %36 = vector.broadcast %6 : vector<1x256xf32> to vector<8x256xf32>
    %37 = arith.addf %35, %36 : vector<8x256xf32>
    %38 = vector.extract_strided_slice %37 {offsets = [0, 0], sizes = [8, 192], strides = [1, 1]} : vector<8x256xf32> to vector<8x192xf32>
    %39 = arith.negf %38 : vector<8x192xf32>
    %40 = math.exp %39 : vector<8x192xf32>
    %cst_27 = arith.constant 1.000000e+00 : f32
    %41 = vector.broadcast %cst_27 : f32 to vector<8x192xf32>
    %42 = arith.addf %41, %40 : vector<8x192xf32>
    %43 = arith.divf %41, %42 : vector<8x192xf32>
    %44 = vector.extract_strided_slice %37 {offsets = [0, 192], sizes = [8, 64], strides = [1, 1]} : vector<8x256xf32> to vector<8x64xf32>
    %45 = math.tanh %44 : vector<8x64xf32>
    %46 = vector.extract_strided_slice %43 {offsets = [0, 0], sizes = [8, 64], strides = [1, 1]} : vector<8x192xf32> to vector<8x64xf32>
    %47 = vector.extract_strided_slice %43 {offsets = [0, 64], sizes = [8, 64], strides = [1, 1]} : vector<8x192xf32> to vector<8x64xf32>
    %48 = vector.extract_strided_slice %43 {offsets = [0, 128], sizes = [8, 64], strides = [1, 1]} : vector<8x192xf32> to vector<8x64xf32>
    %49 = arith.mulf %47, %11 : vector<8x64xf32>
    %50 = arith.mulf %46, %45 : vector<8x64xf32>
    %51 = arith.addf %49, %50 : vector<8x64xf32>
    %52 = math.tanh %51 : vector<8x64xf32>
    %53 = arith.mulf %48, %52 : vector<8x64xf32>
    %c1 = arith.constant 1 : index
    %c0_28 = arith.constant 0 : index
    %c0_29 = arith.constant 0 : index
    %54 = vector.load %arg2[%c1, %c0_28, %c0_29] : memref<8x8x128xf32, #tpu.memory_space<vmem>>, vector<1x8x128xf32>
    %55 = vector.shape_cast %54 : vector<1x8x128xf32> to vector<8x128xf32>
    %cst_30 = arith.constant dense<0.000000e+00> : vector<8x128xf32>
    %56 = tpu.matmul %33, %3, %cst_30 {dimension_numbers = #tpu.dot_dimension_numbers<[1], [0], [0], [1], [0, 0, 1, 1], [], []>} : vector<8x32xf32>, vector<32x128xf32>, vector<8x128xf32> -> vector<8x128xf32>
    %57 = arith.addf %55, %56 : vector<8x128xf32>
    %58 = vector.extract_strided_slice %57 {offsets = [0, 0], sizes = [8, 96], strides = [1, 1]} : vector<8x128xf32> to vector<8x96xf32>
    %59 = arith.negf %58 : vector<8x96xf32>
    %60 = math.exp %59 : vector<8x96xf32>
    %cst_31 = arith.constant 1.000000e+00 : f32
    %61 = vector.broadcast %cst_31 : f32 to vector<8x96xf32>
    %62 = arith.addf %61, %60 : vector<8x96xf32>
    %63 = arith.divf %61, %62 : vector<8x96xf32>
    %64 = vector.extract_strided_slice %57 {offsets = [0, 96], sizes = [8, 32], strides = [1, 1]} : vector<8x128xf32> to vector<8x32xf32>
    %65 = math.tanh %64 : vector<8x32xf32>
    %66 = vector.extract_strided_slice %63 {offsets = [0, 0], sizes = [8, 32], strides = [1, 1]} : vector<8x96xf32> to vector<8x32xf32>
    %67 = vector.extract_strided_slice %63 {offsets = [0, 32], sizes = [8, 32], strides = [1, 1]} : vector<8x96xf32> to vector<8x32xf32>
    %68 = vector.extract_strided_slice %63 {offsets = [0, 64], sizes = [8, 32], strides = [1, 1]} : vector<8x96xf32> to vector<8x32xf32>
    %69 = arith.mulf %67, %31 : vector<8x32xf32>
    %70 = arith.mulf %66, %65 : vector<8x32xf32>
    %71 = arith.addf %69, %70 : vector<8x32xf32>
    %72 = math.tanh %71 : vector<8x32xf32>
    %73 = arith.mulf %68, %72 : vector<8x32xf32>
    %c2_i32 = arith.constant 2 : i32
    %74 = arith.index_cast %c2_i32 : i32 to index
    %c0_32 = arith.constant 0 : index
    %c0_33 = arith.constant 0 : index
    %75 = vector.load %arg2[%74, %c0_32, %c0_33] : memref<8x8x128xf32, #tpu.memory_space<vmem>>, vector<1x8x128xf32>
    %76 = vector.shape_cast %75 : vector<1x8x128xf32> to vector<8x128xf32>
    %cst_34 = arith.constant dense<0.000000e+00> : vector<8x128xf32>
    %77 = tpu.matmul %73, %3, %cst_34 {dimension_numbers = #tpu.dot_dimension_numbers<[1], [0], [0], [1], [0, 0, 1, 1], [], []>} : vector<8x32xf32>, vector<32x128xf32>, vector<8x128xf32> -> vector<8x128xf32>
    %78 = arith.addf %76, %77 : vector<8x128xf32>
    %79 = vector.extract_strided_slice %78 {offsets = [0, 0], sizes = [8, 96], strides = [1, 1]} : vector<8x128xf32> to vector<8x96xf32>
    %80 = arith.negf %79 : vector<8x96xf32>
    %81 = math.exp %80 : vector<8x96xf32>
    %cst_35 = arith.constant 1.000000e+00 : f32
    %82 = vector.broadcast %cst_35 : f32 to vector<8x96xf32>
    %83 = arith.addf %82, %81 : vector<8x96xf32>
    %84 = arith.divf %82, %83 : vector<8x96xf32>
    %85 = vector.extract_strided_slice %78 {offsets = [0, 96], sizes = [8, 32], strides = [1, 1]} : vector<8x128xf32> to vector<8x32xf32>
    %86 = math.tanh %85 : vector<8x32xf32>
    %87 = vector.extract_strided_slice %84 {offsets = [0, 0], sizes = [8, 32], strides = [1, 1]} : vector<8x96xf32> to vector<8x32xf32>
    %88 = vector.extract_strided_slice %84 {offsets = [0, 32], sizes = [8, 32], strides = [1, 1]} : vector<8x96xf32> to vector<8x32xf32>
    %89 = vector.extract_strided_slice %84 {offsets = [0, 64], sizes = [8, 32], strides = [1, 1]} : vector<8x96xf32> to vector<8x32xf32>
    %90 = arith.mulf %88, %71 : vector<8x32xf32>
    %91 = arith.mulf %87, %86 : vector<8x32xf32>
    %92 = arith.addf %90, %91 : vector<8x32xf32>
    %93 = math.tanh %92 : vector<8x32xf32>
    %94 = arith.mulf %89, %93 : vector<8x32xf32>
    %95 = tpu.concatenate %73, %53 in 1 : vector<8x32xf32>, vector<8x64xf32> -> vector<8x96xf32>
    %cst_36 = arith.constant dense<0.000000e+00> : vector<8x256xf32>
    %96 = tpu.matmul %95, %4, %cst_36 {dimension_numbers = #tpu.dot_dimension_numbers<[1], [0], [0], [1], [0, 0, 1, 1], [], []>} : vector<8x96xf32>, vector<96x256xf32>, vector<8x256xf32> -> vector<8x256xf32>
    %97 = vector.broadcast %6 : vector<1x256xf32> to vector<8x256xf32>
    %98 = arith.addf %96, %97 : vector<8x256xf32>
    %99 = vector.extract_strided_slice %98 {offsets = [0, 0], sizes = [8, 192], strides = [1, 1]} : vector<8x256xf32> to vector<8x192xf32>
    %100 = arith.negf %99 : vector<8x192xf32>
    %101 = math.exp %100 : vector<8x192xf32>
    %cst_37 = arith.constant 1.000000e+00 : f32
    %102 = vector.broadcast %cst_37 : f32 to vector<8x192xf32>
    %103 = arith.addf %102, %101 : vector<8x192xf32>
    %104 = arith.divf %102, %103 : vector<8x192xf32>
    %105 = vector.extract_strided_slice %98 {offsets = [0, 192], sizes = [8, 64], strides = [1, 1]} : vector<8x256xf32> to vector<8x64xf32>
    %106 = math.tanh %105 : vector<8x64xf32>
    %107 = vector.extract_strided_slice %104 {offsets = [0, 0], sizes = [8, 64], strides = [1, 1]} : vector<8x192xf32> to vector<8x64xf32>
    %108 = vector.extract_strided_slice %104 {offsets = [0, 64], sizes = [8, 64], strides = [1, 1]} : vector<8x192xf32> to vector<8x64xf32>
    %109 = vector.extract_strided_slice %104 {offsets = [0, 128], sizes = [8, 64], strides = [1, 1]} : vector<8x192xf32> to vector<8x64xf32>
    %110 = arith.mulf %108, %51 : vector<8x64xf32>
    %111 = arith.mulf %107, %106 : vector<8x64xf32>
    %112 = arith.addf %110, %111 : vector<8x64xf32>
    %113 = math.tanh %112 : vector<8x64xf32>
    %114 = arith.mulf %109, %113 : vector<8x64xf32>
    %c2_i32_38 = arith.constant 2 : i32
    %115 = arith.subi %c2_i32, %c2_i32_38 : i32
    %116 = tpu.concatenate %53, %12 in 1 : vector<8x64xf32>, vector<8x128xf32> -> vector<8x192xf32>
    %cst_39 = arith.constant dense<0.000000e+00> : vector<8x512xf32>
    %117 = tpu.matmul %116, %5, %cst_39 {dimension_numbers = #tpu.dot_dimension_numbers<[1], [0], [0], [1], [0, 0, 1, 1], [], []>} : vector<8x192xf32>, vector<192x512xf32>, vector<8x512xf32> -> vector<8x512xf32>
    %118 = vector.broadcast %7 : vector<1x512xf32> to vector<8x512xf32>
    %119 = arith.addf %117, %118 : vector<8x512xf32>
    %120 = vector.extract_strided_slice %119 {offsets = [0, 0], sizes = [8, 384], strides = [1, 1]} : vector<8x512xf32> to vector<8x384xf32>
    %121 = arith.negf %120 : vector<8x384xf32>
    %122 = math.exp %121 : vector<8x384xf32>
    %cst_40 = arith.constant 1.000000e+00 : f32
    %123 = vector.broadcast %cst_40 : f32 to vector<8x384xf32>
    %124 = arith.addf %123, %122 : vector<8x384xf32>
    %125 = arith.divf %123, %124 : vector<8x384xf32>
    %126 = vector.extract_strided_slice %119 {offsets = [0, 384], sizes = [8, 128], strides = [1, 1]} : vector<8x512xf32> to vector<8x128xf32>
    %127 = math.tanh %126 : vector<8x128xf32>
    %128 = vector.extract_strided_slice %125 {offsets = [0, 0], sizes = [8, 128], strides = [1, 1]} : vector<8x384xf32> to vector<8x128xf32>
    %129 = vector.extract_strided_slice %125 {offsets = [0, 128], sizes = [8, 128], strides = [1, 1]} : vector<8x384xf32> to vector<8x128xf32>
    %130 = vector.extract_strided_slice %125 {offsets = [0, 256], sizes = [8, 128], strides = [1, 1]} : vector<8x384xf32> to vector<8x128xf32>
    %131 = arith.mulf %129, %13 : vector<8x128xf32>
    %132 = arith.mulf %128, %127 : vector<8x128xf32>
    %133 = arith.addf %131, %132 : vector<8x128xf32>
    %134 = math.tanh %133 : vector<8x128xf32>
    %135 = arith.mulf %130, %134 : vector<8x128xf32>
    %136 = arith.index_cast %115 : i32 to index
    %c0_41 = arith.constant 0 : index
    %c0_42 = arith.constant 0 : index
    %137 = vector.load %arg8[%136, %c0_41, %c0_42] : memref<8x8x128xf32, #tpu.memory_space<vmem>>, vector<1x8x128xf32>
    %138 = vector.shape_cast %137 : vector<1x8x128xf32> to vector<8x128xf32>
    %139 = vector.shape_cast %135 : vector<8x128xf32> to vector<1x8x128xf32>
    tpu.vector_store %arg8[%136, %c0_41, %c0_42], %139 {strides = array<i32>} : memref<8x8x128xf32, #tpu.memory_space<vmem>>, vector<1x8x128xf32>,
    %c3_i32 = arith.constant 3 : i32
    %140 = arith.index_cast %c3_i32 : i32 to index
    %c0_43 = arith.constant 0 : index
    %c0_44 = arith.constant 0 : index
    %141 = vector.load %arg2[%140, %c0_43, %c0_44] : memref<8x8x128xf32, #tpu.memory_space<vmem>>, vector<1x8x128xf32>
    %142 = vector.shape_cast %141 : vector<1x8x128xf32> to vector<8x128xf32>
    %cst_45 = arith.constant dense<0.000000e+00> : vector<8x128xf32>
    %143 = tpu.matmul %94, %3, %cst_45 {dimension_numbers = #tpu.dot_dimension_numbers<[1], [0], [0], [1], [0, 0, 1, 1], [], []>} : vector<8x32xf32>, vector<32x128xf32>, vector<8x128xf32> -> vector<8x128xf32>
    %144 = arith.addf %142, %143 : vector<8x128xf32>
    %145 = vector.extract_strided_slice %144 {offsets = [0, 0], sizes = [8, 96], strides = [1, 1]} : vector<8x128xf32> to vector<8x96xf32>
    %146 = arith.negf %145 : vector<8x96xf32>
    %147 = math.exp %146 : vector<8x96xf32>
    %cst_46 = arith.constant 1.000000e+00 : f32
    %148 = vector.broadcast %cst_46 : f32 to vector<8x96xf32>
    %149 = arith.addf %148, %147 : vector<8x96xf32>
    %150 = arith.divf %148, %149 : vector<8x96xf32>
    %151 = vector.extract_strided_slice %144 {offsets = [0, 96], sizes = [8, 32], strides = [1, 1]} : vector<8x128xf32> to vector<8x32xf32>
    %152 = math.tanh %151 : vector<8x32xf32>
    %153 = vector.extract_strided_slice %150 {offsets = [0, 0], sizes = [8, 32], strides = [1, 1]} : vector<8x96xf32> to vector<8x32xf32>
    %154 = vector.extract_strided_slice %150 {offsets = [0, 32], sizes = [8, 32], strides = [1, 1]} : vector<8x96xf32> to vector<8x32xf32>
    %155 = vector.extract_strided_slice %150 {offsets = [0, 64], sizes = [8, 32], strides = [1, 1]} : vector<8x96xf32> to vector<8x32xf32>
    %156 = arith.mulf %154, %92 : vector<8x32xf32>
    %157 = arith.mulf %153, %152 : vector<8x32xf32>
    %158 = arith.addf %156, %157 : vector<8x32xf32>
    %159 = math.tanh %158 : vector<8x32xf32>
    %160 = arith.mulf %155, %159 : vector<8x32xf32>
    %161 = tpu.concatenate %94, %114 in 1 : vector<8x32xf32>, vector<8x64xf32> -> vector<8x96xf32>
    %cst_47 = arith.constant dense<0.000000e+00> : vector<8x256xf32>
    %162 = tpu.matmul %161, %4, %cst_47 {dimension_numbers = #tpu.dot_dimension_numbers<[1], [0], [0], [1], [0, 0, 1, 1], [], []>} : vector<8x96xf32>, vector<96x256xf32>, vector<8x256xf32> -> vector<8x256xf32>
    %163 = vector.broadcast %6 : vector<1x256xf32> to vector<8x256xf32>
    %164 = arith.addf %162, %163 : vector<8x256xf32>
    %165 = vector.extract_strided_slice %164 {offsets = [0, 0], sizes = [8, 192], strides = [1, 1]} : vector<8x256xf32> to vector<8x192xf32>
    %166 = arith.negf %165 : vector<8x192xf32>
    %167 = math.exp %166 : vector<8x192xf32>
    %cst_48 = arith.constant 1.000000e+00 : f32
    %168 = vector.broadcast %cst_48 : f32 to vector<8x192xf32>
    %169 = arith.addf %168, %167 : vector<8x192xf32>
    %170 = arith.divf %168, %169 : vector<8x192xf32>
    %171 = vector.extract_strided_slice %164 {offsets = [0, 192], sizes = [8, 64], strides = [1, 1]} : vector<8x256xf32> to vector<8x64xf32>
    %172 = math.tanh %171 : vector<8x64xf32>
    %173 = vector.extract_strided_slice %170 {offsets = [0, 0], sizes = [8, 64], strides = [1, 1]} : vector<8x192xf32> to vector<8x64xf32>
    %174 = vector.extract_strided_slice %170 {offsets = [0, 64], sizes = [8, 64], strides = [1, 1]} : vector<8x192xf32> to vector<8x64xf32>
    %175 = vector.extract_strided_slice %170 {offsets = [0, 128], sizes = [8, 64], strides = [1, 1]} : vector<8x192xf32> to vector<8x64xf32>
    %176 = arith.mulf %174, %112 : vector<8x64xf32>
    %177 = arith.mulf %173, %172 : vector<8x64xf32>
    %178 = arith.addf %176, %177 : vector<8x64xf32>
    %179 = math.tanh %178 : vector<8x64xf32>
    %180 = arith.mulf %175, %179 : vector<8x64xf32>
    %c2_i32_49 = arith.constant 2 : i32
    %181 = arith.subi %c3_i32, %c2_i32_49 : i32
    %182 = tpu.concatenate %114, %135 in 1 : vector<8x64xf32>, vector<8x128xf32> -> vector<8x192xf32>
    %cst_50 = arith.constant dense<0.000000e+00> : vector<8x512xf32>
    %183 = tpu.matmul %182, %5, %cst_50 {dimension_numbers = #tpu.dot_dimension_numbers<[1], [0], [0], [1], [0, 0, 1, 1], [], []>} : vector<8x192xf32>, vector<192x512xf32>, vector<8x512xf32> -> vector<8x512xf32>
    %184 = vector.broadcast %7 : vector<1x512xf32> to vector<8x512xf32>
    %185 = arith.addf %183, %184 : vector<8x512xf32>
    %186 = vector.extract_strided_slice %185 {offsets = [0, 0], sizes = [8, 384], strides = [1, 1]} : vector<8x512xf32> to vector<8x384xf32>
    %187 = arith.negf %186 : vector<8x384xf32>
    %188 = math.exp %187 : vector<8x384xf32>
    %cst_51 = arith.constant 1.000000e+00 : f32
    %189 = vector.broadcast %cst_51 : f32 to vector<8x384xf32>
    %190 = arith.addf %189, %188 : vector<8x384xf32>
    %191 = arith.divf %189, %190 : vector<8x384xf32>
    %192 = vector.extract_strided_slice %185 {offsets = [0, 384], sizes = [8, 128], strides = [1, 1]} : vector<8x512xf32> to vector<8x128xf32>
    %193 = math.tanh %192 : vector<8x128xf32>
    %194 = vector.extract_strided_slice %191 {offsets = [0, 0], sizes = [8, 128], strides = [1, 1]} : vector<8x384xf32> to vector<8x128xf32>
    %195 = vector.extract_strided_slice %191 {offsets = [0, 128], sizes = [8, 128], strides = [1, 1]} : vector<8x384xf32> to vector<8x128xf32>
    %196 = vector.extract_strided_slice %191 {offsets = [0, 256], sizes = [8, 128], strides = [1, 1]} : vector<8x384xf32> to vector<8x128xf32>
    %197 = arith.mulf %195, %133 : vector<8x128xf32>
    %198 = arith.mulf %194, %193 : vector<8x128xf32>
    %199 = arith.addf %197, %198 : vector<8x128xf32>
    %200 = math.tanh %199 : vector<8x128xf32>
    %201 = arith.mulf %196, %200 : vector<8x128xf32>
    %202 = arith.index_cast %181 : i32 to index
    %c0_52 = arith.constant 0 : index
    %c0_53 = arith.constant 0 : index
    %203 = vector.load %arg8[%202, %c0_52, %c0_53] : memref<8x8x128xf32, #tpu.memory_space<vmem>>, vector<1x8x128xf32>
    %204 = vector.shape_cast %203 : vector<1x8x128xf32> to vector<8x128xf32>
    %205 = vector.shape_cast %201 : vector<8x128xf32> to vector<1x8x128xf32>
    tpu.vector_store %arg8[%202, %c0_52, %c0_53], %205 {strides = array<i32>} : memref<8x8x128xf32, #tpu.memory_space<vmem>>, vector<1x8x128xf32>,
    %c4_i32 = arith.constant 4 : i32
    %206 = arith.index_cast %c4_i32 : i32 to index
    %c0_54 = arith.constant 0 : index
    %c0_55 = arith.constant 0 : index
    %207 = vector.load %arg2[%206, %c0_54, %c0_55] : memref<8x8x128xf32, #tpu.memory_space<vmem>>, vector<1x8x128xf32>
    %208 = vector.shape_cast %207 : vector<1x8x128xf32> to vector<8x128xf32>
    %cst_56 = arith.constant dense<0.000000e+00> : vector<8x128xf32>
    %209 = tpu.matmul %160, %3, %cst_56 {dimension_numbers = #tpu.dot_dimension_numbers<[1], [0], [0], [1], [0, 0, 1, 1], [], []>} : vector<8x32xf32>, vector<32x128xf32>, vector<8x128xf32> -> vector<8x128xf32>
    %210 = arith.addf %208, %209 : vector<8x128xf32>
    %211 = vector.extract_strided_slice %210 {offsets = [0, 0], sizes = [8, 96], strides = [1, 1]} : vector<8x128xf32> to vector<8x96xf32>
    %212 = arith.negf %211 : vector<8x96xf32>
    %213 = math.exp %212 : vector<8x96xf32>
    %cst_57 = arith.constant 1.000000e+00 : f32
    %214 = vector.broadcast %cst_57 : f32 to vector<8x96xf32>
    %215 = arith.addf %214, %213 : vector<8x96xf32>
    %216 = arith.divf %214, %215 : vector<8x96xf32>
    %217 = vector.extract_strided_slice %210 {offsets = [0, 96], sizes = [8, 32], strides = [1, 1]} : vector<8x128xf32> to vector<8x32xf32>
    %218 = math.tanh %217 : vector<8x32xf32>
    %219 = vector.extract_strided_slice %216 {offsets = [0, 0], sizes = [8, 32], strides = [1, 1]} : vector<8x96xf32> to vector<8x32xf32>
    %220 = vector.extract_strided_slice %216 {offsets = [0, 32], sizes = [8, 32], strides = [1, 1]} : vector<8x96xf32> to vector<8x32xf32>
    %221 = vector.extract_strided_slice %216 {offsets = [0, 64], sizes = [8, 32], strides = [1, 1]} : vector<8x96xf32> to vector<8x32xf32>
    %222 = arith.mulf %220, %158 : vector<8x32xf32>
    %223 = arith.mulf %219, %218 : vector<8x32xf32>
    %224 = arith.addf %222, %223 : vector<8x32xf32>
    %225 = math.tanh %224 : vector<8x32xf32>
    %226 = arith.mulf %221, %225 : vector<8x32xf32>
    %227 = tpu.concatenate %160, %180 in 1 : vector<8x32xf32>, vector<8x64xf32> -> vector<8x96xf32>
    %cst_58 = arith.constant dense<0.000000e+00> : vector<8x256xf32>
    %228 = tpu.matmul %227, %4, %cst_58 {dimension_numbers = #tpu.dot_dimension_numbers<[1], [0], [0], [1], [0, 0, 1, 1], [], []>} : vector<8x96xf32>, vector<96x256xf32>, vector<8x256xf32> -> vector<8x256xf32>
    %229 = vector.broadcast %6 : vector<1x256xf32> to vector<8x256xf32>
    %230 = arith.addf %228, %229 : vector<8x256xf32>
    %231 = vector.extract_strided_slice %230 {offsets = [0, 0], sizes = [8, 192], strides = [1, 1]} : vector<8x256xf32> to vector<8x192xf32>
    %232 = arith.negf %231 : vector<8x192xf32>
    %233 = math.exp %232 : vector<8x192xf32>
    %cst_59 = arith.constant 1.000000e+00 : f32
    %234 = vector.broadcast %cst_59 : f32 to vector<8x192xf32>
    %235 = arith.addf %234, %233 : vector<8x192xf32>
    %236 = arith.divf %234, %235 : vector<8x192xf32>
    %237 = vector.extract_strided_slice %230 {offsets = [0, 192], sizes = [8, 64], strides = [1, 1]} : vector<8x256xf32> to vector<8x64xf32>
    %238 = math.tanh %237 : vector<8x64xf32>
    %239 = vector.extract_strided_slice %236 {offsets = [0, 0], sizes = [8, 64], strides = [1, 1]} : vector<8x192xf32> to vector<8x64xf32>
    %240 = vector.extract_strided_slice %236 {offsets = [0, 64], sizes = [8, 64], strides = [1, 1]} : vector<8x192xf32> to vector<8x64xf32>
    %241 = vector.extract_strided_slice %236 {offsets = [0, 128], sizes = [8, 64], strides = [1, 1]} : vector<8x192xf32> to vector<8x64xf32>
    %242 = arith.mulf %240, %178 : vector<8x64xf32>
    %243 = arith.mulf %239, %238 : vector<8x64xf32>
    %244 = arith.addf %242, %243 : vector<8x64xf32>
    %245 = math.tanh %244 : vector<8x64xf32>
    %246 = arith.mulf %241, %245 : vector<8x64xf32>
    %c2_i32_60 = arith.constant 2 : i32
    %247 = arith.subi %c4_i32, %c2_i32_60 : i32
    %248 = tpu.concatenate %180, %201 in 1 : vector<8x64xf32>, vector<8x128xf32> -> vector<8x192xf32>
    %cst_61 = arith.constant dense<0.000000e+00> : vector<8x512xf32>
    %249 = tpu.matmul %248, %5, %cst_61 {dimension_numbers = #tpu.dot_dimension_numbers<[1], [0], [0], [1], [0, 0, 1, 1], [], []>} : vector<8x192xf32>, vector<192x512xf32>, vector<8x512xf32> -> vector<8x512xf32>
    %250 = vector.broadcast %7 : vector<1x512xf32> to vector<8x512xf32>
    %251 = arith.addf %249, %250 : vector<8x512xf32>
    %252 = vector.extract_strided_slice %251 {offsets = [0, 0], sizes = [8, 384], strides = [1, 1]} : vector<8x512xf32> to vector<8x384xf32>
    %253 = arith.negf %252 : vector<8x384xf32>
    %254 = math.exp %253 : vector<8x384xf32>
    %cst_62 = arith.constant 1.000000e+00 : f32
    %255 = vector.broadcast %cst_62 : f32 to vector<8x384xf32>
    %256 = arith.addf %255, %254 : vector<8x384xf32>
    %257 = arith.divf %255, %256 : vector<8x384xf32>
    %258 = vector.extract_strided_slice %251 {offsets = [0, 384], sizes = [8, 128], strides = [1, 1]} : vector<8x512xf32> to vector<8x128xf32>
    %259 = math.tanh %258 : vector<8x128xf32>
    %260 = vector.extract_strided_slice %257 {offsets = [0, 0], sizes = [8, 128], strides = [1, 1]} : vector<8x384xf32> to vector<8x128xf32>
    %261 = vector.extract_strided_slice %257 {offsets = [0, 128], sizes = [8, 128], strides = [1, 1]} : vector<8x384xf32> to vector<8x128xf32>
    %262 = vector.extract_strided_slice %257 {offsets = [0, 256], sizes = [8, 128], strides = [1, 1]} : vector<8x384xf32> to vector<8x128xf32>
    %263 = arith.mulf %261, %199 : vector<8x128xf32>
    %264 = arith.mulf %260, %259 : vector<8x128xf32>
    %265 = arith.addf %263, %264 : vector<8x128xf32>
    %266 = math.tanh %265 : vector<8x128xf32>
    %267 = arith.mulf %262, %266 : vector<8x128xf32>
    %268 = arith.index_cast %247 : i32 to index
    %c0_63 = arith.constant 0 : index
    %c0_64 = arith.constant 0 : index
    %269 = vector.load %arg8[%268, %c0_63, %c0_64] : memref<8x8x128xf32, #tpu.memory_space<vmem>>, vector<1x8x128xf32>
    %270 = vector.shape_cast %269 : vector<1x8x128xf32> to vector<8x128xf32>
    %271 = vector.shape_cast %267 : vector<8x128xf32> to vector<1x8x128xf32>
    tpu.vector_store %arg8[%268, %c0_63, %c0_64], %271 {strides = array<i32>} : memref<8x8x128xf32, #tpu.memory_space<vmem>>, vector<1x8x128xf32>,
    %c5_i32 = arith.constant 5 : i32
    %272 = arith.index_cast %c5_i32 : i32 to index
    %c0_65 = arith.constant 0 : index
    %c0_66 = arith.constant 0 : index
    %273 = vector.load %arg2[%272, %c0_65, %c0_66] : memref<8x8x128xf32, #tpu.memory_space<vmem>>, vector<1x8x128xf32>
    %274 = vector.shape_cast %273 : vector<1x8x128xf32> to vector<8x128xf32>
    %cst_67 = arith.constant dense<0.000000e+00> : vector<8x128xf32>
    %275 = tpu.matmul %226, %3, %cst_67 {dimension_numbers = #tpu.dot_dimension_numbers<[1], [0], [0], [1], [0, 0, 1, 1], [], []>} : vector<8x32xf32>, vector<32x128xf32>, vector<8x128xf32> -> vector<8x128xf32>
    %276 = arith.addf %274, %275 : vector<8x128xf32>
    %277 = vector.extract_strided_slice %276 {offsets = [0, 0], sizes = [8, 96], strides = [1, 1]} : vector<8x128xf32> to vector<8x96xf32>
    %278 = arith.negf %277 : vector<8x96xf32>
    %279 = math.exp %278 : vector<8x96xf32>
    %cst_68 = arith.constant 1.000000e+00 : f32
    %280 = vector.broadcast %cst_68 : f32 to vector<8x96xf32>
    %281 = arith.addf %280, %279 : vector<8x96xf32>
    %282 = arith.divf %280, %281 : vector<8x96xf32>
    %283 = vector.extract_strided_slice %276 {offsets = [0, 96], sizes = [8, 32], strides = [1, 1]} : vector<8x128xf32> to vector<8x32xf32>
    %284 = math.tanh %283 : vector<8x32xf32>
    %285 = vector.extract_strided_slice %282 {offsets = [0, 0], sizes = [8, 32], strides = [1, 1]} : vector<8x96xf32> to vector<8x32xf32>
    %286 = vector.extract_strided_slice %282 {offsets = [0, 32], sizes = [8, 32], strides = [1, 1]} : vector<8x96xf32> to vector<8x32xf32>
    %287 = vector.extract_strided_slice %282 {offsets = [0, 64], sizes = [8, 32], strides = [1, 1]} : vector<8x96xf32> to vector<8x32xf32>
    %288 = arith.mulf %286, %224 : vector<8x32xf32>
    %289 = arith.mulf %285, %284 : vector<8x32xf32>
    %290 = arith.addf %288, %289 : vector<8x32xf32>
    %291 = math.tanh %290 : vector<8x32xf32>
    %292 = arith.mulf %287, %291 : vector<8x32xf32>
    %293 = tpu.concatenate %226, %246 in 1 : vector<8x32xf32>, vector<8x64xf32> -> vector<8x96xf32>
    %cst_69 = arith.constant dense<0.000000e+00> : vector<8x256xf32>
    %294 = tpu.matmul %293, %4, %cst_69 {dimension_numbers = #tpu.dot_dimension_numbers<[1], [0], [0], [1], [0, 0, 1, 1], [], []>} : vector<8x96xf32>, vector<96x256xf32>, vector<8x256xf32> -> vector<8x256xf32>
    %295 = vector.broadcast %6 : vector<1x256xf32> to vector<8x256xf32>
    %296 = arith.addf %294, %295 : vector<8x256xf32>
    %297 = vector.extract_strided_slice %296 {offsets = [0, 0], sizes = [8, 192], strides = [1, 1]} : vector<8x256xf32> to vector<8x192xf32>
    %298 = arith.negf %297 : vector<8x192xf32>
    %299 = math.exp %298 : vector<8x192xf32>
    %cst_70 = arith.constant 1.000000e+00 : f32
    %300 = vector.broadcast %cst_70 : f32 to vector<8x192xf32>
    %301 = arith.addf %300, %299 : vector<8x192xf32>
    %302 = arith.divf %300, %301 : vector<8x192xf32>
    %303 = vector.extract_strided_slice %296 {offsets = [0, 192], sizes = [8, 64], strides = [1, 1]} : vector<8x256xf32> to vector<8x64xf32>
    %304 = math.tanh %303 : vector<8x64xf32>
    %305 = vector.extract_strided_slice %302 {offsets = [0, 0], sizes = [8, 64], strides = [1, 1]} : vector<8x192xf32> to vector<8x64xf32>
    %306 = vector.extract_strided_slice %302 {offsets = [0, 64], sizes = [8, 64], strides = [1, 1]} : vector<8x192xf32> to vector<8x64xf32>
    %307 = vector.extract_strided_slice %302 {offsets = [0, 128], sizes = [8, 64], strides = [1, 1]} : vector<8x192xf32> to vector<8x64xf32>
    %308 = arith.mulf %306, %244 : vector<8x64xf32>
    %309 = arith.mulf %305, %304 : vector<8x64xf32>
    %310 = arith.addf %308, %309 : vector<8x64xf32>
    %311 = math.tanh %310 : vector<8x64xf32>
    %312 = arith.mulf %307, %311 : vector<8x64xf32>
    %c2_i32_71 = arith.constant 2 : i32
    %313 = arith.subi %c5_i32, %c2_i32_71 : i32
    %314 = tpu.concatenate %246, %267 in 1 : vector<8x64xf32>, vector<8x128xf32> -> vector<8x192xf32>
    %cst_72 = arith.constant dense<0.000000e+00> : vector<8x512xf32>
    %315 = tpu.matmul %314, %5, %cst_72 {dimension_numbers = #tpu.dot_dimension_numbers<[1], [0], [0], [1], [0, 0, 1, 1], [], []>} : vector<8x192xf32>, vector<192x512xf32>, vector<8x512xf32> -> vector<8x512xf32>
    %316 = vector.broadcast %7 : vector<1x512xf32> to vector<8x512xf32>
    %317 = arith.addf %315, %316 : vector<8x512xf32>
    %318 = vector.extract_strided_slice %317 {offsets = [0, 0], sizes = [8, 384], strides = [1, 1]} : vector<8x512xf32> to vector<8x384xf32>
    %319 = arith.negf %318 : vector<8x384xf32>
    %320 = math.exp %319 : vector<8x384xf32>
    %cst_73 = arith.constant 1.000000e+00 : f32
    %321 = vector.broadcast %cst_73 : f32 to vector<8x384xf32>
    %322 = arith.addf %321, %320 : vector<8x384xf32>
    %323 = arith.divf %321, %322 : vector<8x384xf32>
    %324 = vector.extract_strided_slice %317 {offsets = [0, 384], sizes = [8, 128], strides = [1, 1]} : vector<8x512xf32> to vector<8x128xf32>
    %325 = math.tanh %324 : vector<8x128xf32>
    %326 = vector.extract_strided_slice %323 {offsets = [0, 0], sizes = [8, 128], strides = [1, 1]} : vector<8x384xf32> to vector<8x128xf32>
    %327 = vector.extract_strided_slice %323 {offsets = [0, 128], sizes = [8, 128], strides = [1, 1]} : vector<8x384xf32> to vector<8x128xf32>
    %328 = vector.extract_strided_slice %323 {offsets = [0, 256], sizes = [8, 128], strides = [1, 1]} : vector<8x384xf32> to vector<8x128xf32>
    %329 = arith.mulf %327, %265 : vector<8x128xf32>
    %330 = arith.mulf %326, %325 : vector<8x128xf32>
    %331 = arith.addf %329, %330 : vector<8x128xf32>
    %332 = math.tanh %331 : vector<8x128xf32>
    %333 = arith.mulf %328, %332 : vector<8x128xf32>
    %334 = arith.index_cast %313 : i32 to index
    %c0_74 = arith.constant 0 : index
    %c0_75 = arith.constant 0 : index
    %335 = vector.load %arg8[%334, %c0_74, %c0_75] : memref<8x8x128xf32, #tpu.memory_space<vmem>>, vector<1x8x128xf32>
    %336 = vector.shape_cast %335 : vector<1x8x128xf32> to vector<8x128xf32>
    %337 = vector.shape_cast %333 : vector<8x128xf32> to vector<1x8x128xf32>
    tpu.vector_store %arg8[%334, %c0_74, %c0_75], %337 {strides = array<i32>} : memref<8x8x128xf32, #tpu.memory_space<vmem>>, vector<1x8x128xf32>,
    %c6_i32 = arith.constant 6 : i32
    %338 = arith.index_cast %c6_i32 : i32 to index
    %c0_76 = arith.constant 0 : index
    %c0_77 = arith.constant 0 : index
    %339 = vector.load %arg2[%338, %c0_76, %c0_77] : memref<8x8x128xf32, #tpu.memory_space<vmem>>, vector<1x8x128xf32>
    %340 = vector.shape_cast %339 : vector<1x8x128xf32> to vector<8x128xf32>
    %cst_78 = arith.constant dense<0.000000e+00> : vector<8x128xf32>
    %341 = tpu.matmul %292, %3, %cst_78 {dimension_numbers = #tpu.dot_dimension_numbers<[1], [0], [0], [1], [0, 0, 1, 1], [], []>} : vector<8x32xf32>, vector<32x128xf32>, vector<8x128xf32> -> vector<8x128xf32>
    %342 = arith.addf %340, %341 : vector<8x128xf32>
    %343 = vector.extract_strided_slice %342 {offsets = [0, 0], sizes = [8, 96], strides = [1, 1]} : vector<8x128xf32> to vector<8x96xf32>
    %344 = arith.negf %343 : vector<8x96xf32>
    %345 = math.exp %344 : vector<8x96xf32>
    %cst_79 = arith.constant 1.000000e+00 : f32
    %346 = vector.broadcast %cst_79 : f32 to vector<8x96xf32>
    %347 = arith.addf %346, %345 : vector<8x96xf32>
    %348 = arith.divf %346, %347 : vector<8x96xf32>
    %349 = vector.extract_strided_slice %342 {offsets = [0, 96], sizes = [8, 32], strides = [1, 1]} : vector<8x128xf32> to vector<8x32xf32>
    %350 = math.tanh %349 : vector<8x32xf32>
    %351 = vector.extract_strided_slice %348 {offsets = [0, 0], sizes = [8, 32], strides = [1, 1]} : vector<8x96xf32> to vector<8x32xf32>
    %352 = vector.extract_strided_slice %348 {offsets = [0, 32], sizes = [8, 32], strides = [1, 1]} : vector<8x96xf32> to vector<8x32xf32>
    %353 = vector.extract_strided_slice %348 {offsets = [0, 64], sizes = [8, 32], strides = [1, 1]} : vector<8x96xf32> to vector<8x32xf32>
    %354 = arith.mulf %352, %290 : vector<8x32xf32>
    %355 = arith.mulf %351, %350 : vector<8x32xf32>
    %356 = arith.addf %354, %355 : vector<8x32xf32>
    %357 = math.tanh %356 : vector<8x32xf32>
    %358 = arith.mulf %353, %357 : vector<8x32xf32>
    %359 = tpu.concatenate %292, %312 in 1 : vector<8x32xf32>, vector<8x64xf32> -> vector<8x96xf32>
    %cst_80 = arith.constant dense<0.000000e+00> : vector<8x256xf32>
    %360 = tpu.matmul %359, %4, %cst_80 {dimension_numbers = #tpu.dot_dimension_numbers<[1], [0], [0], [1], [0, 0, 1, 1], [], []>} : vector<8x96xf32>, vector<96x256xf32>, vector<8x256xf32> -> vector<8x256xf32>
    %361 = vector.broadcast %6 : vector<1x256xf32> to vector<8x256xf32>
    %362 = arith.addf %360, %361 : vector<8x256xf32>
    %363 = vector.extract_strided_slice %362 {offsets = [0, 0], sizes = [8, 192], strides = [1, 1]} : vector<8x256xf32> to vector<8x192xf32>
    %364 = arith.negf %363 : vector<8x192xf32>
    %365 = math.exp %364 : vector<8x192xf32>
    %cst_81 = arith.constant 1.000000e+00 : f32
    %366 = vector.broadcast %cst_81 : f32 to vector<8x192xf32>
    %367 = arith.addf %366, %365 : vector<8x192xf32>
    %368 = arith.divf %366, %367 : vector<8x192xf32>
    %369 = vector.extract_strided_slice %362 {offsets = [0, 192], sizes = [8, 64], strides = [1, 1]} : vector<8x256xf32> to vector<8x64xf32>
    %370 = math.tanh %369 : vector<8x64xf32>
    %371 = vector.extract_strided_slice %368 {offsets = [0, 0], sizes = [8, 64], strides = [1, 1]} : vector<8x192xf32> to vector<8x64xf32>
    %372 = vector.extract_strided_slice %368 {offsets = [0, 64], sizes = [8, 64], strides = [1, 1]} : vector<8x192xf32> to vector<8x64xf32>
    %373 = vector.extract_strided_slice %368 {offsets = [0, 128], sizes = [8, 64], strides = [1, 1]} : vector<8x192xf32> to vector<8x64xf32>
    %374 = arith.mulf %372, %310 : vector<8x64xf32>
    %375 = arith.mulf %371, %370 : vector<8x64xf32>
    %376 = arith.addf %374, %375 : vector<8x64xf32>
    %377 = math.tanh %376 : vector<8x64xf32>
    %378 = arith.mulf %373, %377 : vector<8x64xf32>
    %c2_i32_82 = arith.constant 2 : i32
    %379 = arith.subi %c6_i32, %c2_i32_82 : i32
    %380 = tpu.concatenate %312, %333 in 1 : vector<8x64xf32>, vector<8x128xf32> -> vector<8x192xf32>
    %cst_83 = arith.constant dense<0.000000e+00> : vector<8x512xf32>
    %381 = tpu.matmul %380, %5, %cst_83 {dimension_numbers = #tpu.dot_dimension_numbers<[1], [0], [0], [1], [0, 0, 1, 1], [], []>} : vector<8x192xf32>, vector<192x512xf32>, vector<8x512xf32> -> vector<8x512xf32>
    %382 = vector.broadcast %7 : vector<1x512xf32> to vector<8x512xf32>
    %383 = arith.addf %381, %382 : vector<8x512xf32>
    %384 = vector.extract_strided_slice %383 {offsets = [0, 0], sizes = [8, 384], strides = [1, 1]} : vector<8x512xf32> to vector<8x384xf32>
    %385 = arith.negf %384 : vector<8x384xf32>
    %386 = math.exp %385 : vector<8x384xf32>
    %cst_84 = arith.constant 1.000000e+00 : f32
    %387 = vector.broadcast %cst_84 : f32 to vector<8x384xf32>
    %388 = arith.addf %387, %386 : vector<8x384xf32>
    %389 = arith.divf %387, %388 : vector<8x384xf32>
    %390 = vector.extract_strided_slice %383 {offsets = [0, 384], sizes = [8, 128], strides = [1, 1]} : vector<8x512xf32> to vector<8x128xf32>
    %391 = math.tanh %390 : vector<8x128xf32>
    %392 = vector.extract_strided_slice %389 {offsets = [0, 0], sizes = [8, 128], strides = [1, 1]} : vector<8x384xf32> to vector<8x128xf32>
    %393 = vector.extract_strided_slice %389 {offsets = [0, 128], sizes = [8, 128], strides = [1, 1]} : vector<8x384xf32> to vector<8x128xf32>
    %394 = vector.extract_strided_slice %389 {offsets = [0, 256], sizes = [8, 128], strides = [1, 1]} : vector<8x384xf32> to vector<8x128xf32>
    %395 = arith.mulf %393, %331 : vector<8x128xf32>
    %396 = arith.mulf %392, %391 : vector<8x128xf32>
    %397 = arith.addf %395, %396 : vector<8x128xf32>
    %398 = math.tanh %397 : vector<8x128xf32>
    %399 = arith.mulf %394, %398 : vector<8x128xf32>
    %400 = arith.index_cast %379 : i32 to index
    %c0_85 = arith.constant 0 : index
    %c0_86 = arith.constant 0 : index
    %401 = vector.load %arg8[%400, %c0_85, %c0_86] : memref<8x8x128xf32, #tpu.memory_space<vmem>>, vector<1x8x128xf32>
    %402 = vector.shape_cast %401 : vector<1x8x128xf32> to vector<8x128xf32>
    %403 = vector.shape_cast %399 : vector<8x128xf32> to vector<1x8x128xf32>
    tpu.vector_store %arg8[%400, %c0_85, %c0_86], %403 {strides = array<i32>} : memref<8x8x128xf32, #tpu.memory_space<vmem>>, vector<1x8x128xf32>,
    %c7_i32 = arith.constant 7 : i32
    %404 = arith.index_cast %c7_i32 : i32 to index
    %c0_87 = arith.constant 0 : index
    %c0_88 = arith.constant 0 : index
    %405 = vector.load %arg2[%404, %c0_87, %c0_88] : memref<8x8x128xf32, #tpu.memory_space<vmem>>, vector<1x8x128xf32>
    %406 = vector.shape_cast %405 : vector<1x8x128xf32> to vector<8x128xf32>
    %cst_89 = arith.constant dense<0.000000e+00> : vector<8x128xf32>
    %407 = tpu.matmul %358, %3, %cst_89 {dimension_numbers = #tpu.dot_dimension_numbers<[1], [0], [0], [1], [0, 0, 1, 1], [], []>} : vector<8x32xf32>, vector<32x128xf32>, vector<8x128xf32> -> vector<8x128xf32>
    %408 = arith.addf %406, %407 : vector<8x128xf32>
    %409 = vector.extract_strided_slice %408 {offsets = [0, 0], sizes = [8, 96], strides = [1, 1]} : vector<8x128xf32> to vector<8x96xf32>
    %410 = arith.negf %409 : vector<8x96xf32>
    %411 = math.exp %410 : vector<8x96xf32>
    %cst_90 = arith.constant 1.000000e+00 : f32
    %412 = vector.broadcast %cst_90 : f32 to vector<8x96xf32>
    %413 = arith.addf %412, %411 : vector<8x96xf32>
    %414 = arith.divf %412, %413 : vector<8x96xf32>
    %415 = vector.extract_strided_slice %408 {offsets = [0, 96], sizes = [8, 32], strides = [1, 1]} : vector<8x128xf32> to vector<8x32xf32>
    %416 = math.tanh %415 : vector<8x32xf32>
    %417 = vector.extract_strided_slice %414 {offsets = [0, 0], sizes = [8, 32], strides = [1, 1]} : vector<8x96xf32> to vector<8x32xf32>
    %418 = vector.extract_strided_slice %414 {offsets = [0, 32], sizes = [8, 32], strides = [1, 1]} : vector<8x96xf32> to vector<8x32xf32>
    %419 = vector.extract_strided_slice %414 {offsets = [0, 64], sizes = [8, 32], strides = [1, 1]} : vector<8x96xf32> to vector<8x32xf32>
    %420 = arith.mulf %418, %356 : vector<8x32xf32>
    %421 = arith.mulf %417, %416 : vector<8x32xf32>
    %422 = arith.addf %420, %421 : vector<8x32xf32>
    %423 = math.tanh %422 : vector<8x32xf32>
    %424 = arith.mulf %419, %423 : vector<8x32xf32>
    %425 = tpu.concatenate %358, %378 in 1 : vector<8x32xf32>, vector<8x64xf32> -> vector<8x96xf32>
    %cst_91 = arith.constant dense<0.000000e+00> : vector<8x256xf32>
    %426 = tpu.matmul %425, %4, %cst_91 {dimension_numbers = #tpu.dot_dimension_numbers<[1], [0], [0], [1], [0, 0, 1, 1], [], []>} : vector<8x96xf32>, vector<96x256xf32>, vector<8x256xf32> -> vector<8x256xf32>
    %427 = vector.broadcast %6 : vector<1x256xf32> to vector<8x256xf32>
    %428 = arith.addf %426, %427 : vector<8x256xf32>
    %429 = vector.extract_strided_slice %428 {offsets = [0, 0], sizes = [8, 192], strides = [1, 1]} : vector<8x256xf32> to vector<8x192xf32>
    %430 = arith.negf %429 : vector<8x192xf32>
    %431 = math.exp %430 : vector<8x192xf32>
    %cst_92 = arith.constant 1.000000e+00 : f32
    %432 = vector.broadcast %cst_92 : f32 to vector<8x192xf32>
    %433 = arith.addf %432, %431 : vector<8x192xf32>
    %434 = arith.divf %432, %433 : vector<8x192xf32>
    %435 = vector.extract_strided_slice %428 {offsets = [0, 192], sizes = [8, 64], strides = [1, 1]} : vector<8x256xf32> to vector<8x64xf32>
    %436 = math.tanh %435 : vector<8x64xf32>
    %437 = vector.extract_strided_slice %434 {offsets = [0, 0], sizes = [8, 64], strides = [1, 1]} : vector<8x192xf32> to vector<8x64xf32>
    %438 = vector.extract_strided_slice %434 {offsets = [0, 64], sizes = [8, 64], strides = [1, 1]} : vector<8x192xf32> to vector<8x64xf32>
    %439 = vector.extract_strided_slice %434 {offsets = [0, 128], sizes = [8, 64], strides = [1, 1]} : vector<8x192xf32> to vector<8x64xf32>
    %440 = arith.mulf %438, %376 : vector<8x64xf32>
    %441 = arith.mulf %437, %436 : vector<8x64xf32>
    %442 = arith.addf %440, %441 : vector<8x64xf32>
    %443 = math.tanh %442 : vector<8x64xf32>
    %444 = arith.mulf %439, %443 : vector<8x64xf32>
    %c2_i32_93 = arith.constant 2 : i32
    %445 = arith.subi %c7_i32, %c2_i32_93 : i32
    %446 = tpu.concatenate %378, %399 in 1 : vector<8x64xf32>, vector<8x128xf32> -> vector<8x192xf32>
    %cst_94 = arith.constant dense<0.000000e+00> : vector<8x512xf32>
    %447 = tpu.matmul %446, %5, %cst_94 {dimension_numbers = #tpu.dot_dimension_numbers<[1], [0], [0], [1], [0, 0, 1, 1], [], []>} : vector<8x192xf32>, vector<192x512xf32>, vector<8x512xf32> -> vector<8x512xf32>
    %448 = vector.broadcast %7 : vector<1x512xf32> to vector<8x512xf32>
    %449 = arith.addf %447, %448 : vector<8x512xf32>
    %450 = vector.extract_strided_slice %449 {offsets = [0, 0], sizes = [8, 384], strides = [1, 1]} : vector<8x512xf32> to vector<8x384xf32>
    %451 = arith.negf %450 : vector<8x384xf32>
    %452 = math.exp %451 : vector<8x384xf32>
    %cst_95 = arith.constant 1.000000e+00 : f32
    %453 = vector.broadcast %cst_95 : f32 to vector<8x384xf32>
    %454 = arith.addf %453, %452 : vector<8x384xf32>
    %455 = arith.divf %453, %454 : vector<8x384xf32>
    %456 = vector.extract_strided_slice %449 {offsets = [0, 384], sizes = [8, 128], strides = [1, 1]} : vector<8x512xf32> to vector<8x128xf32>
    %457 = math.tanh %456 : vector<8x128xf32>
    %458 = vector.extract_strided_slice %455 {offsets = [0, 0], sizes = [8, 128], strides = [1, 1]} : vector<8x384xf32> to vector<8x128xf32>
    %459 = vector.extract_strided_slice %455 {offsets = [0, 128], sizes = [8, 128], strides = [1, 1]} : vector<8x384xf32> to vector<8x128xf32>
    %460 = vector.extract_strided_slice %455 {offsets = [0, 256], sizes = [8, 128], strides = [1, 1]} : vector<8x384xf32> to vector<8x128xf32>
    %461 = arith.mulf %459, %397 : vector<8x128xf32>
    %462 = arith.mulf %458, %457 : vector<8x128xf32>
    %463 = arith.addf %461, %462 : vector<8x128xf32>
    %464 = math.tanh %463 : vector<8x128xf32>
    %465 = arith.mulf %460, %464 : vector<8x128xf32>
    %466 = arith.index_cast %445 : i32 to index
    %c0_96 = arith.constant 0 : index
    %c0_97 = arith.constant 0 : index
    %467 = vector.load %arg8[%466, %c0_96, %c0_97] : memref<8x8x128xf32, #tpu.memory_space<vmem>>, vector<1x8x128xf32>
    %468 = vector.shape_cast %467 : vector<1x8x128xf32> to vector<8x128xf32>
    %469 = vector.shape_cast %465 : vector<8x128xf32> to vector<1x8x128xf32>
    tpu.vector_store %arg8[%466, %c0_96, %c0_97], %469 {strides = array<i32>} : memref<8x8x128xf32, #tpu.memory_space<vmem>>, vector<1x8x128xf32>,
    %c6_i32_98 = arith.constant 6 : i32
    %470 = tpu.concatenate %424, %444 in 1 : vector<8x32xf32>, vector<8x64xf32> -> vector<8x96xf32>
    %cst_99 = arith.constant dense<0.000000e+00> : vector<8x256xf32>
    %471 = tpu.matmul %470, %4, %cst_99 {dimension_numbers = #tpu.dot_dimension_numbers<[1], [0], [0], [1], [0, 0, 1, 1], [], []>} : vector<8x96xf32>, vector<96x256xf32>, vector<8x256xf32> -> vector<8x256xf32>
    %472 = vector.broadcast %6 : vector<1x256xf32> to vector<8x256xf32>
    %473 = arith.addf %471, %472 : vector<8x256xf32>
    %474 = vector.extract_strided_slice %473 {offsets = [0, 0], sizes = [8, 192], strides = [1, 1]} : vector<8x256xf32> to vector<8x192xf32>
    %475 = arith.negf %474 : vector<8x192xf32>
    %476 = math.exp %475 : vector<8x192xf32>
    %cst_100 = arith.constant 1.000000e+00 : f32
    %477 = vector.broadcast %cst_100 : f32 to vector<8x192xf32>
    %478 = arith.addf %477, %476 : vector<8x192xf32>
    %479 = arith.divf %477, %478 : vector<8x192xf32>
    %480 = vector.extract_strided_slice %473 {offsets = [0, 192], sizes = [8, 64], strides = [1, 1]} : vector<8x256xf32> to vector<8x64xf32>
    %481 = math.tanh %480 : vector<8x64xf32>
    %482 = vector.extract_strided_slice %479 {offsets = [0, 0], sizes = [8, 64], strides = [1, 1]} : vector<8x192xf32> to vector<8x64xf32>
    %483 = vector.extract_strided_slice %479 {offsets = [0, 64], sizes = [8, 64], strides = [1, 1]} : vector<8x192xf32> to vector<8x64xf32>
    %484 = vector.extract_strided_slice %479 {offsets = [0, 128], sizes = [8, 64], strides = [1, 1]} : vector<8x192xf32> to vector<8x64xf32>
    %485 = arith.mulf %483, %442 : vector<8x64xf32>
    %486 = arith.mulf %482, %481 : vector<8x64xf32>
    %487 = arith.addf %485, %486 : vector<8x64xf32>
    %488 = math.tanh %487 : vector<8x64xf32>
    %489 = arith.mulf %484, %488 : vector<8x64xf32>
    %490 = tpu.concatenate %444, %465 in 1 : vector<8x64xf32>, vector<8x128xf32> -> vector<8x192xf32>
    %cst_101 = arith.constant dense<0.000000e+00> : vector<8x512xf32>
    %491 = tpu.matmul %490, %5, %cst_101 {dimension_numbers = #tpu.dot_dimension_numbers<[1], [0], [0], [1], [0, 0, 1, 1], [], []>} : vector<8x192xf32>, vector<192x512xf32>, vector<8x512xf32> -> vector<8x512xf32>
    %492 = vector.broadcast %7 : vector<1x512xf32> to vector<8x512xf32>
    %493 = arith.addf %491, %492 : vector<8x512xf32>
    %494 = vector.extract_strided_slice %493 {offsets = [0, 0], sizes = [8, 384], strides = [1, 1]} : vector<8x512xf32> to vector<8x384xf32>
    %495 = arith.negf %494 : vector<8x384xf32>
    %496 = math.exp %495 : vector<8x384xf32>
    %cst_102 = arith.constant 1.000000e+00 : f32
    %497 = vector.broadcast %cst_102 : f32 to vector<8x384xf32>
    %498 = arith.addf %497, %496 : vector<8x384xf32>
    %499 = arith.divf %497, %498 : vector<8x384xf32>
    %500 = vector.extract_strided_slice %493 {offsets = [0, 384], sizes = [8, 128], strides = [1, 1]} : vector<8x512xf32> to vector<8x128xf32>
    %501 = math.tanh %500 : vector<8x128xf32>
    %502 = vector.extract_strided_slice %499 {offsets = [0, 0], sizes = [8, 128], strides = [1, 1]} : vector<8x384xf32> to vector<8x128xf32>
    %503 = vector.extract_strided_slice %499 {offsets = [0, 128], sizes = [8, 128], strides = [1, 1]} : vector<8x384xf32> to vector<8x128xf32>
    %504 = vector.extract_strided_slice %499 {offsets = [0, 256], sizes = [8, 128], strides = [1, 1]} : vector<8x384xf32> to vector<8x128xf32>
    %505 = arith.mulf %503, %463 : vector<8x128xf32>
    %506 = arith.mulf %502, %501 : vector<8x128xf32>
    %507 = arith.addf %505, %506 : vector<8x128xf32>
    %508 = math.tanh %507 : vector<8x128xf32>
    %509 = arith.mulf %504, %508 : vector<8x128xf32>
    %c6 = arith.constant 6 : index
    %c0_103 = arith.constant 0 : index
    %c0_104 = arith.constant 0 : index
    %510 = vector.load %arg8[%c6, %c0_103, %c0_104] : memref<8x8x128xf32, #tpu.memory_space<vmem>>, vector<1x8x128xf32>
    %511 = vector.shape_cast %510 : vector<1x8x128xf32> to vector<8x128xf32>
    %512 = vector.shape_cast %509 : vector<8x128xf32> to vector<1x8x128xf32>
    tpu.vector_store %arg8[%c6, %c0_103, %c0_104], %512 {strides = array<i32>} : memref<8x8x128xf32, #tpu.memory_space<vmem>>, vector<1x8x128xf32>,
    %513 = tpu.concatenate %489, %509 in 1 : vector<8x64xf32>, vector<8x128xf32> -> vector<8x192xf32>
    %cst_105 = arith.constant dense<0.000000e+00> : vector<8x512xf32>
    %514 = tpu.matmul %513, %5, %cst_105 {dimension_numbers = #tpu.dot_dimension_numbers<[1], [0], [0], [1], [0, 0, 1, 1], [], []>} : vector<8x192xf32>, vector<192x512xf32>, vector<8x512xf32> -> vector<8x512xf32>
    %515 = vector.broadcast %7 : vector<1x512xf32> to vector<8x512xf32>
    %516 = arith.addf %514, %515 : vector<8x512xf32>
    %517 = vector.extract_strided_slice %516 {offsets = [0, 0], sizes = [8, 384], strides = [1, 1]} : vector<8x512xf32> to vector<8x384xf32>
    %518 = arith.negf %517 : vector<8x384xf32>
    %519 = math.exp %518 : vector<8x384xf32>
    %cst_106 = arith.constant 1.000000e+00 : f32
    %520 = vector.broadcast %cst_106 : f32 to vector<8x384xf32>
    %521 = arith.addf %520, %519 : vector<8x384xf32>
    %522 = arith.divf %520, %521 : vector<8x384xf32>
    %523 = vector.extract_strided_slice %516 {offsets = [0, 384], sizes = [8, 128], strides = [1, 1]} : vector<8x512xf32> to vector<8x128xf32>
    %524 = math.tanh %523 : vector<8x128xf32>
    %525 = vector.extract_strided_slice %522 {offsets = [0, 0], sizes = [8, 128], strides = [1, 1]} : vector<8x384xf32> to vector<8x128xf32>
    %526 = vector.extract_strided_slice %522 {offsets = [0, 128], sizes = [8, 128], strides = [1, 1]} : vector<8x384xf32> to vector<8x128xf32>
    %527 = vector.extract_strided_slice %522 {offsets = [0, 256], sizes = [8, 128], strides = [1, 1]} : vector<8x384xf32> to vector<8x128xf32>
    %528 = arith.mulf %526, %507 : vector<8x128xf32>
    %529 = arith.mulf %525, %524 : vector<8x128xf32>
    %530 = arith.addf %528, %529 : vector<8x128xf32>
    %531 = math.tanh %530 : vector<8x128xf32>
    %532 = arith.mulf %527, %531 : vector<8x128xf32>
    %c7 = arith.constant 7 : index
    %c0_107 = arith.constant 0 : index
    %c0_108 = arith.constant 0 : index
    %533 = vector.load %arg8[%c7, %c0_107, %c0_108] : memref<8x8x128xf32, #tpu.memory_space<vmem>>, vector<1x8x128xf32>
    %534 = vector.shape_cast %533 : vector<1x8x128xf32> to vector<8x128xf32>
    %535 = vector.shape_cast %532 : vector<8x128xf32> to vector<1x8x128xf32>
    tpu.vector_store %arg8[%c7, %c0_107, %c0_108], %535 {strides = array<i32>} : memref<8x8x128xf32, #tpu.memory_space<vmem>>, vector<1x8x128xf32>,
    %c0_109 = arith.constant 0 : index
    %c0_110 = arith.constant 0 : index
    %536 = vector.load %arg9[%c0_109, %c0_110] : memref<8x32xf32, #tpu.memory_space<vmem>>, vector<8x32xf32>
    tpu.vector_store %arg9[%c0_109, %c0_110], %424 {strides = array<i32>} : memref<8x32xf32, #tpu.memory_space<vmem>>, vector<8x32xf32>,
    %c0_111 = arith.constant 0 : index
    %c0_112 = arith.constant 0 : index
    %537 = vector.load %arg10[%c0_111, %c0_112] : memref<8x32xf32, #tpu.memory_space<vmem>>, vector<8x32xf32>
    tpu.vector_store %arg10[%c0_111, %c0_112], %422 {strides = array<i32>} : memref<8x32xf32, #tpu.memory_space<vmem>>, vector<8x32xf32>,
    %c0_113 = arith.constant 0 : index
    %c0_114 = arith.constant 0 : index
    %538 = vector.load %arg11[%c0_113, %c0_114] : memref<8x64xf32, #tpu.memory_space<vmem>>, vector<8x64xf32>
    tpu.vector_store %arg11[%c0_113, %c0_114], %489 {strides = array<i32>} : memref<8x64xf32, #tpu.memory_space<vmem>>, vector<8x64xf32>,
    %c0_115 = arith.constant 0 : index
    %c0_116 = arith.constant 0 : index
    %539 = vector.load %arg12[%c0_115, %c0_116] : memref<8x64xf32, #tpu.memory_space<vmem>>, vector<8x64xf32>
    tpu.vector_store %arg12[%c0_115, %c0_116], %487 {strides = array<i32>} : memref<8x64xf32, #tpu.memory_space<vmem>>, vector<8x64xf32>,
    %c0_117 = arith.constant 0 : index
    %c0_118 = arith.constant 0 : index
    %540 = vector.load %arg13[%c0_117, %c0_118] : memref<8x128xf32, #tpu.memory_space<vmem>>, vector<8x128xf32>
    tpu.vector_store %arg13[%c0_117, %c0_118], %532 {strides = array<i32>} : memref<8x128xf32, #tpu.memory_space<vmem>>, vector<8x128xf32>,
    %c0_119 = arith.constant 0 : index
    %c0_120 = arith.constant 0 : index
    %541 = vector.load %arg14[%c0_119, %c0_120] : memref<8x128xf32, #tpu.memory_space<vmem>>, vector<8x128xf32>
    tpu.vector_store %arg14[%c0_119, %c0_120], %530 {strides = array<i32>} : memref<8x128xf32, #tpu.memory_space<vmem>>, vector<8x128xf32>,
    return
  }
  func.func @transform_0(%arg0: i32, %arg1: i32) -> (i32, i32, i32) {
    %c0_i32 = arith.constant 0 : i32
    %c0_i32_0 = arith.constant 0 : i32
    return %arg1, %arg0, %c0_i32 : i32, i32, i32
  }
  func.func @transform_1(%arg0: i32, %arg1: i32) -> (i32, i32) {
    %c0_i32 = arith.constant 0 : i32
    %c0_i32_0 = arith.constant 0 : i32
    %c0_i32_1 = arith.constant 0 : i32
    return %c0_i32, %c0_i32_0 : i32, i32
  }
  func.func @transform_2(%arg0: i32, %arg1: i32) -> (i32, i32) {
    %c0_i32 = arith.constant 0 : i32
    %c0_i32_0 = arith.constant 0 : i32
    %c0_i32_1 = arith.constant 0 : i32
    return %c0_i32, %c0_i32_0 : i32, i32
  }
  func.func @transform_3(%arg0: i32, %arg1: i32) -> (i32, i32) {
    %c0_i32 = arith.constant 0 : i32
    %c0_i32_0 = arith.constant 0 : i32
    %c0_i32_1 = arith.constant 0 : i32
    return %c0_i32, %c0_i32_0 : i32, i32
  }
  func.func @transform_4(%arg0: i32, %arg1: i32) -> (i32, i32) {
    %c0_i32 = arith.constant 0 : i32
    %c0_i32_0 = arith.constant 0 : i32
    %c0_i32_1 = arith.constant 0 : i32
    return %c0_i32, %c0_i32_0 : i32, i32
  }
  func.func @transform_5(%arg0: i32, %arg1: i32) -> (i32, i32) {
    %c0_i32 = arith.constant 0 : i32
    %c0_i32_0 = arith.constant 0 : i32
    %c0_i32_1 = arith.constant 0 : i32
    return %c0_i32, %c0_i32_0 : i32, i32
  }
  func.func @transform_6(%arg0: i32, %arg1: i32) -> (i32, i32, i32) {
    %c0_i32 = arith.constant 0 : i32
    %c0_i32_0 = arith.constant 0 : i32
    return %arg1, %arg0, %c0_i32 : i32, i32, i32
  }
}

</mosaic_0001>

<bundles_post_ra>
// kernel: decoder_forward.1
= control target key start
LH: loop header
LB: loop body
LE: loop exit
PB: predicated region body
PF: predicated region fallthrough
CT: control target
= control target key end

     0   :  { %vm27_vm0 = vcmask 261120   ;;  %v4184_v2 = vmov 0.0   ;;  %s4185_s7 = smov 32   ;;  %vm30_vm5 = vcmask 523264   ;;  %s4186_s13 = smov 64   ;;  %vm248_vm6 = vcmask 785408   ;;  %s7867_s1 = inlined_call_operand.vmem [shape: f32[32,128], index: 1, kind: input, shape index: {}]   ;;  %s7868_s0 = inlined_call_operand.vmem [shape: f32[8,8,128], index: 0, kind: input, shape index: {}]   ;;  %s7869_s2 = inlined_call_operand.vmem [shape: f32[96,256], index: 2, kind: input, shape index: {}]   ;;  %s7870_s3 = inlined_call_operand.vmem [shape: f32[1,256], index: 3, kind: input, shape index: {}]   ;;  %s7871_s4 = inlined_call_operand.vmem [shape: f32[192,512], index: 4, kind: input, shape index: {}]   ;;  %s7872_s5 = inlined_call_operand.vmem [shape: f32[1,512], index: 5, kind: input, shape index: {}]   ;;  %s7873_s6 = inlined_call_operand.vmem [shape: f32[8,8,128], index: 6, kind: output, shape index: {}]  }
   0x1   :  { %v38_v0 = vld [vmem:[%s7867_s1 + $0x18] sm:$0xff]  ;;  %v37_v1 = vld [vmem:[%s7867_s1 + $0x10] sm:$0xff]  ;;  %28 = vst.msk [vmem:[#allocation2] sm:$0xff] %vm27_vm0, %v4184_v2  ;;  %v36_v3 = vld [vmem:[%s7867_s1 + $0x8] sm:$0xff]  ;;  %s4187_s26 = smov 96  }
   0x2   :  { %184 = vmatpush.msra.mxu0 %v38_v0  ;;  %29 = vst.msk [vmem:[#allocation3] sm:$0xff] %vm27_vm0, %v4184_v2  ;;  %368 = vmatpush.msra.mxu3 %v38_v0  ;;  %v35_v4 = vld [vmem:[%s7867_s1] sm:$0xff]  ;;  %v4257_v31 = vld [vmem:[%s7869_s2 + $0xb0] sm:$0xff]  ;;  %v4262_v32 = vld [vmem:[%s7869_s2 + $0xb8] sm:$0xff] }
   0x3   :  { %v167_v6 = vld [vmem:[%s7868_s0] sm:$0xff]  ;;  %31 = vst.msk [vmem:[#allocation4] sm:$0xff] %vm30_vm5, %v4184_v2  ;;  %256 = vmatpush.msra.mxu1 %v4257_v31  ;;  %276 = vmatpush.msra.mxu2 %v4262_v32  ;;  %v4274_v34 = vld [vmem:[%s7869_s2 + $0xa8] sm:$0xff]  ;;  %v4279_v35 = vld [vmem:[%s7869_s2 + $0x90] sm:$0xff] }
   0x4   :  { %185 = vmatpush.msra.mxu0 %v37_v1  ;;  %369 = vmatpush.msra.mxu3 %v37_v1  ;;  %32 = vst.msk [vmem:[#allocation5] sm:$0xff] %vm30_vm5, %v4184_v2  ;;  %v4267_v33 = vld [vmem:[%s7869_s2 + $0xa0] sm:$0xff]  ;;  %v4284_v36 = vld [vmem:[%s7869_s2 + $0x98] sm:$0xff]  ;;  %v4298_v38 = vld [vmem:[%s7869_s2 + $0x88] sm:$0xff] }
   0x5   :  { %257 = vmatpush.msra.mxu1 %v4267_v33  ;;  %277 = vmatpush.msra.mxu2 %v4274_v34  ;;  %v4293_v37 = vld [vmem:[%s7869_s2 + $0x80] sm:$0xff]  ;;  %v4307_v39 = vld [vmem:[%s7869_s2 + $0x70] sm:$0xff]  ;;  %v4312_v40 = vld [vmem:[%s7869_s2 + $0x78] sm:$0xff] }
   0x6   :  { %186 = vmatpush.msra.mxu0 %v36_v3  ;;  %370 = vmatpush.msra.mxu3 %v36_v3  ;;  %v4321_v41 = vld [vmem:[%s7869_s2 + $0x60] sm:$0xff]  ;;  %v4326_v42 = vld [vmem:[%s7869_s2 + $0x68] sm:$0xff]  ;;  %v4335_v43 = vld [vmem:[%s7869_s2 + $0x50] sm:$0xff] }
   0x7   :  { %258 = vmatpush.msra.mxu1 %v4279_v35  ;;  %278 = vmatpush.msra.mxu2 %v4284_v36  ;;  %v4340_v44 = vld [vmem:[%s7869_s2 + $0x58] sm:$0xff]  ;;  %v4357_v48 = vld [vmem:[%s7869_s2 + $0x40] sm:$0xff]  ;;  %v4362_v49 = vld [vmem:[%s7869_s2 + $0x48] sm:$0xff] }
   0x8   :  { %187 = vmatpush.msra.mxu0 %v35_v4  ;;  %v161_v5 = vld [vmem:[#allocation2] sm:$0xff]  ;;  %371 = vmatpush.msra.mxu3 %v35_v4  ;;  %v4369_v50 = vld [vmem:[%s7869_s2 + $0x30] sm:$0xff]  ;;  %v4374_v51 = vld [vmem:[%s7869_s2 + $0x38] sm:$0xff] }
   0x9   :  { %3425 = vmatmul.msk.f32.vlgmr.msra.gmra.mxu0 %vm27_vm0, %v161_v5  ;;  %v162_v10 = vld [vmem:[#allocation3] sm:$0xff]  ;;  %259 = vmatpush.msra.mxu1 %v4293_v37  ;;  %v4379_v52 = vld [vmem:[%s7869_s2 + $0x20] sm:$0xff]  ;;  %v4393_v54 = vld [vmem:[%s7869_s2 + $0x10] sm:$0xff] }
   0xa   :  { %433 = vmatpush.msrb.mxu0 %v38_v0  ;;  %492 = vmatpush.msrb.mxu3 %v4257_v31  ;;  %v163_v47 = vld [vmem:[#allocation4] sm:$0xff]  ;;  %v4384_v53 = vld [vmem:[%s7869_s2 + $0x28] sm:$0xff]  ;;  %v4398_v55 = vld [vmem:[%s7869_s2 + $0x18] sm:$0xff] }
   0xb   :  { %279 = vmatpush.msra.mxu2 %v4298_v38  ;;  %260 = vmatpush.msra.mxu1 %v4307_v39  ;;  %v4411_v56 = vld [vmem:[%s7869_s2] sm:$0xff]  ;;  %v4416_v57 = vld [vmem:[%s7869_s2 + $0x8] sm:$0xff] }
   0xc   :  { %434 = vmatpush.msrb.mxu0 %v37_v1  ;;  %493 = vmatpush.msrb.mxu3 %v4267_v33  ;;  %8144 = vst [vmem:[#allocation8_spill] sm:$0xff] %v4416_v57  ;;  %v3431_v61 = vld [vmem:[%s7868_s0 + $0x8] sm:$0xff]  ;;  %v159_v0 = vld [vmem:[%s7870_s3] sm:$0x3] }
   0xd   :  { %280 = vmatpush.msra.mxu2 %v4312_v40  ;;  %261 = vmatpush.msra.mxu1 %v4321_v41  ;;  %v4434_v1 = vperm.slane %v159_v0, 1 }
   0xe   :  { %435 = vmatpush.msrb.mxu0 %v36_v3  ;;  %494 = vmatpush.msrb.mxu3 %v4279_v35 }
   0xf   :  { %281 = vmatpush.msra.mxu2 %v4326_v42  ;;  %262 = vmatpush.msra.mxu1 %v4335_v43  ;;  %8145 = vst [vmem:[#allocation9_spill] sm:$0xff] %v4434_v1 }
  0x10   :  { %436 = vmatpush.msrb.mxu0 %v35_v4  ;;  %495 = vmatpush.msrb.mxu3 %v4293_v37 }
  0x11   :  { %282 = vmatpush.msra.mxu2 %v4340_v44  ;;  %263 = vmatpush.msra.mxu1 %v4357_v48 }
  0x12   :  { %512 = vmatpush.msra.mxu0 %v4262_v32  ;;  %496 = vmatpush.msrb.mxu3 %v4307_v39 }
  0x13   :  { %283 = vmatpush.msra.mxu2 %v4362_v49  ;;  %264 = vmatpush.msra.mxu1 %v4369_v50 }
  0x14   :  { %513 = vmatpush.msra.mxu0 %v4274_v34  ;;  %497 = vmatpush.msrb.mxu3 %v4321_v41 }
  0x15   :  { %284 = vmatpush.msra.mxu2 %v4374_v51  ;;  %265 = vmatpush.msra.mxu1 %v4379_v52 }
  0x16   :  { %514 = vmatpush.msra.mxu0 %v4284_v36  ;;  %498 = vmatpush.msrb.mxu3 %v4335_v43 }
  0x17   :  { %285 = vmatpush.msra.mxu2 %v4384_v53  ;;  %266 = vmatpush.msra.mxu1 %v4393_v54 }
  0x18   :  { %515 = vmatpush.msra.mxu0 %v4298_v38  ;;  %499 = vmatpush.msrb.mxu3 %v4357_v48 }
  0x19   :  { %286 = vmatpush.msra.mxu2 %v4398_v55  ;;  %267 = vmatpush.msra.mxu1 %v4411_v56 }
  0x1a   :  { %516 = vmatpush.msra.mxu0 %v4312_v40  ;;  %500 = vmatpush.msrb.mxu3 %v4369_v50 }
  0x1b   :  { %287 = vmatpush.msra.mxu2 %v4416_v57 }
  0x1c   :  { %517 = vmatpush.msra.mxu0 %v4326_v42  ;;  %501 = vmatpush.msrb.mxu3 %v4379_v52 }
  0x1e   :  { %518 = vmatpush.msra.mxu0 %v4340_v44  ;;  %502 = vmatpush.msrb.mxu3 %v4393_v54 }
  0x20   :  { %519 = vmatpush.msra.mxu0 %v4362_v49  ;;  %503 = vmatpush.msrb.mxu3 %v4411_v56 }
  0x22   :  { %520 = vmatpush.msra.mxu0 %v4374_v51 }
  0x24   :  { %521 = vmatpush.msra.mxu0 %v4384_v53 }
  0x26   :  { %522 = vmatpush.msra.mxu0 %v4398_v55 }
  0x28   :  { %523 = vmatpush.msra.mxu0 %v4416_v57  ;;  %v4798_v57 = vld [vmem:[%s7871_s4 + $0x1d8] sm:$0xff] }
  0x29   :  { %8171 = vst [vmem:[#allocation35_spill] sm:$0xff] %v4798_v57 }
  0x86   :  { %v189_v7 = vpop.f32.mrf.mxu0 }
  0x87   :  { %v192_v8 = vadd.f32 %v189_v7, %v167_v6  ;;  %v164_v6 = vld [vmem:[#allocation5] sm:$0xff] }
  0x89   :  { %3547 = vtanh.f32 %v192_v8  ;;  %v3426_v11 = vmul.f32 -1.442695, %v192_v8 }
  0x8b   :  { %3549 = vpow2.f32 %v3426_v11 }
  0x8f   :  { %v3548_v9 = vpop.eup %3547 }
  0x90   :  { %219 = vrot.lane.b32.xlu0 %v3548_v9, %s4185_s7  ;;  %v4443_v9 = vperm.slane %v159_v0, 0 }
  0x91   :  { %v3550_v12 = vpop.eup %3549 }
  0x92   :  { %v196_v13 = vadd.f32 1.0, %v3550_v12  ;;  %8146 = vst [vmem:[#allocation10_spill] sm:$0xff] %v4443_v9 }
  0x94   :  { %3551 = vrcp.f32 %v196_v13  ;;  %v208_v19 = vand.u32 2147483648, %v196_v13  ;;  %vm202_vm2 = vweird.f32 %v196_v13  ;;  %v206_v20 = vand.u32 2147483647, %v196_v13 }
  0x96   :  { %v209_v22 = vor.u32 1.1754944e-38, %v208_v19  ;;  %vm207_vm4 = vcmp.eq.f32.partialorder %v206_v20, 8.507059e+37 }
  0x98   :  { %214 = vrot.lane.b32.xlu0 %v162_v10, %s4185_s7 }
  0x9a   :  { %v3552_v14 = vpop.eup %3551 }
  0x9b   :  { %v198_v15 = vmul.f32 %v3552_v14, %v196_v13  ;;  %vm203_vm1 = vweird.f32 %v3552_v14 }
  0x9c   :  { %vm204_vm3 = vmor %vm202_vm2, %vm203_vm1 }
  0x9d   :  { %v199_v16 = vsub.f32 1.0, %v198_v15 }
  0x9f   :  { %v200_v17 = vmul.f32 %v3552_v14, %v199_v16 }
  0xa1   :  { %v201_v18 = vadd.f32 %v3552_v14, %v200_v17 }
  0xa3   :  { %v205_v21 = vsel %vm204_vm3, %v3552_v14, %v201_v18 }
  0xa4   :  { %v210_v24 = vsel %vm207_vm4, %v209_v22, %v205_v21 }
 0x102   :  { %v220_v23 = vpop.permute.xlu0 %219 }
 0x103   :  { %v222_v25 = vmul.f32 %v220_v23, %v210_v24 }
 0x105   :  { %224 = vrot.lane.b32.xlu1 %v222_v25, %s4185_s7 }
 0x10a   :  { %v215_v26 = vpop.permute.xlu0 %214 }
 0x10b   :  { %v217_v27 = vmul.f32 %v215_v26, %v210_v24 }
 0x177   :  { %v225_v28 = vpop.permute.xlu1 %224 }
 0x178   :  { %v4246_v29 = vadd.f32 %v225_v28, %v217_v27 }
 0x17a   :  { %3553 = vtanh.f32 %v4246_v29 }
 0x180   :  { %v3554_v30 = vpop.eup %3553 }
 0x181   :  { %230 = vrot.lane.b32.xlu1 %v3554_v30, %s4185_s7 }
 0x1f3   :  { %v231_v45 = vpop.permute.xlu1 %230 }
 0x1f4   :  { %v233_v46 = vmul.f32 %v231_v45, %v210_v24 }
 0x1f6   :  { %235 = vrot.lane.b32.xlu2 %v233_v46, %s4186_s13 }
 0x1fe   :  { %239 = vrot.lane.b32.xlu2 %v163_v47, %s4185_s7 }
 0x250   :  { %v236_v58 = vpop.permute.xlu2 %235 }
 0x251   :  { %3432 = vmatmul.msk.f32.vlgmr.msra.gmra.mxu3 %vm27_vm0, %v236_v58 }
 0x258   :  { %v240_v59 = vpop.permute.xlu2 %239 }
 0x259   :  { %v242_v60 = vsel %vm27_vm0, %v236_v58, %v240_v59 }
 0x25a   :  { %3427 = vmatmul.msk.f32.vlgmr.msra.gmra.mxu1 %vm248_vm6, %v242_v60  ;;  %3428 = vmatmul.msk.f32.vlgmr.msra.gmra.mxu2 %vm248_vm6, %v242_v60 }
 0x2d4   :  { %v373_v62 = vpop.f32.mrf.mxu3 }
 0x2d5   :  { %v376_v63 = vadd.f32 %v3431_v61, %v373_v62 }
 0x2d7   :  { %3555 = vtanh.f32 %v376_v63  ;;  %v3433_v8 = vmul.f32 -1.442695, %v376_v63  ;;  %v269_v10 = vpop.f32.mrf.mxu1 }
 0x2d8   :  { %v270_v11 = vadd.f32 %v269_v10, %v4443_v9 }
 0x2da   :  { %v3429_v12 = vmul.f32 -1.442695, %v270_v11 }
 0x2dd   :  { %v3556_v3 = vpop.eup %3555  ;;  %v289_v4 = vpop.f32.mrf.mxu2 }
 0x2de   :  { %v4437_v5 = vadd.f32 %v289_v4, %v4434_v1  ;;  %399 = vrot.lane.b32.xlu0 %v3556_v3, %s4185_s7 }
 0x2e0   :  { %3557 = vtanh.f32 %v4437_v5 }
 0x2e1   :  { %3559 = vpow2.f32 %v3433_v8 }
 0x2e2   :  { %3561 = vpow2.f32 %v3429_v12 }
 0x2e6   :  { %v3558_v7 = vpop.eup %3557  ;;  %332 = vrot.lane.b32.xlu0 %v164_v6, %s4186_s13 }
 0x2e7   :  { %337 = vrot.lane.b32.xlu1 %v3558_v7, %s4186_s13  ;;  %v3560_v13 = vpop.eup %3559 }
 0x2e8   :  { %v380_v14 = vadd.f32 1.0, %v3560_v13  ;;  %v3562_v15 = vpop.eup %3561 }
 0x2e9   :  { %v298_v16 = vadd.f32 1.0, %v3562_v15 }
 0x2ea   :  { %3563 = vrcp.f32 %v380_v14  ;;  %v392_v24 = vand.u32 2147483648, %v380_v14  ;;  %vm386_vm8 = vweird.f32 %v380_v14  ;;  %v390_v26 = vand.u32 2147483647, %v380_v14 }
 0x2eb   :  { %3565 = vrcp.f32 %v298_v16  ;;  %v311_v59 = vand.u32 2147483648, %v298_v16  ;;  %vm305_vm12 = vweird.f32 %v298_v16  ;;  %v309_v60 = vand.u32 2147483647, %v298_v16 }
 0x2ec   :  { %v393_v28 = vor.u32 1.1754944e-38, %v392_v24  ;;  %vm391_vm10 = vcmp.eq.f32.partialorder %v390_v26, 8.507059e+37 }
 0x2ed   :  { %v312_v62 = vor.u32 1.1754944e-38, %v311_v59  ;;  %vm310_vm14 = vcmp.eq.f32.partialorder %v309_v60, 8.507059e+37 }
 0x2f0   :  { %v3564_v17 = vpop.eup %3563 }
 0x2f1   :  { %v382_v18 = vmul.f32 %v3564_v17, %v380_v14  ;;  %v3566_v20 = vpop.eup %3565  ;;  %vm387_vm7 = vweird.f32 %v3564_v17 }
 0x2f2   :  { %v301_v22 = vmul.f32 %v3566_v20, %v298_v16  ;;  %vm388_vm9 = vmor %vm386_vm8, %vm387_vm7  ;;  %vm306_vm11 = vweird.f32 %v3566_v20  ;;  %v3430_v16 = vmul.f32 -1.442695, %v4437_v5 }
 0x2f3   :  { %v383_v19 = vsub.f32 1.0, %v382_v18  ;;  %vm307_vm13 = vmor %vm305_vm12, %vm306_vm11 }
 0x2f4   :  { %v302_v25 = vsub.f32 1.0, %v301_v22 }
 0x2f5   :  { %v384_v21 = vmul.f32 %v3564_v17, %v383_v19 }
 0x2f6   :  { %v303_v30 = vmul.f32 %v3566_v20, %v302_v25 }
 0x2f7   :  { %v385_v23 = vadd.f32 %v3564_v17, %v384_v21 }
 0x2f8   :  { %v304_v58 = vadd.f32 %v3566_v20, %v303_v30 }
 0x2f9   :  { %v389_v27 = vsel %vm388_vm9, %v3564_v17, %v385_v23 }
 0x2fa   :  { %v394_v46 = vsel %vm391_vm10, %v393_v28, %v389_v27  ;;  %v308_v61 = vsel %vm307_vm13, %v3566_v20, %v304_v58  ;;  %v3434_v58 = vld [vmem:[%s7868_s0 + $0x10] sm:$0xff] }
 0x2fb   :  { %v313_v63 = vsel %vm310_vm14, %v312_v62, %v308_v61  ;;  %v397_v4 = vmul.f32 %v394_v46, %v4246_v29 }
 0x350   :  { %v400_v45 = vpop.permute.xlu0 %399 }
 0x351   :  { %v402_v47 = vmul.f32 %v400_v45, %v394_v46 }
 0x353   :  { %404 = vrot.lane.b32.xlu2 %v402_v47, %s4185_s7 }
 0x358   :  { %v333_v10 = vpop.permute.xlu0 %332 }
 0x359   :  { %v338_v0 = vpop.permute.xlu1 %337  ;;  %v335_v11 = vmul.f32 %v333_v10, %v313_v63 }
 0x35a   :  { %v340_v3 = vmul.f32 %v338_v0, %v313_v63 }
 0x35c   :  { %342 = vrot.lane.b32.xlu1 %v340_v3, %s4186_s13 }
 0x3ad   :  { %v405_v6 = vpop.permute.xlu2 %404 }
 0x3ae   :  { %v4449_v7 = vadd.f32 %v405_v6, %v397_v4 }
 0x3b0   :  { %3567 = vtanh.f32 %v4449_v7 }
 0x3b6   :  { %v3568_v8 = vpop.eup %3567 }
 0x3b7   :  { %410 = vrot.lane.b32.xlu2 %v3568_v8, %s4185_s7 }
 0x3ce   :  { %v343_v12 = vpop.permute.xlu1 %342 }
 0x3cf   :  { %v4453_v13 = vadd.f32 %v343_v12, %v335_v11 }
 0x3d1   :  { %3569 = vtanh.f32 %v4453_v13 }
 0x3d2   :  { %3571 = vpow2.f32 %v3430_v16 }
 0x3d7   :  { %v3570_v14 = vpop.eup %3569 }
 0x3d8   :  { %348 = vrot.lane.b32.xlu0 %v3570_v14, %s4186_s13  ;;  %v3572_v17 = vpop.eup %3571 }
 0x3d9   :  { %v299_v18 = vadd.f32 1.0, %v3572_v17 }
 0x3db   :  { %3573 = vrcp.f32 %v299_v18  ;;  %v326_v24 = vand.u32 2147483648, %v299_v18  ;;  %vm320_vm1 = vweird.f32 %v299_v18  ;;  %v324_v25 = vand.u32 2147483647, %v299_v18 }
 0x3dd   :  { %v327_v27 = vor.u32 1.1754944e-38, %v326_v24  ;;  %vm325_vm3 = vcmp.eq.f32.partialorder %v324_v25, 8.507059e+37 }
 0x3e1   :  { %v3574_v19 = vpop.eup %3573 }
 0x3e2   :  { %v316_v20 = vmul.f32 %v3574_v19, %v299_v18  ;;  %vm321_vm15 = vweird.f32 %v3574_v19 }
 0x3e3   :  { %vm322_vm2 = vmor %vm320_vm1, %vm321_vm15 }
 0x3e4   :  { %v317_v21 = vsub.f32 1.0, %v316_v20 }
 0x3e6   :  { %v318_v22 = vmul.f32 %v3574_v19, %v317_v21 }
 0x3e8   :  { %v319_v23 = vadd.f32 %v3574_v19, %v318_v22 }
 0x3ea   :  { %v323_v26 = vsel %vm322_vm2, %v3574_v19, %v319_v23 }
 0x3eb   :  { %v328_v28 = vsel %vm325_vm3, %v327_v27, %v323_v26 }
 0x411   :  { %v411_v15 = vpop.permute.xlu2 %410 }
 0x412   :  { %v413_v29 = vmul.f32 %v411_v15, %v394_v46 }
 0x414   :  { %417 = vrot.lane.b32.xlu1 %v413_v29, %s4186_s13 }
 0x44a   :  { %v349_v30 = vpop.permute.xlu0 %348 }
 0x44b   :  { %v4459_v5 = vmul.f32 %v349_v30, %v328_v28 }
 0x44d   :  { %481 = vrot.lane.b32.xlu2 %v4459_v5, %s4185_s7 }
 0x486   :  { %v418_v45 = vpop.permute.xlu1 %417 }
 0x487   :  { %3435 = vmatmul.msk.f32.vlgmr.msrb.gmra.mxu0 %vm27_vm0, %v418_v45 }
 0x4a7   :  { %v482_v46 = vpop.permute.xlu2 %481 }
 0x4a8   :  { %v484_v47 = vsel %vm27_vm0, %v418_v45, %v482_v46 }
 0x4a9   :  { %3437 = vmatmul.msk.f32.vlgmr.msrb.gmra.mxu3 %vm248_vm6, %v484_v47  ;;  %3438 = vmatmul.msk.f32.vlgmr.msra.gmra.mxu0 %vm248_vm6, %v484_v47 }
 0x504   :  { %v438_v59 = vpop.f32.mrf.mxu0 }
 0x505   :  { %v441_v60 = vadd.f32 %v3434_v58, %v438_v59 }
 0x507   :  { %3575 = vtanh.f32 %v441_v60  ;;  %v3436_v3 = vmul.f32 -1.442695, %v441_v60 }
 0x50d   :  { %v3576_v61 = vpop.eup %3575 }
 0x50e   :  { %464 = vrot.lane.b32.xlu0 %v3576_v61, %s4185_s7 }
 0x526   :  { %v525_v62 = vpop.f32.mrf.mxu0 }
 0x527   :  { %v4472_v63 = vadd.f32 %v525_v62, %v4434_v1  ;;  %v4683_v1 = vld [vmem:[%s7871_s4 + $0xc8] sm:$0xff] }
 0x528   :  { %8158 = vst [vmem:[#allocation22_spill] sm:$0xff] %v4683_v1 }
 0x529   :  { %8147 = vst [vmem:[#allocation11_spill] sm:$0xff] %v4472_v63  ;;  %3577 = vtanh.f32 %v4472_v63  ;;  %v4694_v63 = vld [vmem:[%s7871_s4 + $0x80] sm:$0xff] }
 0x52a   :  { %3579 = vpow2.f32 %v3436_v3  ;;  %v4495_v3 = vld [vmem:[%s7871_s4 + $0x1c0] sm:$0xff] }
 0x52c   :  { %v505_v11 = vpop.f32.mrf.mxu3 }
 0x52d   :  { %v506_v12 = vadd.f32 %v505_v11, %v4443_v9  ;;  %v4529_v11 = vld [vmem:[%s7871_s4 + $0x1c8] sm:$0xff] }
 0x52e   :  { %v4677_v9 = vld [vmem:[%s7871_s4 + $0x2a8] sm:$0xff] }
 0x52f   :  { %v3578_v0 = vpop.eup %3577  ;;  %v3439_v15 = vmul.f32 -1.442695, %v506_v12  ;;  %v4534_v12 = vld [vmem:[%s7871_s4 + $0x2a0] sm:$0xff]  ;;  %8157 = vst [vmem:[#allocation21_spill] sm:$0xff] %v4677_v9 }
 0x530   :  { %569 = vrot.lane.b32.xlu1 %v3578_v0, %s4186_s13  ;;  %v3580_v4 = vpop.eup %3579  ;;  %v4490_v0 = vld [vmem:[%s7871_s4 + $0x1e0] sm:$0xff] }
 0x531   :  { %v445_v6 = vadd.f32 1.0, %v3580_v4  ;;  %601 = vmatpush.msrb.mxu1 %v4490_v0  ;;  %v4501_v4 = vld [vmem:[%s7871_s4 + $0x1a0] sm:$0xff] }
 0x533   :  { %3581 = vrcp.f32 %v445_v6  ;;  %v457_v17 = vand.u32 2147483648, %v445_v6  ;;  %vm451_vm7 = vweird.f32 %v445_v6  ;;  %v455_v18 = vand.u32 2147483647, %v445_v6  ;;  %602 = vmatpush.msrb.mxu1 %v4495_v3 }
 0x534   :  { %3583 = vpow2.f32 %v3439_v15  ;;  %v4546_v15 = vld [vmem:[%s7871_s4 + $0x160] sm:$0xff] }
 0x535   :  { %v458_v20 = vor.u32 1.1754944e-38, %v457_v17  ;;  %vm456_vm9 = vcmp.eq.f32.partialorder %v455_v18, 8.507059e+37  ;;  %603 = vmatpush.msrb.mxu1 %v4501_v4  ;;  %v4564_v17 = vld [vmem:[%s7871_s4 + $0x140] sm:$0xff] }
 0x536   :  { %v4570_v18 = vld [vmem:[%s7871_s4 + $0x260] sm:$0xff] }
 0x539   :  { %v3582_v8 = vpop.eup %3581 }
 0x53a   :  { %v447_v10 = vmul.f32 %v3582_v8, %v445_v6  ;;  %vm452_vm4 = vweird.f32 %v3582_v8  ;;  %v3584_v21 = vpop.eup %3583  ;;  %v4513_v6 = vld [vmem:[%s7871_s4 + $0x1e8] sm:$0xff] }
 0x53b   :  { %vm453_vm8 = vmor %vm451_vm7, %vm452_vm4  ;;  %v534_v25 = vadd.f32 1.0, %v3584_v21  ;;  %641 = vmatpush.msra.mxu3 %v4513_v6  ;;  %v4588_v21 = vld [vmem:[%s7871_s4 + $0x240] sm:$0xff] }
 0x53c   :  { %v448_v14 = vsub.f32 1.0, %v447_v10  ;;  %v4523_v10 = vld [vmem:[%s7871_s4 + $0x180] sm:$0xff] }
 0x53d   :  { %3585 = vrcp.f32 %v534_v25  ;;  %v547_v46 = vand.u32 2147483648, %v534_v25  ;;  %vm541_vm11 = vweird.f32 %v534_v25  ;;  %v545_v47 = vand.u32 2147483647, %v534_v25  ;;  %642 = vmatpush.msra.mxu3 %v4529_v11  ;;  %604 = vmatpush.msrb.mxu1 %v4523_v10 }
 0x53e   :  { %v449_v29 = vmul.f32 %v3582_v8, %v448_v14  ;;  %v4541_v14 = vld [vmem:[%s7871_s4 + $0x1a8] sm:$0xff] }
 0x53f   :  { %v548_v59 = vor.u32 1.1754944e-38, %v547_v46  ;;  %vm546_vm13 = vcmp.eq.f32.partialorder %v545_v47, 8.507059e+37  ;;  %643 = vmatpush.msra.mxu3 %v4541_v14  ;;  %605 = vmatpush.msrb.mxu1 %v4546_v15  ;;  %v4641_v46 = vld [vmem:[%s7871_s4 + $0x2e8] sm:$0xff]  ;;  %v4646_v47 = vld [vmem:[%s7871_s4 + $0xc0] sm:$0xff] }
 0x540   :  { %v450_v16 = vadd.f32 %v3582_v8, %v449_v29  ;;  %v4552_v29 = vld [vmem:[%s7871_s4 + $0x280] sm:$0xff]  ;;  %8154 = vst [vmem:[#allocation18_spill] sm:$0xff] %v4641_v46  ;;  %669 = vmatpush.msrb.mxu0 %v4641_v46  ;;  %v4688_v46 = vld [vmem:[%s7871_s4 + $0x1b0] sm:$0xff] }
 0x541   :  { %606 = vmatpush.msrb.mxu1 %v4564_v17 }
 0x542   :  { %v454_v19 = vsel %vm453_vm8, %v3582_v8, %v450_v16  ;;  %v4518_v8 = vld [vmem:[%s7871_s4 + $0x2c0] sm:$0xff]  ;;  %v4559_v16 = vld [vmem:[%s7871_s4 + $0x188] sm:$0xff] }
 0x543   :  { %v4477_v23 = vsel %vm456_vm9, %v458_v20, %v454_v19  ;;  %v3586_v26 = vpop.eup %3585  ;;  %8149 = vst [vmem:[#allocation13_spill] sm:$0xff] %v4559_v16  ;;  %v4577_v19 = vld [vmem:[%s7871_s4 + $0x168] sm:$0xff]  ;;  %v4582_v20 = vld [vmem:[%s7871_s4 + $0x120] sm:$0xff]  ;;  %644 = vmatpush.msra.mxu3 %v4559_v16 }
 0x544   :  { %8148 = vst [vmem:[#allocation12_spill] sm:$0xff] %v4477_v23  ;;  %v537_v27 = vmul.f32 %v3586_v26, %v534_v25  ;;  %vm542_vm10 = vweird.f32 %v3586_v26  ;;  %v4606_v25 = vld [vmem:[%s7871_s4 + $0x220] sm:$0xff]  ;;  %607 = vmatpush.msrb.mxu1 %v4582_v20 }
 0x545   :  { %vm543_vm12 = vmor %vm541_vm11, %vm542_vm10  ;;  %8150 = vst [vmem:[#allocation14_spill] sm:$0xff] %v4577_v19  ;;  %645 = vmatpush.msra.mxu3 %v4577_v19  ;;  %v4767_v19 = vld [vmem:[%s7871_s4 + $0x130] sm:$0xff]  ;;  %v4772_v16 = vld [vmem:[%s7871_s4] sm:$0xff] }
 0x546   :  { %v538_v28 = vsub.f32 1.0, %v537_v27  ;;  %v4618_v27 = vld [vmem:[%s7871_s4 + $0xe0] sm:$0xff]  ;;  %8166 = vst [vmem:[#allocation30_spill] sm:$0xff] %v4767_v19 }
 0x547   :  { %8167 = vst [vmem:[#allocation31_spill] sm:$0xff] %v4772_v16 }
 0x548   :  { %v539_v30 = vmul.f32 %v3586_v26, %v538_v28  ;;  %v4624_v28 = vld [vmem:[%s7871_s4 + $0x200] sm:$0xff] }
 0x54a   :  { %v540_v45 = vadd.f32 %v3586_v26, %v539_v30  ;;  %v4631_v30 = vld [vmem:[%s7871_s4 + $0x108] sm:$0xff] }
 0x54b   :  { %8153 = vst [vmem:[#allocation17_spill] sm:$0xff] %v4631_v30 }
 0x54c   :  { %v544_v58 = vsel %vm543_vm12, %v3586_v26, %v540_v45  ;;  %v4613_v26 = vld [vmem:[%s7871_s4 + $0x128] sm:$0xff]  ;;  %v4636_v45 = vld [vmem:[%s7871_s4 + $0x1f0] sm:$0xff] }
 0x54d   :  { %v4481_v61 = vsel %vm546_vm13, %v548_v59, %v544_v58  ;;  %8152 = vst [vmem:[#allocation16_spill] sm:$0xff] %v4613_v26  ;;  %v4653_v58 = vld [vmem:[%s7871_s4 + $0x2c8] sm:$0xff] }
 0x54e   :  { %8155 = vst [vmem:[#allocation19_spill] sm:$0xff] %v4653_v58  ;;  %v4660_v59 = vld [vmem:[%s7871_s4 + $0xe8] sm:$0xff]  ;;  %670 = vmatpush.msrb.mxu0 %v4653_v58  ;;  %v4709_v58 = vld [vmem:[%s7871_s4 + $0x190] sm:$0xff] }
 0x54f   :  { %8156 = vst [vmem:[#allocation20_spill] sm:$0xff] %v4660_v59 }
 0x550   :  { %671 = vmatpush.msrb.mxu0 %v4677_v9  ;;  %v4730_v9 = vld [vmem:[%s7871_s4 + $0x170] sm:$0xff] }
 0x580   :  { %v465_v22 = vpop.permute.xlu0 %464 }
 0x581   :  { %v467_v24 = vmul.f32 %v465_v22, %v4477_v23  ;;  %v4595_v22 = vld [vmem:[%s7871_s4 + $0x148] sm:$0xff] }
 0x582   :  { %8151 = vst [vmem:[#allocation15_spill] sm:$0xff] %v4595_v22  ;;  %646 = vmatpush.msra.mxu3 %v4595_v22  ;;  %v4715_v22 = vld [vmem:[%s7871_s4 + $0x60] sm:$0xff] }
 0x583   :  { %469 = vrot.lane.b32.xlu2 %v467_v24, %s4185_s7  ;;  %v4600_v24 = vld [vmem:[%s7871_s4 + $0x100] sm:$0xff] }
 0x584   :  { %608 = vmatpush.msrb.mxu1 %v4600_v24  ;;  %647 = vmatpush.msra.mxu3 %v4613_v26  ;;  %v4704_v26 = vld [vmem:[%s7871_s4 + $0xa8] sm:$0xff] }
 0x585   :  { %8159 = vst [vmem:[#allocation23_spill] sm:$0xff] %v4704_v26 }
 0x586   :  { %609 = vmatpush.msrb.mxu1 %v4618_v27  ;;  %648 = vmatpush.msra.mxu3 %v4631_v30  ;;  %v462_v30 = vmul.f32 %v4477_v23, %v4449_v7  ;;  %v4725_v23 = vld [vmem:[%s7871_s4 + $0x88] sm:$0xff] }
 0x587   :  { %8161 = vst [vmem:[#allocation25_spill] sm:$0xff] %v4725_v23 }
 0x588   :  { %610 = vmatpush.msrb.mxu1 %v4646_v47  ;;  %649 = vmatpush.msra.mxu3 %v4660_v59 }
 0x58a   :  { %650 = vmatpush.msra.mxu3 %v4683_v1  ;;  %v4735_v1 = vld [vmem:[%s7871_s4 + $0x40] sm:$0xff] }
 0x58b   :  { %8162 = vst [vmem:[#allocation26_spill] sm:$0xff] %v4735_v1 }
 0x58c   :  { %651 = vmatpush.msra.mxu3 %v4704_v26  ;;  %v4754_v26 = vld [vmem:[%s7871_s4 + $0x20] sm:$0xff] }
 0x58d   :  { %8164 = vst [vmem:[#allocation28_spill] sm:$0xff] %v4754_v26 }
 0x58e   :  { %652 = vmatpush.msra.mxu3 %v4725_v23  ;;  %v4780_v23 = vld [vmem:[%s7871_s4 + $0x1f8] sm:$0xff] }
 0x58f   :  { %8168 = vst [vmem:[#allocation32_spill] sm:$0xff] %v4780_v23 }
 0x5a2   :  { %v570_v60 = vpop.permute.xlu1 %569 }
 0x5a3   :  { %v572_v62 = vmul.f32 %v570_v60, %v4481_v61  ;;  %v4665_v60 = vld [vmem:[%s7871_s4 + $0x1d0] sm:$0xff] }
 0x5a5   :  { %574 = vrot.lane.b32.xlu0 %v572_v62, %s4186_s13  ;;  %v4670_v62 = vld [vmem:[%s7871_s4 + $0xa0] sm:$0xff] }
 0x5a6   :  { %611 = vmatpush.msrb.mxu1 %v4670_v62 }
 0x5a8   :  { %612 = vmatpush.msrb.mxu1 %v4694_v63 }
 0x5aa   :  { %613 = vmatpush.msrb.mxu1 %v4715_v22 }
 0x5ac   :  { %614 = vmatpush.msrb.mxu1 %v4735_v1  ;;  %v4787_v1 = vld [vmem:[%s7871_s4 + $0x28] sm:$0xff] }
 0x5ad   :  { %585 = vrot.lane.b32.xlu0 %v4184_v2, %s4186_s13  ;;  %v4506_v2 = vld [vmem:[%s7871_s4 + $0x2e0] sm:$0xff]  ;;  %8169 = vst [vmem:[#allocation33_spill] sm:$0xff] %v4787_v1 }
 0x5ae   :  { %629 = vmatpush.msrb.mxu2 %v4506_v2  ;;  %615 = vmatpush.msrb.mxu1 %v4754_v26 }
 0x5b0   :  { %630 = vmatpush.msrb.mxu2 %v4518_v8  ;;  %616 = vmatpush.msrb.mxu1 %v4772_v16  ;;  %v4813_v16 = vld [vmem:[%s7871_s4 + $0x198] sm:$0xff] }
 0x5b1   :  { %8173 = vst [vmem:[#allocation37_spill] sm:$0xff] %v4813_v16 }
 0x5b2   :  { %631 = vmatpush.msrb.mxu2 %v4534_v12  ;;  %721 = vmatpush.msra.mxu1 %v4780_v23  ;;  %v4825_v23 = vld [vmem:[%s7871_s4 + $0x158] sm:$0xff] }
 0x5b3   :  { %8175 = vst [vmem:[#allocation39_spill] sm:$0xff] %v4825_v23 }
 0x5b4   :  { %632 = vmatpush.msrb.mxu2 %v4552_v29  ;;  %722 = vmatpush.msra.mxu1 %v4798_v57  ;;  %v4831_v57 = vld [vmem:[%s7871_s4 + $0x138] sm:$0xff] }
 0x5b5   :  { %8176 = vst [vmem:[#allocation40_spill] sm:$0xff] %v4831_v57 }
 0x5b6   :  { %633 = vmatpush.msrb.mxu2 %v4570_v18 }
 0x5b8   :  { %634 = vmatpush.msrb.mxu2 %v4588_v21 }
 0x5ba   :  { %635 = vmatpush.msrb.mxu2 %v4606_v25 }
 0x5bc   :  { %636 = vmatpush.msrb.mxu2 %v4624_v28 }
 0x5be   :  { %681 = vmatpush.msra.mxu2 %v4636_v45 }
 0x5c0   :  { %682 = vmatpush.msra.mxu2 %v4665_v60 }
 0x5c2   :  { %683 = vmatpush.msra.mxu2 %v4688_v46 }
 0x5c4   :  { %684 = vmatpush.msra.mxu2 %v4709_v58 }
 0x5c6   :  { %685 = vmatpush.msra.mxu2 %v4730_v9 }
 0x5dd   :  { %v470_v59 = vpop.permute.xlu2 %469 }
 0x5de   :  { %v4719_v7 = vadd.f32 %v470_v59, %v462_v30  ;;  %v4744_v30 = vld [vmem:[%s7871_s4 + $0x68] sm:$0xff]  ;;  %v4749_v59 = vld [vmem:[%s7871_s4 + $0x150] sm:$0xff] }
 0x5df   :  { %8163 = vst [vmem:[#allocation27_spill] sm:$0xff] %v4744_v30  ;;  %653 = vmatpush.msra.mxu3 %v4744_v30  ;;  %686 = vmatpush.msra.mxu2 %v4749_v59  ;;  %v4792_v30 = vld [vmem:[%s7871_s4 + $0x110] sm:$0xff] }
 0x5e0   :  { %8160 = vst [vmem:[#allocation24_spill] sm:$0xff] %v4719_v7  ;;  %3587 = vtanh.f32 %v4719_v7  ;;  %v4762_v7 = vld [vmem:[%s7871_s4 + $0x48] sm:$0xff] }
 0x5e1   :  { %8165 = vst [vmem:[#allocation29_spill] sm:$0xff] %v4762_v7  ;;  %654 = vmatpush.msra.mxu3 %v4762_v7  ;;  %687 = vmatpush.msra.mxu2 %v4767_v19  ;;  %v4805_v7 = vld [vmem:[%s7871_s4 + $0x1b8] sm:$0xff] }
 0x5e2   :  { %8170 = vst [vmem:[#allocation34_spill] sm:$0xff] %v4792_v30  ;;  %723 = vmatpush.msra.mxu1 %v4805_v7  ;;  %v4911_v19 = vld [vmem:[%s7871_s4 + $0xb8] sm:$0xff] }
 0x5e3   :  { %8172 = vst [vmem:[#allocation36_spill] sm:$0xff] %v4805_v7  ;;  %655 = vmatpush.msra.mxu3 %v4787_v1  ;;  %688 = vmatpush.msra.mxu2 %v4792_v30  ;;  %v4843_v7 = vld [vmem:[%s7871_s4 + $0x118] sm:$0xff]  ;;  %v4877_v1 = vld [vmem:[%s7871_s4 + $0xd0] sm:$0xff] }
 0x5e4   :  { %724 = vmatpush.msra.mxu1 %v4813_v16  ;;  %v4838_v16 = vld [vmem:[%s7871_s4 + $0x288] sm:$0xff]  ;;  %8178 = vst [vmem:[#allocation42_spill] sm:$0xff] %v4843_v7  ;;  %v4894_v30 = vld [vmem:[%s7871_s4 + $0x2d8] sm:$0xff] }
 0x5e5   :  { %8177 = vst [vmem:[#allocation41_spill] sm:$0xff] %v4838_v16  ;;  %672 = vmatpush.msrb.mxu0 %v4838_v16  ;;  %v4872_v16 = vld [vmem:[%s7871_s4 + $0x2f8] sm:$0xff] }
 0x5e6   :  { %v3588_v26 = vpop.eup %3587  ;;  %8183 = vst [vmem:[#allocation47_spill] sm:$0xff] %v4872_v16 }
 0x5e7   :  { %475 = vrot.lane.b32.xlu1 %v3588_v26, %s4185_s7  ;;  %v4819_v26 = vld [vmem:[%s7871_s4 + $0x178] sm:$0xff]  ;;  %8184 = vst [vmem:[#allocation48_spill] sm:$0xff] %v4877_v1 }
 0x5e8   :  { %8174 = vst [vmem:[#allocation38_spill] sm:$0xff] %v4819_v26  ;;  %725 = vmatpush.msra.mxu1 %v4819_v26  ;;  %v4860_v26 = vld [vmem:[%s7871_s4 + $0x268] sm:$0xff] }
 0x5e9   :  { %8181 = vst [vmem:[#allocation45_spill] sm:$0xff] %v4860_v26  ;;  %673 = vmatpush.msrb.mxu0 %v4860_v26  ;;  %v4906_v26 = vld [vmem:[%s7871_s4 + $0x228] sm:$0xff] }
 0x5ea   :  { %726 = vmatpush.msra.mxu1 %v4825_v23  ;;  %v4850_v23 = vld [vmem:[%s7871_s4 + $0x8] sm:$0xff]  ;;  %8187 = vst [vmem:[#allocation51_spill] sm:$0xff] %v4894_v30 }
 0x5eb   :  { %8179 = vst [vmem:[#allocation43_spill] sm:$0xff] %v4850_v23  ;;  %656 = vmatpush.msra.mxu3 %v4850_v23  ;;  %v4884_v23 = vld [vmem:[%s7871_s4 + $0x248] sm:$0xff] }
 0x5ec   :  { %727 = vmatpush.msra.mxu1 %v4831_v57  ;;  %v4855_v57 = vld [vmem:[%s7871_s4 + $0xf0] sm:$0xff]  ;;  %8185 = vst [vmem:[#allocation49_spill] sm:$0xff] %v4884_v23  ;;  %674 = vmatpush.msrb.mxu0 %v4884_v23  ;;  %v4937_v23 = vld [vmem:[%s7871_s4 + $0x98] sm:$0xff] }
 0x5ed   :  { %8180 = vst [vmem:[#allocation44_spill] sm:$0xff] %v4855_v57  ;;  %689 = vmatpush.msra.mxu2 %v4855_v57  ;;  %v4889_v57 = vld [vmem:[%s7871_s4 + $0xd8] sm:$0xff]  ;;  %749 = vmatpush.msrb.mxu3 %v4872_v16 }
 0x5ee   :  { %728 = vmatpush.msra.mxu1 %v4843_v7  ;;  %v4867_v7 = vld [vmem:[%s7871_s4 + $0xf8] sm:$0xff]  ;;  %8186 = vst [vmem:[#allocation50_spill] sm:$0xff] %v4889_v57  ;;  %675 = vmatpush.msrb.mxu0 %v4906_v26 }
 0x5ef   :  { %8182 = vst [vmem:[#allocation46_spill] sm:$0xff] %v4867_v7  ;;  %690 = vmatpush.msra.mxu2 %v4877_v1  ;;  %v4918_v16 = vld [vmem:[%s7871_s4 + $0x2b8] sm:$0xff]  ;;  %v4923_v1 = vld [vmem:[%s7871_s4 + $0x90] sm:$0xff]  ;;  %750 = vmatpush.msrb.mxu3 %v4894_v30 }
 0x5f0   :  { %729 = vmatpush.msra.mxu1 %v4867_v7  ;;  %v4901_v7 = vld [vmem:[%s7871_s4 + $0xb0] sm:$0xff]  ;;  %8189 = vst [vmem:[#allocation53_spill] sm:$0xff] %v4906_v26  ;;  %v4942_v30 = vld [vmem:[%s7871_s4 + $0x298] sm:$0xff] }
 0x5f1   :  { %8188 = vst [vmem:[#allocation52_spill] sm:$0xff] %v4901_v7  ;;  %691 = vmatpush.msra.mxu2 %v4901_v7  ;;  %751 = vmatpush.msrb.mxu3 %v4918_v16  ;;  %v4954_v26 = vld [vmem:[%s7871_s4 + $0x2f0] sm:$0xff] }
 0x5f2   :  { %8190 = vst [vmem:[#allocation54_spill] sm:$0xff] %v4911_v19  ;;  %730 = vmatpush.msra.mxu1 %v4889_v57  ;;  %v4932_v57 = vld [vmem:[%s7871_s4 + $0x208] sm:$0xff]  ;;  %v4971_v7 = vld [vmem:[%s7871_s4 + $0x50] sm:$0xff] }
 0x5f3   :  { %8191 = vst [vmem:[#allocation55_spill] sm:$0xff] %v4918_v16  ;;  %692 = vmatpush.msra.mxu2 %v4923_v1  ;;  %676 = vmatpush.msrb.mxu0 %v4932_v57  ;;  %v4961_v16 = vld [vmem:[%s7871_s4 + $0x78] sm:$0xff] }
 0x5f4   :  { %8192 = vst [vmem:[#allocation56_spill] sm:$0xff] %v4923_v1  ;;  %731 = vmatpush.msra.mxu1 %v4911_v19  ;;  %v4949_v19 = vld [vmem:[%s7871_s4 + $0x70] sm:$0xff]  ;;  %v4966_v1 = vld [vmem:[%s7871_s4 + $0x278] sm:$0xff]  ;;  %752 = vmatpush.msrb.mxu3 %v4942_v30 }
 0x5f5   :  { %8193 = vst [vmem:[#allocation57_spill] sm:$0xff] %v4932_v57  ;;  %693 = vmatpush.msra.mxu2 %v4949_v19  ;;  %v4983_v57 = vld [vmem:[%s7871_s4 + $0x58] sm:$0xff]  ;;  %709 = vmatpush.msra.mxu0 %v4954_v26 }
 0x5f6   :  { %8194 = vst [vmem:[#allocation58_spill] sm:$0xff] %v4937_v23  ;;  %732 = vmatpush.msra.mxu1 %v4937_v23  ;;  %v4978_v23 = vld [vmem:[%s7871_s4 + $0x2d0] sm:$0xff]  ;;  %753 = vmatpush.msrb.mxu3 %v4966_v1 }
 0x5f7   :  { %8195 = vst [vmem:[#allocation59_spill] sm:$0xff] %v4942_v30  ;;  %v4990_v30 = vld [vmem:[%s7871_s4 + $0x258] sm:$0xff]  ;;  %694 = vmatpush.msra.mxu2 %v4971_v7  ;;  %710 = vmatpush.msra.mxu0 %v4978_v23 }
 0x5f8   :  { %8196 = vst [vmem:[#allocation60_spill] sm:$0xff] %v4949_v19  ;;  %733 = vmatpush.msra.mxu1 %v4961_v16  ;;  %v4995_v19 = vld [vmem:[%s7871_s4 + $0x30] sm:$0xff]  ;;  %754 = vmatpush.msrb.mxu3 %v4990_v30 }
 0x5f9   :  { %8197 = vst [vmem:[#allocation61_spill] sm:$0xff] %v4954_v26  ;;  %v5002_v26 = vld [vmem:[%s7871_s4 + $0x2b0] sm:$0xff]  ;;  %695 = vmatpush.msra.mxu2 %v4995_v19 }
 0x5fa   :  { %8198 = vst [vmem:[#allocation62_spill] sm:$0xff] %v4961_v16  ;;  %v5007_v16 = vld [vmem:[%s7871_s4 + $0x38] sm:$0xff]  ;;  %734 = vmatpush.msra.mxu1 %v4983_v57  ;;  %711 = vmatpush.msra.mxu0 %v5002_v26 }
 0x5fb   :  { %8199 = vst [vmem:[#allocation63_spill] sm:$0xff] %v4966_v1  ;;  %v5014_v1 = vld [vmem:[%s7871_s4 + $0x238] sm:$0xff] }
 0x5fc   :  { %8200 = vst [vmem:[#allocation64_spill] sm:$0xff] %v4971_v7  ;;  %v5019_v7 = vld [vmem:[%s7871_s4 + $0x10] sm:$0xff]  ;;  %735 = vmatpush.msra.mxu1 %v5007_v16  ;;  %755 = vmatpush.msrb.mxu3 %v5014_v1 }
 0x5fd   :  { %8201 = vst [vmem:[#allocation65_spill] sm:$0xff] %v4978_v23  ;;  %v5026_v23 = vld [vmem:[%s7871_s4 + $0x290] sm:$0xff]  ;;  %696 = vmatpush.msra.mxu2 %v5019_v7 }
 0x5fe   :  { %8202 = vst [vmem:[#allocation66_spill] sm:$0xff] %v4983_v57  ;;  %v5033_v57 = vld [vmem:[%s7871_s4 + $0x18] sm:$0xff]  ;;  %712 = vmatpush.msra.mxu0 %v5026_v23 }
 0x5ff   :  { %8203 = vst [vmem:[#allocation67_spill] sm:$0xff] %v4990_v30  ;;  %v5038_v30 = vld [vmem:[%s7871_s4 + $0x218] sm:$0xff]  ;;  %736 = vmatpush.msra.mxu1 %v5033_v57 }
 0x600   :  { %8204 = vst [vmem:[#allocation68_spill] sm:$0xff] %v4995_v19  ;;  %v5045_v19 = vld [vmem:[%s7871_s4 + $0x270] sm:$0xff]  ;;  %756 = vmatpush.msrb.mxu3 %v5038_v30 }
 0x601   :  { %8205 = vst [vmem:[#allocation69_spill] sm:$0xff] %v5002_v26  ;;  %713 = vmatpush.msra.mxu0 %v5045_v19 }
 0x602   :  { %8206 = vst [vmem:[#allocation70_spill] sm:$0xff] %v5007_v16  ;;  %v5053_v16 = vld [vmem:[%s7871_s4 + $0x250] sm:$0xff] }
 0x603   :  { %8207 = vst [vmem:[#allocation71_spill] sm:$0xff] %v5014_v1  ;;  %v5059_v1 = vld [vmem:[%s7871_s4 + $0x230] sm:$0xff]  ;;  %714 = vmatpush.msra.mxu0 %v5053_v16 }
 0x604   :  { %8208 = vst [vmem:[#allocation72_spill] sm:$0xff] %v5019_v7 }
 0x605   :  { %8209 = vst [vmem:[#allocation73_spill] sm:$0xff] %v5026_v23  ;;  %715 = vmatpush.msra.mxu0 %v5059_v1 }
 0x606   :  { %8210 = vst [vmem:[#allocation74_spill] sm:$0xff] %v5033_v57  ;;  %v5065_v57 = vld [vmem:[%s7871_s4 + $0x210] sm:$0xff] }
 0x607   :  { %8211 = vst [vmem:[#allocation75_spill] sm:$0xff] %v5038_v30  ;;  %716 = vmatpush.msra.mxu0 %v5065_v57  ;;  %v567_v30 = vmul.f32 %v4481_v61, %v4453_v13  ;;  %v5082_v13 = vld [vmem:[%s7867_s1 + $0x18] sm:$0xff]  ;;  %v5099_v61 = vld [vmem:[%s7867_s1 + $0x8] sm:$0xff] }
 0x608   :  { %8212 = vst [vmem:[#allocation76_spill] sm:$0xff] %v5045_v19 }
 0x609   :  { %8213 = vst [vmem:[#allocation77_spill] sm:$0xff] %v5053_v16 }
 0x617   :  { %v575_v7 = vpop.permute.xlu0 %574 }
 0x618   :  { %v5071_v19 = vadd.f32 %v575_v7, %v567_v30  ;;  %v160_v7 = vld [vmem:[%s7872_s5] sm:$0xf] }
 0x619   :  { %v5203_v30 = vperm.slane %v160_v7, 0 }
 0x61a   :  { %3589 = vtanh.f32 %v5071_v19 }
 0x61f   :  { %v586_v23 = vpop.permute.xlu0 %585 }
 0x620   :  { %v3590_v26 = vpop.eup %3589  ;;  %3441 = vmatmul.msk.f32.vlgmr.msrb.gmra.mxu2 %vm30_vm5, %v586_v23  ;;  %v589_v16 = vsel %vm30_vm5, %v4459_v5, %v586_v23  ;;  %3442 = vmatmul.msk.f32.vlgmr.msrb.gmra.mxu0 %vm30_vm5, %v586_v23  ;;  %v5090_v5 = vld [vmem:[%s7867_s1 + $0x10] sm:$0xff] }
 0x621   :  { %617 = vmatmul.f32.vlgmr.msrb.gmra.mxu1 %v589_v16  ;;  %657 = vmatmul.f32.vlgmr.msra.gmra.mxu3 %v589_v16 }
 0x622   :  { %580 = vrot.lane.b32.xlu2 %v3590_v26, %s4186_s13  ;;  %844 = vmatpush.msrb.mxu0 %v5082_v13 }
 0x623   :  { %903 = vmatpush.msrb.mxu2 %v4257_v31  ;;  %1030 = vmatpush.msrb.mxu1 %v4506_v2  ;;  %v5110_v31 = vld [vmem:[%s7867_s1] sm:$0xff]  ;;  %v8240_v2 = vld [vmem:[#allocation25_spill] sm:$0xff] }
 0x624   :  { %845 = vmatpush.msrb.mxu0 %v5090_v5  ;;  %1002 = vmatpush.msra.mxu3 %v4490_v0  ;;  %v8237_v0 = vld [vmem:[#allocation23_spill] sm:$0xff] }
 0x625   :  { %904 = vmatpush.msrb.mxu2 %v4267_v33  ;;  %1031 = vmatpush.msrb.mxu1 %v4518_v8  ;;  %v8215_v33 = vld [vmem:[#allocation13_spill] sm:$0xff]  ;;  %v8242_v8 = vld [vmem:[#allocation68_spill] sm:$0xff] }
 0x626   :  { %846 = vmatpush.msrb.mxu0 %v5099_v61  ;;  %1003 = vmatpush.msra.mxu3 %v4495_v3  ;;  %v8238_v3 = vld [vmem:[#allocation76_spill] sm:$0xff] }
 0x627   :  { %905 = vmatpush.msrb.mxu2 %v4279_v35  ;;  %1032 = vmatpush.msrb.mxu1 %v4534_v12  ;;  %v8217_v35 = vld [vmem:[#allocation30_spill] sm:$0xff]  ;;  %v8245_v12 = vld [vmem:[#allocation29_spill] sm:$0xff] }
 0x628   :  { %697 = vmatmul.f32.vlgmr.msra.gmra.mxu2 %v589_v16  ;;  %3443 = vmatmul.msk.f32.vlgmr.msra.gmra.mxu0 %vm30_vm5, %v586_v23 }
 0x629   :  { %737 = vmatmul.f32.vlgmr.msra.gmra.mxu1 %v589_v16  ;;  %3444 = vmatmul.msk.f32.vlgmr.msrb.gmra.mxu3 %vm30_vm5, %v586_v23  ;;  %v8247_v16 = vld [vmem:[#allocation43_spill] sm:$0xff] }
 0x62a   :  { %847 = vmatpush.msrb.mxu0 %v5110_v31  ;;  %906 = vmatpush.msrb.mxu2 %v4293_v37  ;;  %v8219_v37 = vld [vmem:[#allocation28_spill] sm:$0xff] }
 0x62b   :  { %1004 = vmatpush.msra.mxu3 %v4501_v4  ;;  %1033 = vmatpush.msrb.mxu1 %v4552_v29  ;;  %v8239_v4 = vld [vmem:[#allocation64_spill] sm:$0xff] }
 0x62c   :  { %923 = vmatpush.msra.mxu0 %v4262_v32  ;;  %907 = vmatpush.msrb.mxu2 %v4307_v39  ;;  %v8214_v32 = vld [vmem:[#allocation8_spill] sm:$0xff]  ;;  %v8221_v39 = vld [vmem:[#allocation15_spill] sm:$0xff] }
 0x62d   :  { %1005 = vmatpush.msra.mxu3 %v4523_v10  ;;  %1034 = vmatpush.msrb.mxu1 %v4570_v18  ;;  %v8243_v10 = vld [vmem:[#allocation27_spill] sm:$0xff]  ;;  %8249 = vst [vmem:[#allocation8_spill] sm:$0xff] %v5203_v30 }
 0x62e   :  { %924 = vmatpush.msra.mxu0 %v4274_v34  ;;  %908 = vmatpush.msrb.mxu2 %v4321_v41  ;;  %v8216_v34 = vld [vmem:[#allocation26_spill] sm:$0xff]  ;;  %v8223_v41 = vld [vmem:[#allocation44_spill] sm:$0xff] }
 0x62f   :  { %1006 = vmatpush.msra.mxu3 %v4546_v15  ;;  %1035 = vmatpush.msrb.mxu1 %v4588_v21 }
 0x630   :  { %925 = vmatpush.msra.mxu0 %v4284_v36  ;;  %909 = vmatpush.msrb.mxu2 %v4335_v43  ;;  %v8218_v36 = vld [vmem:[#allocation14_spill] sm:$0xff]  ;;  %v8225_v43 = vld [vmem:[#allocation61_spill] sm:$0xff] }
 0x631   :  { %1007 = vmatpush.msra.mxu3 %v4564_v17  ;;  %1036 = vmatpush.msrb.mxu1 %v4606_v25  ;;  %v8248_v17 = vld [vmem:[#allocation12_spill] sm:$0xff] }
 0x632   :  { %926 = vmatpush.msra.mxu0 %v4298_v38  ;;  %910 = vmatpush.msrb.mxu2 %v4357_v48  ;;  %v8220_v38 = vld [vmem:[#allocation34_spill] sm:$0xff]  ;;  %v8227_v48 = vld [vmem:[#allocation17_spill] sm:$0xff] }
 0x633   :  { %1008 = vmatpush.msra.mxu3 %v4582_v20  ;;  %1037 = vmatpush.msrb.mxu1 %v4624_v28 }
 0x634   :  { %927 = vmatpush.msra.mxu0 %v4312_v40  ;;  %911 = vmatpush.msrb.mxu2 %v4369_v50  ;;  %v8222_v40 = vld [vmem:[#allocation31_spill] sm:$0xff]  ;;  %v8229_v50 = vld [vmem:[#allocation52_spill] sm:$0xff] }
 0x635   :  { %1009 = vmatpush.msra.mxu3 %v4600_v24  ;;  %1082 = vmatpush.msra.mxu1 %v4636_v45 }
 0x636   :  { %928 = vmatpush.msra.mxu0 %v4326_v42  ;;  %912 = vmatpush.msrb.mxu2 %v4379_v52  ;;  %v8224_v42 = vld [vmem:[#allocation16_spill] sm:$0xff]  ;;  %v8231_v52 = vld [vmem:[#allocation69_spill] sm:$0xff] }
 0x637   :  { %1010 = vmatpush.msra.mxu3 %v4618_v27  ;;  %1083 = vmatpush.msra.mxu1 %v4665_v60 }
 0x638   :  { %929 = vmatpush.msra.mxu0 %v4340_v44  ;;  %913 = vmatpush.msrb.mxu2 %v4393_v54  ;;  %v8226_v44 = vld [vmem:[#allocation48_spill] sm:$0xff]  ;;  %v8233_v54 = vld [vmem:[#allocation22_spill] sm:$0xff] }
 0x639   :  { %1011 = vmatpush.msra.mxu3 %v4646_v47  ;;  %1084 = vmatpush.msra.mxu1 %v4688_v46 }
 0x63a   :  { %930 = vmatpush.msra.mxu0 %v4362_v49  ;;  %914 = vmatpush.msrb.mxu2 %v4411_v56  ;;  %v8228_v49 = vld [vmem:[#allocation65_spill] sm:$0xff]  ;;  %v8235_v56 = vld [vmem:[#allocation60_spill] sm:$0xff] }
 0x63b   :  { %1012 = vmatpush.msra.mxu3 %v4670_v62  ;;  %1085 = vmatpush.msra.mxu1 %v4709_v58 }
 0x63c   :  { %931 = vmatpush.msra.mxu0 %v4374_v51  ;;  %1042 = vmatpush.msra.mxu2 %v4513_v6  ;;  %v8230_v51 = vld [vmem:[#allocation20_spill] sm:$0xff]  ;;  %v8241_v6 = vld [vmem:[#allocation77_spill] sm:$0xff] }
 0x63d   :  { %1013 = vmatpush.msra.mxu3 %v4694_v63  ;;  %1086 = vmatpush.msra.mxu1 %v4730_v9  ;;  %v8236_v63 = vld [vmem:[#allocation11_spill] sm:$0xff] }
 0x63e   :  { %932 = vmatpush.msra.mxu0 %v4384_v53  ;;  %1043 = vmatpush.msra.mxu2 %v4529_v11  ;;  %v8232_v53 = vld [vmem:[#allocation56_spill] sm:$0xff]  ;;  %v3440_v23 = vmul.f32 -1.442695, %v8236_v63 }
 0x63f   :  { %1014 = vmatpush.msra.mxu3 %v4715_v22  ;;  %1087 = vmatpush.msra.mxu1 %v4749_v59  ;;  %v8244_v11 = vld [vmem:[#allocation72_spill] sm:$0xff] }
 0x640   :  { %933 = vmatpush.msra.mxu0 %v4398_v55  ;;  %1044 = vmatpush.msra.mxu2 %v4541_v14  ;;  %v8234_v55 = vld [vmem:[#allocation73_spill] sm:$0xff]  ;;  %3591 = vpow2.f32 %v3440_v23 }
 0x641   :  { %1015 = vmatpush.msra.mxu3 %v8216_v34  ;;  %1088 = vmatpush.msra.mxu1 %v8217_v35  ;;  %v8246_v14 = vld [vmem:[#allocation33_spill] sm:$0xff] }
 0x642   :  { %934 = vmatpush.msra.mxu0 %v8214_v32  ;;  %1045 = vmatpush.msra.mxu2 %v8215_v33  ;;  %v5205_v32 = vperm.slane %v160_v7, 1 }
 0x643   :  { %1016 = vmatpush.msra.mxu3 %v8219_v37  ;;  %1089 = vmatpush.msra.mxu1 %v8220_v38 }
 0x644   :  { %1046 = vmatpush.msra.mxu2 %v8218_v36  ;;  %8250 = vst [vmem:[#allocation13_spill] sm:$0xff] %v5205_v32 }
 0x645   :  { %1017 = vmatpush.msra.mxu3 %v8222_v40  ;;  %1090 = vmatpush.msra.mxu1 %v8223_v41 }
 0x646   :  { %1047 = vmatpush.msra.mxu2 %v8221_v39  ;;  %v3592_v15 = vpop.eup %3591 }
 0x647   :  { %1110 = vmatpush.msrb.mxu3 %v8225_v43  ;;  %1091 = vmatpush.msra.mxu1 %v8226_v44  ;;  %v535_v20 = vadd.f32 1.0, %v3592_v15 }
 0x648   :  { %1048 = vmatpush.msra.mxu2 %v8224_v42 }
 0x649   :  { %1111 = vmatpush.msrb.mxu3 %v8228_v49  ;;  %1092 = vmatpush.msra.mxu1 %v8229_v50  ;;  %3593 = vrcp.f32 %v535_v20  ;;  %v562_v28 = vand.u32 2147483648, %v535_v20  ;;  %vm556_vm15 = vweird.f32 %v535_v20  ;;  %v560_v45 = vand.u32 2147483647, %v535_v20 }
 0x64a   :  { %1049 = vmatpush.msra.mxu2 %v8227_v48 }
 0x64b   :  { %1112 = vmatpush.msrb.mxu3 %v8231_v52  ;;  %1093 = vmatpush.msra.mxu1 %v8232_v53  ;;  %v563_v47 = vor.u32 1.1754944e-38, %v562_v28  ;;  %vm561_vm2 = vcmp.eq.f32.partialorder %v560_v45, 8.507059e+37 }
 0x64c   :  { %1050 = vmatpush.msra.mxu2 %v8230_v51 }
 0x64d   :  { %1113 = vmatpush.msrb.mxu3 %v8234_v55  ;;  %1094 = vmatpush.msra.mxu1 %v8235_v56 }
 0x64e   :  { %1051 = vmatpush.msra.mxu2 %v8233_v54  ;;  %v5209_v54 = vperm.slane %v160_v7, 2 }
 0x64f   :  { %1114 = vmatpush.msrb.mxu3 %v8238_v3  ;;  %1095 = vmatpush.msra.mxu1 %v8239_v4  ;;  %v3594_v21 = vpop.eup %3593 }
 0x650   :  { %1052 = vmatpush.msra.mxu2 %v8237_v0  ;;  %v552_v22 = vmul.f32 %v3594_v21, %v535_v20  ;;  %vm557_vm14 = vweird.f32 %v3594_v21  ;;  %8251 = vst [vmem:[#allocation26_spill] sm:$0xff] %v5209_v54 }
 0x651   :  { %1115 = vmatpush.msrb.mxu3 %v8241_v6  ;;  %1096 = vmatpush.msra.mxu1 %v8242_v8  ;;  %vm558_vm1 = vmor %vm556_vm15, %vm557_vm14 }
 0x652   :  { %1053 = vmatpush.msra.mxu2 %v8240_v2  ;;  %v553_v24 = vsub.f32 1.0, %v552_v22 }
 0x653   :  { %1116 = vmatpush.msrb.mxu3 %v5059_v1  ;;  %1097 = vmatpush.msra.mxu1 %v8244_v11 }
 0x654   :  { %1054 = vmatpush.msra.mxu2 %v8243_v10  ;;  %v554_v25 = vmul.f32 %v3594_v21, %v553_v24 }
 0x655   :  { %1117 = vmatpush.msrb.mxu3 %v5065_v57 }
 0x656   :  { %1055 = vmatpush.msra.mxu2 %v8245_v12  ;;  %v555_v27 = vadd.f32 %v3594_v21, %v554_v25 }
 0x658   :  { %1056 = vmatpush.msra.mxu2 %v8246_v14  ;;  %v559_v46 = vsel %vm558_vm1, %v3594_v21, %v555_v27 }
 0x659   :  { %v476_v29 = vpop.permute.xlu1 %475  ;;  %v564_v58 = vsel %vm561_vm2, %v563_v47, %v559_v46 }
 0x65a   :  { %1057 = vmatpush.msra.mxu2 %v8247_v16  ;;  %v478_v18 = vmul.f32 %v476_v29, %v8248_v17 }
 0x65c   :  { %828 = vrot.lane.b32.xlu1 %v478_v18, %s4186_s13  ;;  %v5212_v18 = vperm.slane %v160_v7, 3 }
 0x65e   :  { %8252 = vst [vmem:[#allocation30_spill] sm:$0xff] %v5212_v18 }
 0x67c   :  { %v581_v60 = vpop.permute.xlu2 %580 }
 0x67d   :  { %v5196_v62 = vmul.f32 %v581_v60, %v564_v58 }
 0x67f   :  { %892 = vrot.lane.b32.xlu2 %v5196_v62, %s4185_s7 }
 0x69d   :  { %v678_v33 = vpop.f32.mrf.mxu0 }
 0x69e   :  { %v618_v26 = vpop.f32.mrf.mxu1 }
 0x69f   :  { %v619_v34 = vadd.f32 %v618_v26, %v5203_v30 }
 0x6a3   :  { %v638_v36 = vpop.f32.mrf.mxu2 }
 0x6a4   :  { %v639_v37 = vadd.f32 %v638_v36, %v619_v34  ;;  %v658_v39 = vpop.f32.mrf.mxu3 }
 0x6a5   :  { %v659_v42 = vadd.f32 %v658_v39, %v5205_v32  ;;  %v718_v0 = vpop.f32.mrf.mxu0 }
 0x6a6   :  { %v3445_v48 = vmul.f32 -1.442695, %v639_v37  ;;  %v738_v20 = vpop.f32.mrf.mxu1 }
 0x6a7   :  { %v679_v51 = vadd.f32 %v678_v33, %v659_v42  ;;  %v739_v27 = vadd.f32 %v738_v20, %v5212_v18 }
 0x6a8   :  { %3595 = vpow2.f32 %v3445_v48 }
 0x6a9   :  { %v3446_v63 = vmul.f32 -1.442695, %v679_v51 }
 0x6ab   :  { %3597 = vpow2.f32 %v3446_v63  ;;  %v698_v23 = vpop.f32.mrf.mxu2 }
 0x6ac   :  { %v699_v2 = vadd.f32 %v698_v23, %v5209_v54  ;;  %v758_v22 = vpop.f32.mrf.mxu3 }
 0x6ad   :  { %v759_v47 = vadd.f32 %v758_v22, %v739_v27 }
 0x6ae   :  { %v3596_v10 = vpop.eup %3595  ;;  %v719_v12 = vadd.f32 %v718_v0, %v699_v2 }
 0x6af   :  { %v770_v14 = vadd.f32 1.0, %v3596_v10 }
 0x6b0   :  { %v3447_v15 = vmul.f32 -1.442695, %v719_v12 }
 0x6b1   :  { %v3598_v29 = vpop.eup %3597  ;;  %3599 = vrcp.f32 %v770_v14  ;;  %v784_v26 = vand.u32 2147483648, %v770_v14  ;;  %v782_v34 = vand.u32 2147483647, %v770_v14  ;;  %vm778_vm4 = vweird.f32 %v770_v14 }
 0x6b2   :  { %v771_v17 = vadd.f32 1.0, %v3598_v29  ;;  %3601 = vpow2.f32 %v3447_v15 }
 0x6b3   :  { %v785_v48 = vor.u32 1.1754944e-38, %v784_v26  ;;  %vm783_vm10 = vcmp.eq.f32.partialorder %v782_v34, 8.507059e+37  ;;  %v8253_v26 = vld [vmem:[#allocation18_spill] sm:$0xff]  ;;  %v8256_v34 = vld [vmem:[#allocation41_spill] sm:$0xff] }
 0x6b4   :  { %3603 = vrcp.f32 %v771_v17  ;;  %v799_v7 = vand.u32 2147483648, %v771_v17  ;;  %v797_v39 = vand.u32 2147483647, %v771_v17  ;;  %vm793_vm9 = vweird.f32 %v771_v17 }
 0x6b6   :  { %v800_v23 = vor.u32 1.1754944e-38, %v799_v7  ;;  %vm798_vm12 = vcmp.eq.f32.partialorder %v797_v39, 8.507059e+37  ;;  %v8257_v7 = vld [vmem:[#allocation45_spill] sm:$0xff] }
 0x6b7   :  { %v3600_v21 = vpop.eup %3599  ;;  %v8258_v39 = vld [vmem:[#allocation49_spill] sm:$0xff] }
 0x6b8   :  { %v3602_v24 = vpop.eup %3601  ;;  %v774_v25 = vmul.f32 %v3600_v21, %v770_v14  ;;  %vm779_vm3 = vweird.f32 %v3600_v21 }
 0x6b9   :  { %v772_v28 = vadd.f32 1.0, %v3602_v24  ;;  %vm780_vm7 = vmor %vm778_vm4, %vm779_vm3 }
 0x6ba   :  { %v3604_v45 = vpop.eup %3603  ;;  %v775_v46 = vsub.f32 1.0, %v774_v25 }
 0x6bb   :  { %v789_v58 = vmul.f32 %v3604_v45, %v771_v17  ;;  %3605 = vrcp.f32 %v772_v28  ;;  %vm794_vm8 = vweird.f32 %v3604_v45  ;;  %v814_v25 = vand.u32 2147483648, %v772_v28 }
 0x6bc   :  { %v776_v60 = vmul.f32 %v3600_v21, %v775_v46  ;;  %3607 = vtanh.f32 %v759_v47  ;;  %vm795_vm11 = vmor %vm793_vm9, %vm794_vm8  ;;  %vm808_vm14 = vweird.f32 %v772_v28  ;;  %v812_v17 = vand.u32 2147483647, %v772_v28 }
 0x6bd   :  { %v790_v33 = vsub.f32 1.0, %v789_v58  ;;  %v815_v46 = vor.u32 1.1754944e-38, %v814_v25  ;;  %v8274_v25 = vld [vmem:[#allocation75_spill] sm:$0xff] }
 0x6be   :  { %v777_v36 = vadd.f32 %v3600_v21, %v776_v60  ;;  %vm813_vm1 = vcmp.eq.f32.partialorder %v812_v17, 8.507059e+37  ;;  %v8275_v17 = vld [vmem:[#allocation40_spill] sm:$0xff] }
 0x6bf   :  { %v791_v37 = vmul.f32 %v3604_v45, %v790_v33  ;;  %v8254_v33 = vld [vmem:[#allocation19_spill] sm:$0xff] }
 0x6c0   :  { %v781_v42 = vsel %vm780_vm7, %v3600_v21, %v777_v36 }
 0x6c1   :  { %v3606_v51 = vpop.eup %3605  ;;  %v792_v63 = vadd.f32 %v3604_v45, %v791_v37  ;;  %v786_v0 = vsel %vm783_vm10, %v785_v48, %v781_v42  ;;  %v8259_v42 = vld [vmem:[#allocation53_spill] sm:$0xff]  ;;  %v8260_v48 = vld [vmem:[#allocation47_spill] sm:$0xff] }
 0x6c2   :  { %v804_v2 = vmul.f32 %v3606_v51, %v772_v28  ;;  %v3608_v12 = vpop.eup %3607  ;;  %vm809_vm13 = vweird.f32 %v3606_v51  ;;  %v8255_v28 = vld [vmem:[#allocation21_spill] sm:$0xff] }
 0x6c3   :  { %v796_v10 = vsel %vm795_vm11, %v3604_v45, %v792_v63  ;;  %v820_v20 = vmul.f32 %v3608_v12, %v786_v0  ;;  %vm810_vm15 = vmor %vm808_vm14, %vm809_vm13  ;;  %v8262_v63 = vld [vmem:[#allocation51_spill] sm:$0xff]  ;;  %v8267_v12 = vld [vmem:[#allocation36_spill] sm:$0xff] }
 0x6c4   :  { %v801_v15 = vsel %vm798_vm12, %v800_v23, %v796_v10  ;;  %v805_v14 = vsub.f32 1.0, %v804_v2  ;;  %v8263_v23 = vld [vmem:[#allocation32_spill] sm:$0xff]  ;;  %v8264_v0 = vld [vmem:[#allocation55_spill] sm:$0xff] }
 0x6c5   :  { %v819_v29 = vmul.f32 0.0, %v801_v15  ;;  %v8265_v2 = vld [vmem:[#allocation35_spill] sm:$0xff] }
 0x6c6   :  { %v806_v22 = vmul.f32 %v3606_v51, %v805_v14  ;;  %v8266_v10 = vld [vmem:[#allocation59_spill] sm:$0xff]  ;;  %v8269_v14 = vld [vmem:[#allocation37_spill] sm:$0xff] }
 0x6c7   :  { %v5215_v24 = vadd.f32 %v820_v20, %v819_v29  ;;  %v8268_v15 = vld [vmem:[#allocation63_spill] sm:$0xff]  ;;  %v8271_v20 = vld [vmem:[#allocation38_spill] sm:$0xff] }
 0x6c8   :  { %v807_v21 = vadd.f32 %v3606_v51, %v806_v22  ;;  %v8270_v29 = vld [vmem:[#allocation67_spill] sm:$0xff] }
 0x6c9   :  { %3609 = vtanh.f32 %v5215_v24  ;;  %v8272_v22 = vld [vmem:[#allocation71_spill] sm:$0xff] }
 0x6ca   :  { %v811_v27 = vsel %vm810_vm15, %v3606_v51, %v807_v21  ;;  %v8261_v51 = vld [vmem:[#allocation57_spill] sm:$0xff]  ;;  %v8273_v21 = vld [vmem:[#allocation39_spill] sm:$0xff] }
 0x6cb   :  { %v816_v58 = vsel %vm813_vm1, %v815_v46, %v811_v27  ;;  %v8276_v27 = vld [vmem:[#allocation42_spill] sm:$0xff] }
 0x6cc   :  { %v8277_v46 = vld [vmem:[#allocation46_spill] sm:$0xff] }
 0x6ce   :  { %v829_v45 = vpop.permute.xlu1 %828 }
 0x6cf   :  { %v3610_v47 = vpop.eup %3609  ;;  %3449 = vmatmul.msk.f32.vlgmr.msrb.gmra.mxu0 %vm27_vm0, %v829_v45 }
 0x6d0   :  { %v5219_v60 = vmul.f32 %v3610_v47, %v816_v58  ;;  %1070 = vmatpush.msrb.mxu0 %v8253_v26  ;;  %v8279_v47 = vld [vmem:[#allocation54_spill] sm:$0xff] }
 0x6d1   :  { %v8280_v58 = vld [vmem:[#allocation58_spill] sm:$0xff] }
 0x6d2   :  { %824 = vst [vmem:[%s7873_s6] sm:$0xff] %v5219_v60  ;;  %1071 = vmatpush.msrb.mxu0 %v8254_v33  ;;  %v8281_v26 = vld [vmem:[#allocation62_spill] sm:$0xff] }
 0x6d3   :  { %v8282_v33 = vld [vmem:[#allocation66_spill] sm:$0xff] }
 0x6d4   :  { %1072 = vmatpush.msrb.mxu0 %v8255_v28  ;;  %v8283_v28 = vld [vmem:[#allocation70_spill] sm:$0xff] }
 0x6d6   :  { %1073 = vmatpush.msrb.mxu0 %v8256_v34  ;;  %v8284_v34 = vld [vmem:[#allocation74_spill] sm:$0xff] }
 0x6d8   :  { %1074 = vmatpush.msrb.mxu0 %v8257_v7  ;;  %v3448_v7 = vld [vmem:[%s7868_s0 + $0x18] sm:$0xff] }
 0x6d9   :  { %v893_v36 = vpop.permute.xlu2 %892 }
 0x6da   :  { %v895_v37 = vsel %vm27_vm0, %v829_v45, %v893_v36  ;;  %1075 = vmatpush.msrb.mxu0 %v8258_v39  ;;  %v8278_v45 = vld [vmem:[#allocation50_spill] sm:$0xff] }
 0x6db   :  { %3451 = vmatmul.msk.f32.vlgmr.msrb.gmra.mxu2 %vm248_vm6, %v895_v37  ;;  %3452 = vmatmul.msk.f32.vlgmr.msra.gmra.mxu0 %vm248_vm6, %v895_v37 }
 0x6dc   :  { %1076 = vmatpush.msrb.mxu0 %v8259_v42  ;;  %1150 = vmatpush.msrb.mxu2 %v8260_v48  ;;  %v8285_v48 = vld [vmem:[#allocation9_spill] sm:$0xff] }
 0x6de   :  { %1077 = vmatpush.msrb.mxu0 %v8261_v51  ;;  %1151 = vmatpush.msrb.mxu2 %v8262_v63 }
 0x6e0   :  { %1122 = vmatpush.msra.mxu0 %v8263_v23  ;;  %1152 = vmatpush.msrb.mxu2 %v8264_v0 }
 0x6e2   :  { %1123 = vmatpush.msra.mxu0 %v8265_v2  ;;  %1153 = vmatpush.msrb.mxu2 %v8266_v10  ;;  %v8286_v2 = vld [vmem:[#allocation10_spill] sm:$0xff] }
 0x6e4   :  { %1124 = vmatpush.msra.mxu0 %v8267_v12  ;;  %1154 = vmatpush.msrb.mxu2 %v8268_v15 }
 0x6e6   :  { %1125 = vmatpush.msra.mxu0 %v8269_v14  ;;  %1155 = vmatpush.msrb.mxu2 %v8270_v29 }
 0x6e8   :  { %1126 = vmatpush.msra.mxu0 %v8271_v20  ;;  %1156 = vmatpush.msrb.mxu2 %v8272_v22 }
 0x6ea   :  { %1127 = vmatpush.msra.mxu0 %v8273_v21  ;;  %1157 = vmatpush.msrb.mxu2 %v8274_v25 }
 0x6ec   :  { %1128 = vmatpush.msra.mxu0 %v8275_v17 }
 0x6ee   :  { %1129 = vmatpush.msra.mxu0 %v8276_v27 }
 0x6f0   :  { %1130 = vmatpush.msra.mxu0 %v8277_v46 }
 0x6f2   :  { %1131 = vmatpush.msra.mxu0 %v8278_v45 }
 0x6f4   :  { %1132 = vmatpush.msra.mxu0 %v8279_v47 }
 0x6f6   :  { %1133 = vmatpush.msra.mxu0 %v8280_v58 }
 0x6f8   :  { %1134 = vmatpush.msra.mxu0 %v8281_v26 }
 0x6fa   :  { %1135 = vmatpush.msra.mxu0 %v8282_v33 }
 0x6fc   :  { %1136 = vmatpush.msra.mxu0 %v8283_v28 }
 0x6fe   :  { %1137 = vmatpush.msra.mxu0 %v8284_v34 }
 0x74c   :  { %v849_v36 = vpop.f32.mrf.mxu0 }
 0x74d   :  { %v852_v37 = vadd.f32 %v3448_v7, %v849_v36 }
 0x74f   :  { %3611 = vtanh.f32 %v852_v37  ;;  %v3450_v23 = vmul.f32 -1.442695, %v852_v37 }
 0x755   :  { %v3612_v39 = vpop.eup %3611 }
 0x756   :  { %875 = vrot.lane.b32.xlu0 %v3612_v39, %s4185_s7 }
 0x758   :  { %v936_v42 = vpop.f32.mrf.mxu0 }
 0x759   :  { %v5265_v51 = vadd.f32 %v936_v42, %v8285_v48 }
 0x75b   :  { %3613 = vtanh.f32 %v5265_v51 }
 0x75c   :  { %3615 = vpow2.f32 %v3450_v23 }
 0x75e   :  { %v916_v0 = vpop.f32.mrf.mxu2 }
 0x75f   :  { %v917_v10 = vadd.f32 %v916_v0, %v8286_v2 }
 0x761   :  { %v3614_v63 = vpop.eup %3613  ;;  %v3453_v15 = vmul.f32 -1.442695, %v917_v10 }
 0x762   :  { %980 = vrot.lane.b32.xlu1 %v3614_v63, %s4186_s13  ;;  %v3616_v12 = vpop.eup %3615 }
 0x763   :  { %v856_v14 = vadd.f32 1.0, %v3616_v12  ;;  %3617 = vpow2.f32 %v3453_v15 }
 0x765   :  { %3619 = vrcp.f32 %v856_v14  ;;  %v868_v47 = vand.u32 2147483648, %v856_v14  ;;  %vm862_vm3 = vweird.f32 %v856_v14  ;;  %v866_v58 = vand.u32 2147483647, %v856_v14 }
 0x767   :  { %v869_v28 = vor.u32 1.1754944e-38, %v868_v47  ;;  %vm867_vm7 = vcmp.eq.f32.partialorder %v866_v58, 8.507059e+37  ;;  %v5302_v47 = vld [vmem:[%s7871_s4 + $0x2e0] sm:$0xff] }
 0x768   :  { %v5321_v58 = vld [vmem:[%s7871_s4 + $0x2c0] sm:$0xff] }
 0x769   :  { %v3618_v29 = vpop.eup %3617 }
 0x76a   :  { %v945_v22 = vadd.f32 1.0, %v3618_v29 }
 0x76b   :  { %v3620_v20 = vpop.eup %3619 }
 0x76c   :  { %v858_v21 = vmul.f32 %v3620_v20, %v856_v14  ;;  %3621 = vrcp.f32 %v945_v22  ;;  %vm863_vm2 = vweird.f32 %v3620_v20  ;;  %v958_v42 = vand.u32 2147483648, %v945_v22  ;;  %v8287_v14 = vld [vmem:[#allocation24_spill] sm:$0xff] }
 0x76d   :  { %vm864_vm4 = vmor %vm862_vm3, %vm863_vm2  ;;  %vm952_vm9 = vweird.f32 %v945_v22  ;;  %v956_v63 = vand.u32 2147483647, %v945_v22 }
 0x76e   :  { %v859_v25 = vsub.f32 1.0, %v858_v21  ;;  %v959_v0 = vor.u32 1.1754944e-38, %v958_v42  ;;  %v5391_v42 = vld [vmem:[%s7869_s2 + $0x60] sm:$0xff] }
 0x76f   :  { %vm957_vm11 = vcmp.eq.f32.partialorder %v956_v63, 8.507059e+37  ;;  %v5397_v63 = vld [vmem:[%s7871_s4 + $0x260] sm:$0xff] }
 0x770   :  { %v860_v17 = vmul.f32 %v3620_v20, %v859_v25 }
 0x772   :  { %v3622_v27 = vpop.eup %3621  ;;  %v861_v46 = vadd.f32 %v3620_v20, %v860_v17 }
 0x773   :  { %v948_v45 = vmul.f32 %v3622_v27, %v945_v22  ;;  %vm953_vm8 = vweird.f32 %v3622_v27 }
 0x774   :  { %v865_v26 = vsel %vm864_vm4, %v3620_v20, %v861_v46  ;;  %vm954_vm10 = vmor %vm952_vm9, %vm953_vm8 }
 0x775   :  { %v949_v33 = vsub.f32 1.0, %v948_v45  ;;  %v5270_v7 = vsel %vm867_vm7, %v869_v28, %v865_v26  ;;  %v5334_v26 = vld [vmem:[%s7869_s2 + $0x90] sm:$0xff]  ;;  %v5355_v28 = vld [vmem:[%s7869_s2 + $0xb8] sm:$0xff] }
 0x776   :  { %v873_v29 = vmul.f32 %v5270_v7, %v8287_v14  ;;  %v5433_v14 = vld [vmem:[%s7871_s4 + $0x140] sm:$0xff] }
 0x777   :  { %v950_v37 = vmul.f32 %v3622_v27, %v949_v33  ;;  %v5340_v33 = vld [vmem:[%s7871_s4 + $0x2a0] sm:$0xff]  ;;  %8289 = vst [vmem:[#allocation28_spill] sm:$0xff] %v5433_v14 }
 0x779   :  { %v951_v39 = vadd.f32 %v3622_v27, %v950_v37  ;;  %v5379_v37 = vld [vmem:[%s7869_s2 + $0xa8] sm:$0xff] }
 0x77b   :  { %v955_v23 = vsel %vm954_vm10, %v3622_v27, %v951_v39  ;;  %v5385_v39 = vld [vmem:[%s7871_s4 + $0x180] sm:$0xff] }
 0x77c   :  { %v960_v12 = vsel %vm957_vm11, %v959_v0, %v955_v23  ;;  %v5403_v23 = vld [vmem:[%s7869_s2 + $0x98] sm:$0xff]  ;;  %v5409_v0 = vld [vmem:[%s7871_s4 + $0x160] sm:$0xff] }
 0x77d   :  { %v978_v25 = vmul.f32 %v960_v12, %v5071_v19  ;;  %v5296_v19 = vld [vmem:[%s7869_s2 + $0xb0] sm:$0xff]  ;;  %8288 = vst [vmem:[#allocation14_spill] sm:$0xff] %v5409_v0 }
 0x7c8   :  { %v876_v34 = vpop.permute.xlu0 %875 }
 0x7c9   :  { %v878_v36 = vmul.f32 %v876_v34, %v5270_v7  ;;  %v5361_v34 = vld [vmem:[%s7871_s4 + $0x1a0] sm:$0xff] }
 0x7cb   :  { %880 = vrot.lane.b32.xlu2 %v878_v36, %s4185_s7  ;;  %v5373_v36 = vld [vmem:[%s7871_s4 + $0x280] sm:$0xff] }
 0x7d4   :  { %v981_v10 = vpop.permute.xlu1 %980 }
 0x7d5   :  { %v983_v15 = vmul.f32 %v981_v10, %v960_v12  ;;  %v5415_v10 = vld [vmem:[%s7869_s2 + $0x50] sm:$0xff]  ;;  %v5421_v12 = vld [vmem:[%s7871_s4 + $0x240] sm:$0xff] }
 0x7d7   :  { %985 = vrot.lane.b32.xlu0 %v983_v15, %s4186_s13  ;;  %v5427_v15 = vld [vmem:[%s7869_s2 + $0x88] sm:$0xff] }
 0x7df   :  { %996 = vrot.lane.b32.xlu0 %v5219_v60, %s4186_s13 }
 0x825   :  { %v881_v20 = vpop.permute.xlu2 %880 }
 0x826   :  { %v5279_v21 = vadd.f32 %v881_v20, %v873_v29  ;;  %v5439_v29 = vld [vmem:[%s7869_s2 + $0x40] sm:$0xff] }
 0x827   :  { %v5445_v20 = vld [vmem:[%s7871_s4 + $0x220] sm:$0xff] }
 0x828   :  { %3623 = vtanh.f32 %v5279_v21 }
 0x82e   :  { %v3624_v22 = vpop.eup %3623 }
 0x82f   :  { %886 = vrot.lane.b32.xlu1 %v3624_v22, %s4185_s7  ;;  %v5451_v22 = vld [vmem:[%s7869_s2 + $0x78] sm:$0xff] }
 0x849   :  { %v986_v17 = vpop.permute.xlu0 %985 }
 0x84a   :  { %v5284_v27 = vadd.f32 %v986_v17, %v978_v25  ;;  %v5457_v25 = vld [vmem:[%s7871_s4 + $0x120] sm:$0xff]  ;;  %v5463_v17 = vld [vmem:[%s7869_s2 + $0x30] sm:$0xff] }
 0x84b   :  { %8290 = vst [vmem:[#allocation34_spill] sm:$0xff] %v5457_v25 }
 0x84c   :  { %3625 = vtanh.f32 %v5284_v27  ;;  %8291 = vst [vmem:[#allocation15_spill] sm:$0xff] %v5463_v17 }
 0x851   :  { %v997_v46 = vpop.permute.xlu0 %996 }
 0x852   :  { %v3626_v60 = vpop.eup %3625  ;;  %3455 = vmatmul.msk.f32.vlgmr.msrb.gmra.mxu1 %vm30_vm5, %v997_v46  ;;  %3456 = vmatmul.msk.f32.vlgmr.msrb.gmra.mxu0 %vm30_vm5, %v997_v46  ;;  %v999_v45 = vsel %vm30_vm5, %v5196_v62, %v997_v46  ;;  %v5315_v62 = vld [vmem:[%s7869_s2 + $0xa0] sm:$0xff] }
 0x853   :  { %1018 = vmatmul.f32.vlgmr.msra.gmra.mxu3 %v999_v45  ;;  %1058 = vmatmul.f32.vlgmr.msra.gmra.mxu2 %v999_v45 }
 0x854   :  { %991 = vrot.lane.b32.xlu2 %v3626_v60, %s4186_s13  ;;  %1246 = vmatpush.msra.mxu3 %v5082_v13  ;;  %v5309_v13 = vld [vmem:[%s7871_s4 + $0x1e0] sm:$0xff]  ;;  %v5475_v60 = vld [vmem:[%s7869_s2 + $0x68] sm:$0xff] }
 0x855   :  { %1305 = vmatpush.msrb.mxu1 %v5296_v19  ;;  %1432 = vmatpush.msrb.mxu0 %v5302_v47 }
 0x856   :  { %1247 = vmatpush.msra.mxu3 %v5090_v5  ;;  %1404 = vmatpush.msra.mxu2 %v5309_v13  ;;  %v5328_v5 = vld [vmem:[%s7871_s4 + $0x1c0] sm:$0xff] }
 0x857   :  { %1306 = vmatpush.msrb.mxu1 %v5315_v62  ;;  %1433 = vmatpush.msrb.mxu0 %v5321_v58 }
 0x858   :  { %1248 = vmatpush.msra.mxu3 %v5099_v61  ;;  %1405 = vmatpush.msra.mxu2 %v5328_v5  ;;  %v5349_v61 = vld [vmem:[%s7869_s2 + $0x80] sm:$0xff] }
 0x859   :  { %1307 = vmatpush.msrb.mxu1 %v5334_v26  ;;  %1434 = vmatpush.msrb.mxu0 %v5340_v33 }
 0x85a   :  { %1098 = vmatmul.f32.vlgmr.msra.gmra.mxu1 %v999_v45  ;;  %1138 = vmatmul.f32.vlgmr.msra.gmra.mxu0 %v999_v45  ;;  %v5481_v45 = vld [vmem:[%s7871_s4 + $0x100] sm:$0xff] }
 0x85b   :  { %3457 = vmatmul.msk.f32.vlgmr.msrb.gmra.mxu3 %vm30_vm5, %v997_v46  ;;  %3458 = vmatmul.msk.f32.vlgmr.msrb.gmra.mxu2 %vm30_vm5, %v997_v46  ;;  %v5469_v46 = vld [vmem:[%s7871_s4 + $0x200] sm:$0xff]  ;;  %8293 = vst [vmem:[#allocation44_spill] sm:$0xff] %v5481_v45 }
 0x85c   :  { %1249 = vmatpush.msra.mxu3 %v5110_v31  ;;  %1308 = vmatpush.msrb.mxu1 %v5349_v61  ;;  %v5367_v31 = vld [vmem:[%s7869_s2 + $0x70] sm:$0xff]  ;;  %8292 = vst [vmem:[#allocation31_spill] sm:$0xff] %v5469_v46 }
 0x85d   :  { %1406 = vmatpush.msra.mxu2 %v5361_v34  ;;  %1435 = vmatpush.msrb.mxu0 %v5373_v36 }
 0x85e   :  { %1325 = vmatpush.msrb.mxu3 %v5355_v28  ;;  %1309 = vmatpush.msrb.mxu1 %v5367_v31 }
 0x85f   :  { %1407 = vmatpush.msra.mxu2 %v5385_v39  ;;  %1436 = vmatpush.msrb.mxu0 %v5397_v63 }
 0x860   :  { %1326 = vmatpush.msrb.mxu3 %v5379_v37  ;;  %1310 = vmatpush.msrb.mxu1 %v5391_v42 }
 0x861   :  { %1408 = vmatpush.msra.mxu2 %v5409_v0  ;;  %1437 = vmatpush.msrb.mxu0 %v5421_v12  ;;  %v5523_v0 = vld [vmem:[%s7869_s2 + $0x48] sm:$0xff] }
 0x862   :  { %1327 = vmatpush.msrb.mxu3 %v5403_v23  ;;  %1311 = vmatpush.msrb.mxu1 %v5415_v10 }
 0x863   :  { %1409 = vmatpush.msra.mxu2 %v5433_v14  ;;  %1438 = vmatpush.msrb.mxu0 %v5445_v20  ;;  %v5493_v14 = vld [vmem:[%s7871_s4 + $0x1f0] sm:$0xff] }
 0x864   :  { %1328 = vmatpush.msrb.mxu3 %v5427_v15  ;;  %1312 = vmatpush.msrb.mxu1 %v5439_v29  ;;  %8295 = vst [vmem:[#allocation61_spill] sm:$0xff] %v5493_v14 }
 0x865   :  { %1410 = vmatpush.msra.mxu2 %v5457_v25  ;;  %1439 = vmatpush.msrb.mxu0 %v5469_v46  ;;  %v5487_v25 = vld [vmem:[%s7869_s2 + $0x20] sm:$0xff]  ;;  %v5499_v46 = vld [vmem:[%s7869_s2 + $0x58] sm:$0xff] }
 0x866   :  { %1329 = vmatpush.msrb.mxu3 %v5451_v22  ;;  %1313 = vmatpush.msrb.mxu1 %v5463_v17  ;;  %8294 = vst [vmem:[#allocation16_spill] sm:$0xff] %v5487_v25  ;;  %v5547_v17 = vld [vmem:[%s7869_s2 + $0x38] sm:$0xff] }
 0x867   :  { %1411 = vmatpush.msra.mxu2 %v5481_v45  ;;  %1484 = vmatpush.msra.mxu0 %v5493_v14  ;;  %v5505_v45 = vld [vmem:[%s7871_s4 + $0xe0] sm:$0xff]  ;;  %v5517_v14 = vld [vmem:[%s7871_s4 + $0x1d0] sm:$0xff]  ;;  %8302 = vst [vmem:[#allocation56_spill] sm:$0xff] %v5547_v17 }
 0x868   :  { %1330 = vmatpush.msrb.mxu3 %v5475_v60  ;;  %1314 = vmatpush.msrb.mxu1 %v5487_v25  ;;  %8296 = vst [vmem:[#allocation48_spill] sm:$0xff] %v5505_v45  ;;  %v5511_v25 = vld [vmem:[%s7869_s2 + $0x10] sm:$0xff] }
 0x869   :  { %1412 = vmatpush.msra.mxu2 %v5505_v45  ;;  %8297 = vst [vmem:[#allocation17_spill] sm:$0xff] %v5511_v25  ;;  %1485 = vmatpush.msra.mxu0 %v5517_v14  ;;  %v5529_v45 = vld [vmem:[%s7871_s4 + $0xc0] sm:$0xff] }
 0x86a   :  { %1331 = vmatpush.msrb.mxu3 %v5499_v46  ;;  %1315 = vmatpush.msrb.mxu1 %v5511_v25  ;;  %8298 = vst [vmem:[#allocation65_spill] sm:$0xff] %v5517_v14  ;;  %v5535_v25 = vld [vmem:[%s7869_s2] sm:$0xff]  ;;  %v5541_v14 = vld [vmem:[%s7871_s4 + $0x1b0] sm:$0xff] }
 0x86b   :  { %8299 = vst [vmem:[#allocation52_spill] sm:$0xff] %v5529_v45  ;;  %1413 = vmatpush.msra.mxu2 %v5529_v45  ;;  %1486 = vmatpush.msra.mxu0 %v5541_v14  ;;  %v5553_v45 = vld [vmem:[%s7871_s4 + $0x1e8] sm:$0xff] }
 0x86c   :  { %1332 = vmatpush.msrb.mxu3 %v5523_v0  ;;  %8300 = vst [vmem:[#allocation20_spill] sm:$0xff] %v5535_v25  ;;  %1316 = vmatpush.msrb.mxu1 %v5535_v25  ;;  %v5559_v25 = vld [vmem:[%s7871_s4 + $0xa0] sm:$0xff] }
 0x86d   :  { %8301 = vst [vmem:[#allocation69_spill] sm:$0xff] %v5541_v14  ;;  %1414 = vmatpush.msra.mxu2 %v5559_v25  ;;  %v5565_v14 = vld [vmem:[%s7871_s4 + $0x190] sm:$0xff] }
 0x86e   :  { %1333 = vmatpush.msrb.mxu3 %v5547_v17  ;;  %8303 = vst [vmem:[#allocation22_spill] sm:$0xff] %v5553_v45  ;;  %1444 = vmatpush.msra.mxu1 %v5553_v45  ;;  %v5571_v17 = vld [vmem:[%s7869_s2 + $0x28] sm:$0xff] }
 0x86f   :  { %8304 = vst [vmem:[#allocation73_spill] sm:$0xff] %v5559_v25  ;;  %1487 = vmatpush.msra.mxu0 %v5565_v14  ;;  %v5577_v45 = vld [vmem:[%s7871_s4 + $0x1c8] sm:$0xff]  ;;  %v5583_v25 = vld [vmem:[%s7871_s4 + $0x80] sm:$0xff] }
 0x870   :  { %8305 = vst [vmem:[#allocation60_spill] sm:$0xff] %v5565_v14  ;;  %1334 = vmatpush.msrb.mxu3 %v5571_v17  ;;  %1445 = vmatpush.msra.mxu1 %v5577_v45  ;;  %v5590_v14 = vld [vmem:[%s7869_s2 + $0x18] sm:$0xff] }
 0x871   :  { %8306 = vst [vmem:[#allocation11_spill] sm:$0xff] %v5577_v45  ;;  %1415 = vmatpush.msra.mxu2 %v5583_v25  ;;  %1488 = vmatpush.msra.mxu0 %v4730_v9  ;;  %v5596_v45 = vld [vmem:[%s7871_s4 + $0x1a8] sm:$0xff] }
 0x872   :  { %8307 = vst [vmem:[#allocation23_spill] sm:$0xff] %v5583_v25  ;;  %1335 = vmatpush.msrb.mxu3 %v5590_v14  ;;  %1446 = vmatpush.msra.mxu1 %v5596_v45  ;;  %v5602_v25 = vld [vmem:[%s7871_s4 + $0x60] sm:$0xff]  ;;  %v5609_v9 = vld [vmem:[%s7869_s2 + $0x8] sm:$0xff] }
 0x873   :  { %8308 = vst [vmem:[#allocation76_spill] sm:$0xff] %v5596_v45  ;;  %1416 = vmatpush.msra.mxu2 %v5602_v25  ;;  %1489 = vmatpush.msra.mxu0 %v4749_v59  ;;  %v5615_v45 = vld [vmem:[%s7871_s4 + $0x188] sm:$0xff] }
 0x874   :  { %8309 = vst [vmem:[#allocation64_spill] sm:$0xff] %v5602_v25  ;;  %1336 = vmatpush.msrb.mxu3 %v5609_v9  ;;  %1447 = vmatpush.msra.mxu1 %v5615_v45  ;;  %v5621_v25 = vld [vmem:[%s7871_s4 + $0x40] sm:$0xff]  ;;  %v5628_v59 = vld [vmem:[%s7871_s4 + $0x168] sm:$0xff] }
 0x875   :  { %8310 = vst [vmem:[#allocation25_spill] sm:$0xff] %v5615_v45  ;;  %1417 = vmatpush.msra.mxu2 %v5621_v25  ;;  %1490 = vmatpush.msra.mxu0 %v8217_v35  ;;  %v5634_v45 = vld [vmem:[%s7871_s4 + $0x20] sm:$0xff]  ;;  %v5641_v35 = vld [vmem:[%s7871_s4 + $0x148] sm:$0xff] }
 0x876   :  { %8311 = vst [vmem:[#allocation77_spill] sm:$0xff] %v5621_v25  ;;  %1448 = vmatpush.msra.mxu1 %v5628_v59  ;;  %v5649_v25 = vld [vmem:[%s7871_s4 + $0x128] sm:$0xff] }
 0x877   :  { %8312 = vst [vmem:[#allocation68_spill] sm:$0xff] %v5634_v45  ;;  %1418 = vmatpush.msra.mxu2 %v5634_v45  ;;  %1491 = vmatpush.msra.mxu0 %v8220_v38  ;;  %v5657_v38 = vld [vmem:[%s7871_s4 + $0x108] sm:$0xff] }
 0x878   :  { %1449 = vmatpush.msra.mxu1 %v5641_v35  ;;  %8313 = vst [vmem:[#allocation27_spill] sm:$0xff] %v5649_v25 }
 0x879   :  { %1419 = vmatpush.msra.mxu2 %v8222_v40  ;;  %1492 = vmatpush.msra.mxu0 %v8223_v41  ;;  %8314 = vst [vmem:[#allocation72_spill] sm:$0xff] %v5657_v38  ;;  %v5665_v40 = vld [vmem:[%s7871_s4 + $0xe8] sm:$0xff] }
 0x87a   :  { %1450 = vmatpush.msra.mxu1 %v5649_v25  ;;  %8315 = vst [vmem:[#allocation29_spill] sm:$0xff] %v5665_v40  ;;  %v5673_v41 = vld [vmem:[%s7871_s4 + $0xc8] sm:$0xff] }
 0x87b   :  { %1512 = vmatpush.msrb.mxu2 %v8225_v43  ;;  %1493 = vmatpush.msra.mxu0 %v8226_v44  ;;  %8316 = vst [vmem:[#allocation33_spill] sm:$0xff] %v5673_v41  ;;  %v3454_v43 = vmul.f32 -1.442695, %v5265_v51  ;;  %v5682_v44 = vld [vmem:[%s7871_s4 + $0xa8] sm:$0xff] }
 0x87c   :  { %1451 = vmatpush.msra.mxu1 %v5657_v38  ;;  %8317 = vst [vmem:[#allocation43_spill] sm:$0xff] %v5682_v44 }
 0x87d   :  { %1513 = vmatpush.msrb.mxu2 %v8228_v49  ;;  %1494 = vmatpush.msra.mxu0 %v8229_v50  ;;  %v5690_v49 = vld [vmem:[%s7871_s4 + $0x88] sm:$0xff]  ;;  %3627 = vpow2.f32 %v3454_v43 }
 0x87e   :  { %1452 = vmatpush.msra.mxu1 %v5665_v40  ;;  %8318 = vst [vmem:[#allocation12_spill] sm:$0xff] %v5690_v49  ;;  %v5698_v50 = vld [vmem:[%s7871_s4 + $0x68] sm:$0xff] }
 0x87f   :  { %1514 = vmatpush.msrb.mxu2 %v8231_v52  ;;  %1495 = vmatpush.msra.mxu0 %v8232_v53  ;;  %8319 = vst [vmem:[#allocation18_spill] sm:$0xff] %v5698_v50  ;;  %v5706_v52 = vld [vmem:[%s7871_s4 + $0x48] sm:$0xff] }
 0x880   :  { %1453 = vmatpush.msra.mxu1 %v5673_v41  ;;  %8320 = vst [vmem:[#allocation19_spill] sm:$0xff] %v5706_v52  ;;  %v5713_v53 = vld [vmem:[%s7871_s4 + $0x28] sm:$0xff] }
 0x881   :  { %1515 = vmatpush.msrb.mxu2 %v8234_v55  ;;  %1496 = vmatpush.msra.mxu0 %v8235_v56  ;;  %8321 = vst [vmem:[#allocation21_spill] sm:$0xff] %v5713_v53 }
 0x882   :  { %1454 = vmatpush.msra.mxu1 %v5682_v44 }
 0x883   :  { %1516 = vmatpush.msrb.mxu2 %v8238_v3  ;;  %1497 = vmatpush.msra.mxu0 %v8239_v4  ;;  %v3628_v55 = vpop.eup %3627 }
 0x884   :  { %1455 = vmatpush.msra.mxu1 %v5690_v49 }
 0x885   :  { %1517 = vmatpush.msrb.mxu2 %v8241_v6  ;;  %1498 = vmatpush.msra.mxu0 %v8242_v8 }
 0x886   :  { %1456 = vmatpush.msra.mxu1 %v5698_v50 }
 0x887   :  { %1518 = vmatpush.msrb.mxu2 %v5059_v1  ;;  %1499 = vmatpush.msra.mxu0 %v8244_v11  ;;  %v946_v1 = vadd.f32 1.0, %v3628_v55 }
 0x888   :  { %1457 = vmatpush.msra.mxu1 %v5706_v52 }
 0x889   :  { %1519 = vmatpush.msrb.mxu2 %v5065_v57  ;;  %3629 = vrcp.f32 %v946_v1  ;;  %v973_v51 = vand.u32 2147483648, %v946_v1  ;;  %vm967_vm13 = vweird.f32 %v946_v1  ;;  %v971_v43 = vand.u32 2147483647, %v946_v1 }
 0x88a   :  { %1458 = vmatpush.msra.mxu1 %v5713_v53 }
 0x88b   :  { %v974_v52 = vor.u32 1.1754944e-38, %v973_v51  ;;  %vm972_vm15 = vcmp.eq.f32.partialorder %v971_v43, 8.507059e+37 }
 0x88c   :  { %1459 = vmatpush.msra.mxu1 %v8247_v16 }
 0x88f   :  { %v3630_v56 = vpop.eup %3629 }
 0x890   :  { %v963_v3 = vmul.f32 %v3630_v56, %v946_v1  ;;  %vm968_vm12 = vweird.f32 %v3630_v56 }
 0x891   :  { %vm969_vm14 = vmor %vm967_vm13, %vm968_vm12 }
 0x892   :  { %v964_v4 = vsub.f32 1.0, %v963_v3 }
 0x894   :  { %v965_v11 = vmul.f32 %v3630_v56, %v964_v4 }
 0x896   :  { %v966_v57 = vadd.f32 %v3630_v56, %v965_v11 }
 0x898   :  { %v970_v53 = vsel %vm969_vm14, %v3630_v56, %v966_v57 }
 0x899   :  { %v975_v16 = vsel %vm972_vm15, %v974_v52, %v970_v53 }
 0x8a1   :  { %v887_v6 = vpop.permute.xlu1 %886 }
 0x8a2   :  { %v889_v8 = vmul.f32 %v887_v6, %v5270_v7 }
 0x8a4   :  { %1230 = vrot.lane.b32.xlu1 %v889_v8, %s4186_s13 }
 0x8ae   :  { %v992_v55 = vpop.permute.xlu2 %991 }
 0x8af   :  { %v5719_v50 = vmul.f32 %v992_v55, %v975_v16 }
 0x8b1   :  { %1294 = vrot.lane.b32.xlu2 %v5719_v50, %s4185_s7 }
 0x8cf   :  { %v1039_v7 = vpop.f32.mrf.mxu1  ;;  %v1079_v11 = vpop.f32.mrf.mxu0 }
 0x8d6   :  { %v1019_v3 = vpop.f32.mrf.mxu3  ;;  %v1059_v4 = vpop.f32.mrf.mxu2 }
 0x8d7   :  { %v1020_v6 = vadd.f32 %v1019_v3, %v5203_v30  ;;  %v1060_v8 = vadd.f32 %v1059_v4, %v5205_v32  ;;  %v1099_v56 = vpop.f32.mrf.mxu1  ;;  %v1139_v4 = vpop.f32.mrf.mxu0 }
 0x8d8   :  { %v1100_v52 = vadd.f32 %v1099_v56, %v5209_v54 }
 0x8d9   :  { %v1040_v1 = vadd.f32 %v1039_v7, %v1020_v6  ;;  %v1080_v49 = vadd.f32 %v1079_v11, %v1060_v8  ;;  %v1140_v8 = vadd.f32 %v1139_v4, %v5212_v18 }
 0x8db   :  { %v3459_v57 = vmul.f32 -1.442695, %v1040_v1  ;;  %v3460_v51 = vmul.f32 -1.442695, %v1080_v49 }
 0x8dd   :  { %3631 = vpow2.f32 %v3459_v57 }
 0x8de   :  { %3633 = vpow2.f32 %v3460_v51  ;;  %v1119_v53 = vpop.f32.mrf.mxu3  ;;  %v1159_v6 = vpop.f32.mrf.mxu2 }
 0x8df   :  { %v1120_v43 = vadd.f32 %v1119_v53, %v1100_v52  ;;  %v1160_v1 = vadd.f32 %v1159_v6, %v1140_v8 }
 0x8e1   :  { %v3461_v16 = vmul.f32 -1.442695, %v1120_v43 }
 0x8e3   :  { %v3632_v55 = vpop.eup %3631  ;;  %3635 = vpow2.f32 %v3461_v16 }
 0x8e4   :  { %v3634_v44 = vpop.eup %3633  ;;  %v1171_v41 = vadd.f32 1.0, %v3632_v55 }
 0x8e5   :  { %v1172_v3 = vadd.f32 1.0, %v3634_v44 }
 0x8e6   :  { %3637 = vrcp.f32 %v1171_v41  ;;  %v1185_v43 = vand.u32 2147483648, %v1171_v41  ;;  %v1183_v55 = vand.u32 2147483647, %v1171_v41  ;;  %vm1179_vm3 = vweird.f32 %v1171_v41 }
 0x8e7   :  { %3639 = vrcp.f32 %v1172_v3  ;;  %v1200_v16 = vand.u32 2147483648, %v1172_v3  ;;  %v1198_v32 = vand.u32 2147483647, %v1172_v3  ;;  %vm1194_vm4 = vweird.f32 %v1172_v3 }
 0x8e8   :  { %v1186_v6 = vor.u32 1.1754944e-38, %v1185_v43  ;;  %vm1184_vm8 = vcmp.eq.f32.partialorder %v1183_v55, 8.507059e+37  ;;  %v5773_v55 = vld [vmem:[%s7871_s4 + $0x2b8] sm:$0xff] }
 0x8e9   :  { %v3636_v7 = vpop.eup %3635  ;;  %vm1199_vm10 = vcmp.eq.f32.partialorder %v1198_v32, 8.507059e+37  ;;  %8324 = vst [vmem:[#allocation49_spill] sm:$0xff] %v5773_v55 }
 0x8ea   :  { %v1173_v49 = vadd.f32 1.0, %v3636_v7 }
 0x8ec   :  { %v3638_v11 = vpop.eup %3637  ;;  %3641 = vrcp.f32 %v1173_v49  ;;  %vm1209_vm12 = vweird.f32 %v1173_v49 }
 0x8ed   :  { %v3640_v56 = vpop.eup %3639  ;;  %v1175_v57 = vmul.f32 %v3638_v11, %v1171_v41  ;;  %3643 = vtanh.f32 %v1160_v1  ;;  %vm1180_vm1 = vweird.f32 %v3638_v11 }
 0x8ee   :  { %v1190_v51 = vmul.f32 %v3640_v56, %v1172_v3  ;;  %vm1195_vm2 = vweird.f32 %v3640_v56  ;;  %vm1181_vm7 = vmor %vm1179_vm3, %vm1180_vm1  ;;  %v1215_v3 = vand.u32 2147483648, %v1173_v49 }
 0x8ef   :  { %v1176_v52 = vsub.f32 1.0, %v1175_v57  ;;  %vm1196_vm9 = vmor %vm1194_vm4, %vm1195_vm2  ;;  %v1201_v57 = vor.u32 1.1754944e-38, %v1200_v16  ;;  %v5767_v16 = vld [vmem:[%s7871_s4 + $0x2a8] sm:$0xff] }
 0x8f0   :  { %v1191_v53 = vsub.f32 1.0, %v1190_v51  ;;  %v1216_v43 = vor.u32 1.1754944e-38, %v1215_v3  ;;  %v5840_v3 = vld [vmem:[%s7871_s4 + $0x218] sm:$0xff] }
 0x8f1   :  { %v1177_v44 = vmul.f32 %v3638_v11, %v1176_v52  ;;  %8330 = vst [vmem:[#allocation55_spill] sm:$0xff] %v5840_v3 }
 0x8f2   :  { %v3642_v54 = vpop.eup %3641  ;;  %v1192_v30 = vmul.f32 %v3640_v56, %v1191_v53 }
 0x8f3   :  { %v1205_v4 = vmul.f32 %v3642_v54, %v1173_v49  ;;  %v1178_v7 = vadd.f32 %v3638_v11, %v1177_v44  ;;  %v3644_v51 = vpop.eup %3643  ;;  %vm1210_vm11 = vweird.f32 %v3642_v54 }
 0x8f4   :  { %v1193_v8 = vadd.f32 %v3640_v56, %v1192_v30  ;;  %v1213_v30 = vand.u32 2147483647, %v1173_v49  ;;  %vm1211_vm13 = vmor %vm1209_vm12, %vm1210_vm11  ;;  %v5755_v49 = vld [vmem:[%s7871_s4 + $0x2c8] sm:$0xff] }
 0x8f5   :  { %v1182_v18 = vsel %vm1181_vm7, %v3638_v11, %v1178_v7  ;;  %v1206_v1 = vsub.f32 1.0, %v1205_v4  ;;  %v5779_v4 = vld [vmem:[%s7871_s4 + $0x288] sm:$0xff]  ;;  %v5786_v7 = vld [vmem:[%s7871_s4 + $0x298] sm:$0xff] }
 0x8f6   :  { %v1187_v52 = vsel %vm1184_vm8, %v1186_v6, %v1182_v18  ;;  %v1197_v40 = vsel %vm1196_vm9, %v3640_v56, %v1193_v8  ;;  %vm1214_vm14 = vcmp.eq.f32.partialorder %v1213_v30, 8.507059e+37  ;;  %v5761_v56 = vld [vmem:[%s7871_s4 + $0x2d8] sm:$0xff]  ;;  %8325 = vst [vmem:[#allocation53_spill] sm:$0xff] %v5786_v7  ;;  %v5792_v6 = vld [vmem:[%s7871_s4 + $0x268] sm:$0xff] }
 0x8f7   :  { %v1202_v45 = vsel %vm1199_vm10, %v1201_v57, %v1197_v40  ;;  %v1221_v53 = vmul.f32 %v3644_v51, %v1187_v52  ;;  %v1207_v38 = vmul.f32 %v3642_v54, %v1206_v1  ;;  %8323 = vst [vmem:[#allocation45_spill] sm:$0xff] %v5761_v56  ;;  %v5798_v8 = vld [vmem:[%s7871_s4 + $0x278] sm:$0xff]  ;;  %v5804_v57 = vld [vmem:[%s7871_s4 + $0x248] sm:$0xff] }
 0x8f8   :  { %v1220_v25 = vmul.f32 %v1202_v45, %v5215_v24  ;;  %8326 = vst [vmem:[#allocation47_spill] sm:$0xff] %v5798_v8  ;;  %v5810_v1 = vld [vmem:[%s7871_s4 + $0x258] sm:$0xff]  ;;  %v5816_v51 = vld [vmem:[%s7871_s4 + $0x228] sm:$0xff] }
 0x8f9   :  { %v1208_v41 = vadd.f32 %v3642_v54, %v1207_v38  ;;  %v5749_v38 = vld [vmem:[%s7871_s4 + $0x2f8] sm:$0xff]  ;;  %8327 = vst [vmem:[#allocation57_spill] sm:$0xff] %v5810_v1 }
 0x8fa   :  { %v5728_v44 = vadd.f32 %v1221_v53, %v1220_v25  ;;  %8322 = vst [vmem:[#allocation41_spill] sm:$0xff] %v5749_v38  ;;  %v5822_v52 = vld [vmem:[%s7871_s4 + $0x238] sm:$0xff]  ;;  %v5828_v53 = vld [vmem:[%s7871_s4 + $0x208] sm:$0xff] }
 0x8fb   :  { %v1212_v11 = vsel %vm1211_vm13, %v3642_v54, %v1208_v41  ;;  %v5743_v54 = vld [vmem:[%s7871_s4 + $0x2e8] sm:$0xff]  ;;  %8328 = vst [vmem:[#allocation51_spill] sm:$0xff] %v5822_v52  ;;  %v5834_v41 = vld [vmem:[%s7871_s4 + $0x1f8] sm:$0xff] }
 0x8fc   :  { %3645 = vtanh.f32 %v5728_v44  ;;  %v1217_v32 = vsel %vm1214_vm14, %v1216_v43, %v1212_v11  ;;  %8329 = vst [vmem:[#allocation32_spill] sm:$0xff] %v5834_v41  ;;  %v5846_v30 = vld [vmem:[%s7871_s4 + $0x1d8] sm:$0xff] }
 0x8fd   :  { %8331 = vst [vmem:[#allocation35_spill] sm:$0xff] %v5846_v30  ;;  %v5852_v11 = vld [vmem:[%s7871_s4 + $0x1b8] sm:$0xff] }
 0x8fe   :  { %8332 = vst [vmem:[#allocation59_spill] sm:$0xff] %v5852_v11  ;;  %v5858_v43 = vld [vmem:[%s7871_s4 + $0x198] sm:$0xff] }
 0x8ff   :  { %8333 = vst [vmem:[#allocation36_spill] sm:$0xff] %v5858_v43 }
 0x902   :  { %v3646_v18 = vpop.eup %3645 }
 0x903   :  { %v5731_v40 = vmul.f32 %v3646_v18, %v1217_v32  ;;  %v5864_v18 = vld [vmem:[%s7871_s4 + $0x178] sm:$0xff] }
 0x904   :  { %8334 = vst [vmem:[#allocation63_spill] sm:$0xff] %v5864_v18  ;;  %v5870_v32 = vld [vmem:[%s7871_s4 + $0x158] sm:$0xff] }
 0x905   :  { %3462 = vst [vmem:[%s7873_s6 + $0x8] sm:$0xff] %v5731_v40 }
 0x906   :  { %8335 = vst [vmem:[#allocation37_spill] sm:$0xff] %v5870_v32 }
 0x90b   :  { %v1295_v24 = vpop.permute.xlu2 %1294 }
 0x916   :  { %v1231_v25 = vpop.permute.xlu1 %1230 }
 0x917   :  { %v1297_v45 = vsel %vm27_vm0, %v1231_v25, %v1295_v24  ;;  %3464 = vmatmul.msk.f32.vlgmr.msra.gmra.mxu3 %vm27_vm0, %v1231_v25  ;;  %v5876_v24 = vld [vmem:[%s7871_s4 + $0x138] sm:$0xff] }
 0x918   :  { %3466 = vmatmul.msk.f32.vlgmr.msrb.gmra.mxu1 %vm248_vm6, %v1297_v45  ;;  %1472 = vmatpush.msra.mxu3 %v5743_v54  ;;  %8336 = vst [vmem:[#allocation67_spill] sm:$0xff] %v5876_v24  ;;  %v5882_v25 = vld [vmem:[%s7871_s4 + $0x118] sm:$0xff] }
 0x919   :  { %1552 = vmatpush.msrb.mxu1 %v5749_v38  ;;  %8337 = vst [vmem:[#allocation38_spill] sm:$0xff] %v5882_v25 }
 0x91a   :  { %1473 = vmatpush.msra.mxu3 %v5755_v49 }
 0x91b   :  { %1553 = vmatpush.msrb.mxu1 %v5761_v56 }
 0x91c   :  { %1474 = vmatpush.msra.mxu3 %v5767_v16 }
 0x91d   :  { %1554 = vmatpush.msrb.mxu1 %v5773_v55 }
 0x91e   :  { %1475 = vmatpush.msra.mxu3 %v5779_v4 }
 0x91f   :  { %3467 = vmatmul.msk.f32.vlgmr.msrb.gmra.mxu3 %vm248_vm6, %v1297_v45  ;;  %1555 = vmatpush.msrb.mxu1 %v5786_v7  ;;  %v5888_v45 = vld [vmem:[%s7871_s4 + $0xf8] sm:$0xff] }
 0x920   :  { %1476 = vmatpush.msra.mxu3 %v5792_v6  ;;  %8338 = vst [vmem:[#allocation71_spill] sm:$0xff] %v5888_v45 }
 0x921   :  { %1556 = vmatpush.msrb.mxu1 %v5798_v8 }
 0x922   :  { %1477 = vmatpush.msra.mxu3 %v5804_v57 }
 0x923   :  { %1557 = vmatpush.msrb.mxu1 %v5810_v1 }
 0x924   :  { %1478 = vmatpush.msra.mxu3 %v5816_v51 }
 0x925   :  { %1558 = vmatpush.msrb.mxu1 %v5822_v52  ;;  %v5900_v52 = vld [vmem:[%s7871_s4 + $0xb8] sm:$0xff] }
 0x926   :  { %1479 = vmatpush.msra.mxu3 %v5828_v53  ;;  %8340 = vst [vmem:[#allocation75_spill] sm:$0xff] %v5900_v52 }
 0x927   :  { %1559 = vmatpush.msrb.mxu1 %v5840_v3  ;;  %v5894_v3 = vld [vmem:[%s7871_s4 + $0xd8] sm:$0xff] }
 0x928   :  { %1524 = vmatpush.msrb.mxu3 %v5834_v41  ;;  %8339 = vst [vmem:[#allocation39_spill] sm:$0xff] %v5894_v3 }
 0x92a   :  { %1525 = vmatpush.msrb.mxu3 %v5846_v30 }
 0x92c   :  { %1526 = vmatpush.msrb.mxu3 %v5852_v11 }
 0x92e   :  { %1527 = vmatpush.msrb.mxu3 %v5858_v43 }
 0x930   :  { %1528 = vmatpush.msrb.mxu3 %v5864_v18 }
 0x932   :  { %1529 = vmatpush.msrb.mxu3 %v5870_v32 }
 0x934   :  { %1530 = vmatpush.msrb.mxu3 %v5876_v24 }
 0x936   :  { %1531 = vmatpush.msrb.mxu3 %v5882_v25  ;;  %v5906_v25 = vld [vmem:[%s7871_s4 + $0x98] sm:$0xff] }
 0x937   :  { %8341 = vst [vmem:[#allocation40_spill] sm:$0xff] %v5906_v25 }
 0x938   :  { %1532 = vmatpush.msrb.mxu3 %v5888_v45  ;;  %v5912_v45 = vld [vmem:[%s7871_s4 + $0x78] sm:$0xff] }
 0x939   :  { %8342 = vst [vmem:[#allocation42_spill] sm:$0xff] %v5912_v45 }
 0x93a   :  { %1533 = vmatpush.msrb.mxu3 %v5894_v3  ;;  %v5918_v3 = vld [vmem:[%s7871_s4 + $0x58] sm:$0xff] }
 0x93b   :  { %8343 = vst [vmem:[#allocation46_spill] sm:$0xff] %v5918_v3 }
 0x93c   :  { %1534 = vmatpush.msrb.mxu3 %v5900_v52  ;;  %v5924_v52 = vld [vmem:[%s7871_s4 + $0x38] sm:$0xff] }
 0x93d   :  { %8344 = vst [vmem:[#allocation50_spill] sm:$0xff] %v5924_v52 }
 0x93e   :  { %1535 = vmatpush.msrb.mxu3 %v5906_v25  ;;  %v5930_v25 = vld [vmem:[%s7871_s4 + $0x18] sm:$0xff] }
 0x93f   :  { %8345 = vst [vmem:[#allocation54_spill] sm:$0xff] %v5930_v25 }
 0x940   :  { %1536 = vmatpush.msrb.mxu3 %v5912_v45  ;;  %v3463_v45 = vld [vmem:[%s7868_s0 + $0x20] sm:$0xff] }
 0x942   :  { %1537 = vmatpush.msrb.mxu3 %v5918_v3 }
 0x944   :  { %1538 = vmatpush.msrb.mxu3 %v5924_v52 }
 0x946   :  { %1539 = vmatpush.msrb.mxu3 %v5930_v25 }
 0x995   :  { %v1318_v18 = vpop.f32.mrf.mxu1 }
 0x996   :  { %v1319_v7 = vadd.f32 %v1318_v18, %v8286_v2 }
 0x998   :  { %v3468_v43 = vmul.f32 -1.442695, %v1319_v7 }
 0x99a   :  { %v1251_v24 = vpop.f32.mrf.mxu3 }
 0x99b   :  { %v1254_v3 = vadd.f32 %v3463_v45, %v1251_v24 }
 0x99d   :  { %3647 = vtanh.f32 %v1254_v3  ;;  %v3465_v25 = vmul.f32 -1.442695, %v1254_v3 }
 0x9a2   :  { %v1338_v1 = vpop.f32.mrf.mxu3 }
 0x9a3   :  { %v3648_v32 = vpop.eup %3647  ;;  %v5937_v8 = vadd.f32 %v1338_v1, %v8285_v48 }
 0x9a4   :  { %1277 = vrot.lane.b32.xlu0 %v3648_v32, %s4185_s7 }
 0x9a5   :  { %3649 = vtanh.f32 %v5937_v8 }
 0x9a6   :  { %3651 = vpow2.f32 %v3465_v25 }
 0x9a7   :  { %3653 = vpow2.f32 %v3468_v43 }
 0x9ab   :  { %v3650_v52 = vpop.eup %3649 }
 0x9ac   :  { %1382 = vrot.lane.b32.xlu1 %v3650_v52, %s4186_s13  ;;  %v3652_v24 = vpop.eup %3651 }
 0x9ad   :  { %v1258_v45 = vadd.f32 1.0, %v3652_v24  ;;  %v3654_v55 = vpop.eup %3653 }
 0x9ae   :  { %v1347_v1 = vadd.f32 1.0, %v3654_v55 }
 0x9af   :  { %3655 = vrcp.f32 %v1258_v45  ;;  %v1270_v41 = vand.u32 2147483648, %v1258_v45  ;;  %vm1264_vm1 = vweird.f32 %v1258_v45  ;;  %v1268_v18 = vand.u32 2147483647, %v1258_v45 }
 0x9b0   :  { %3657 = vrcp.f32 %v1347_v1  ;;  %vm1354_vm7 = vweird.f32 %v1347_v1 }
 0x9b1   :  { %v1271_v25 = vor.u32 1.1754944e-38, %v1270_v41  ;;  %vm1269_vm3 = vcmp.eq.f32.partialorder %v1268_v18, 8.507059e+37 }
 0x9b5   :  { %v3656_v48 = vpop.eup %3655 }
 0x9b6   :  { %v1260_v32 = vmul.f32 %v3656_v48, %v1258_v45  ;;  %v3658_v56 = vpop.eup %3657  ;;  %vm1265_vm15 = vweird.f32 %v3656_v48 }
 0x9b7   :  { %v1350_v38 = vmul.f32 %v3658_v56, %v1347_v1  ;;  %vm1266_vm2 = vmor %vm1264_vm1, %vm1265_vm15  ;;  %vm1355_vm4 = vweird.f32 %v3658_v56 }
 0x9b8   :  { %v1261_v11 = vsub.f32 1.0, %v1260_v32  ;;  %vm1356_vm8 = vmor %vm1354_vm7, %vm1355_vm4 }
 0x9b9   :  { %v1351_v3 = vsub.f32 1.0, %v1350_v38  ;;  %v1358_v38 = vand.u32 2147483647, %v1347_v1 }
 0x9ba   :  { %v1262_v30 = vmul.f32 %v3656_v48, %v1261_v11  ;;  %v1360_v11 = vand.u32 2147483648, %v1347_v1 }
 0x9bb   :  { %v1352_v43 = vmul.f32 %v3658_v56, %v1351_v3  ;;  %vm1359_vm9 = vcmp.eq.f32.partialorder %v1358_v38, 8.507059e+37  ;;  %v8376_v38 = vld [vmem:[#allocation12_spill] sm:$0xff] }
 0x9bc   :  { %v1263_v52 = vadd.f32 %v3656_v48, %v1262_v30  ;;  %v1361_v45 = vor.u32 1.1754944e-38, %v1360_v11  ;;  %v6119_v11 = vld [vmem:[%s7871_s4 + $0x70] sm:$0xff] }
 0x9bd   :  { %v1353_v32 = vadd.f32 %v3658_v56, %v1352_v43 }
 0x9be   :  { %v1267_v7 = vsel %vm1266_vm2, %v3656_v48, %v1263_v52 }
 0x9bf   :  { %v5943_v55 = vsel %vm1269_vm3, %v1271_v25, %v1267_v7  ;;  %v1357_v30 = vsel %vm1356_vm8, %v3658_v56, %v1353_v32  ;;  %v8375_v32 = vld [vmem:[#allocation43_spill] sm:$0xff] }
 0x9c0   :  { %v1362_v52 = vsel %vm1359_vm9, %v1361_v45, %v1357_v30  ;;  %v1275_v3 = vmul.f32 %v5943_v55, %v5279_v21  ;;  %v6126_v30 = vld [vmem:[%s7871_s4 + $0x50] sm:$0xff] }
 0x9c1   :  { %v1380_v56 = vmul.f32 %v1362_v52, %v5284_v27  ;;  %v5970_v27 = vld [vmem:[%s7867_s1 + $0x18] sm:$0xff]  ;;  %v6133_v45 = vld [vmem:[%s7871_s4 + $0x30] sm:$0xff] }
 0xa16   :  { %v1278_v24 = vpop.permute.xlu0 %1277 }
 0xa17   :  { %v1280_v2 = vmul.f32 %v1278_v24, %v5943_v55  ;;  %v3469_v24 = vmul.f32 -1.442695, %v5937_v8  ;;  %v8377_v8 = vld [vmem:[#allocation18_spill] sm:$0xff] }
 0xa19   :  { %1282 = vrot.lane.b32.xlu2 %v1280_v2, %s4185_s7 }
 0xa1e   :  { %v1383_v48 = vpop.permute.xlu1 %1382 }
 0xa1f   :  { %v1385_v41 = vmul.f32 %v1383_v48, %v1362_v52  ;;  %v8378_v48 = vld [vmem:[#allocation19_spill] sm:$0xff]  ;;  %v6140_v52 = vld [vmem:[%s7871_s4 + $0x10] sm:$0xff] }
 0xa21   :  { %1387 = vrot.lane.b32.xlu0 %v1385_v41, %s4186_s13  ;;  %v8379_v41 = vld [vmem:[#allocation21_spill] sm:$0xff] }
 0xa29   :  { %1398 = vrot.lane.b32.xlu0 %v5731_v40, %s4186_s13 }
 0xa73   :  { %v1283_v18 = vpop.permute.xlu2 %1282 }
 0xa74   :  { %v5952_v7 = vadd.f32 %v1283_v18, %v1275_v3  ;;  %v6147_v18 = vld [vmem:[%s7871_s4 + $0x8] sm:$0xff] }
 0xa76   :  { %3659 = vtanh.f32 %v5952_v7 }
 0xa7c   :  { %v3660_v2 = vpop.eup %3659 }
 0xa7d   :  { %1288 = vrot.lane.b32.xlu1 %v3660_v2, %s4185_s7 }
 0xa93   :  { %v1388_v1 = vpop.permute.xlu0 %1387 }
 0xa94   :  { %v5957_v43 = vadd.f32 %v1388_v1, %v1380_v56 }
 0xa96   :  { %3661 = vtanh.f32 %v5957_v43 }
 0xa97   :  { %3663 = vpow2.f32 %v3469_v24 }
 0xa9b   :  { %v1399_v25 = vpop.permute.xlu0 %1398 }
 0xa9c   :  { %v3662_v40 = vpop.eup %3661  ;;  %3470 = vmatmul.msk.f32.vlgmr.msrb.gmra.mxu0 %vm30_vm5, %v1399_v25  ;;  %3471 = vmatmul.msk.f32.vlgmr.msra.gmra.mxu3 %vm30_vm5, %v1399_v25  ;;  %v1401_v21 = vsel %vm30_vm5, %v5719_v50, %v1399_v25  ;;  %v5979_v50 = vld [vmem:[%s7867_s1 + $0x10] sm:$0xff] }
 0xa9d   :  { %1420 = vmatmul.f32.vlgmr.msra.gmra.mxu2 %v1401_v21  ;;  %1460 = vmatmul.f32.vlgmr.msra.gmra.mxu1 %v1401_v21  ;;  %v3664_v3 = vpop.eup %3663 }
 0xa9e   :  { %1393 = vrot.lane.b32.xlu2 %v3662_v40, %s4186_s13  ;;  %1707 = vmatpush.msrb.mxu0 %v5296_v19  ;;  %v5988_v19 = vld [vmem:[%s7867_s1 + $0x8] sm:$0xff]  ;;  %v1348_v2 = vadd.f32 1.0, %v3664_v3 }
 0xa9f   :  { %1727 = vmatpush.msra.mxu2 %v5355_v28  ;;  %1648 = vmatpush.msra.mxu1 %v5970_v27  ;;  %v8353_v28 = vld [vmem:[#allocation17_spill] sm:$0xff] }
 0xaa0   :  { %1708 = vmatpush.msrb.mxu0 %v5315_v62  ;;  %1834 = vmatpush.msra.mxu3 %v5302_v47  ;;  %v5998_v47 = vld [vmem:[%s7867_s1] sm:$0xff]  ;;  %3665 = vrcp.f32 %v1348_v2  ;;  %vm1369_vm11 = vweird.f32 %v1348_v2 }
 0xaa1   :  { %1728 = vmatpush.msra.mxu2 %v5379_v37  ;;  %1649 = vmatpush.msra.mxu1 %v5979_v50  ;;  %v8347_v62 = vld [vmem:[#allocation56_spill] sm:$0xff]  ;;  %v8357_v37 = vld [vmem:[#allocation22_spill] sm:$0xff] }
 0xaa2   :  { %1709 = vmatpush.msrb.mxu0 %v5334_v26  ;;  %1835 = vmatpush.msra.mxu3 %v5321_v58  ;;  %v8348_v58 = vld [vmem:[#allocation14_spill] sm:$0xff]  ;;  %v8350_v26 = vld [vmem:[#allocation16_spill] sm:$0xff] }
 0xaa3   :  { %1729 = vmatpush.msra.mxu2 %v5403_v23  ;;  %1650 = vmatpush.msra.mxu1 %v5988_v19  ;;  %v8361_v23 = vld [vmem:[#allocation48_spill] sm:$0xff] }
 0xaa4   :  { %1500 = vmatmul.f32.vlgmr.msra.gmra.mxu0 %v1401_v21  ;;  %1540 = vmatmul.f32.vlgmr.msrb.gmra.mxu3 %v1401_v21 }
 0xaa5   :  { %3472 = vmatmul.msk.f32.vlgmr.msrb.gmra.mxu2 %vm30_vm5, %v1399_v25  ;;  %3473 = vmatmul.msk.f32.vlgmr.msrb.gmra.mxu1 %vm30_vm5, %v1399_v25 }
 0xaa6   :  { %1710 = vmatpush.msrb.mxu0 %v5349_v61  ;;  %1730 = vmatpush.msra.mxu2 %v5427_v15  ;;  %v8352_v61 = vld [vmem:[#allocation61_spill] sm:$0xff]  ;;  %v6046_v15 = vld [vmem:[%s7871_s4 + $0x170] sm:$0xff]  ;;  %v3666_v56 = vpop.eup %3665 }
 0xaa7   :  { %1651 = vmatpush.msra.mxu1 %v5998_v47  ;;  %1836 = vmatpush.msra.mxu3 %v5340_v33  ;;  %v8351_v33 = vld [vmem:[#allocation28_spill] sm:$0xff]  ;;  %v1365_v1 = vmul.f32 %v3666_v56, %v1348_v2  ;;  %vm1370_vm10 = vweird.f32 %v3666_v56 }
 0xaa8   :  { %1711 = vmatpush.msrb.mxu0 %v5367_v31  ;;  %1731 = vmatpush.msra.mxu2 %v5451_v22  ;;  %v8355_v31 = vld [vmem:[#allocation65_spill] sm:$0xff]  ;;  %v8367_v22 = vld [vmem:[#allocation23_spill] sm:$0xff]  ;;  %vm1371_vm12 = vmor %vm1369_vm11, %vm1370_vm10 }
 0xaa9   :  { %1806 = vmatpush.msrb.mxu1 %v5309_v13  ;;  %1837 = vmatpush.msra.mxu3 %v5373_v36  ;;  %v8346_v13 = vld [vmem:[#allocation15_spill] sm:$0xff]  ;;  %v8356_v36 = vld [vmem:[#allocation20_spill] sm:$0xff]  ;;  %v1366_v25 = vsub.f32 1.0, %v1365_v1 }
 0xaaa   :  { %1712 = vmatpush.msrb.mxu0 %v5391_v42  ;;  %1732 = vmatpush.msra.mxu2 %v5475_v60  ;;  %v8359_v42 = vld [vmem:[#allocation69_spill] sm:$0xff]  ;;  %v6073_v60 = vld [vmem:[%s7871_s4 + $0x110] sm:$0xff] }
 0xaab   :  { %1807 = vmatpush.msrb.mxu1 %v5328_v5  ;;  %1838 = vmatpush.msra.mxu3 %v5397_v63  ;;  %v8349_v5 = vld [vmem:[#allocation31_spill] sm:$0xff]  ;;  %v1367_v40 = vmul.f32 %v3666_v56, %v1366_v25 }
 0xaac   :  { %1713 = vmatpush.msrb.mxu0 %v5415_v10  ;;  %1733 = vmatpush.msra.mxu2 %v5499_v46  ;;  %v8360_v63 = vld [vmem:[#allocation11_spill] sm:$0xff]  ;;  %v8363_v10 = vld [vmem:[#allocation76_spill] sm:$0xff] }
 0xaad   :  { %1808 = vmatpush.msrb.mxu1 %v5361_v34  ;;  %1839 = vmatpush.msra.mxu3 %v5421_v12  ;;  %v8354_v34 = vld [vmem:[#allocation34_spill] sm:$0xff]  ;;  %v8364_v12 = vld [vmem:[#allocation52_spill] sm:$0xff] }
 0xaae   :  { %1714 = vmatpush.msrb.mxu0 %v5439_v29  ;;  %1734 = vmatpush.msra.mxu2 %v5523_v0  ;;  %v8362_v0 = vld [vmem:[#allocation60_spill] sm:$0xff]  ;;  %v8366_v29 = vld [vmem:[#allocation73_spill] sm:$0xff] }
 0xaaf   :  { %1809 = vmatpush.msrb.mxu1 %v5385_v39  ;;  %1840 = vmatpush.msra.mxu3 %v5445_v20  ;;  %v8358_v39 = vld [vmem:[#allocation44_spill] sm:$0xff]  ;;  %v6055_v20 = vld [vmem:[%s7871_s4 + $0x150] sm:$0xff] }
 0xab0   :  { %1715 = vmatpush.msrb.mxu0 %v8346_v13  ;;  %1735 = vmatpush.msra.mxu2 %v8347_v62  ;;  %v8368_v46 = vld [vmem:[#allocation64_spill] sm:$0xff]  ;;  %v1368_v62 = vadd.f32 %v3666_v56, %v1367_v40 }
 0xab1   :  { %1810 = vmatpush.msrb.mxu1 %v8348_v58  ;;  %1841 = vmatpush.msra.mxu3 %v8349_v5  ;;  %v1375_v58 = vand.u32 2147483648, %v1348_v2  ;;  %v1373_v5 = vand.u32 2147483647, %v1348_v2 }
 0xab2   :  { %1716 = vmatpush.msrb.mxu0 %v8350_v26  ;;  %1736 = vmatpush.msra.mxu2 %v5571_v17  ;;  %v6064_v17 = vld [vmem:[%s7871_s4 + $0x130] sm:$0xff]  ;;  %v1372_v26 = vsel %vm1371_vm12, %v3666_v56, %v1368_v62 }
 0xab3   :  { %1811 = vmatpush.msrb.mxu1 %v8351_v33  ;;  %1886 = vmatpush.msrb.mxu3 %v8352_v61  ;;  %v1376_v33 = vor.u32 1.1754944e-38, %v1375_v58  ;;  %vm1374_vm13 = vcmp.eq.f32.partialorder %v1373_v5, 8.507059e+37 }
 0xab4   :  { %1717 = vmatpush.msrb.mxu0 %v8353_v28  ;;  %1737 = vmatpush.msra.mxu2 %v5590_v14  ;;  %v8365_v14 = vld [vmem:[#allocation25_spill] sm:$0xff] }
 0xab5   :  { %1812 = vmatpush.msrb.mxu1 %v8354_v34  ;;  %1887 = vmatpush.msrb.mxu3 %v8355_v31  ;;  %v1377_v61 = vsel %vm1374_vm13, %v1376_v33, %v1372_v26 }
 0xab6   :  { %1718 = vmatpush.msrb.mxu0 %v8356_v36  ;;  %1738 = vmatpush.msra.mxu2 %v5609_v9  ;;  %v8369_v9 = vld [vmem:[#allocation27_spill] sm:$0xff]  ;;  %v8380_v36 = vld [vmem:[#allocation13_spill] sm:$0xff] }
 0xab7   :  { %1813 = vmatpush.msrb.mxu1 %v8358_v39  ;;  %1888 = vmatpush.msrb.mxu3 %v8359_v42 }
 0xab8   :  { %1874 = vmatpush.msrb.mxu2 %v5743_v54  ;;  %1846 = vmatpush.msra.mxu0 %v8357_v37  ;;  %v6082_v54 = vld [vmem:[%s7871_s4 + $0xf0] sm:$0xff] }
 0xab9   :  { %1814 = vmatpush.msrb.mxu1 %v8361_v23  ;;  %1889 = vmatpush.msrb.mxu3 %v8362_v0  ;;  %v8381_v23 = vld [vmem:[#allocation8_spill] sm:$0xff] }
 0xaba   :  { %1875 = vmatpush.msrb.mxu2 %v5755_v49  ;;  %1847 = vmatpush.msra.mxu0 %v8360_v63  ;;  %v8372_v49 = vld [vmem:[#allocation68_spill] sm:$0xff] }
 0xabb   :  { %1815 = vmatpush.msrb.mxu1 %v8364_v12  ;;  %1890 = vmatpush.msrb.mxu3 %v6046_v15 }
 0xabc   :  { %1876 = vmatpush.msrb.mxu2 %v5767_v16  ;;  %1848 = vmatpush.msra.mxu0 %v8363_v10  ;;  %v6091_v16 = vld [vmem:[%s7871_s4 + $0xd0] sm:$0xff] }
 0xabd   :  { %1816 = vmatpush.msrb.mxu1 %v8366_v29  ;;  %1891 = vmatpush.msrb.mxu3 %v6055_v20 }
 0xabe   :  { %1877 = vmatpush.msrb.mxu2 %v5779_v4  ;;  %1849 = vmatpush.msra.mxu0 %v8365_v14  ;;  %v8373_v4 = vld [vmem:[#allocation29_spill] sm:$0xff] }
 0xabf   :  { %1817 = vmatpush.msrb.mxu1 %v8367_v22  ;;  %1892 = vmatpush.msrb.mxu3 %v6064_v17  ;;  %v8382_v22 = vld [vmem:[#allocation26_spill] sm:$0xff] }
 0xac0   :  { %1878 = vmatpush.msrb.mxu2 %v5792_v6  ;;  %1850 = vmatpush.msra.mxu0 %v5628_v59  ;;  %v8370_v59 = vld [vmem:[#allocation77_spill] sm:$0xff]  ;;  %v6098_v6 = vld [vmem:[%s7871_s4] sm:$0xff] }
 0xac1   :  { %1818 = vmatpush.msrb.mxu1 %v8368_v46  ;;  %1893 = vmatpush.msrb.mxu3 %v6073_v60 }
 0xac2   :  { %1879 = vmatpush.msrb.mxu2 %v5804_v57  ;;  %1851 = vmatpush.msra.mxu0 %v5641_v35  ;;  %v8371_v35 = vld [vmem:[#allocation72_spill] sm:$0xff]  ;;  %v6104_v57 = vld [vmem:[%s7871_s4 + $0xb0] sm:$0xff] }
 0xac3   :  { %1819 = vmatpush.msrb.mxu1 %v8370_v59  ;;  %1894 = vmatpush.msrb.mxu3 %v6082_v54 }
 0xac4   :  { %1880 = vmatpush.msrb.mxu2 %v5816_v51  ;;  %1852 = vmatpush.msra.mxu0 %v8369_v9  ;;  %v8374_v51 = vld [vmem:[#allocation33_spill] sm:$0xff] }
 0xac5   :  { %1820 = vmatpush.msrb.mxu1 %v8372_v49  ;;  %1895 = vmatpush.msrb.mxu3 %v6091_v16 }
 0xac6   :  { %1881 = vmatpush.msrb.mxu2 %v5828_v53  ;;  %1853 = vmatpush.msra.mxu0 %v8371_v35  ;;  %v6111_v53 = vld [vmem:[%s7871_s4 + $0x90] sm:$0xff] }
 0xac7   :  { %1821 = vmatpush.msrb.mxu1 %v6098_v6  ;;  %1896 = vmatpush.msrb.mxu3 %v6104_v57 }
 0xac8   :  { %1854 = vmatpush.msra.mxu0 %v8373_v4 }
 0xac9   :  { %1897 = vmatpush.msrb.mxu3 %v6111_v53 }
 0xaca   :  { %1855 = vmatpush.msra.mxu0 %v8374_v51 }
 0xacb   :  { %1898 = vmatpush.msrb.mxu3 %v6119_v11 }
 0xacc   :  { %1856 = vmatpush.msra.mxu0 %v8375_v32 }
 0xacd   :  { %1899 = vmatpush.msrb.mxu3 %v6126_v30 }
 0xace   :  { %1857 = vmatpush.msra.mxu0 %v8376_v38  ;;  %v8383_v38 = vld [vmem:[#allocation30_spill] sm:$0xff] }
 0xacf   :  { %1900 = vmatpush.msrb.mxu3 %v6133_v45 }
 0xad0   :  { %1858 = vmatpush.msra.mxu0 %v8377_v8 }
 0xad1   :  { %1901 = vmatpush.msrb.mxu3 %v6140_v52 }
 0xad2   :  { %1859 = vmatpush.msra.mxu0 %v8378_v48 }
 0xad4   :  { %1860 = vmatpush.msra.mxu0 %v8379_v41 }
 0xad6   :  { %1861 = vmatpush.msra.mxu0 %v6147_v18 }
 0xaef   :  { %v1289_v21 = vpop.permute.xlu1 %1288 }
 0xaf0   :  { %v1291_v13 = vmul.f32 %v1289_v21, %v5943_v55 }
 0xaf2   :  { %1632 = vrot.lane.b32.xlu1 %v1291_v13, %s4186_s13 }
 0xaf8   :  { %v1394_v28 = vpop.permute.xlu2 %1393 }
 0xaf9   :  { %v6152_v34 = vmul.f32 %v1394_v28, %v1377_v61 }
 0xafb   :  { %1696 = vrot.lane.b32.xlu2 %v6152_v34, %s4185_s7 }
 0xb19   :  { %v1441_v31 = vpop.f32.mrf.mxu0 }
 0xb1a   :  { %v1461_v55 = vpop.f32.mrf.mxu1 }
 0xb1b   :  { %v1462_v37 = vadd.f32 %v1461_v55, %v8380_v36 }
 0xb1f   :  { %v1481_v39 = vpop.f32.mrf.mxu3 }
 0xb20   :  { %v1482_v42 = vadd.f32 %v1481_v39, %v1462_v37  ;;  %v1421_v63 = vpop.f32.mrf.mxu2 }
 0xb21   :  { %v1422_v0 = vadd.f32 %v1421_v63, %v8381_v23  ;;  %v1501_v14 = vpop.f32.mrf.mxu0 }
 0xb22   :  { %v3475_v10 = vmul.f32 -1.442695, %v1482_v42  ;;  %v1502_v46 = vadd.f32 %v1501_v14, %v8382_v22  ;;  %v1561_v2 = vpop.f32.mrf.mxu1 }
 0xb23   :  { %v1442_v12 = vadd.f32 %v1441_v31, %v1422_v0 }
 0xb24   :  { %3667 = vpow2.f32 %v3475_v10 }
 0xb25   :  { %v3474_v29 = vmul.f32 -1.442695, %v1442_v12 }
 0xb27   :  { %3669 = vpow2.f32 %v3474_v29  ;;  %v1541_v32 = vpop.f32.mrf.mxu3 }
 0xb28   :  { %v1521_v9 = vpop.f32.mrf.mxu2  ;;  %v1542_v8 = vadd.f32 %v1541_v32, %v8383_v38 }
 0xb29   :  { %v1522_v59 = vadd.f32 %v1521_v9, %v1502_v46 }
 0xb2a   :  { %v3668_v35 = vpop.eup %3667  ;;  %v1562_v40 = vadd.f32 %v1561_v2, %v1542_v8 }
 0xb2b   :  { %v1574_v49 = vadd.f32 1.0, %v3668_v35  ;;  %v3476_v4 = vmul.f32 -1.442695, %v1522_v59 }
 0xb2d   :  { %v3670_v51 = vpop.eup %3669  ;;  %3671 = vrcp.f32 %v1574_v49  ;;  %v1602_v62 = vand.u32 2147483648, %v1574_v49  ;;  %v1600_v58 = vand.u32 2147483647, %v1574_v49  ;;  %vm1596_vm15 = vweird.f32 %v1574_v49 }
 0xb2e   :  { %v1573_v24 = vadd.f32 1.0, %v3670_v51  ;;  %3673 = vpow2.f32 %v3476_v4 }
 0xb2f   :  { %v1603_v31 = vor.u32 1.1754944e-38, %v1602_v62  ;;  %vm1601_vm3 = vcmp.eq.f32.partialorder %v1600_v58, 8.507059e+37  ;;  %v8388_v62 = vld [vmem:[#allocation59_spill] sm:$0xff]  ;;  %v6194_v58 = vld [vmem:[%s7871_s4 + $0x2b0] sm:$0xff] }
 0xb30   :  { %3675 = vrcp.f32 %v1573_v24  ;;  %v1587_v33 = vand.u32 2147483648, %v1573_v24  ;;  %v1585_v28 = vand.u32 2147483647, %v1573_v24  ;;  %vm1581_vm4 = vweird.f32 %v1573_v24  ;;  %8389 = vst [vmem:[#allocation58_spill] sm:$0xff] %v6194_v58 }
 0xb32   :  { %v1588_v42 = vor.u32 1.1754944e-38, %v1587_v33  ;;  %vm1586_vm8 = vcmp.eq.f32.partialorder %v1585_v28, 8.507059e+37  ;;  %v6202_v33 = vld [vmem:[%s7871_s4 + $0x290] sm:$0xff]  ;;  %v8394_v28 = vld [vmem:[#allocation63_spill] sm:$0xff] }
 0xb33   :  { %v3672_v48 = vpop.eup %3671  ;;  %8392 = vst [vmem:[#allocation62_spill] sm:$0xff] %v6202_v33 }
 0xb34   :  { %v3674_v41 = vpop.eup %3673  ;;  %v1592_v3 = vmul.f32 %v3672_v48, %v1574_v49  ;;  %vm1597_vm14 = vweird.f32 %v3672_v48 }
 0xb35   :  { %v1575_v56 = vadd.f32 1.0, %v3674_v41  ;;  %vm1598_vm1 = vmor %vm1596_vm15, %vm1597_vm14 }
 0xb36   :  { %v3676_v1 = vpop.eup %3675  ;;  %v1593_v25 = vsub.f32 1.0, %v1592_v3 }
 0xb37   :  { %v1577_v21 = vmul.f32 %v3676_v1, %v1573_v24  ;;  %3677 = vrcp.f32 %v1575_v56  ;;  %vm1582_vm2 = vweird.f32 %v3676_v1  ;;  %v1617_v4 = vand.u32 2147483648, %v1575_v56 }
 0xb38   :  { %v1594_v13 = vmul.f32 %v3672_v48, %v1593_v25  ;;  %3679 = vtanh.f32 %v1562_v40  ;;  %vm1583_vm7 = vmor %vm1581_vm4, %vm1582_vm2  ;;  %vm1611_vm10 = vweird.f32 %v1575_v56  ;;  %v1615_v51 = vand.u32 2147483647, %v1575_v56  ;;  %v8385_v25 = vld [vmem:[#allocation41_spill] sm:$0xff]  ;;  %v8386_v40 = vld [vmem:[#allocation35_spill] sm:$0xff] }
 0xb39   :  { %v1578_v5 = vsub.f32 1.0, %v1577_v21  ;;  %v1618_v32 = vor.u32 1.1754944e-38, %v1617_v4  ;;  %v6186_v21 = vld [vmem:[%s7871_s4 + $0x2d0] sm:$0xff] }
 0xb3a   :  { %v1595_v26 = vadd.f32 %v3672_v48, %v1594_v13  ;;  %vm1616_vm12 = vcmp.eq.f32.partialorder %v1615_v51, 8.507059e+37  ;;  %v8387_v13 = vld [vmem:[#allocation45_spill] sm:$0xff]  ;;  %v8410_v4 = vld [vmem:[#allocation42_spill] sm:$0xff] }
 0xb3b   :  { %v1579_v61 = vmul.f32 %v3676_v1, %v1578_v5  ;;  %v8390_v5 = vld [vmem:[#allocation49_spill] sm:$0xff]  ;;  %v8411_v51 = vld [vmem:[#allocation46_spill] sm:$0xff] }
 0xb3c   :  { %v1599_v55 = vsel %vm1598_vm1, %v3672_v48, %v1595_v26  ;;  %v8391_v26 = vld [vmem:[#allocation36_spill] sm:$0xff] }
 0xb3d   :  { %v3678_v37 = vpop.eup %3677  ;;  %v1580_v39 = vadd.f32 %v3676_v1, %v1579_v61  ;;  %v1604_v63 = vsel %vm1601_vm3, %v1603_v31, %v1599_v55  ;;  %v8393_v61 = vld [vmem:[#allocation53_spill] sm:$0xff]  ;;  %v6210_v31 = vld [vmem:[%s7871_s4 + $0x270] sm:$0xff]  ;;  %v8396_v55 = vld [vmem:[#allocation47_spill] sm:$0xff] }
 0xb3e   :  { %v1607_v0 = vmul.f32 %v3678_v37, %v1575_v56  ;;  %v3680_v12 = vpop.eup %3679  ;;  %v1622_v46 = vmul.f32 %v1604_v63, %v5728_v44  ;;  %vm1612_vm9 = vweird.f32 %v3678_v37  ;;  %v8384_v56 = vld [vmem:[#allocation32_spill] sm:$0xff]  ;;  %8395 = vst [vmem:[#allocation66_spill] sm:$0xff] %v6210_v31  ;;  %v8400_v63 = vld [vmem:[#allocation67_spill] sm:$0xff] }
 0xb3f   :  { %v1584_v10 = vsel %vm1583_vm7, %v3676_v1, %v1580_v39  ;;  %vm1613_vm11 = vmor %vm1611_vm10, %vm1612_vm9  ;;  %v6178_v1 = vld [vmem:[%s7871_s4 + $0x2f0] sm:$0xff] }
 0xb40   :  { %v1589_v14 = vsel %vm1586_vm8, %v1588_v42, %v1584_v10  ;;  %v1608_v29 = vsub.f32 1.0, %v1607_v0  ;;  %v6218_v39 = vld [vmem:[%s7871_s4 + $0x250] sm:$0xff]  ;;  %v8399_v42 = vld [vmem:[#allocation57_spill] sm:$0xff]  ;;  %v8402_v10 = vld [vmem:[#allocation51_spill] sm:$0xff] }
 0xb41   :  { %v1623_v9 = vmul.f32 %v3680_v12, %v1589_v14  ;;  %8398 = vst [vmem:[#allocation70_spill] sm:$0xff] %v6218_v39  ;;  %v6226_v0 = vld [vmem:[%s7871_s4 + $0x230] sm:$0xff] }
 0xb42   :  { %v1609_v59 = vmul.f32 %v3678_v37, %v1608_v29  ;;  %8401 = vst [vmem:[#allocation74_spill] sm:$0xff] %v6226_v0  ;;  %v8403_v12 = vld [vmem:[#allocation38_spill] sm:$0xff]  ;;  %v8405_v29 = vld [vmem:[#allocation55_spill] sm:$0xff] }
 0xb43   :  { %v6161_v35 = vadd.f32 %v1623_v9, %v1622_v46  ;;  %v6234_v14 = vld [vmem:[%s7871_s4 + $0x210] sm:$0xff]  ;;  %v8406_v46 = vld [vmem:[#allocation71_spill] sm:$0xff] }
 0xb44   :  { %v1610_v49 = vadd.f32 %v3678_v37, %v1609_v59  ;;  %8404 = vst [vmem:[#allocation24_spill] sm:$0xff] %v6234_v14  ;;  %v8407_v9 = vld [vmem:[#allocation39_spill] sm:$0xff] }
 0xb45   :  { %3681 = vtanh.f32 %v6161_v35  ;;  %v8408_v59 = vld [vmem:[#allocation75_spill] sm:$0xff] }
 0xb46   :  { %v1614_v24 = vsel %vm1613_vm11, %v3678_v37, %v1610_v49  ;;  %v8397_v37 = vld [vmem:[#allocation37_spill] sm:$0xff]  ;;  %v8409_v49 = vld [vmem:[#allocation40_spill] sm:$0xff] }
 0xb47   :  { %v1619_v48 = vsel %vm1616_vm12, %v1618_v32, %v1614_v24  ;;  %v8412_v24 = vld [vmem:[#allocation50_spill] sm:$0xff] }
 0xb48   :  { %v8413_v32 = vld [vmem:[#allocation54_spill] sm:$0xff] }
 0xb4b   :  { %v3682_v8 = vpop.eup %3681 }
 0xb4c   :  { %v6164_v41 = vmul.f32 %v3682_v8, %v1619_v48  ;;  %v3478_v8 = vld [vmem:[%s7868_s0 + $0x28] sm:$0xff] }
 0xb4e   :  { %3477 = vst [vmem:[%s7873_s6 + $0x10] sm:$0xff] %v6164_v41 }
 0xb55   :  { %v1697_v44 = vpop.permute.xlu2 %1696 }
 0xb64   :  { %v1633_v3 = vpop.permute.xlu1 %1632 }
 0xb65   :  { %v1699_v2 = vsel %vm27_vm0, %v1633_v3, %v1697_v44  ;;  %3479 = vmatmul.msk.f32.vlgmr.msra.gmra.mxu1 %vm27_vm0, %v1633_v3 }
 0xb66   :  { %3481 = vmatmul.msk.f32.vlgmr.msrb.gmra.mxu0 %vm248_vm6, %v1699_v2  ;;  %3482 = vmatmul.msk.f32.vlgmr.msra.gmra.mxu2 %vm248_vm6, %v1699_v2  ;;  %v8414_v2 = vld [vmem:[#allocation9_spill] sm:$0xff] }
 0xb67   :  { %1926 = vmatpush.msra.mxu2 %v8384_v56  ;;  %1914 = vmatpush.msra.mxu1 %v6178_v1 }
 0xb68   :  { %1954 = vmatpush.msrb.mxu0 %v8385_v25 }
 0xb69   :  { %1927 = vmatpush.msra.mxu2 %v8386_v40  ;;  %1915 = vmatpush.msra.mxu1 %v6186_v21 }
 0xb6a   :  { %1955 = vmatpush.msrb.mxu0 %v8387_v13 }
 0xb6b   :  { %1928 = vmatpush.msra.mxu2 %v8388_v62  ;;  %1916 = vmatpush.msra.mxu1 %v6194_v58 }
 0xb6c   :  { %1956 = vmatpush.msrb.mxu0 %v8390_v5  ;;  %v8415_v5 = vld [vmem:[#allocation10_spill] sm:$0xff] }
 0xb6d   :  { %1929 = vmatpush.msra.mxu2 %v8391_v26  ;;  %1917 = vmatpush.msra.mxu1 %v6202_v33 }
 0xb6e   :  { %1957 = vmatpush.msrb.mxu0 %v8393_v61 }
 0xb6f   :  { %1930 = vmatpush.msra.mxu2 %v8394_v28  ;;  %1918 = vmatpush.msra.mxu1 %v6210_v31 }
 0xb70   :  { %1958 = vmatpush.msrb.mxu0 %v8396_v55 }
 0xb71   :  { %1931 = vmatpush.msra.mxu2 %v8397_v37  ;;  %1919 = vmatpush.msra.mxu1 %v6218_v39 }
 0xb72   :  { %1959 = vmatpush.msrb.mxu0 %v8399_v42 }
 0xb73   :  { %1932 = vmatpush.msra.mxu2 %v8400_v63  ;;  %1920 = vmatpush.msra.mxu1 %v6226_v0 }
 0xb74   :  { %1960 = vmatpush.msrb.mxu0 %v8402_v10 }
 0xb75   :  { %1933 = vmatpush.msra.mxu2 %v8403_v12  ;;  %1921 = vmatpush.msra.mxu1 %v6234_v14 }
 0xb76   :  { %1961 = vmatpush.msrb.mxu0 %v8405_v29 }
 0xb77   :  { %1934 = vmatpush.msra.mxu2 %v8406_v46 }
 0xb79   :  { %1935 = vmatpush.msra.mxu2 %v8407_v9 }
 0xb7b   :  { %1936 = vmatpush.msra.mxu2 %v8408_v59 }
 0xb7d   :  { %1937 = vmatpush.msra.mxu2 %v8409_v49 }
 0xb7f   :  { %1938 = vmatpush.msra.mxu2 %v8410_v4 }
 0xb81   :  { %1939 = vmatpush.msra.mxu2 %v8411_v51 }
 0xb83   :  { %1940 = vmatpush.msra.mxu2 %v8412_v24 }
 0xb85   :  { %1941 = vmatpush.msra.mxu2 %v8413_v32 }
 0xbe2   :  { %v1653_v48 = vpop.f32.mrf.mxu1 }
 0xbe3   :  { %v1656_v44 = vadd.f32 %v3478_v8, %v1653_v48  ;;  %v1720_v62 = vpop.f32.mrf.mxu0 }
 0xbe4   :  { %v1721_v26 = vadd.f32 %v1720_v62, %v8415_v5 }
 0xbe5   :  { %3683 = vtanh.f32 %v1656_v44  ;;  %v3480_v13 = vmul.f32 -1.442695, %v1656_v44 }
 0xbe6   :  { %v3483_v61 = vmul.f32 -1.442695, %v1721_v26 }
 0xbe9   :  { %v1740_v3 = vpop.f32.mrf.mxu2 }
 0xbea   :  { %v6250_v56 = vadd.f32 %v1740_v3, %v8414_v2 }
 0xbeb   :  { %v3684_v25 = vpop.eup %3683 }
 0xbec   :  { %3685 = vtanh.f32 %v6250_v56  ;;  %1679 = vrot.lane.b32.xlu0 %v3684_v25, %s4185_s7 }
 0xbed   :  { %3687 = vpow2.f32 %v3480_v13 }
 0xbee   :  { %3689 = vpow2.f32 %v3483_v61 }
 0xbf2   :  { %v3686_v40 = vpop.eup %3685 }
 0xbf3   :  { %1784 = vrot.lane.b32.xlu1 %v3686_v40, %s4186_s13  ;;  %v3688_v28 = vpop.eup %3687 }
 0xbf4   :  { %v1660_v55 = vadd.f32 1.0, %v3688_v28  ;;  %v3690_v37 = vpop.eup %3689 }
 0xbf5   :  { %v1749_v42 = vadd.f32 1.0, %v3690_v37 }
 0xbf6   :  { %3691 = vrcp.f32 %v1660_v55  ;;  %v1672_v4 = vand.u32 2147483648, %v1660_v55  ;;  %vm1666_vm14 = vweird.f32 %v1660_v55  ;;  %v1670_v51 = vand.u32 2147483647, %v1660_v55 }
 0xbf7   :  { %3693 = vrcp.f32 %v1749_v42  ;;  %v1762_v40 = vand.u32 2147483648, %v1749_v42  ;;  %vm1756_vm3 = vweird.f32 %v1749_v42  ;;  %v1760_v13 = vand.u32 2147483647, %v1749_v42 }
 0xbf8   :  { %v1673_v8 = vor.u32 1.1754944e-38, %v1672_v4  ;;  %vm1671_vm1 = vcmp.eq.f32.partialorder %v1670_v51, 8.507059e+37  ;;  %v6320_v4 = vld [vmem:[%s7869_s2 + $0x90] sm:$0xff]  ;;  %v6326_v51 = vld [vmem:[%s7871_s4 + $0x2a0] sm:$0xff] }
 0xbf9   :  { %v1763_v26 = vor.u32 1.1754944e-38, %v1762_v40  ;;  %vm1761_vm7 = vcmp.eq.f32.partialorder %v1760_v13, 8.507059e+37  ;;  %v6383_v40 = vld [vmem:[%s7871_s4 + $0x260] sm:$0xff]  ;;  %v6389_v13 = vld [vmem:[%s7869_s2 + $0x98] sm:$0xff] }
 0xbfc   :  { %v3692_v63 = vpop.eup %3691 }
 0xbfd   :  { %v1662_v10 = vmul.f32 %v3692_v63, %v1660_v55  ;;  %v3694_v12 = vpop.eup %3693  ;;  %vm1667_vm13 = vweird.f32 %v3692_v63 }
 0xbfe   :  { %v1752_v46 = vmul.f32 %v3694_v12, %v1749_v42  ;;  %vm1668_vm15 = vmor %vm1666_vm14, %vm1667_vm13  ;;  %vm1757_vm2 = vweird.f32 %v3694_v12 }
 0xbff   :  { %v1663_v29 = vsub.f32 1.0, %v1662_v10  ;;  %vm1758_vm4 = vmor %vm1756_vm3, %vm1757_vm2 }
 0xc00   :  { %v1753_v59 = vsub.f32 1.0, %v1752_v46 }
 0xc01   :  { %v1664_v9 = vmul.f32 %v3692_v63, %v1663_v29 }
 0xc02   :  { %v1754_v24 = vmul.f32 %v3694_v12, %v1753_v59  ;;  %v6288_v59 = vld [vmem:[%s7871_s4 + $0x2e0] sm:$0xff] }
 0xc03   :  { %v1665_v49 = vadd.f32 %v3692_v63, %v1664_v9 }
 0xc04   :  { %v1755_v3 = vadd.f32 %v3694_v12, %v1754_v24  ;;  %v6341_v24 = vld [vmem:[%s7869_s2 + $0xb8] sm:$0xff] }
 0xc05   :  { %v1669_v32 = vsel %vm1668_vm15, %v3692_v63, %v1665_v49  ;;  %v6307_v49 = vld [vmem:[%s7871_s4 + $0x2c0] sm:$0xff] }
 0xc06   :  { %v6256_v44 = vsel %vm1671_vm1, %v1673_v8, %v1669_v32  ;;  %v1759_v62 = vsel %vm1758_vm4, %v3694_v12, %v1755_v3  ;;  %v6347_v32 = vld [vmem:[%s7871_s4 + $0x1a0] sm:$0xff] }
 0xc07   :  { %v1764_v28 = vsel %vm1761_vm7, %v1763_v26, %v1759_v62  ;;  %v1677_v37 = vmul.f32 %v6256_v44, %v5952_v7  ;;  %v6359_v8 = vld [vmem:[%s7871_s4 + $0x280] sm:$0xff]  ;;  %v6401_v26 = vld [vmem:[%s7869_s2 + $0x50] sm:$0xff] }
 0xc08   :  { %v1782_v12 = vmul.f32 %v1764_v28, %v5957_v43  ;;  %v6282_v43 = vld [vmem:[%s7869_s2 + $0xb0] sm:$0xff]  ;;  %v6371_v3 = vld [vmem:[%s7871_s4 + $0x180] sm:$0xff] }
 0xc09   :  { %v6395_v62 = vld [vmem:[%s7871_s4 + $0x160] sm:$0xff] }
 0xc5e   :  { %v1680_v48 = vpop.permute.xlu0 %1679 }
 0xc5f   :  { %v1682_v25 = vmul.f32 %v1680_v48, %v6256_v44  ;;  %v6365_v48 = vld [vmem:[%s7869_s2 + $0xa8] sm:$0xff] }
 0xc61   :  { %1684 = vrot.lane.b32.xlu2 %v1682_v25, %s4185_s7  ;;  %v6377_v25 = vld [vmem:[%s7869_s2 + $0x60] sm:$0xff] }
 0xc65   :  { %v1785_v61 = vpop.permute.xlu1 %1784 }
 0xc66   :  { %v1787_v55 = vmul.f32 %v1785_v61, %v1764_v28  ;;  %v6407_v61 = vld [vmem:[%s7871_s4 + $0x240] sm:$0xff]  ;;  %v6413_v28 = vld [vmem:[%s7869_s2 + $0x88] sm:$0xff] }
 0xc67   :  { %8418 = vst [vmem:[#allocation14_spill] sm:$0xff] %v6413_v28 }
 0xc68   :  { %1789 = vrot.lane.b32.xlu0 %v1787_v55, %s4186_s13  ;;  %v6419_v55 = vld [vmem:[%s7871_s4 + $0x140] sm:$0xff] }
 0xc70   :  { %1800 = vrot.lane.b32.xlu0 %v6164_v41, %s4186_s13 }
 0xcbb   :  { %v1685_v63 = vpop.permute.xlu2 %1684 }
 0xcbc   :  { %v6265_v10 = vadd.f32 %v1685_v63, %v1677_v37  ;;  %v6425_v37 = vld [vmem:[%s7869_s2 + $0x40] sm:$0xff] }
 0xcbd   :  { %v6431_v63 = vld [vmem:[%s7871_s4 + $0x220] sm:$0xff] }
 0xcbe   :  { %8416 = vst [vmem:[#allocation15_spill] sm:$0xff] %v6265_v10  ;;  %3695 = vtanh.f32 %v6265_v10  ;;  %v6479_v10 = vld [vmem:[%s7871_s4 + $0x1f0] sm:$0xff] }
 0xcc4   :  { %v3696_v42 = vpop.eup %3695 }
 0xcc5   :  { %1690 = vrot.lane.b32.xlu1 %v3696_v42, %s4185_s7  ;;  %v6437_v42 = vld [vmem:[%s7869_s2 + $0x78] sm:$0xff] }
 0xcc6   :  { %8419 = vst [vmem:[#allocation31_spill] sm:$0xff] %v6437_v42 }
 0xcda   :  { %v1790_v29 = vpop.permute.xlu0 %1789 }
 0xcdb   :  { %v6270_v46 = vadd.f32 %v1790_v29, %v1782_v12  ;;  %v6443_v12 = vld [vmem:[%s7871_s4 + $0x120] sm:$0xff]  ;;  %v6449_v29 = vld [vmem:[%s7869_s2 + $0x30] sm:$0xff] }
 0xcdc   :  { %8420 = vst [vmem:[#allocation16_spill] sm:$0xff] %v6449_v29 }
 0xcdd   :  { %8417 = vst [vmem:[#allocation56_spill] sm:$0xff] %v6270_v46  ;;  %3697 = vtanh.f32 %v6270_v46  ;;  %v6473_v46 = vld [vmem:[%s7869_s2 + $0x20] sm:$0xff] }
 0xcde   :  { %8422 = vst [vmem:[#allocation61_spill] sm:$0xff] %v6473_v46 }
 0xce2   :  { %v1801_v9 = vpop.permute.xlu0 %1800 }
 0xce3   :  { %v3698_v41 = vpop.eup %3697  ;;  %3485 = vmatmul.msk.f32.vlgmr.msra.gmra.mxu3 %vm30_vm5, %v1801_v9  ;;  %3486 = vmatmul.msk.f32.vlgmr.msrb.gmra.mxu2 %vm30_vm5, %v1801_v9  ;;  %v1803_v7 = vsel %vm30_vm5, %v6152_v34, %v1801_v9  ;;  %v6301_v34 = vld [vmem:[%s7869_s2 + $0xa0] sm:$0xff] }
 0xce4   :  { %1822 = vmatmul.f32.vlgmr.msrb.gmra.mxu1 %v1803_v7  ;;  %1862 = vmatmul.f32.vlgmr.msra.gmra.mxu0 %v1803_v7 }
 0xce5   :  { %1795 = vrot.lane.b32.xlu2 %v3698_v41, %s4186_s13  ;;  %2050 = vmatpush.msrb.mxu1 %v5970_v27  ;;  %v6295_v27 = vld [vmem:[%s7871_s4 + $0x1e0] sm:$0xff]  ;;  %v6461_v41 = vld [vmem:[%s7869_s2 + $0x68] sm:$0xff] }
 0xce6   :  { %2109 = vmatpush.msra.mxu3 %v6282_v43  ;;  %2236 = vmatpush.msrb.mxu2 %v6288_v59  ;;  %8421 = vst [vmem:[#allocation28_spill] sm:$0xff] %v6461_v41 }
 0xce7   :  { %2051 = vmatpush.msrb.mxu1 %v5979_v50  ;;  %2208 = vmatpush.msra.mxu0 %v6295_v27  ;;  %v6314_v50 = vld [vmem:[%s7871_s4 + $0x1c0] sm:$0xff] }
 0xce8   :  { %2110 = vmatpush.msra.mxu3 %v6301_v34  ;;  %2237 = vmatpush.msrb.mxu2 %v6307_v49 }
 0xce9   :  { %2052 = vmatpush.msrb.mxu1 %v5988_v19  ;;  %2209 = vmatpush.msra.mxu0 %v6314_v50  ;;  %v6335_v19 = vld [vmem:[%s7869_s2 + $0x80] sm:$0xff] }
 0xcea   :  { %2111 = vmatpush.msra.mxu3 %v6320_v4  ;;  %2238 = vmatpush.msrb.mxu2 %v6326_v51 }
 0xceb   :  { %1902 = vmatmul.f32.vlgmr.msrb.gmra.mxu3 %v1803_v7  ;;  %1942 = vmatmul.f32.vlgmr.msra.gmra.mxu2 %v1803_v7  ;;  %v6467_v7 = vld [vmem:[%s7871_s4 + $0x100] sm:$0xff] }
 0xcec   :  { %3487 = vmatmul.msk.f32.vlgmr.msra.gmra.mxu1 %vm30_vm5, %v1801_v9  ;;  %3488 = vmatmul.msk.f32.vlgmr.msrb.gmra.mxu0 %vm30_vm5, %v1801_v9  ;;  %v6455_v9 = vld [vmem:[%s7871_s4 + $0x200] sm:$0xff] }
 0xced   :  { %2053 = vmatpush.msrb.mxu1 %v5998_v47  ;;  %2112 = vmatpush.msra.mxu3 %v6335_v19  ;;  %v6353_v47 = vld [vmem:[%s7869_s2 + $0x70] sm:$0xff] }
 0xcee   :  { %2210 = vmatpush.msra.mxu0 %v6347_v32  ;;  %2239 = vmatpush.msrb.mxu2 %v6359_v8 }
 0xcef   :  { %2129 = vmatpush.msra.mxu1 %v6341_v24  ;;  %2113 = vmatpush.msra.mxu3 %v6353_v47 }
 0xcf0   :  { %2211 = vmatpush.msra.mxu0 %v6371_v3  ;;  %2240 = vmatpush.msrb.mxu2 %v6383_v40 }
 0xcf1   :  { %2130 = vmatpush.msra.mxu1 %v6365_v48  ;;  %2114 = vmatpush.msra.mxu3 %v6377_v25 }
 0xcf2   :  { %2212 = vmatpush.msra.mxu0 %v6395_v62  ;;  %2241 = vmatpush.msrb.mxu2 %v6407_v61 }
 0xcf3   :  { %2131 = vmatpush.msra.mxu1 %v6389_v13  ;;  %2115 = vmatpush.msra.mxu3 %v6401_v26 }
 0xcf4   :  { %2213 = vmatpush.msra.mxu0 %v6419_v55  ;;  %2242 = vmatpush.msrb.mxu2 %v6431_v63 }
 0xcf5   :  { %2132 = vmatpush.msra.mxu1 %v6413_v28  ;;  %2116 = vmatpush.msra.mxu3 %v6425_v37  ;;  %v6515_v28 = vld [vmem:[%s7871_s4 + $0xc0] sm:$0xff] }
 0xcf6   :  { %2214 = vmatpush.msra.mxu0 %v6443_v12  ;;  %2243 = vmatpush.msrb.mxu2 %v6455_v9  ;;  %8427 = vst [vmem:[#allocation22_spill] sm:$0xff] %v6515_v28 }
 0xcf7   :  { %2133 = vmatpush.msra.mxu1 %v6437_v42  ;;  %2117 = vmatpush.msra.mxu3 %v6449_v29  ;;  %v6491_v42 = vld [vmem:[%s7871_s4 + $0xe0] sm:$0xff]  ;;  %v6503_v29 = vld [vmem:[%s7871_s4 + $0x1d0] sm:$0xff] }
 0xcf8   :  { %2215 = vmatpush.msra.mxu0 %v6467_v7  ;;  %2288 = vmatpush.msra.mxu2 %v6479_v10  ;;  %8425 = vst [vmem:[#allocation65_spill] sm:$0xff] %v6503_v29 }
 0xcf9   :  { %2134 = vmatpush.msra.mxu1 %v6461_v41  ;;  %2118 = vmatpush.msra.mxu3 %v6473_v46  ;;  %v6485_v41 = vld [vmem:[%s7869_s2 + $0x58] sm:$0xff]  ;;  %v6497_v46 = vld [vmem:[%s7869_s2 + $0x10] sm:$0xff] }
 0xcfa   :  { %8423 = vst [vmem:[#allocation17_spill] sm:$0xff] %v6485_v41  ;;  %2216 = vmatpush.msra.mxu0 %v6491_v42  ;;  %2289 = vmatpush.msra.mxu2 %v6503_v29  ;;  %v6527_v29 = vld [vmem:[%s7871_s4 + $0x1b0] sm:$0xff] }
 0xcfb   :  { %2135 = vmatpush.msra.mxu1 %v6485_v41  ;;  %8424 = vst [vmem:[#allocation34_spill] sm:$0xff] %v6497_v46  ;;  %2119 = vmatpush.msra.mxu3 %v6497_v46  ;;  %v6509_v41 = vld [vmem:[%s7869_s2 + $0x48] sm:$0xff]  ;;  %v6521_v46 = vld [vmem:[%s7869_s2] sm:$0xff] }
 0xcfc   :  { %8426 = vst [vmem:[#allocation20_spill] sm:$0xff] %v6509_v41  ;;  %2217 = vmatpush.msra.mxu0 %v6515_v28  ;;  %2290 = vmatpush.msra.mxu2 %v6527_v29  ;;  %v6539_v28 = vld [vmem:[%s7871_s4 + $0x1e8] sm:$0xff] }
 0xcfd   :  { %2136 = vmatpush.msra.mxu1 %v6509_v41  ;;  %8428 = vst [vmem:[#allocation44_spill] sm:$0xff] %v6521_v46  ;;  %2120 = vmatpush.msra.mxu3 %v6521_v46  ;;  %v6533_v41 = vld [vmem:[%s7869_s2 + $0x38] sm:$0xff]  ;;  %v6545_v46 = vld [vmem:[%s7871_s4 + $0xa0] sm:$0xff] }
 0xcfe   :  { %8429 = vst [vmem:[#allocation69_spill] sm:$0xff] %v6527_v29  ;;  %2218 = vmatpush.msra.mxu0 %v6545_v46  ;;  %v6551_v29 = vld [vmem:[%s7871_s4 + $0x190] sm:$0xff] }
 0xcff   :  { %8430 = vst [vmem:[#allocation11_spill] sm:$0xff] %v6533_v41  ;;  %2137 = vmatpush.msra.mxu1 %v6533_v41  ;;  %2248 = vmatpush.msrb.mxu3 %v6539_v28  ;;  %v6557_v41 = vld [vmem:[%s7869_s2 + $0x28] sm:$0xff] }
 0xd00   :  { %8431 = vst [vmem:[#allocation48_spill] sm:$0xff] %v6539_v28  ;;  %2291 = vmatpush.msra.mxu2 %v6551_v29  ;;  %v6563_v28 = vld [vmem:[%s7871_s4 + $0x1c8] sm:$0xff] }
 0xd01   :  { %8432 = vst [vmem:[#allocation60_spill] sm:$0xff] %v6545_v46  ;;  %2138 = vmatpush.msra.mxu1 %v6557_v41  ;;  %2249 = vmatpush.msrb.mxu3 %v6563_v28  ;;  %v6569_v46 = vld [vmem:[%s7871_s4 + $0x80] sm:$0xff] }
 0xd02   :  { %8433 = vst [vmem:[#allocation76_spill] sm:$0xff] %v6557_v41  ;;  %2219 = vmatpush.msra.mxu0 %v6569_v46  ;;  %2292 = vmatpush.msra.mxu2 %v6046_v15  ;;  %v6576_v41 = vld [vmem:[%s7869_s2 + $0x18] sm:$0xff]  ;;  %v6595_v15 = vld [vmem:[%s7869_s2 + $0x8] sm:$0xff] }
 0xd03   :  { %8434 = vst [vmem:[#allocation52_spill] sm:$0xff] %v6563_v28  ;;  %2139 = vmatpush.msra.mxu1 %v6576_v41  ;;  %v6582_v28 = vld [vmem:[%s7871_s4 + $0x1a8] sm:$0xff] }
 0xd04   :  { %8435 = vst [vmem:[#allocation25_spill] sm:$0xff] %v6569_v46  ;;  %2250 = vmatpush.msrb.mxu3 %v6582_v28  ;;  %v6588_v46 = vld [vmem:[%s7871_s4 + $0x60] sm:$0xff]  ;;  %2293 = vmatpush.msra.mxu2 %v6055_v20  ;;  %v6614_v20 = vld [vmem:[%s7871_s4 + $0x168] sm:$0xff] }
 0xd05   :  { %8436 = vst [vmem:[#allocation73_spill] sm:$0xff] %v6576_v41  ;;  %2220 = vmatpush.msra.mxu0 %v6588_v46  ;;  %2140 = vmatpush.msra.mxu1 %v6595_v15  ;;  %v6601_v41 = vld [vmem:[%s7871_s4 + $0x188] sm:$0xff] }
 0xd06   :  { %8437 = vst [vmem:[#allocation23_spill] sm:$0xff] %v6582_v28  ;;  %2251 = vmatpush.msrb.mxu3 %v6601_v41  ;;  %v6607_v28 = vld [vmem:[%s7871_s4 + $0x40] sm:$0xff]  ;;  %2294 = vmatpush.msra.mxu2 %v6064_v17  ;;  %v6627_v17 = vld [vmem:[%s7871_s4 + $0x148] sm:$0xff] }
 0xd07   :  { %8438 = vst [vmem:[#allocation64_spill] sm:$0xff] %v6595_v15  ;;  %2221 = vmatpush.msra.mxu0 %v6607_v28  ;;  %v6620_v15 = vld [vmem:[%s7871_s4 + $0x20] sm:$0xff] }
 0xd08   :  { %8439 = vst [vmem:[#allocation27_spill] sm:$0xff] %v6614_v20  ;;  %2252 = vmatpush.msrb.mxu3 %v6614_v20  ;;  %2295 = vmatpush.msra.mxu2 %v6073_v60  ;;  %v6635_v20 = vld [vmem:[%s7871_s4 + $0x128] sm:$0xff] }
 0xd09   :  { %2222 = vmatpush.msra.mxu0 %v6620_v15  ;;  %8440 = vst [vmem:[#allocation77_spill] sm:$0xff] %v6627_v17  ;;  %v6643_v60 = vld [vmem:[%s7871_s4 + $0x108] sm:$0xff] }
 0xd0a   :  { %2253 = vmatpush.msrb.mxu3 %v6627_v17  ;;  %2296 = vmatpush.msra.mxu2 %v6082_v54  ;;  %8441 = vst [vmem:[#allocation72_spill] sm:$0xff] %v6635_v20  ;;  %v6651_v54 = vld [vmem:[%s7871_s4 + $0xe8] sm:$0xff] }
 0xd0b   :  { %2223 = vmatpush.msra.mxu0 %v6098_v6  ;;  %8442 = vst [vmem:[#allocation68_spill] sm:$0xff] %v6643_v60  ;;  %v3484_v6 = vmul.f32 -1.442695, %v6250_v56 }
 0xd0c   :  { %2254 = vmatpush.msrb.mxu3 %v6635_v20  ;;  %2297 = vmatpush.msra.mxu2 %v6091_v16  ;;  %8443 = vst [vmem:[#allocation29_spill] sm:$0xff] %v6651_v54  ;;  %v6659_v16 = vld [vmem:[%s7871_s4 + $0xc8] sm:$0xff] }
 0xd0d   :  { %2316 = vmatpush.msrb.mxu0 %v6178_v1  ;;  %8444 = vst [vmem:[#allocation33_spill] sm:$0xff] %v6659_v16  ;;  %3699 = vpow2.f32 %v3484_v6 }
 0xd0e   :  { %2255 = vmatpush.msrb.mxu3 %v6643_v60  ;;  %2298 = vmatpush.msra.mxu2 %v6104_v57  ;;  %v6668_v57 = vld [vmem:[%s7871_s4 + $0xa8] sm:$0xff] }
 0xd0f   :  { %2317 = vmatpush.msrb.mxu0 %v6186_v21  ;;  %8445 = vst [vmem:[#allocation43_spill] sm:$0xff] %v6668_v57 }
 0xd10   :  { %2256 = vmatpush.msrb.mxu3 %v6651_v54  ;;  %2299 = vmatpush.msra.mxu2 %v6111_v53  ;;  %v6676_v53 = vld [vmem:[%s7871_s4 + $0x88] sm:$0xff] }
 0xd11   :  { %2318 = vmatpush.msrb.mxu0 %v6194_v58  ;;  %8446 = vst [vmem:[#allocation12_spill] sm:$0xff] %v6676_v53 }
 0xd12   :  { %2257 = vmatpush.msrb.mxu3 %v6659_v16  ;;  %2300 = vmatpush.msra.mxu2 %v6119_v11  ;;  %v6684_v11 = vld [vmem:[%s7871_s4 + $0x68] sm:$0xff] }
 0xd13   :  { %2319 = vmatpush.msrb.mxu0 %v6202_v33  ;;  %8447 = vst [vmem:[#allocation18_spill] sm:$0xff] %v6684_v11  ;;  %v3700_v56 = vpop.eup %3699 }
 0xd14   :  { %2258 = vmatpush.msrb.mxu3 %v6668_v57  ;;  %2301 = vmatpush.msra.mxu2 %v6126_v30  ;;  %v6692_v30 = vld [vmem:[%s7871_s4 + $0x48] sm:$0xff] }
 0xd15   :  { %2320 = vmatpush.msrb.mxu0 %v6210_v31  ;;  %8448 = vst [vmem:[#allocation19_spill] sm:$0xff] %v6692_v30 }
 0xd16   :  { %2259 = vmatpush.msrb.mxu3 %v6676_v53  ;;  %2302 = vmatpush.msra.mxu2 %v6133_v45  ;;  %v6699_v45 = vld [vmem:[%s7871_s4 + $0x28] sm:$0xff] }
 0xd17   :  { %2321 = vmatpush.msrb.mxu0 %v6218_v39  ;;  %8449 = vst [vmem:[#allocation21_spill] sm:$0xff] %v6699_v45 }
 0xd18   :  { %2260 = vmatpush.msrb.mxu3 %v6684_v11  ;;  %2303 = vmatpush.msra.mxu2 %v6140_v52  ;;  %v1750_v52 = vadd.f32 1.0, %v3700_v56 }
 0xd19   :  { %2322 = vmatpush.msrb.mxu0 %v6226_v0 }
 0xd1a   :  { %2261 = vmatpush.msrb.mxu3 %v6692_v30  ;;  %3701 = vrcp.f32 %v1750_v52  ;;  %v1777_v16 = vand.u32 2147483648, %v1750_v52  ;;  %vm1771_vm9 = vweird.f32 %v1750_v52  ;;  %v1775_v39 = vand.u32 2147483647, %v1750_v52 }
 0xd1b   :  { %2323 = vmatpush.msrb.mxu0 %v6234_v14 }
 0xd1c   :  { %2262 = vmatpush.msrb.mxu3 %v6699_v45  ;;  %v1778_v54 = vor.u32 1.1754944e-38, %v1777_v16  ;;  %vm1776_vm11 = vcmp.eq.f32.partialorder %v1775_v39, 8.507059e+37 }
 0xd1e   :  { %2263 = vmatpush.msrb.mxu3 %v6147_v18 }
 0xd20   :  { %v3702_v6 = vpop.eup %3701 }
 0xd21   :  { %v1767_v11 = vmul.f32 %v3702_v6, %v1750_v52  ;;  %vm1772_vm8 = vweird.f32 %v3702_v6 }
 0xd22   :  { %vm1773_vm10 = vmor %vm1771_vm9, %vm1772_vm8 }
 0xd23   :  { %v1768_v53 = vsub.f32 1.0, %v1767_v11 }
 0xd25   :  { %v1769_v57 = vmul.f32 %v3702_v6, %v1768_v53 }
 0xd27   :  { %v1770_v14 = vadd.f32 %v3702_v6, %v1769_v57 }
 0xd29   :  { %v1774_v45 = vsel %vm1773_vm10, %v3702_v6, %v1770_v14 }
 0xd2a   :  { %v1779_v18 = vsel %vm1776_vm11, %v1778_v54, %v1774_v45 }
 0xd37   :  { %v1691_v0 = vpop.permute.xlu1 %1690 }
 0xd38   :  { %v1693_v30 = vmul.f32 %v1691_v0, %v6256_v44 }
 0xd3a   :  { %2034 = vrot.lane.b32.xlu1 %v1693_v30, %s4186_s13 }
 0xd3f   :  { %v1796_v56 = vpop.permute.xlu2 %1795 }
 0xd40   :  { %v6705_v31 = vmul.f32 %v1796_v56, %v1779_v18 }
 0xd42   :  { %2098 = vrot.lane.b32.xlu2 %v6705_v31, %s4185_s7 }
 0xd61   :  { %v1823_v53 = vpop.f32.mrf.mxu1  ;;  %v1863_v0 = vpop.f32.mrf.mxu0 }
 0xd62   :  { %v1824_v44 = vadd.f32 %v1823_v53, %v8381_v23  ;;  %v1864_v57 = vadd.f32 %v1863_v0, %v8380_v36 }
 0xd66   :  { %v1843_v11 = vpop.f32.mrf.mxu3  ;;  %v1883_v30 = vpop.f32.mrf.mxu2 }
 0xd67   :  { %v1844_v52 = vadd.f32 %v1843_v11, %v1824_v44  ;;  %v1884_v60 = vadd.f32 %v1883_v30, %v1864_v57 }
 0xd69   :  { %v3489_v14 = vmul.f32 -1.442695, %v1844_v52  ;;  %v3490_v16 = vmul.f32 -1.442695, %v1884_v60  ;;  %v1923_v45 = vpop.f32.mrf.mxu1  ;;  %v1963_v44 = vpop.f32.mrf.mxu0 }
 0xd6b   :  { %3703 = vpow2.f32 %v3489_v14 }
 0xd6c   :  { %3705 = vpow2.f32 %v3490_v16 }
 0xd6e   :  { %v1903_v39 = vpop.f32.mrf.mxu3  ;;  %v1943_v23 = vpop.f32.mrf.mxu2 }
 0xd6f   :  { %v1904_v54 = vadd.f32 %v1903_v39, %v8382_v22  ;;  %v1944_v0 = vadd.f32 %v1943_v23, %v8383_v38 }
 0xd71   :  { %v3704_v6 = vpop.eup %3703  ;;  %v1924_v18 = vadd.f32 %v1923_v45, %v1904_v54  ;;  %v1964_v57 = vadd.f32 %v1963_v44, %v1944_v0 }
 0xd72   :  { %v3706_v56 = vpop.eup %3705  ;;  %v1975_v33 = vadd.f32 1.0, %v3704_v6 }
 0xd73   :  { %v1976_v20 = vadd.f32 1.0, %v3706_v56  ;;  %v3491_v53 = vmul.f32 -1.442695, %v1924_v18 }
 0xd74   :  { %3707 = vrcp.f32 %v1975_v33  ;;  %v1989_v54 = vand.u32 2147483648, %v1975_v33  ;;  %v1987_v6 = vand.u32 2147483647, %v1975_v33  ;;  %vm1983_vm14 = vweird.f32 %v1975_v33 }
 0xd75   :  { %3709 = vrcp.f32 %v1976_v20  ;;  %v2004_v56 = vand.u32 2147483648, %v1976_v20  ;;  %v2002_v23 = vand.u32 2147483647, %v1976_v20  ;;  %vm1998_vm15 = vweird.f32 %v1976_v20 }
 0xd76   :  { %3711 = vpow2.f32 %v3491_v53  ;;  %v1990_v44 = vor.u32 1.1754944e-38, %v1989_v54  ;;  %vm1988_vm3 = vcmp.eq.f32.partialorder %v1987_v6, 8.507059e+37 }
 0xd77   :  { %3713 = vtanh.f32 %v1964_v57  ;;  %vm2003_vm4 = vcmp.eq.f32.partialorder %v2002_v23, 8.507059e+37 }
 0xd7a   :  { %v3708_v60 = vpop.eup %3707 }
 0xd7b   :  { %v3710_v11 = vpop.eup %3709  ;;  %v1979_v30 = vmul.f32 %v3708_v60, %v1975_v33  ;;  %vm1984_vm12 = vweird.f32 %v3708_v60 }
 0xd7c   :  { %v3712_v52 = vpop.eup %3711  ;;  %v1994_v14 = vmul.f32 %v3710_v11, %v1976_v20  ;;  %vm1999_vm13 = vweird.f32 %v3710_v11  ;;  %vm1985_vm1 = vmor %vm1983_vm14, %vm1984_vm12 }
 0xd7d   :  { %v1980_v16 = vsub.f32 1.0, %v1979_v30  ;;  %v1977_v39 = vadd.f32 1.0, %v3712_v52  ;;  %vm2000_vm2 = vmor %vm1998_vm15, %vm1999_vm13  ;;  %v2005_v30 = vor.u32 1.1754944e-38, %v2004_v56 }
 0xd7e   :  { %v1995_v45 = vsub.f32 1.0, %v1994_v14  ;;  %v3714_v14 = vpop.eup %3713 }
 0xd7f   :  { %v1981_v18 = vmul.f32 %v3708_v60, %v1980_v16  ;;  %3715 = vrcp.f32 %v1977_v39  ;;  %v2019_v20 = vand.u32 2147483648, %v1977_v39  ;;  %v2017_v54 = vand.u32 2147483647, %v1977_v39 }
 0xd80   :  { %v1996_v53 = vmul.f32 %v3710_v11, %v1995_v45  ;;  %vm2013_vm8 = vweird.f32 %v1977_v39 }
 0xd81   :  { %v1982_v38 = vadd.f32 %v3708_v60, %v1981_v18  ;;  %vm2018_vm10 = vcmp.eq.f32.partialorder %v2017_v54, 8.507059e+37  ;;  %v6814_v54 = vld [vmem:[%s7871_s4 + $0x208] sm:$0xff] }
 0xd82   :  { %v1997_v0 = vadd.f32 %v3710_v11, %v1996_v53  ;;  %8457 = vst [vmem:[#allocation53_spill] sm:$0xff] %v6814_v54 }
 0xd83   :  { %v1986_v52 = vsel %vm1985_vm1, %v3708_v60, %v1982_v38  ;;  %v2020_v60 = vor.u32 1.1754944e-38, %v2019_v20  ;;  %v6802_v20 = vld [vmem:[%s7871_s4 + $0x228] sm:$0xff] }
 0xd84   :  { %v1991_v57 = vsel %vm1988_vm3, %v1990_v44, %v1986_v52  ;;  %v2001_v16 = vsel %vm2000_vm2, %v3710_v11, %v1997_v0  ;;  %v6747_v0 = vld [vmem:[%s7871_s4 + $0x2d8] sm:$0xff]  ;;  %v6753_v44 = vld [vmem:[%s7871_s4 + $0x2a8] sm:$0xff] }
 0xd85   :  { %v3716_v22 = vpop.eup %3715  ;;  %v2006_v36 = vsel %vm2003_vm4, %v2005_v30, %v2001_v16  ;;  %v2025_v58 = vmul.f32 %v3714_v14, %v1991_v57  ;;  %8451 = vst [vmem:[#allocation41_spill] sm:$0xff] %v6747_v0  ;;  %v6759_v30 = vld [vmem:[%s7871_s4 + $0x2b8] sm:$0xff]  ;;  %v6765_v52 = vld [vmem:[%s7871_s4 + $0x288] sm:$0xff] }
 0xd86   :  { %v2024_v45 = vmul.f32 %v2006_v36, %v6161_v35  ;;  %v2009_v17 = vmul.f32 %v3716_v22, %v1977_v39  ;;  %vm2014_vm7 = vweird.f32 %v3716_v22  ;;  %v6741_v39 = vld [vmem:[%s7871_s4 + $0x2c8] sm:$0xff]  ;;  %8452 = vst [vmem:[#allocation35_spill] sm:$0xff] %v6759_v30  ;;  %v6772_v14 = vld [vmem:[%s7871_s4 + $0x298] sm:$0xff] }
 0xd87   :  { %vm2015_vm9 = vmor %vm2013_vm8, %vm2014_vm7  ;;  %8453 = vst [vmem:[#allocation45_spill] sm:$0xff] %v6772_v14  ;;  %v6778_v57 = vld [vmem:[%s7871_s4 + $0x268] sm:$0xff]  ;;  %v6784_v16 = vld [vmem:[%s7871_s4 + $0x278] sm:$0xff] }
 0xd88   :  { %v6714_v33 = vadd.f32 %v2025_v58, %v2024_v45  ;;  %v2010_v18 = vsub.f32 1.0, %v2009_v17  ;;  %v6735_v17 = vld [vmem:[%s7871_s4 + $0x2f8] sm:$0xff]  ;;  %8454 = vst [vmem:[#allocation59_spill] sm:$0xff] %v6784_v16  ;;  %v6790_v45 = vld [vmem:[%s7871_s4 + $0x248] sm:$0xff] }
 0xd89   :  { %8450 = vst [vmem:[#allocation32_spill] sm:$0xff] %v6735_v17 }
 0xd8a   :  { %v2011_v53 = vmul.f32 %v3716_v22, %v2010_v18  ;;  %3717 = vtanh.f32 %v6714_v33  ;;  %v6796_v18 = vld [vmem:[%s7871_s4 + $0x258] sm:$0xff] }
 0xd8b   :  { %8455 = vst [vmem:[#allocation49_spill] sm:$0xff] %v6796_v18 }
 0xd8c   :  { %v2012_v38 = vadd.f32 %v3716_v22, %v2011_v53  ;;  %v6808_v53 = vld [vmem:[%s7871_s4 + $0x238] sm:$0xff] }
 0xd8d   :  { %8456 = vst [vmem:[#allocation36_spill] sm:$0xff] %v6808_v53 }
 0xd8e   :  { %v2016_v11 = vsel %vm2015_vm9, %v3716_v22, %v2012_v38  ;;  %v6729_v22 = vld [vmem:[%s7871_s4 + $0x2e8] sm:$0xff]  ;;  %v6820_v38 = vld [vmem:[%s7871_s4 + $0x1f8] sm:$0xff] }
 0xd8f   :  { %v2021_v6 = vsel %vm2018_vm10, %v2020_v60, %v2016_v11  ;;  %8458 = vst [vmem:[#allocation63_spill] sm:$0xff] %v6820_v38  ;;  %v6826_v60 = vld [vmem:[%s7871_s4 + $0x218] sm:$0xff] }
 0xd90   :  { %v3718_v56 = vpop.eup %3717  ;;  %8459 = vst [vmem:[#allocation47_spill] sm:$0xff] %v6826_v60  ;;  %v6832_v11 = vld [vmem:[%s7871_s4 + $0x1d8] sm:$0xff] }
 0xd91   :  { %v6717_v23 = vmul.f32 %v3718_v56, %v2021_v6  ;;  %8460 = vst [vmem:[#allocation37_spill] sm:$0xff] %v6832_v11  ;;  %v6838_v6 = vld [vmem:[%s7871_s4 + $0x1b8] sm:$0xff] }
 0xd92   :  { %8461 = vst [vmem:[#allocation57_spill] sm:$0xff] %v6838_v6  ;;  %v6844_v56 = vld [vmem:[%s7871_s4 + $0x198] sm:$0xff] }
 0xd93   :  { %3492 = vst [vmem:[%s7873_s6 + $0x18] sm:$0xff] %v6717_v23 }
 0xd94   :  { %8462 = vst [vmem:[#allocation67_spill] sm:$0xff] %v6844_v56 }
 0xd9c   :  { %v2099_v36 = vpop.permute.xlu2 %2098 }
 0xdac   :  { %v2035_v35 = vpop.permute.xlu1 %2034 }
 0xdad   :  { %v2101_v58 = vsel %vm27_vm0, %v2035_v35, %v2099_v36  ;;  %3494 = vmatmul.msk.f32.vlgmr.msrb.gmra.mxu1 %vm27_vm0, %v2035_v35  ;;  %v6850_v36 = vld [vmem:[%s7871_s4 + $0x178] sm:$0xff] }
 0xdae   :  { %3496 = vmatmul.msk.f32.vlgmr.msra.gmra.mxu3 %vm248_vm6, %v2101_v58  ;;  %2276 = vmatpush.msrb.mxu1 %v6729_v22  ;;  %8463 = vst [vmem:[#allocation51_spill] sm:$0xff] %v6850_v36  ;;  %v6856_v35 = vld [vmem:[%s7871_s4 + $0x158] sm:$0xff] }
 0xdaf   :  { %2356 = vmatpush.msra.mxu3 %v6735_v17  ;;  %8464 = vst [vmem:[#allocation38_spill] sm:$0xff] %v6856_v35 }
 0xdb0   :  { %2277 = vmatpush.msrb.mxu1 %v6741_v39 }
 0xdb1   :  { %2357 = vmatpush.msra.mxu3 %v6747_v0 }
 0xdb2   :  { %2278 = vmatpush.msrb.mxu1 %v6753_v44 }
 0xdb3   :  { %2358 = vmatpush.msra.mxu3 %v6759_v30 }
 0xdb4   :  { %2279 = vmatpush.msrb.mxu1 %v6765_v52 }
 0xdb5   :  { %3497 = vmatmul.msk.f32.vlgmr.msra.gmra.mxu1 %vm248_vm6, %v2101_v58  ;;  %2359 = vmatpush.msra.mxu3 %v6772_v14  ;;  %v6862_v58 = vld [vmem:[%s7871_s4 + $0x138] sm:$0xff] }
 0xdb6   :  { %2280 = vmatpush.msrb.mxu1 %v6778_v57  ;;  %8465 = vst [vmem:[#allocation55_spill] sm:$0xff] %v6862_v58 }
 0xdb7   :  { %2360 = vmatpush.msra.mxu3 %v6784_v16 }
 0xdb8   :  { %2281 = vmatpush.msrb.mxu1 %v6790_v45 }
 0xdb9   :  { %2361 = vmatpush.msra.mxu3 %v6796_v18  ;;  %v6880_v18 = vld [vmem:[%s7871_s4 + $0xd8] sm:$0xff] }
 0xdba   :  { %2282 = vmatpush.msrb.mxu1 %v6802_v20  ;;  %8468 = vst [vmem:[#allocation75_spill] sm:$0xff] %v6880_v18 }
 0xdbb   :  { %2362 = vmatpush.msra.mxu3 %v6808_v53  ;;  %v6874_v53 = vld [vmem:[%s7871_s4 + $0xf8] sm:$0xff] }
 0xdbc   :  { %2283 = vmatpush.msrb.mxu1 %v6814_v54  ;;  %8467 = vst [vmem:[#allocation39_spill] sm:$0xff] %v6874_v53 }
 0xdbd   :  { %2363 = vmatpush.msra.mxu3 %v6826_v60  ;;  %v6868_v60 = vld [vmem:[%s7871_s4 + $0x118] sm:$0xff] }
 0xdbe   :  { %2328 = vmatpush.msra.mxu1 %v6820_v38  ;;  %8466 = vst [vmem:[#allocation71_spill] sm:$0xff] %v6868_v60 }
 0xdc0   :  { %2329 = vmatpush.msra.mxu1 %v6832_v11 }
 0xdc2   :  { %2330 = vmatpush.msra.mxu1 %v6838_v6 }
 0xdc4   :  { %2331 = vmatpush.msra.mxu1 %v6844_v56 }
 0xdc6   :  { %2332 = vmatpush.msra.mxu1 %v6850_v36 }
 0xdc8   :  { %2333 = vmatpush.msra.mxu1 %v6856_v35 }
 0xdca   :  { %2334 = vmatpush.msra.mxu1 %v6862_v58  ;;  %v6886_v58 = vld [vmem:[%s7871_s4 + $0xb8] sm:$0xff] }
 0xdcb   :  { %8469 = vst [vmem:[#allocation40_spill] sm:$0xff] %v6886_v58 }
 0xdcc   :  { %2335 = vmatpush.msra.mxu1 %v6868_v60  ;;  %v6892_v60 = vld [vmem:[%s7871_s4 + $0x98] sm:$0xff] }
 0xdcd   :  { %8470 = vst [vmem:[#allocation42_spill] sm:$0xff] %v6892_v60 }
 0xdce   :  { %2336 = vmatpush.msra.mxu1 %v6874_v53  ;;  %v6898_v53 = vld [vmem:[%s7871_s4 + $0x78] sm:$0xff] }
 0xdcf   :  { %8471 = vst [vmem:[#allocation46_spill] sm:$0xff] %v6898_v53 }
 0xdd0   :  { %2337 = vmatpush.msra.mxu1 %v6880_v18  ;;  %v6904_v18 = vld [vmem:[%s7871_s4 + $0x58] sm:$0xff] }
 0xdd1   :  { %8472 = vst [vmem:[#allocation50_spill] sm:$0xff] %v6904_v18 }
 0xdd2   :  { %2338 = vmatpush.msra.mxu1 %v6886_v58  ;;  %v6910_v58 = vld [vmem:[%s7871_s4 + $0x38] sm:$0xff] }
 0xdd3   :  { %8473 = vst [vmem:[#allocation54_spill] sm:$0xff] %v6910_v58 }
 0xdd4   :  { %2339 = vmatpush.msra.mxu1 %v6892_v60  ;;  %v6916_v60 = vld [vmem:[%s7871_s4 + $0x18] sm:$0xff] }
 0xdd5   :  { %8474 = vst [vmem:[#allocation78_spill] sm:$0xff] %v6916_v60 }
 0xdd6   :  { %2340 = vmatpush.msra.mxu1 %v6898_v53  ;;  %v3493_v53 = vld [vmem:[%s7868_s0 + $0x30] sm:$0xff] }
 0xdd8   :  { %2341 = vmatpush.msra.mxu1 %v6904_v18 }
 0xdda   :  { %2342 = vmatpush.msra.mxu1 %v6910_v58 }
 0xddc   :  { %2343 = vmatpush.msra.mxu1 %v6916_v60 }
 0xe2a   :  { %v2055_v35 = vpop.f32.mrf.mxu1 }
 0xe2b   :  { %v2058_v18 = vadd.f32 %v3493_v53, %v2055_v35 }
 0xe2d   :  { %3719 = vtanh.f32 %v2058_v18  ;;  %v3495_v60 = vmul.f32 -1.442695, %v2058_v18 }
 0xe31   :  { %v2122_v56 = vpop.f32.mrf.mxu3 }
 0xe32   :  { %v2142_v16 = vpop.f32.mrf.mxu1  ;;  %v2123_v53 = vadd.f32 %v2122_v56, %v8415_v5 }
 0xe33   :  { %v3720_v36 = vpop.eup %3719  ;;  %v6923_v14 = vadd.f32 %v2142_v16, %v8414_v2 }
 0xe34   :  { %2081 = vrot.lane.b32.xlu0 %v3720_v36, %s4185_s7  ;;  %v3498_v35 = vmul.f32 -1.442695, %v2123_v53 }
 0xe35   :  { %3721 = vtanh.f32 %v6923_v14 }
 0xe36   :  { %3723 = vpow2.f32 %v3495_v60 }
 0xe37   :  { %3725 = vpow2.f32 %v3498_v35 }
 0xe3b   :  { %v3722_v58 = vpop.eup %3721 }
 0xe3c   :  { %2186 = vrot.lane.b32.xlu1 %v3722_v58, %s4186_s13  ;;  %v3724_v30 = vpop.eup %3723 }
 0xe3d   :  { %v2062_v16 = vadd.f32 1.0, %v3724_v30  ;;  %v3726_v2 = vpop.eup %3725 }
 0xe3e   :  { %v2151_v36 = vadd.f32 1.0, %v3726_v2 }
 0xe3f   :  { %3727 = vrcp.f32 %v2062_v16  ;;  %v2074_v60 = vand.u32 2147483648, %v2062_v16  ;;  %vm2068_vm12 = vweird.f32 %v2062_v16  ;;  %v2072_v56 = vand.u32 2147483647, %v2062_v16 }
 0xe40   :  { %3729 = vrcp.f32 %v2151_v36  ;;  %vm2158_vm1 = vweird.f32 %v2151_v36 }
 0xe41   :  { %v2075_v30 = vor.u32 1.1754944e-38, %v2074_v60  ;;  %vm2073_vm14 = vcmp.eq.f32.partialorder %v2072_v56, 8.507059e+37  ;;  %v8499_v56 = vld [vmem:[#allocation72_spill] sm:$0xff] }
 0xe44   :  { %2202 = vrot.lane.b32.xlu1 %v6717_v23, %s4186_s13 }
 0xe45   :  { %v3728_v6 = vpop.eup %3727 }
 0xe46   :  { %v2064_v0 = vmul.f32 %v3728_v6, %v2062_v16  ;;  %v3730_v58 = vpop.eup %3729  ;;  %vm2069_vm11 = vweird.f32 %v3728_v6 }
 0xe47   :  { %v2154_v38 = vmul.f32 %v3730_v58, %v2151_v36  ;;  %vm2070_vm13 = vmor %vm2068_vm12, %vm2069_vm11  ;;  %vm2159_vm15 = vweird.f32 %v3730_v58 }
 0xe48   :  { %v2065_v11 = vsub.f32 1.0, %v2064_v0  ;;  %vm2160_vm2 = vmor %vm2158_vm1, %vm2159_vm15 }
 0xe49   :  { %v2155_v18 = vsub.f32 1.0, %v2154_v38 }
 0xe4a   :  { %v2066_v17 = vmul.f32 %v3728_v6, %v2065_v11  ;;  %v2164_v11 = vand.u32 2147483648, %v2151_v36 }
 0xe4b   :  { %v2156_v35 = vmul.f32 %v3730_v58, %v2155_v18 }
 0xe4c   :  { %v2067_v23 = vadd.f32 %v3728_v6, %v2066_v17  ;;  %v2162_v17 = vand.u32 2147483647, %v2151_v36  ;;  %v2165_v16 = vor.u32 1.1754944e-38, %v2164_v11  ;;  %v8497_v36 = vld [vmem:[#allocation64_spill] sm:$0xff]  ;;  %v8503_v11 = vld [vmem:[#allocation29_spill] sm:$0xff] }
 0xe4d   :  { %v2157_v0 = vadd.f32 %v3730_v58, %v2156_v35  ;;  %v8501_v35 = vld [vmem:[#allocation68_spill] sm:$0xff] }
 0xe4e   :  { %v2071_v53 = vsel %vm2070_vm13, %v3728_v6, %v2067_v23  ;;  %vm2163_vm3 = vcmp.eq.f32.partialorder %v2162_v17, 8.507059e+37  ;;  %v7085_v17 = vld [vmem:[%s7871_s4 + $0x50] sm:$0xff] }
 0xe4f   :  { %v6931_v2 = vsel %vm2073_vm14, %v2075_v30, %v2071_v53  ;;  %v2161_v38 = vsel %vm2160_vm2, %v3730_v58, %v2157_v0  ;;  %v8498_v58 = vld [vmem:[#allocation58_spill] sm:$0xff] }
 0xe50   :  { %v6935_v23 = vsel %vm2163_vm3, %v2165_v16, %v2161_v38  ;;  %v7069_v53 = vld [vmem:[%s7871_s4 + $0x90] sm:$0xff]  ;;  %v8505_v16 = vld [vmem:[#allocation33_spill] sm:$0xff] }
 0xe51   :  { %v7077_v30 = vld [vmem:[%s7871_s4 + $0x70] sm:$0xff] }
 0xe52   :  { %v8502_v0 = vld [vmem:[#allocation66_spill] sm:$0xff] }
 0xe53   :  { %v8504_v38 = vld [vmem:[#allocation70_spill] sm:$0xff] }
 0xea6   :  { %v2082_v5 = vpop.permute.xlu0 %2081 }
 0xea7   :  { %v2084_v54 = vmul.f32 %v2082_v5, %v6931_v2 }
 0xea9   :  { %2086 = vrot.lane.b32.xlu2 %v2084_v54, %s4185_s7  ;;  %v4061_v54 = vld [vmem:[%s7867_s1 + $0x18] sm:$0xff] }
 0xeae   :  { %v2187_v6 = vpop.permute.xlu1 %2186 }
 0xeaf   :  { %v2189_v18 = vmul.f32 %v2187_v6, %v6935_v23  ;;  %v7093_v6 = vld [vmem:[%s7871_s4 + $0x30] sm:$0xff] }
 0xeb1   :  { %2191 = vrot.lane.b32.xlu0 %v2189_v18, %s4186_s13  ;;  %v8506_v18 = vld [vmem:[#allocation74_spill] sm:$0xff] }
 0xeb6   :  { %v2203_v60 = vpop.permute.xlu1 %2202 }
 0xeb7   :  { %3500 = vmatmul.msk.f32.vlgmr.msrb.gmra.mxu2 %vm30_vm5, %v2203_v60  ;;  %3501 = vmatmul.msk.f32.vlgmr.msrb.gmra.mxu1 %vm30_vm5, %v2203_v60  ;;  %v2205_v5 = vsel %vm30_vm5, %v6705_v31, %v2203_v60  ;;  %v4062_v31 = vld [vmem:[%s7867_s1 + $0x10] sm:$0xff] }
 0xeb8   :  { %2224 = vmatmul.f32.vlgmr.msra.gmra.mxu0 %v2205_v5  ;;  %2264 = vmatmul.f32.vlgmr.msrb.gmra.mxu3 %v2205_v5 }
 0xeb9   :  { %2638 = vmatpush.msrb.mxu1 %v6288_v59  ;;  %2610 = vmatpush.msrb.mxu3 %v6295_v27  ;;  %v4064_v59 = vld [vmem:[%s7867_s1] sm:$0xff]  ;;  %v8475_v27 = vld [vmem:[#allocation14_spill] sm:$0xff] }
 0xeba   :  { %2511 = vmatpush.msrb.mxu2 %v6282_v43  ;;  %2452 = vmatpush.msra.mxu0 %v4061_v54  ;;  %v4063_v43 = vld [vmem:[%s7867_s1 + $0x8] sm:$0xff]  ;;  %v8509_v54 = vld [vmem:[#allocation24_spill] sm:$0xff] }
 0xebb   :  { %2639 = vmatpush.msrb.mxu1 %v6307_v49  ;;  %2611 = vmatpush.msrb.mxu3 %v6314_v50  ;;  %v8477_v49 = vld [vmem:[#allocation16_spill] sm:$0xff]  ;;  %v8478_v50 = vld [vmem:[#allocation22_spill] sm:$0xff] }
 0xebc   :  { %2512 = vmatpush.msrb.mxu2 %v6301_v34  ;;  %2453 = vmatpush.msra.mxu0 %v4062_v31  ;;  %v8476_v34 = vld [vmem:[#allocation65_spill] sm:$0xff]  ;;  %v8510_v31 = vld [vmem:[#allocation12_spill] sm:$0xff] }
 0xebd   :  { %2640 = vmatpush.msrb.mxu1 %v6326_v51  ;;  %2612 = vmatpush.msrb.mxu3 %v6347_v32  ;;  %v8480_v51 = vld [vmem:[#allocation69_spill] sm:$0xff]  ;;  %v8484_v32 = vld [vmem:[#allocation34_spill] sm:$0xff] }
 0xebe   :  { %2513 = vmatpush.msrb.mxu2 %v6320_v4  ;;  %2454 = vmatpush.msra.mxu0 %v4063_v43  ;;  %v8479_v4 = vld [vmem:[#allocation31_spill] sm:$0xff]  ;;  %v8511_v43 = vld [vmem:[#allocation18_spill] sm:$0xff] }
 0xebf   :  { %2304 = vmatmul.f32.vlgmr.msra.gmra.mxu2 %v2205_v5  ;;  %2344 = vmatmul.f32.vlgmr.msra.gmra.mxu1 %v2205_v5  ;;  %v7101_v5 = vld [vmem:[%s7871_s4 + $0x10] sm:$0xff] }
 0xec0   :  { %3502 = vmatmul.msk.f32.vlgmr.msrb.gmra.mxu0 %vm30_vm5, %v2203_v60  ;;  %3503 = vmatmul.msk.f32.vlgmr.msra.gmra.mxu3 %vm30_vm5, %v2203_v60  ;;  %v8507_v60 = vld [vmem:[#allocation43_spill] sm:$0xff]  ;;  %8508 = vst [vmem:[#allocation14_spill] sm:$0xff] %v7101_v5 }
 0xec1   :  { %2641 = vmatpush.msrb.mxu1 %v6359_v8  ;;  %2613 = vmatpush.msrb.mxu3 %v6371_v3  ;;  %v8486_v8 = vld [vmem:[#allocation17_spill] sm:$0xff]  ;;  %v7002_v3 = vld [vmem:[%s7871_s4 + $0x170] sm:$0xff] }
 0xec2   :  { %2514 = vmatpush.msrb.mxu2 %v6335_v19  ;;  %2455 = vmatpush.msra.mxu0 %v4064_v59  ;;  %v8481_v19 = vld [vmem:[#allocation61_spill] sm:$0xff]  ;;  %v8512_v59 = vld [vmem:[#allocation19_spill] sm:$0xff] }
 0xec3   :  { %2642 = vmatpush.msrb.mxu1 %v6383_v40  ;;  %2614 = vmatpush.msrb.mxu3 %v6395_v62  ;;  %v8488_v40 = vld [vmem:[#allocation48_spill] sm:$0xff]  ;;  %v7011_v62 = vld [vmem:[%s7871_s4 + $0x150] sm:$0xff] }
 0xec4   :  { %2515 = vmatpush.msrb.mxu2 %v6353_v47  ;;  %2531 = vmatpush.msrb.mxu0 %v6341_v24  ;;  %v8482_v24 = vld [vmem:[#allocation60_spill] sm:$0xff]  ;;  %v8485_v47 = vld [vmem:[#allocation25_spill] sm:$0xff] }
 0xec5   :  { %2643 = vmatpush.msrb.mxu1 %v6407_v61  ;;  %2615 = vmatpush.msrb.mxu3 %v6419_v55  ;;  %v8490_v61 = vld [vmem:[#allocation52_spill] sm:$0xff]  ;;  %v7020_v55 = vld [vmem:[%s7871_s4 + $0x130] sm:$0xff] }
 0xec6   :  { %2516 = vmatpush.msrb.mxu2 %v6377_v25  ;;  %2532 = vmatpush.msrb.mxu0 %v6365_v48  ;;  %v8487_v25 = vld [vmem:[#allocation44_spill] sm:$0xff] }
 0xec7   :  { %2644 = vmatpush.msrb.mxu1 %v6431_v63  ;;  %2616 = vmatpush.msrb.mxu3 %v6443_v12  ;;  %v7029_v63 = vld [vmem:[%s7871_s4 + $0x110] sm:$0xff] }
 0xec8   :  { %2517 = vmatpush.msrb.mxu2 %v6401_v26  ;;  %2533 = vmatpush.msrb.mxu0 %v6389_v13  ;;  %v8489_v26 = vld [vmem:[#allocation20_spill] sm:$0xff]  ;;  %v7043_v12 = vld [vmem:[%s7871_s4 + $0xf0] sm:$0xff] }
 0xec9   :  { %2645 = vmatpush.msrb.mxu1 %v6455_v9  ;;  %2617 = vmatpush.msrb.mxu3 %v6467_v7  ;;  %v8495_v9 = vld [vmem:[#allocation73_spill] sm:$0xff]  ;;  %v7052_v7 = vld [vmem:[%s7871_s4 + $0xd0] sm:$0xff] }
 0xeca   :  { %2518 = vmatpush.msrb.mxu2 %v6425_v37  ;;  %2534 = vmatpush.msrb.mxu0 %v8475_v27  ;;  %v8492_v37 = vld [vmem:[#allocation23_spill] sm:$0xff] }
 0xecb   :  { %2690 = vmatpush.msra.mxu1 %v6479_v10  ;;  %2618 = vmatpush.msrb.mxu3 %v6491_v42  ;;  %v8483_v10 = vld [vmem:[#allocation28_spill] sm:$0xff] }
 0xecc   :  { %2519 = vmatpush.msrb.mxu2 %v8477_v49  ;;  %2535 = vmatpush.msrb.mxu0 %v8479_v4  ;;  %v7036_v42 = vld [vmem:[%s7871_s4] sm:$0xff]  ;;  %v7112_v49 = vld [vmem:[%s7871_s4 + $0x8] sm:$0xff] }
 0xecd   :  { %2691 = vmatpush.msra.mxu1 %v8476_v34  ;;  %2619 = vmatpush.msrb.mxu3 %v8478_v50  ;;  %v8513_v34 = vld [vmem:[#allocation21_spill] sm:$0xff]  ;;  %v8514_v50 = vld [vmem:[#allocation15_spill] sm:$0xff] }
 0xece   :  { %2520 = vmatpush.msrb.mxu2 %v8481_v19  ;;  %2536 = vmatpush.msrb.mxu0 %v8483_v10 }
 0xecf   :  { %2692 = vmatpush.msra.mxu1 %v8480_v51  ;;  %2620 = vmatpush.msrb.mxu3 %v8482_v24  ;;  %v2079_v51 = vmul.f32 %v6931_v2, %v8514_v50 }
 0xed0   :  { %2521 = vmatpush.msrb.mxu2 %v8484_v32  ;;  %2537 = vmatpush.msrb.mxu0 %v8486_v8 }
 0xed1   :  { %2693 = vmatpush.msra.mxu1 %v6551_v29  ;;  %2621 = vmatpush.msrb.mxu3 %v8485_v47  ;;  %v8494_v29 = vld [vmem:[#allocation27_spill] sm:$0xff]  ;;  %v8516_v47 = vld [vmem:[#allocation56_spill] sm:$0xff] }
 0xed2   :  { %2522 = vmatpush.msrb.mxu2 %v8487_v25  ;;  %2538 = vmatpush.msrb.mxu0 %v8489_v26  ;;  %v2184_v25 = vmul.f32 %v6935_v23, %v8516_v47 }
 0xed3   :  { %2694 = vmatpush.msra.mxu1 %v7002_v3  ;;  %2622 = vmatpush.msrb.mxu3 %v6588_v46  ;;  %v8491_v46 = vld [vmem:[#allocation11_spill] sm:$0xff] }
 0xed4   :  { %2650 = vmatpush.msra.mxu2 %v8488_v40  ;;  %2539 = vmatpush.msrb.mxu0 %v8491_v46 }
 0xed5   :  { %2695 = vmatpush.msra.mxu1 %v7011_v62  ;;  %2623 = vmatpush.msrb.mxu3 %v6607_v28  ;;  %v8493_v28 = vld [vmem:[#allocation76_spill] sm:$0xff] }
 0xed6   :  { %2651 = vmatpush.msra.mxu2 %v8490_v61  ;;  %2540 = vmatpush.msrb.mxu0 %v8493_v28 }
 0xed7   :  { %2696 = vmatpush.msra.mxu1 %v7020_v55  ;;  %2624 = vmatpush.msrb.mxu3 %v6620_v15  ;;  %v8496_v15 = vld [vmem:[#allocation77_spill] sm:$0xff] }
 0xed8   :  { %2652 = vmatpush.msra.mxu2 %v8492_v37  ;;  %2541 = vmatpush.msrb.mxu0 %v8495_v9 }
 0xed9   :  { %2697 = vmatpush.msra.mxu1 %v7029_v63  ;;  %2625 = vmatpush.msrb.mxu3 %v7036_v42 }
 0xeda   :  { %2653 = vmatpush.msra.mxu2 %v6601_v41  ;;  %2542 = vmatpush.msrb.mxu0 %v8497_v36 }
 0xedb   :  { %2698 = vmatpush.msra.mxu1 %v7043_v12  ;;  %2718 = vmatpush.msra.mxu3 %v6178_v1  ;;  %v7061_v1 = vld [vmem:[%s7871_s4 + $0xb0] sm:$0xff] }
 0xedc   :  { %2654 = vmatpush.msra.mxu2 %v8494_v29 }
 0xedd   :  { %2699 = vmatpush.msra.mxu1 %v7052_v7  ;;  %2719 = vmatpush.msra.mxu3 %v6186_v21  ;;  %v8500_v21 = vld [vmem:[#allocation62_spill] sm:$0xff] }
 0xede   :  { %2655 = vmatpush.msra.mxu2 %v8496_v15 }
 0xedf   :  { %2700 = vmatpush.msra.mxu1 %v7061_v1  ;;  %2720 = vmatpush.msra.mxu3 %v8498_v58 }
 0xee0   :  { %2656 = vmatpush.msra.mxu2 %v8499_v56 }
 0xee1   :  { %2701 = vmatpush.msra.mxu1 %v7069_v53  ;;  %2721 = vmatpush.msra.mxu3 %v8500_v21 }
 0xee2   :  { %2657 = vmatpush.msra.mxu2 %v8501_v35  ;;  %v8518_v35 = vld [vmem:[#allocation8_spill] sm:$0xff] }
 0xee3   :  { %2702 = vmatpush.msra.mxu1 %v7077_v30  ;;  %2722 = vmatpush.msra.mxu3 %v8502_v0 }
 0xee4   :  { %2658 = vmatpush.msra.mxu2 %v8503_v11 }
 0xee5   :  { %2703 = vmatpush.msra.mxu1 %v7085_v17  ;;  %2723 = vmatpush.msra.mxu3 %v8504_v38 }
 0xee6   :  { %2659 = vmatpush.msra.mxu2 %v8505_v16 }
 0xee7   :  { %2704 = vmatpush.msra.mxu1 %v7093_v6  ;;  %2724 = vmatpush.msra.mxu3 %v8506_v18  ;;  %v8519_v18 = vld [vmem:[#allocation13_spill] sm:$0xff] }
 0xee8   :  { %2660 = vmatpush.msra.mxu2 %v8507_v60 }
 0xee9   :  { %2705 = vmatpush.msra.mxu1 %v7101_v5  ;;  %2725 = vmatpush.msra.mxu3 %v8509_v54 }
 0xeea   :  { %2661 = vmatpush.msra.mxu2 %v8510_v31 }
 0xeec   :  { %2662 = vmatpush.msra.mxu2 %v8511_v43 }
 0xeee   :  { %2663 = vmatpush.msra.mxu2 %v8512_v59 }
 0xef0   :  { %2664 = vmatpush.msra.mxu2 %v8513_v34  ;;  %v8520_v34 = vld [vmem:[#allocation26_spill] sm:$0xff] }
 0xef2   :  { %2665 = vmatpush.msra.mxu2 %v7112_v49 }
 0xf03   :  { %v2087_v19 = vpop.permute.xlu2 %2086 }
 0xf04   :  { %v7117_v24 = vadd.f32 %v2087_v19, %v2079_v51 }
 0xf06   :  { %8515 = vst [vmem:[#allocation65_spill] sm:$0xff] %v7117_v24  ;;  %3731 = vtanh.f32 %v7117_v24 }
 0xf0c   :  { %v3732_v32 = vpop.eup %3731 }
 0xf0d   :  { %2092 = vrot.lane.b32.xlu2 %v3732_v32, %s4185_s7 }
 0xf23   :  { %v2192_v40 = vpop.permute.xlu0 %2191 }
 0xf24   :  { %v7123_v58 = vadd.f32 %v2192_v40, %v2184_v25 }
 0xf26   :  { %8517 = vst [vmem:[#allocation16_spill] sm:$0xff] %v7123_v58  ;;  %3733 = vtanh.f32 %v7123_v58 }
 0xf2c   :  { %v3734_v56 = vpop.eup %3733 }
 0xf2d   :  { %2197 = vrot.lane.b32.xlu0 %v3734_v56, %s4186_s13 }
 0xf34   :  { %v2285_v54 = vpop.f32.mrf.mxu1 }
 0xf35   :  { %v2225_v21 = vpop.f32.mrf.mxu0 }
 0xf36   :  { %v2226_v0 = vadd.f32 %v2225_v21, %v8518_v35 }
 0xf3a   :  { %v2245_v11 = vpop.f32.mrf.mxu2 }
 0xf3b   :  { %v2246_v38 = vadd.f32 %v2245_v11, %v2226_v0  ;;  %v2265_v16 = vpop.f32.mrf.mxu3 }
 0xf3c   :  { %v2266_v60 = vadd.f32 %v2265_v16, %v8519_v18  ;;  %v2345_v21 = vpop.f32.mrf.mxu1 }
 0xf3d   :  { %v3504_v31 = vmul.f32 -1.442695, %v2246_v38  ;;  %v2325_v51 = vpop.f32.mrf.mxu0 }
 0xf3e   :  { %v2286_v43 = vadd.f32 %v2285_v54, %v2266_v60  ;;  %v8521_v60 = vld [vmem:[#allocation30_spill] sm:$0xff] }
 0xf3f   :  { %3735 = vpow2.f32 %v3504_v31  ;;  %v2346_v54 = vadd.f32 %v2345_v21, %v8521_v60 }
 0xf40   :  { %v3505_v23 = vmul.f32 -1.442695, %v2286_v43 }
 0xf42   :  { %3737 = vpow2.f32 %v3505_v23  ;;  %v2305_v59 = vpop.f32.mrf.mxu2 }
 0xf43   :  { %v2306_v50 = vadd.f32 %v2305_v59, %v8520_v34  ;;  %v2365_v11 = vpop.f32.mrf.mxu3 }
 0xf44   :  { %v2366_v59 = vadd.f32 %v2365_v11, %v2346_v54 }
 0xf45   :  { %v3736_v19 = vpop.eup %3735  ;;  %v2326_v32 = vadd.f32 %v2325_v51, %v2306_v50 }
 0xf46   :  { %v2377_v47 = vadd.f32 1.0, %v3736_v19 }
 0xf47   :  { %v3506_v25 = vmul.f32 -1.442695, %v2326_v32 }
 0xf48   :  { %v3738_v40 = vpop.eup %3737  ;;  %3739 = vrcp.f32 %v2377_v47  ;;  %v2391_v51 = vand.u32 2147483648, %v2377_v47  ;;  %v2389_v32 = vand.u32 2147483647, %v2377_v47  ;;  %vm2385_vm7 = vweird.f32 %v2377_v47 }
 0xf49   :  { %v2378_v56 = vadd.f32 1.0, %v3738_v40  ;;  %3741 = vpow2.f32 %v3506_v25 }
 0xf4a   :  { %vm2390_vm11 = vcmp.eq.f32.partialorder %v2389_v32, 8.507059e+37 }
 0xf4b   :  { %3743 = vrcp.f32 %v2378_v56  ;;  %v2406_v25 = vand.u32 2147483648, %v2378_v56  ;;  %v2404_v18 = vand.u32 2147483647, %v2378_v56  ;;  %vm2400_vm10 = vweird.f32 %v2378_v56 }
 0xf4d   :  { %v2407_v54 = vor.u32 1.1754944e-38, %v2406_v25  ;;  %vm2405_vm13 = vcmp.eq.f32.partialorder %v2404_v18, 8.507059e+37 }
 0xf4e   :  { %v3740_v0 = vpop.eup %3739 }
 0xf4f   :  { %v3742_v38 = vpop.eup %3741  ;;  %v2381_v16 = vmul.f32 %v3740_v0, %v2377_v47  ;;  %vm2386_vm4 = vweird.f32 %v3740_v0 }
 0xf50   :  { %v2379_v31 = vadd.f32 1.0, %v3742_v38  ;;  %vm2387_vm8 = vmor %vm2385_vm7, %vm2386_vm4  ;;  %v2392_v38 = vor.u32 1.1754944e-38, %v2391_v51 }
 0xf51   :  { %v3744_v43 = vpop.eup %3743  ;;  %v2382_v23 = vsub.f32 1.0, %v2381_v16 }
 0xf52   :  { %v2396_v58 = vmul.f32 %v3744_v43, %v2378_v56  ;;  %3745 = vrcp.f32 %v2379_v31  ;;  %vm2401_vm9 = vweird.f32 %v3744_v43  ;;  %v2421_v56 = vand.u32 2147483648, %v2379_v31 }
 0xf53   :  { %v2383_v50 = vmul.f32 %v3740_v0, %v2382_v23  ;;  %3747 = vtanh.f32 %v2366_v59  ;;  %vm2402_vm12 = vmor %vm2400_vm10, %vm2401_vm9  ;;  %vm2415_vm15 = vweird.f32 %v2379_v31 }
 0xf54   :  { %v2397_v19 = vsub.f32 1.0, %v2396_v58 }
 0xf55   :  { %v2384_v40 = vadd.f32 %v3740_v0, %v2383_v50 }
 0xf56   :  { %v2398_v24 = vmul.f32 %v3744_v43, %v2397_v19 }
 0xf57   :  { %v2388_v21 = vsel %vm2387_vm8, %v3740_v0, %v2384_v40 }
 0xf58   :  { %v3746_v60 = vpop.eup %3745  ;;  %v2399_v11 = vadd.f32 %v3744_v43, %v2398_v24  ;;  %v2393_v16 = vsel %vm2390_vm11, %v2392_v38, %v2388_v21  ;;  %v2419_v24 = vand.u32 2147483647, %v2379_v31 }
 0xf59   :  { %v2411_v23 = vmul.f32 %v3746_v60, %v2379_v31  ;;  %v3748_v34 = vpop.eup %3747  ;;  %vm2416_vm14 = vweird.f32 %v3746_v60 }
 0xf5a   :  { %v2403_v58 = vsel %vm2402_vm12, %v3744_v43, %v2399_v11  ;;  %v2427_v19 = vmul.f32 %v3748_v34, %v2393_v16  ;;  %vm2417_vm1 = vmor %vm2415_vm15, %vm2416_vm14  ;;  %v2422_v43 = vor.u32 1.1754944e-38, %v2421_v56  ;;  %vm2420_vm2 = vcmp.eq.f32.partialorder %v2419_v24, 8.507059e+37  ;;  %v4079_v56 = vld [vmem:[%s7869_s2 + $0xb0] sm:$0xff]  ;;  %v4080_v24 = vld [vmem:[%s7869_s2 + $0xb8] sm:$0xff] }
 0xf5b   :  { %v2408_v50 = vsel %vm2405_vm13, %v2407_v54, %v2403_v58  ;;  %v2412_v47 = vsub.f32 1.0, %v2411_v23 }
 0xf5c   :  { %v2426_v59 = vmul.f32 %v2408_v50, %v6714_v33 }
 0xf5d   :  { %v2413_v35 = vmul.f32 %v3746_v60, %v2412_v47 }
 0xf5e   :  { %v7132_v5 = vadd.f32 %v2427_v19, %v2426_v59 }
 0xf5f   :  { %v2414_v0 = vadd.f32 %v3746_v60, %v2413_v35  ;;  %v3499_v35 = vmul.f32 -1.442695, %v6923_v14 }
 0xf60   :  { %3749 = vtanh.f32 %v7132_v5 }
 0xf61   :  { %v2418_v51 = vsel %vm2417_vm1, %v3746_v60, %v2414_v0  ;;  %3751 = vpow2.f32 %v3499_v35  ;;  %v8535_v35 = vld [vmem:[#allocation55_spill] sm:$0xff] }
 0xf62   :  { %v2423_v32 = vsel %vm2420_vm2, %v2422_v43, %v2418_v51  ;;  %v4081_v51 = vld [vmem:[%s7869_s2 + $0xa0] sm:$0xff]  ;;  %v4082_v43 = vld [vmem:[%s7869_s2 + $0x90] sm:$0xff] }
 0xf66   :  { %v3750_v18 = vpop.eup %3749 }
 0xf67   :  { %v2093_v25 = vpop.permute.xlu2 %2092  ;;  %v2430_v40 = vmul.f32 %v3750_v18, %v2423_v32  ;;  %v3752_v34 = vpop.eup %3751  ;;  %v8522_v18 = vld [vmem:[#allocation53_spill] sm:$0xff]  ;;  %v4089_v32 = vld [vmem:[%s7869_s2 + $0x20] sm:$0xff] }
 0xf68   :  { %v2095_v33 = vmul.f32 %v2093_v25, %v6931_v2  ;;  %v2152_v60 = vadd.f32 1.0, %v3752_v34  ;;  %v7257_v25 = vld [vmem:[%s7871_s4 + $0x108] sm:$0xff]  ;;  %v8536_v34 = vld [vmem:[#allocation36_spill] sm:$0xff] }
 0xf69   :  { %3507 = vst [vmem:[%s7873_s6 + $0x20] sm:$0xff] %v2430_v40  ;;  %2604 = vrot.lane.b32.xlu0 %v2430_v40, %s4186_s13  ;;  %v8534_v40 = vld [vmem:[#allocation49_spill] sm:$0xff] }
 0xf6a   :  { %2436 = vrot.lane.b32.xlu1 %v2095_v33, %s4186_s13  ;;  %3753 = vrcp.f32 %v2152_v60  ;;  %v2179_v2 = vand.u32 2147483648, %v2152_v60  ;;  %vm2173_vm4 = vweird.f32 %v2152_v60  ;;  %v2177_v54 = vand.u32 2147483647, %v2152_v60  ;;  %v7266_v33 = vld [vmem:[%s7871_s4 + $0xe8] sm:$0xff] }
 0xf6c   :  { %v2180_v58 = vor.u32 1.1754944e-38, %v2179_v2  ;;  %vm2178_vm8 = vcmp.eq.f32.partialorder %v2177_v54, 8.507059e+37  ;;  %v7297_v2 = vld [vmem:[%s7871_s4 + $0x88] sm:$0xff]  ;;  %v8541_v54 = vld [vmem:[#allocation75_spill] sm:$0xff] }
 0xf6d   :  { %8540 = vst [vmem:[#allocation22_spill] sm:$0xff] %v7297_v2 }
 0xf70   :  { %v3754_v31 = vpop.eup %3753 }
 0xf71   :  { %v2169_v21 = vmul.f32 %v3754_v31, %v2152_v60  ;;  %vm2174_vm3 = vweird.f32 %v3754_v31  ;;  %v7274_v60 = vld [vmem:[%s7871_s4 + $0xc8] sm:$0xff] }
 0xf72   :  { %vm2175_vm7 = vmor %vm2173_vm4, %vm2174_vm3 }
 0xf73   :  { %v2170_v38 = vsub.f32 1.0, %v2169_v21  ;;  %v8538_v21 = vld [vmem:[#allocation47_spill] sm:$0xff] }
 0xf75   :  { %v2171_v11 = vmul.f32 %v3754_v31, %v2170_v38  ;;  %v7284_v38 = vld [vmem:[%s7871_s4 + $0xa8] sm:$0xff] }
 0xf77   :  { %v2172_v16 = vadd.f32 %v3754_v31, %v2171_v11  ;;  %v8539_v11 = vld [vmem:[#allocation39_spill] sm:$0xff] }
 0xf79   :  { %v2176_v23 = vsel %vm2175_vm7, %v3754_v31, %v2172_v16  ;;  %v8537_v31 = vld [vmem:[#allocation71_spill] sm:$0xff]  ;;  %v7291_v16 = vld [vmem:[%s7871_s4 + $0x1e0] sm:$0xff] }
 0xf7a   :  { %v2181_v50 = vsel %vm2178_vm8, %v2180_v58, %v2176_v23  ;;  %v7304_v23 = vld [vmem:[%s7871_s4 + $0x1c0] sm:$0xff]  ;;  %v7310_v58 = vld [vmem:[%s7871_s4 + $0x68] sm:$0xff] }
 0xf7b   :  { %8542 = vst [vmem:[#allocation31_spill] sm:$0xff] %v7310_v58 }
 0xf9f   :  { %v2198_v47 = vpop.permute.xlu0 %2197 }
 0xfa0   :  { %v2200_v14 = vmul.f32 %v2198_v47, %v2181_v50  ;;  %v8543_v50 = vld [vmem:[#allocation40_spill] sm:$0xff] }
 0xfa1   :  { %v7317_v47 = vld [vmem:[%s7871_s4 + $0x1a0] sm:$0xff] }
 0xfa2   :  { %2500 = vrot.lane.b32.xlu2 %v2200_v14, %s4185_s7 }
 0xfdb   :  { %v7143_v59 = vpop.permute.xlu0 %2604 }
 0xfdc   :  { %3515 = vmatmul.msk.f32.vlgmr.msrb.gmra.mxu1 %vm30_vm5, %v7143_v59  ;;  %v2437_v19 = vpop.permute.xlu1 %2436  ;;  %v7149_v0 = vsel %vm30_vm5, %v2200_v14, %v7143_v59  ;;  %v7323_v14 = vld [vmem:[%s7871_s4 + $0x48] sm:$0xff] }
 0xfdd   :  { %3509 = vmatmul.msk.f32.vlgmr.msra.gmra.mxu0 %vm27_vm0, %v2437_v19  ;;  %2626 = vmatmul.f32.vlgmr.msrb.gmra.mxu3 %v7149_v0  ;;  %8544 = vst [vmem:[#allocation69_spill] sm:$0xff] %v7323_v14 }
 0xfde   :  { %2678 = vmatpush.msra.mxu0 %v6729_v22  ;;  %2851 = vmatpush.msrb.mxu3 %v4079_v56  ;;  %v7336_v56 = vld [vmem:[%s7871_s4 + $0x28] sm:$0xff] }
 0xfdf   :  { %2871 = vmatpush.msrb.mxu1 %v4080_v24  ;;  %8546 = vst [vmem:[#allocation61_spill] sm:$0xff] %v7336_v56  ;;  %v8547_v24 = vld [vmem:[#allocation46_spill] sm:$0xff] }
 0xfe0   :  { %2679 = vmatpush.msra.mxu0 %v6741_v39  ;;  %2852 = vmatpush.msrb.mxu3 %v4081_v51  ;;  %v7343_v51 = vld [vmem:[%s7871_s4 + $0x160] sm:$0xff] }
 0xfe1   :  { %2872 = vmatpush.msrb.mxu1 %v6365_v48  ;;  %v4083_v48 = vld [vmem:[%s7869_s2 + $0x80] sm:$0xff] }
 0xfe2   :  { %2680 = vmatpush.msra.mxu0 %v6753_v44  ;;  %2853 = vmatpush.msrb.mxu3 %v4082_v43  ;;  %v8548_v43 = vld [vmem:[#allocation50_spill] sm:$0xff] }
 0xfe3   :  { %2873 = vmatpush.msrb.mxu1 %v6389_v13  ;;  %v4084_v13 = vld [vmem:[%s7869_s2 + $0x70] sm:$0xff] }
 0xfe4   :  { %2706 = vmatmul.f32.vlgmr.msra.gmra.mxu1 %v7149_v0  ;;  %2681 = vmatpush.msra.mxu0 %v6765_v52 }
 0xfe5   :  { %3517 = vmatmul.msk.f32.vlgmr.msra.gmra.mxu3 %vm30_vm5, %v7143_v59  ;;  %2874 = vmatpush.msrb.mxu1 %v8475_v27  ;;  %v4085_v27 = vld [vmem:[%s7869_s2 + $0x60] sm:$0xff] }
 0xfe6   :  { %2682 = vmatpush.msra.mxu0 %v6778_v57  ;;  %2854 = vmatpush.msrb.mxu3 %v4083_v48  ;;  %v7351_v48 = vld [vmem:[%s7871_s4 + $0x140] sm:$0xff] }
 0xfe7   :  { %2875 = vmatpush.msrb.mxu1 %v8479_v4  ;;  %v4086_v4 = vld [vmem:[%s7869_s2 + $0x50] sm:$0xff] }
 0xfe8   :  { %2683 = vmatpush.msra.mxu0 %v6790_v45  ;;  %2855 = vmatpush.msrb.mxu3 %v4084_v13  ;;  %v8549_v13 = vld [vmem:[#allocation54_spill] sm:$0xff] }
 0xfe9   :  { %2876 = vmatpush.msrb.mxu1 %v8483_v10  ;;  %v4087_v10 = vld [vmem:[%s7869_s2 + $0x40] sm:$0xff] }
 0xfea   :  { %2684 = vmatpush.msra.mxu0 %v6802_v20  ;;  %2856 = vmatpush.msrb.mxu3 %v4085_v27  ;;  %v7358_v27 = vld [vmem:[%s7871_s4 + $0x120] sm:$0xff] }
 0xfeb   :  { %2877 = vmatpush.msrb.mxu1 %v8486_v8  ;;  %v4088_v8 = vld [vmem:[%s7869_s2 + $0x30] sm:$0xff] }
 0xfec   :  { %2685 = vmatpush.msra.mxu0 %v8522_v18  ;;  %2857 = vmatpush.msrb.mxu3 %v4086_v4  ;;  %v7372_v4 = vld [vmem:[%s7871_s4 + $0x2e0] sm:$0xff] }
 0xfed   :  { %2878 = vmatpush.msrb.mxu1 %v8489_v26  ;;  %v4090_v26 = vld [vmem:[%s7869_s2 + $0x10] sm:$0xff] }
 0xfee   :  { %2858 = vmatpush.msrb.mxu3 %v4087_v10  ;;  %v7378_v10 = vld [vmem:[%s7871_s4 + $0xe0] sm:$0xff] }
 0xfef   :  { %2879 = vmatpush.msrb.mxu1 %v8491_v46  ;;  %v4091_v46 = vld [vmem:[%s7869_s2] sm:$0xff] }
 0xff0   :  { %2859 = vmatpush.msrb.mxu3 %v4088_v8  ;;  %v7384_v8 = vld [vmem:[%s7871_s4 + $0x2c0] sm:$0xff] }
 0xff1   :  { %2880 = vmatpush.msrb.mxu1 %v8493_v28  ;;  %v7218_v28 = vld [vmem:[%s7871_s4 + $0x1e8] sm:$0xff] }
 0xff2   :  { %2860 = vmatpush.msrb.mxu3 %v4089_v32  ;;  %v7396_v32 = vld [vmem:[%s7871_s4 + $0x2a0] sm:$0xff] }
 0xff3   :  { %2881 = vmatpush.msrb.mxu1 %v8495_v9 }
 0xff4   :  { %2861 = vmatpush.msrb.mxu3 %v4090_v26  ;;  %v7402_v26 = vld [vmem:[%s7871_s4 + $0xa0] sm:$0xff] }
 0xff5   :  { %2882 = vmatpush.msrb.mxu1 %v8497_v36  ;;  %v8523_v36 = vld [vmem:[#allocation63_spill] sm:$0xff] }
 0xff6   :  { %2862 = vmatpush.msrb.mxu3 %v4091_v46  ;;  %v7408_v46 = vld [vmem:[%s7871_s4 + $0x280] sm:$0xff] }
 0xff7   :  { %3018 = vmatpush.msra.mxu1 %v6729_v22 }
 0xff8   :  { %2990 = vmatpush.msra.mxu3 %v7218_v28 }
 0xff9   :  { %3019 = vmatpush.msra.mxu1 %v6741_v39  ;;  %v8524_v39 = vld [vmem:[#allocation32_spill] sm:$0xff] }
 0xffa   :  { %2991 = vmatpush.msra.mxu3 %v8490_v61  ;;  %v8526_v61 = vld [vmem:[#allocation41_spill] sm:$0xff] }
 0xffb   :  { %3020 = vmatpush.msra.mxu1 %v6753_v44  ;;  %v8525_v44 = vld [vmem:[#allocation37_spill] sm:$0xff] }
 0xffc   :  { %2992 = vmatpush.msra.mxu3 %v8492_v37  ;;  %v2501_v9 = vpop.permute.xlu2 %2500  ;;  %v7243_v37 = vld [vmem:[%s7871_s4 + $0x128] sm:$0xff] }
 0xffd   :  { %3021 = vmatpush.msra.mxu1 %v6765_v52  ;;  %v2503_v22 = vsel %vm27_vm0, %v2437_v19, %v2501_v9  ;;  %v8528_v52 = vld [vmem:[#allocation35_spill] sm:$0xff]  ;;  %v7330_v19 = vld [vmem:[%s7871_s4 + $0x180] sm:$0xff] }
 0xffe   :  { %2993 = vmatpush.msra.mxu3 %v6601_v41  ;;  %3511 = vmatmul.msk.f32.vlgmr.msrb.gmra.mxu2 %vm248_vm6, %v2503_v22  ;;  %v8527_v41 = vld [vmem:[#allocation57_spill] sm:$0xff]  ;;  %v7414_v9 = vld [vmem:[%s7871_s4 + $0x80] sm:$0xff] }
 0xfff   :  { %3512 = vmatmul.msk.f32.vlgmr.msrb.gmra.mxu0 %vm248_vm6, %v2503_v22  ;;  %2758 = vmatpush.msrb.mxu2 %v8524_v39  ;;  %v7420_v22 = vld [vmem:[%s7871_s4 + $0x260] sm:$0xff] }
0x1000   :  { %2730 = vmatpush.msrb.mxu0 %v8523_v36  ;;  %2994 = vmatpush.msra.mxu3 %v8494_v29  ;;  %v8530_v29 = vld [vmem:[#allocation45_spill] sm:$0xff]  ;;  %v7426_v39 = vld [vmem:[%s7871_s4 + $0x60] sm:$0xff] }
0x1001   :  { %3022 = vmatpush.msra.mxu1 %v6778_v57  ;;  %2759 = vmatpush.msrb.mxu2 %v8526_v61  ;;  %v8529_v57 = vld [vmem:[#allocation67_spill] sm:$0xff]  ;;  %8551 = vst [vmem:[#allocation60_spill] sm:$0xff] %v7426_v39  ;;  %v7432_v61 = vld [vmem:[%s7871_s4 + $0x240] sm:$0xff] }
0x1002   :  { %2731 = vmatpush.msrb.mxu0 %v8525_v44  ;;  %2995 = vmatpush.msra.mxu3 %v8496_v15  ;;  %v8532_v15 = vld [vmem:[#allocation59_spill] sm:$0xff] }
0x1003   :  { %3023 = vmatpush.msra.mxu1 %v6790_v45  ;;  %2760 = vmatpush.msrb.mxu2 %v8528_v52  ;;  %v8531_v45 = vld [vmem:[#allocation51_spill] sm:$0xff]  ;;  %v7438_v52 = vld [vmem:[%s7871_s4 + $0x40] sm:$0xff] }
0x1004   :  { %2732 = vmatpush.msrb.mxu0 %v8527_v41  ;;  %2996 = vmatpush.msra.mxu3 %v7243_v37  ;;  %8552 = vst [vmem:[#allocation28_spill] sm:$0xff] %v7438_v52 }
0x1005   :  { %3024 = vmatpush.msra.mxu1 %v6802_v20  ;;  %2761 = vmatpush.msrb.mxu2 %v8530_v29  ;;  %v8533_v20 = vld [vmem:[#allocation38_spill] sm:$0xff]  ;;  %v7444_v29 = vld [vmem:[%s7871_s4 + $0x220] sm:$0xff] }
0x1006   :  { %2733 = vmatpush.msrb.mxu0 %v8529_v57  ;;  %2666 = vmatmul.f32.vlgmr.msra.gmra.mxu2 %v7149_v0 }
0x1007   :  { %3516 = vmatmul.msk.f32.vlgmr.msra.gmra.mxu0 %vm30_vm5, %v7143_v59  ;;  %2762 = vmatpush.msrb.mxu2 %v8532_v15  ;;  %v7450_v15 = vld [vmem:[%s7871_s4 + $0x20] sm:$0xff] }
0x1008   :  { %2734 = vmatpush.msrb.mxu0 %v8531_v45  ;;  %2997 = vmatpush.msra.mxu3 %v7257_v25  ;;  %8553 = vst [vmem:[#allocation34_spill] sm:$0xff] %v7450_v15 }
0x1009   :  { %3025 = vmatpush.msra.mxu1 %v8522_v18  ;;  %2763 = vmatpush.msrb.mxu2 %v8534_v40  ;;  %v8550_v18 = vld [vmem:[#allocation78_spill] sm:$0xff]  ;;  %v7456_v40 = vld [vmem:[%s7871_s4 + $0x200] sm:$0xff] }
0x100a   :  { %2735 = vmatpush.msrb.mxu0 %v8533_v20  ;;  %2998 = vmatpush.msra.mxu3 %v7266_v33 }
0x100b   :  { %2764 = vmatpush.msrb.mxu2 %v8536_v34  ;;  %v7463_v34 = vld [vmem:[%s7871_s4 + $0x1f0] sm:$0xff] }
0x100c   :  { %2736 = vmatpush.msrb.mxu0 %v8535_v35  ;;  %2999 = vmatpush.msra.mxu3 %v7274_v60 }
0x100d   :  { %2765 = vmatpush.msrb.mxu2 %v8538_v21  ;;  %v7470_v21 = vld [vmem:[%s7871_s4 + $0x1d0] sm:$0xff] }
0x100e   :  { %2737 = vmatpush.msrb.mxu0 %v8537_v31  ;;  %3518 = vmatmul.msk.f32.vlgmr.msrb.gmra.mxu2 %vm30_vm5, %v7143_v59  ;;  %v8545_v59 = vld [vmem:[#allocation42_spill] sm:$0xff] }
0x100f   :  { %3000 = vmatpush.msra.mxu3 %v7284_v38  ;;  %2950 = vmatpush.msra.mxu2 %v7291_v16 }
0x1010   :  { %2738 = vmatpush.msrb.mxu0 %v8539_v11 }
0x1011   :  { %3001 = vmatpush.msra.mxu3 %v7297_v2  ;;  %2951 = vmatpush.msra.mxu2 %v7304_v23 }
0x1012   :  { %2739 = vmatpush.msrb.mxu0 %v8541_v54 }
0x1013   :  { %3002 = vmatpush.msra.mxu3 %v7310_v58  ;;  %2952 = vmatpush.msra.mxu2 %v7317_v47 }
0x1014   :  { %2740 = vmatpush.msrb.mxu0 %v8543_v50 }
0x1015   :  { %3003 = vmatpush.msra.mxu3 %v7323_v14  ;;  %2953 = vmatpush.msra.mxu2 %v7330_v19 }
0x1016   :  { %2741 = vmatpush.msrb.mxu0 %v8545_v59 }
0x1017   :  { %3004 = vmatpush.msra.mxu3 %v7336_v56  ;;  %2954 = vmatpush.msra.mxu2 %v7343_v51 }
0x1018   :  { %2742 = vmatpush.msrb.mxu0 %v8547_v24 }
0x1019   :  { %3005 = vmatpush.msra.mxu3 %v7112_v49  ;;  %2955 = vmatpush.msra.mxu2 %v7351_v48  ;;  %v7365_v49 = vld [vmem:[%s7871_s4 + $0x100] sm:$0xff] }
0x101a   :  { %2743 = vmatpush.msrb.mxu0 %v8548_v43 }
0x101b   :  { %2956 = vmatpush.msra.mxu2 %v7358_v27 }
0x101c   :  { %2744 = vmatpush.msrb.mxu0 %v8549_v13 }
0x101d   :  { %2957 = vmatpush.msra.mxu2 %v7365_v49 }
0x101e   :  { %2745 = vmatpush.msrb.mxu0 %v8550_v18 }
0x101f   :  { %2746 = vmatmul.f32.vlgmr.msrb.gmra.mxu0 %v7149_v0  ;;  %2958 = vmatpush.msra.mxu2 %v7378_v10  ;;  %v7390_v0 = vld [vmem:[%s7871_s4 + $0xc0] sm:$0xff] }
0x1020   :  { %2978 = vmatpush.msra.mxu0 %v7372_v4 }
0x1021   :  { %2959 = vmatpush.msra.mxu2 %v7390_v0 }
0x1022   :  { %2979 = vmatpush.msra.mxu0 %v7384_v8 }
0x1023   :  { %2960 = vmatpush.msra.mxu2 %v7402_v26 }
0x1024   :  { %2980 = vmatpush.msra.mxu0 %v7396_v32 }
0x1025   :  { %2961 = vmatpush.msra.mxu2 %v7414_v9 }
0x1026   :  { %2981 = vmatpush.msra.mxu0 %v7408_v46 }
0x1027   :  { %2962 = vmatpush.msra.mxu2 %v7426_v39 }
0x1028   :  { %2982 = vmatpush.msra.mxu0 %v7420_v22 }
0x1029   :  { %2963 = vmatpush.msra.mxu2 %v7438_v52 }
0x102a   :  { %2983 = vmatpush.msra.mxu0 %v7432_v61 }
0x102b   :  { %2964 = vmatpush.msra.mxu2 %v7450_v15 }
0x102c   :  { %2984 = vmatpush.msra.mxu0 %v7444_v29 }
0x102d   :  { %2965 = vmatpush.msra.mxu2 %v7036_v42  ;;  %v7477_v42 = vld [vmem:[%s7871_s4 + $0x1b0] sm:$0xff] }
0x102e   :  { %2985 = vmatpush.msra.mxu0 %v7456_v40 }
0x102f   :  { %3070 = vmatpush.msrb.mxu2 %v8523_v36  ;;  %v7484_v36 = vld [vmem:[%s7871_s4 + $0x190] sm:$0xff] }
0x1030   :  { %3030 = vmatpush.msrb.mxu0 %v7463_v34 }
0x1031   :  { %3071 = vmatpush.msrb.mxu2 %v8525_v44 }
0x1032   :  { %3031 = vmatpush.msrb.mxu0 %v7470_v21 }
0x1033   :  { %3072 = vmatpush.msrb.mxu2 %v8527_v41 }
0x1034   :  { %3032 = vmatpush.msrb.mxu0 %v7477_v42 }
0x1035   :  { %3073 = vmatpush.msrb.mxu2 %v8529_v57 }
0x1036   :  { %3033 = vmatpush.msrb.mxu0 %v7484_v36 }
0x1037   :  { %3074 = vmatpush.msrb.mxu2 %v8531_v45 }
0x1038   :  { %3034 = vmatpush.msrb.mxu0 %v7002_v3  ;;  %v8554_v3 = vld [vmem:[#allocation14_spill] sm:$0xff] }
0x1039   :  { %3075 = vmatpush.msrb.mxu2 %v8533_v20  ;;  %v8556_v20 = vld [vmem:[#allocation9_spill] sm:$0xff] }
0x103a   :  { %3035 = vmatpush.msrb.mxu0 %v7011_v62  ;;  %v3508_v62 = vld [vmem:[%s7868_s0 + $0x38] sm:$0xff] }
0x103b   :  { %3076 = vmatpush.msrb.mxu2 %v8535_v35 }
0x103c   :  { %3036 = vmatpush.msrb.mxu0 %v7020_v55 }
0x103d   :  { %3077 = vmatpush.msrb.mxu2 %v8537_v31 }
0x103e   :  { %3037 = vmatpush.msrb.mxu0 %v7029_v63 }
0x103f   :  { %3078 = vmatpush.msrb.mxu2 %v8539_v11 }
0x1040   :  { %3038 = vmatpush.msrb.mxu0 %v7043_v12 }
0x1041   :  { %3079 = vmatpush.msrb.mxu2 %v8541_v54  ;;  %v8557_v54 = vld [vmem:[#allocation26_spill] sm:$0xff] }
0x1042   :  { %3039 = vmatpush.msrb.mxu0 %v7052_v7 }
0x1043   :  { %3080 = vmatpush.msrb.mxu2 %v8543_v50 }
0x1044   :  { %3040 = vmatpush.msrb.mxu0 %v7061_v1 }
0x1045   :  { %3081 = vmatpush.msrb.mxu2 %v8545_v59 }
0x1046   :  { %3041 = vmatpush.msrb.mxu0 %v7069_v53  ;;  %v8555_v53 = vld [vmem:[#allocation8_spill] sm:$0xff] }
0x1047   :  { %3082 = vmatpush.msrb.mxu2 %v8547_v24 }
0x1048   :  { %3042 = vmatpush.msrb.mxu0 %v7077_v30 }
0x1049   :  { %3083 = vmatpush.msrb.mxu2 %v8548_v43 }
0x104a   :  { %3043 = vmatpush.msrb.mxu0 %v7085_v17 }
0x104b   :  { %3084 = vmatpush.msrb.mxu2 %v8549_v13 }
0x104c   :  { %3044 = vmatpush.msrb.mxu0 %v7093_v6 }
0x104d   :  { %3085 = vmatpush.msrb.mxu2 %v8550_v18 }
0x104e   :  { %3045 = vmatpush.msrb.mxu0 %v8554_v3 }
0x1059   :  { %v2647_v1 = vpop.f32.mrf.mxu1 }
0x105a   :  { %v2457_v55 = vpop.f32.mrf.mxu0 }
0x105b   :  { %v7515_v63 = vadd.f32 %v3508_v62, %v2457_v55 }
0x105d   :  { %3755 = vtanh.f32 %v7515_v63 }
0x1060   :  { %v2627_v7 = vpop.f32.mrf.mxu3 }
0x1061   :  { %v2628_v44 = vadd.f32 %v2627_v7, %v8555_v53  ;;  %v2707_v31 = vpop.f32.mrf.mxu1 }
0x1062   :  { %v2708_v50 = vadd.f32 %v2707_v31, %v8557_v54 }
0x1063   :  { %v3756_v12 = vpop.eup %3755  ;;  %v2648_v41 = vadd.f32 %v2647_v1, %v2628_v44 }
0x1064   :  { %2483 = vrot.lane.b32.xlu1 %v3756_v12, %s4185_s7  ;;  %v8558_v12 = vld [vmem:[#allocation13_spill] sm:$0xff] }
0x1065   :  { %v3519_v45 = vmul.f32 -1.442695, %v2648_v41 }
0x1068   :  { %v2727_v11 = vpop.f32.mrf.mxu3 }
0x1069   :  { %v2728_v24 = vadd.f32 %v2727_v11, %v2708_v50 }
0x106b   :  { %v3521_v18 = vmul.f32 -1.442695, %v2728_v24 }
0x107c   :  { %v2544_v57 = vpop.f32.mrf.mxu0 }
0x107d   :  { %v7521_v35 = vadd.f32 %v2544_v57, %v8556_v20 }
0x107f   :  { %3757 = vtanh.f32 %v7521_v35 }
0x1080   :  { %3759 = vpow2.f32 %v3519_v45 }
0x1081   :  { %v7525_v59 = vpop.f32.mrf.mxu2  ;;  %3761 = vpow2.f32 %v3521_v18 }
0x1084   :  { %v2687_v1 = vpop.f32.mrf.mxu0 }
0x1085   :  { %v3758_v43 = vpop.eup %3757 }
0x1086   :  { %2588 = vrot.lane.b32.xlu2 %v3758_v43, %s4186_s13  ;;  %v3760_v13 = vpop.eup %3759 }
0x1087   :  { %v2779_v62 = vadd.f32 1.0, %v3760_v13  ;;  %v3762_v57 = vpop.eup %3761  ;;  %v8559_v13 = vld [vmem:[#allocation30_spill] sm:$0xff] }
0x1088   :  { %v2781_v31 = vadd.f32 1.0, %v3762_v57 }
0x1089   :  { %v2667_v55 = vpop.f32.mrf.mxu2  ;;  %3763 = vrcp.f32 %v2779_v62  ;;  %vm2787_vm10 = vweird.f32 %v2779_v62 }
0x108a   :  { %v2668_v7 = vadd.f32 %v2667_v55, %v8558_v12  ;;  %vm2817_vm3 = vweird.f32 %v2781_v31 }
0x108c   :  { %v2688_v44 = vadd.f32 %v2687_v1, %v2668_v7 }
0x108e   :  { %v3520_v41 = vmul.f32 -1.442695, %v2688_v44 }
0x108f   :  { %v3764_v45 = vpop.eup %3763 }
0x1090   :  { %3765 = vpow2.f32 %v3520_v41  ;;  %v2783_v11 = vmul.f32 %v3764_v45, %v2779_v62  ;;  %vm2788_vm9 = vweird.f32 %v3764_v45 }
0x1091   :  { %3767 = vrcp.f32 %v2781_v31  ;;  %v2767_v53 = vpop.f32.mrf.mxu2  ;;  %vm2789_vm12 = vmor %vm2787_vm10, %vm2788_vm9 }
0x1092   :  { %v2784_v43 = vsub.f32 1.0, %v2783_v11  ;;  %v2791_v11 = vand.u32 2147483647, %v2779_v62 }
0x1094   :  { %v2785_v12 = vmul.f32 %v3764_v45, %v2784_v43  ;;  %vm2792_vm15 = vcmp.eq.f32.partialorder %v2791_v11, 8.507059e+37 }
0x1096   :  { %v3766_v54 = vpop.eup %3765  ;;  %v2786_v56 = vadd.f32 %v3764_v45, %v2785_v12  ;;  %v3510_v12 = vmul.f32 -1.442695, %v7515_v63 }
0x1097   :  { %v2780_v50 = vadd.f32 1.0, %v3766_v54  ;;  %v3768_v55 = vpop.eup %3767  ;;  %v2793_v54 = vand.u32 2147483648, %v2779_v62 }
0x1098   :  { %v2813_v44 = vmul.f32 %v3768_v55, %v2781_v31  ;;  %vm2818_vm2 = vweird.f32 %v3768_v55 }
0x1099   :  { %3769 = vrcp.f32 %v2780_v50  ;;  %v2808_v57 = vand.u32 2147483648, %v2780_v50  ;;  %v2806_v14 = vand.u32 2147483647, %v2780_v50  ;;  %vm2802_vm13 = vweird.f32 %v2780_v50  ;;  %vm2819_vm4 = vmor %vm2817_vm3, %vm2818_vm2 }
0x109a   :  { %v2794_v52 = vor.u32 1.1754944e-38, %v2793_v54 }
0x109b   :  { %v2809_v43 = vor.u32 1.1754944e-38, %v2808_v57  ;;  %vm2807_vm1 = vcmp.eq.f32.partialorder %v2806_v14, 8.507059e+37  ;;  %v2821_v14 = vand.u32 2147483647, %v2781_v31 }
0x109c   :  { %v2747_v24 = vpop.f32.mrf.mxu0 }
0x109d   :  { %v2748_v20 = vadd.f32 %v2747_v24, %v8559_v13  ;;  %v2814_v24 = vsub.f32 1.0, %v2813_v44  ;;  %v2790_v13 = vsel %vm2789_vm12, %v3764_v45, %v2786_v56  ;;  %vm2822_vm7 = vcmp.eq.f32.partialorder %v2821_v14, 8.507059e+37 }
0x109f   :  { %v2768_v18 = vadd.f32 %v2767_v53, %v2748_v20  ;;  %v3770_v7 = vpop.eup %3769 }
0x10a0   :  { %v2798_v1 = vmul.f32 %v3770_v7, %v2780_v50  ;;  %vm2803_vm11 = vweird.f32 %v3770_v7  ;;  %v2823_v50 = vand.u32 2147483648, %v2781_v31 }
0x10a1   :  { %3771 = vtanh.f32 %v2768_v18  ;;  %vm2804_vm14 = vmor %vm2802_vm13, %vm2803_vm11 }
0x10a2   :  { %v2799_v41 = vsub.f32 1.0, %v2798_v1  ;;  %v2795_v1 = vsel %vm2792_vm15, %v2794_v52, %v2790_v13  ;;  %3773 = vpow2.f32 %v3510_v12  ;;  %v2824_v13 = vor.u32 1.1754944e-38, %v2823_v50 }
0x10a4   :  { %v2800_v15 = vmul.f32 %v3770_v7, %v2799_v41  ;;  %v2815_v41 = vmul.f32 %v3768_v55, %v2814_v24 }
0x10a6   :  { %v2801_v53 = vadd.f32 %v3770_v7, %v2800_v15  ;;  %v2816_v56 = vadd.f32 %v3768_v55, %v2815_v41  ;;  %v8560_v15 = vld [vmem:[#allocation10_spill] sm:$0xff] }
0x10a7   :  { %v3772_v20 = vpop.eup %3771  ;;  %v2525_v45 = vadd.f32 %v7525_v59, %v8560_v15 }
0x10a8   :  { %v2805_v18 = vsel %vm2804_vm14, %v3770_v7, %v2801_v53  ;;  %v2829_v39 = vmul.f32 %v3772_v20, %v2795_v1  ;;  %v2820_v52 = vsel %vm2819_vm4, %v3768_v55, %v2816_v56  ;;  %v3774_v7 = vpop.eup %3773 }
0x10a9   :  { %v2810_v58 = vsel %vm2807_vm1, %v2809_v43, %v2805_v18  ;;  %v3513_v63 = vmul.f32 -1.442695, %v2525_v45  ;;  %v2464_v44 = vadd.f32 1.0, %v3774_v7 }
0x10aa   :  { %v2828_v62 = vmul.f32 %v2810_v58, %v7132_v5  ;;  %v2825_v58 = vsel %vm2822_vm7, %v2824_v13, %v2820_v52 }
0x10ab   :  { %v2476_v43 = vand.u32 2147483648, %v2464_v44  ;;  %vm2470_vm9 = vweird.f32 %v2464_v44  ;;  %v2474_v12 = vand.u32 2147483647, %v2464_v44 }
0x10ac   :  { %v7532_v2 = vadd.f32 %v2829_v39, %v2828_v62 }
0x10ad   :  { %v2477_v41 = vor.u32 1.1754944e-38, %v2476_v43  ;;  %vm2475_vm11 = vcmp.eq.f32.partialorder %v2474_v12, 8.507059e+37 }
0x10ae   :  { %3775 = vtanh.f32 %v7532_v2 }
0x10af   :  { %3777 = vpow2.f32 %v3513_v63 }
0x10b0   :  { %3779 = vrcp.f32 %v2464_v44 }
0x10b4   :  { %v3776_v5 = vpop.eup %3775 }
0x10b5   :  { %v2832_v39 = vmul.f32 %v3776_v5, %v2825_v58  ;;  %v3778_v59 = vpop.eup %3777 }
0x10b6   :  { %v2553_v57 = vadd.f32 1.0, %v3778_v59  ;;  %v3780_v54 = vpop.eup %3779  ;;  %v8561_v59 = vld [vmem:[#allocation65_spill] sm:$0xff] }
0x10b7   :  { %3522 = vst [vmem:[%s7873_s6 + $0x28] sm:$0xff] %v2832_v39  ;;  %v2466_v31 = vmul.f32 %v3780_v54, %v2464_v44  ;;  %vm2471_vm8 = vweird.f32 %v3780_v54 }
0x10b8   :  { %3781 = vrcp.f32 %v2553_v57  ;;  %vm2472_vm10 = vmor %vm2470_vm9, %vm2471_vm8  ;;  %v2566_v52 = vand.u32 2147483648, %v2553_v57  ;;  %vm2560_vm13 = vweird.f32 %v2553_v57  ;;  %v2564_v63 = vand.u32 2147483647, %v2553_v57 }
0x10b9   :  { %v2467_v55 = vsub.f32 1.0, %v2466_v31 }
0x10ba   :  { %v2567_v7 = vor.u32 1.1754944e-38, %v2566_v52  ;;  %vm2565_vm15 = vcmp.eq.f32.partialorder %v2564_v63, 8.507059e+37 }
0x10bb   :  { %v2468_v24 = vmul.f32 %v3780_v54, %v2467_v55 }
0x10bd   :  { %v2469_v20 = vadd.f32 %v3780_v54, %v2468_v24  ;;  %v8562_v24 = vld [vmem:[#allocation16_spill] sm:$0xff] }
0x10be   :  { %v3782_v11 = vpop.eup %3781 }
0x10bf   :  { %v2556_v53 = vmul.f32 %v3782_v11, %v2553_v57  ;;  %v2473_v1 = vsel %vm2472_vm10, %v3780_v54, %v2469_v20  ;;  %vm2561_vm12 = vweird.f32 %v3782_v11 }
0x10c0   :  { %v2478_v45 = vsel %vm2475_vm11, %v2477_v41, %v2473_v1  ;;  %vm2562_vm14 = vmor %vm2560_vm13, %vm2561_vm12 }
0x10c1   :  { %v2557_v18 = vsub.f32 1.0, %v2556_v53  ;;  %v2481_v54 = vmul.f32 %v2478_v45, %v8561_v59 }
0x10c3   :  { %v2558_v62 = vmul.f32 %v3782_v11, %v2557_v18  ;;  %v3514_v18 = vmul.f32 -1.442695, %v7521_v35 }
0x10c5   :  { %v2559_v14 = vadd.f32 %v3782_v11, %v2558_v62 }
0x10c7   :  { %v2563_v13 = vsel %vm2562_vm14, %v3782_v11, %v2559_v14 }
0x10c8   :  { %v2568_v58 = vsel %vm2565_vm15, %v2567_v7, %v2563_v13 }
0x10c9   :  { %v2586_v53 = vmul.f32 %v2568_v58, %v8562_v24  ;;  %v4131_v24 = vld [vmem:[%s7871_s4 + $0x2a8] sm:$0xff] }
0x10d6   :  { %v2484_v56 = vpop.permute.xlu1 %2483 }
0x10d7   :  { %v2486_v50 = vmul.f32 %v2484_v56, %v2478_v45 }
0x10d9   :  { %2488 = vrot.lane.b32.xlu0 %v2486_v50, %s4185_s7 }
0x10e0   :  { %v2589_v5 = vpop.permute.xlu2 %2588 }
0x10e1   :  { %v2591_v44 = vmul.f32 %v2589_v5, %v2568_v58 }
0x10e3   :  { %2593 = vrot.lane.b32.xlu1 %v2591_v44, %s4186_s13 }
0x114b   :  { %v2489_v31 = vpop.permute.xlu0 %2488 }
0x114c   :  { %v7543_v55 = vadd.f32 %v2489_v31, %v2481_v54  ;;  %v4129_v54 = vld [vmem:[%s7871_s4 + $0x2e8] sm:$0xff] }
0x114d   :  { %v4130_v31 = vld [vmem:[%s7871_s4 + $0x2c8] sm:$0xff] }
0x114e   :  { %3783 = vtanh.f32 %v7543_v55 }
0x1154   :  { %v3784_v20 = vpop.eup %3783 }
0x1155   :  { %v2594_v57 = vpop.permute.xlu1 %2593  ;;  %2494 = vrot.lane.b32.xlu2 %v3784_v20, %s4185_s7  ;;  %v4145_v20 = vld [vmem:[%s7871_s4 + $0x130] sm:$0xff] }
0x1156   :  { %v7547_v43 = vadd.f32 %v2594_v57, %v2586_v53  ;;  %v4143_v53 = vld [vmem:[%s7871_s4 + $0x150] sm:$0xff]  ;;  %v4146_v57 = vld [vmem:[%s7871_s4 + $0x138] sm:$0xff] }
0x1158   :  { %3785 = vtanh.f32 %v7547_v43 }
0x1159   :  { %3787 = vpow2.f32 %v3514_v18  ;;  %v4148_v18 = vld [vmem:[%s7871_s4 + $0x118] sm:$0xff] }
0x115e   :  { %v3786_v11 = vpop.eup %3785 }
0x115f   :  { %2599 = vrot.lane.b32.xlu0 %v3786_v11, %s4186_s13  ;;  %v3788_v12 = vpop.eup %3787  ;;  %v4147_v11 = vld [vmem:[%s7871_s4 + $0x110] sm:$0xff] }
0x1160   :  { %v2554_v41 = vadd.f32 1.0, %v3788_v12  ;;  %v4149_v12 = vld [vmem:[%s7871_s4 + $0xf0] sm:$0xff] }
0x1162   :  { %3789 = vrcp.f32 %v2554_v41  ;;  %v2581_v13 = vand.u32 2147483648, %v2554_v41  ;;  %vm2575_vm2 = vweird.f32 %v2554_v41  ;;  %v2579_v7 = vand.u32 2147483647, %v2554_v41 }
0x1164   :  { %v2582_v35 = vor.u32 1.1754944e-38, %v2581_v13  ;;  %vm2580_vm4 = vcmp.eq.f32.partialorder %v2579_v7, 8.507059e+37  ;;  %v4158_v13 = vld [vmem:[%s7871_s4 + $0x58] sm:$0xff] }
0x1165   :  { %v4159_v7 = vld [vmem:[%s7871_s4 + $0x38] sm:$0xff] }
0x1167   :  { %2944 = vrot.lane.b32.xlu0 %v2832_v39, %s4186_s13 }
0x1168   :  { %v3790_v56 = vpop.eup %3789 }
0x1169   :  { %v2571_v50 = vmul.f32 %v3790_v56, %v2554_v41  ;;  %vm2576_vm1 = vweird.f32 %v3790_v56  ;;  %v4151_v41 = vld [vmem:[%s7871_s4 + $0xd0] sm:$0xff] }
0x116a   :  { %vm2577_vm3 = vmor %vm2575_vm2, %vm2576_vm1 }
0x116b   :  { %v2572_v14 = vsub.f32 1.0, %v2571_v50  ;;  %v4154_v50 = vld [vmem:[%s7871_s4 + $0xb8] sm:$0xff] }
0x116d   :  { %v2573_v52 = vmul.f32 %v3790_v56, %v2572_v14  ;;  %v4155_v14 = vld [vmem:[%s7871_s4 + $0x90] sm:$0xff] }
0x116f   :  { %v2574_v63 = vadd.f32 %v3790_v56, %v2573_v52  ;;  %v4156_v52 = vld [vmem:[%s7871_s4 + $0x98] sm:$0xff] }
0x1171   :  { %v2578_v39 = vsel %vm2577_vm3, %v3790_v56, %v2574_v63  ;;  %v4153_v56 = vld [vmem:[%s7871_s4 + $0xb0] sm:$0xff]  ;;  %v4157_v63 = vld [vmem:[%s7871_s4 + $0x78] sm:$0xff] }
0x1172   :  { %v2583_v5 = vsel %vm2580_vm4, %v2582_v35, %v2578_v39 }
0x11af   :  { %v2495_v1 = vpop.permute.xlu2 %2494 }
0x11b0   :  { %v2497_v62 = vmul.f32 %v2495_v1, %v2478_v45  ;;  %v4150_v1 = vld [vmem:[%s7871_s4 + $0xf8] sm:$0xff] }
0x11b2   :  { %2836 = vrot.lane.b32.xlu1 %v2497_v62, %s4186_s13  ;;  %v4152_v62 = vld [vmem:[%s7871_s4 + $0xd8] sm:$0xff] }
0x11d1   :  { %v2600_v58 = vpop.permute.xlu0 %2599 }
0x11d2   :  { %v2602_v44 = vmul.f32 %v2600_v58, %v2583_v5  ;;  %v7698_v5 = vld [vmem:[%s7871_s4 + $0x2d0] sm:$0xff]  ;;  %v7704_v58 = vld [vmem:[%s7871_s4 + $0x2d8] sm:$0xff] }
0x11d4   :  { %2840 = vrot.lane.b32.xlu2 %v2602_v44, %s4185_s7 }
0x11d9   :  { %v7556_v45 = vpop.permute.xlu0 %2944 }
0x11da   :  { %3527 = vmatmul.msk.f32.vlgmr.msra.gmra.mxu0 %vm30_vm5, %v7556_v45  ;;  %v7562_v59 = vsel %vm30_vm5, %v2602_v44, %v7556_v45  ;;  %v7710_v44 = vld [vmem:[%s7871_s4 + $0x2b0] sm:$0xff] }
0x11db   :  { %2966 = vmatmul.f32.vlgmr.msra.gmra.mxu2 %v7562_v59  ;;  %3210 = vmatpush.msra.mxu0 %v7372_v4  ;;  %v4132_v4 = vld [vmem:[%s7871_s4 + $0x288] sm:$0xff] }
0x11dc   :  { %3250 = vmatpush.msra.mxu2 %v4129_v54  ;;  %v7716_v54 = vld [vmem:[%s7871_s4 + $0x2b8] sm:$0xff] }
0x11dd   :  { %3211 = vmatpush.msra.mxu0 %v7384_v8  ;;  %v4133_v8 = vld [vmem:[%s7871_s4 + $0x268] sm:$0xff] }
0x11de   :  { %3251 = vmatpush.msra.mxu2 %v4130_v31  ;;  %v7722_v31 = vld [vmem:[%s7871_s4 + $0x290] sm:$0xff] }
0x11df   :  { %3212 = vmatpush.msra.mxu0 %v7396_v32  ;;  %v4134_v32 = vld [vmem:[%s7871_s4 + $0x248] sm:$0xff] }
0x11e0   :  { %3252 = vmatpush.msra.mxu2 %v4131_v24  ;;  %v7728_v24 = vld [vmem:[%s7871_s4 + $0x298] sm:$0xff] }
0x11e1   :  { %3213 = vmatpush.msra.mxu0 %v7408_v46  ;;  %v4135_v46 = vld [vmem:[%s7871_s4 + $0x228] sm:$0xff] }
0x11e2   :  { %3046 = vmatmul.f32.vlgmr.msrb.gmra.mxu0 %v7562_v59  ;;  %3253 = vmatpush.msra.mxu2 %v4132_v4  ;;  %v7737_v4 = vld [vmem:[%s7871_s4 + $0x270] sm:$0xff] }
0x11e3   :  { %3086 = vmatmul.f32.vlgmr.msrb.gmra.mxu2 %v7562_v59  ;;  %3214 = vmatpush.msra.mxu0 %v7420_v22  ;;  %v4136_v22 = vld [vmem:[%s7871_s4 + $0x208] sm:$0xff] }
0x11e4   :  { %3254 = vmatpush.msra.mxu2 %v4133_v8  ;;  %v7743_v8 = vld [vmem:[%s7871_s4 + $0x278] sm:$0xff] }
0x11e5   :  { %3215 = vmatpush.msra.mxu0 %v7432_v61  ;;  %v4137_v61 = vld [vmem:[%s7871_s4 + $0x1f8] sm:$0xff] }
0x11e6   :  { %3255 = vmatpush.msra.mxu2 %v4134_v32  ;;  %v4172_v32 = vld [vmem:[%s7871_s4 + $0x258] sm:$0xff] }
0x11e7   :  { %3216 = vmatpush.msra.mxu0 %v7444_v29  ;;  %v4138_v29 = vld [vmem:[%s7871_s4 + $0x1d8] sm:$0xff] }
0x11e8   :  { %3256 = vmatpush.msra.mxu2 %v4135_v46  ;;  %v4173_v46 = vld [vmem:[%s7871_s4 + $0x230] sm:$0xff] }
0x11e9   :  { %3217 = vmatpush.msra.mxu0 %v7456_v40  ;;  %v4139_v40 = vld [vmem:[%s7871_s4 + $0x1b8] sm:$0xff] }
0x11ea   :  { %3257 = vmatpush.msra.mxu2 %v4136_v22  ;;  %v4174_v22 = vld [vmem:[%s7871_s4 + $0x238] sm:$0xff] }
0x11eb   :  { %3262 = vmatpush.msrb.mxu0 %v7463_v34  ;;  %v4140_v34 = vld [vmem:[%s7871_s4 + $0x198] sm:$0xff] }
0x11ec   :  { %3302 = vmatpush.msrb.mxu2 %v4137_v61  ;;  %v4175_v61 = vld [vmem:[%s7871_s4 + $0x210] sm:$0xff] }
0x11ed   :  { %3263 = vmatpush.msrb.mxu0 %v7470_v21  ;;  %v4141_v21 = vld [vmem:[%s7871_s4 + $0x170] sm:$0xff] }
0x11ee   :  { %3303 = vmatpush.msrb.mxu2 %v4138_v29  ;;  %v4176_v29 = vld [vmem:[%s7871_s4 + $0x218] sm:$0xff] }
0x11ef   :  { %3264 = vmatpush.msrb.mxu0 %v7477_v42  ;;  %v4142_v42 = vld [vmem:[%s7871_s4 + $0x178] sm:$0xff] }
0x11f0   :  { %3304 = vmatpush.msrb.mxu2 %v4139_v40  ;;  %v4177_v40 = vld [vmem:[%s7871_s4 + $0x1c8] sm:$0xff] }
0x11f1   :  { %3265 = vmatpush.msrb.mxu0 %v7484_v36  ;;  %v4144_v36 = vld [vmem:[%s7871_s4 + $0x158] sm:$0xff] }
0x11f2   :  { %3305 = vmatpush.msrb.mxu2 %v4140_v34  ;;  %v4178_v34 = vld [vmem:[%s7871_s4 + $0x1a8] sm:$0xff] }
0x11f3   :  { %3266 = vmatpush.msrb.mxu0 %v4141_v21  ;;  %v8571_v21 = vld [vmem:[#allocation9_spill] sm:$0xff] }
0x11f4   :  { %3306 = vmatpush.msrb.mxu2 %v4142_v42 }
0x11f5   :  { %3267 = vmatpush.msrb.mxu0 %v4143_v53 }
0x11f6   :  { %3307 = vmatpush.msrb.mxu2 %v4144_v36 }
0x11f7   :  { %3268 = vmatpush.msrb.mxu0 %v4145_v20 }
0x11f8   :  { %3308 = vmatpush.msrb.mxu2 %v4146_v57 }
0x11f9   :  { %3269 = vmatpush.msrb.mxu0 %v4147_v11 }
0x11fa   :  { %3309 = vmatpush.msrb.mxu2 %v4148_v18 }
0x11fb   :  { %3270 = vmatpush.msrb.mxu0 %v4149_v12 }
0x11fc   :  { %3310 = vmatpush.msrb.mxu2 %v4150_v1  ;;  %v8572_v1 = vld [vmem:[#allocation26_spill] sm:$0xff] }
0x11fd   :  { %3271 = vmatpush.msrb.mxu0 %v4151_v41 }
0x11fe   :  { %3311 = vmatpush.msrb.mxu2 %v4152_v62  ;;  %v8573_v62 = vld [vmem:[#allocation13_spill] sm:$0xff] }
0x11ff   :  { %3272 = vmatpush.msrb.mxu0 %v4153_v56 }
0x1200   :  { %3312 = vmatpush.msrb.mxu2 %v4154_v50 }
0x1201   :  { %3273 = vmatpush.msrb.mxu0 %v4155_v14 }
0x1202   :  { %3313 = vmatpush.msrb.mxu2 %v4156_v52 }
0x1203   :  { %3274 = vmatpush.msrb.mxu0 %v7077_v30  ;;  %v4160_v30 = vld [vmem:[%s7871_s4 + $0x18] sm:$0xff] }
0x1204   :  { %3314 = vmatpush.msrb.mxu2 %v4157_v63 }
0x1205   :  { %3275 = vmatpush.msrb.mxu0 %v7085_v17 }
0x1206   :  { %3315 = vmatpush.msrb.mxu2 %v4158_v13 }
0x1207   :  { %3276 = vmatpush.msrb.mxu0 %v7093_v6  ;;  %v7686_v6 = vld [vmem:[%s7871_s4 + $0x2f0] sm:$0xff] }
0x1208   :  { %3316 = vmatpush.msrb.mxu2 %v4159_v7 }
0x1209   :  { %3277 = vmatpush.msrb.mxu0 %v8554_v3  ;;  %v7692_v3 = vld [vmem:[%s7871_s4 + $0x2f8] sm:$0xff] }
0x120a   :  { %3317 = vmatpush.msrb.mxu2 %v4160_v30 }
0x1224   :  { %v2837_v17 = vpop.permute.xlu1 %2836 }
0x1225   :  { %3407 = vst.msk [vmem:[#allocation2] sm:$0xff] %vm27_vm0, %v2837_v17 }
0x122e   :  { %v2841_v39 = vpop.permute.xlu2 %2840 }
0x122f   :  { %v2843_v35 = vsel %vm27_vm0, %v2837_v17, %v2841_v39 }
0x1230   :  { %3523 = vmatmul.msk.f32.vlgmr.msrb.gmra.mxu3 %vm248_vm6, %v2843_v35  ;;  %3524 = vmatmul.msk.f32.vlgmr.msrb.gmra.mxu1 %vm248_vm6, %v2843_v35 }
0x1231   :  { %3058 = vmatpush.msrb.mxu1 %v7686_v6  ;;  %3098 = vmatpush.msrb.mxu3 %v7692_v3 }
0x1233   :  { %3059 = vmatpush.msrb.mxu1 %v7698_v5  ;;  %3099 = vmatpush.msrb.mxu3 %v7704_v58 }
0x1235   :  { %3060 = vmatpush.msrb.mxu1 %v7710_v44  ;;  %3100 = vmatpush.msrb.mxu3 %v7716_v54 }
0x1237   :  { %3061 = vmatpush.msrb.mxu1 %v7722_v31  ;;  %3101 = vmatpush.msrb.mxu3 %v7728_v24 }
0x1238   :  { %3006 = vmatmul.f32.vlgmr.msra.gmra.mxu3 %v7562_v59  ;;  %3528 = vmatmul.msk.f32.vlgmr.msra.gmra.mxu1 %vm30_vm5, %v7556_v45  ;;  %v4171_v59 = vld [vmem:[%s7871_s4 + $0x250] sm:$0xff] }
0x1239   :  { %3062 = vmatpush.msrb.mxu1 %v7737_v4  ;;  %3102 = vmatpush.msrb.mxu3 %v7743_v8 }
0x123b   :  { %3063 = vmatpush.msrb.mxu1 %v4171_v59  ;;  %3103 = vmatpush.msrb.mxu3 %v4172_v32 }
0x123d   :  { %3064 = vmatpush.msrb.mxu1 %v4173_v46  ;;  %3104 = vmatpush.msrb.mxu3 %v4174_v22 }
0x123f   :  { %3065 = vmatpush.msrb.mxu1 %v4175_v61  ;;  %3105 = vmatpush.msrb.mxu3 %v4176_v29 }
0x1240   :  { %3529 = vmatmul.msk.f32.vlgmr.msrb.gmra.mxu1 %vm30_vm5, %v7556_v45  ;;  %3530 = vmatmul.msk.f32.vlgmr.msrb.gmra.mxu3 %vm30_vm5, %v7556_v45 }
0x1241   :  { %3182 = vmatpush.msra.mxu1 %v7291_v16  ;;  %3222 = vmatpush.msra.mxu3 %v7218_v28  ;;  %v4179_v28 = vld [vmem:[%s7871_s4 + $0x188] sm:$0xff] }
0x1242   :  { %v4180_v16 = vld [vmem:[%s7871_s4 + $0x168] sm:$0xff] }
0x1243   :  { %3183 = vmatpush.msra.mxu1 %v7304_v23  ;;  %3223 = vmatpush.msra.mxu3 %v4177_v40  ;;  %v4181_v23 = vld [vmem:[%s7871_s4 + $0x148] sm:$0xff] }
0x1245   :  { %3184 = vmatpush.msra.mxu1 %v7317_v47  ;;  %3224 = vmatpush.msra.mxu3 %v4178_v34  ;;  %v8563_v47 = vld [vmem:[#allocation22_spill] sm:$0xff] }
0x1247   :  { %3185 = vmatpush.msra.mxu1 %v7330_v19  ;;  %3225 = vmatpush.msra.mxu3 %v4179_v28  ;;  %v8565_v19 = vld [vmem:[#allocation31_spill] sm:$0xff] }
0x1249   :  { %3186 = vmatpush.msra.mxu1 %v7343_v51  ;;  %3226 = vmatpush.msra.mxu3 %v4180_v16  ;;  %v8567_v51 = vld [vmem:[#allocation69_spill] sm:$0xff] }
0x124b   :  { %3187 = vmatpush.msra.mxu1 %v7351_v48  ;;  %3227 = vmatpush.msra.mxu3 %v4181_v23  ;;  %v8569_v48 = vld [vmem:[#allocation61_spill] sm:$0xff] }
0x124d   :  { %3188 = vmatpush.msra.mxu1 %v7358_v27  ;;  %3228 = vmatpush.msra.mxu3 %v7243_v37  ;;  %v8564_v37 = vld [vmem:[#allocation60_spill] sm:$0xff] }
0x124f   :  { %3189 = vmatpush.msra.mxu1 %v7365_v49  ;;  %3229 = vmatpush.msra.mxu3 %v7257_v25  ;;  %v8566_v25 = vld [vmem:[#allocation28_spill] sm:$0xff] }
0x1250   :  { %v8570_v49 = vld [vmem:[#allocation8_spill] sm:$0xff] }
0x1251   :  { %3190 = vmatpush.msra.mxu1 %v7378_v10  ;;  %3230 = vmatpush.msra.mxu3 %v7266_v33  ;;  %v8568_v33 = vld [vmem:[#allocation34_spill] sm:$0xff] }
0x1253   :  { %3191 = vmatpush.msra.mxu1 %v7390_v0  ;;  %3231 = vmatpush.msra.mxu3 %v7274_v60  ;;  %v4182_v60 = vld [vmem:[%s7871_s4] sm:$0xff] }
0x1255   :  { %3192 = vmatpush.msra.mxu1 %v7402_v26  ;;  %3232 = vmatpush.msra.mxu3 %v7284_v38  ;;  %v4183_v38 = vld [vmem:[%s7871_s4 + $0x8] sm:$0xff] }
0x1257   :  { %3193 = vmatpush.msra.mxu1 %v7414_v9  ;;  %3233 = vmatpush.msra.mxu3 %v8563_v47  ;;  %v2987_v0 = vpop.f32.mrf.mxu0 }
0x1259   :  { %3194 = vmatpush.msra.mxu1 %v8564_v37  ;;  %3234 = vmatpush.msra.mxu3 %v8565_v19 }
0x125b   :  { %3195 = vmatpush.msra.mxu1 %v8566_v25  ;;  %3235 = vmatpush.msra.mxu3 %v8567_v51 }
0x125d   :  { %3196 = vmatpush.msra.mxu1 %v8568_v33  ;;  %3236 = vmatpush.msra.mxu3 %v8569_v48 }
0x125e   :  { %v2967_v27 = vpop.f32.mrf.mxu2 }
0x125f   :  { %3197 = vmatpush.msra.mxu1 %v4182_v60  ;;  %3237 = vmatpush.msra.mxu3 %v4183_v38  ;;  %v2968_v10 = vadd.f32 %v2967_v27, %v8570_v49  ;;  %v3047_v11 = vpop.f32.mrf.mxu0 }
0x1260   :  { %v3048_v41 = vadd.f32 %v3047_v11, %v8572_v1 }
0x1261   :  { %3290 = vmatpush.msrb.mxu1 %v7686_v6  ;;  %3330 = vmatpush.msrb.mxu3 %v7692_v3  ;;  %v2988_v26 = vadd.f32 %v2987_v0, %v2968_v10 }
0x1263   :  { %3291 = vmatpush.msrb.mxu1 %v7698_v5  ;;  %3331 = vmatpush.msrb.mxu3 %v7704_v58  ;;  %v3531_v45 = vmul.f32 -1.442695, %v2988_v26 }
0x1265   :  { %3292 = vmatpush.msrb.mxu1 %v7710_v44  ;;  %3332 = vmatpush.msrb.mxu3 %v7716_v54  ;;  %v8574_v44 = vld [vmem:[#allocation30_spill] sm:$0xff] }
0x1266   :  { %v3087_v6 = vpop.f32.mrf.mxu2 }
0x1267   :  { %3293 = vmatpush.msrb.mxu1 %v7722_v31  ;;  %3333 = vmatpush.msrb.mxu3 %v7728_v24  ;;  %v3088_v54 = vadd.f32 %v3087_v6, %v8574_v44 }
0x1269   :  { %3294 = vmatpush.msrb.mxu1 %v7737_v4  ;;  %3334 = vmatpush.msrb.mxu3 %v7743_v8 }
0x126b   :  { %3295 = vmatpush.msrb.mxu1 %v4171_v59  ;;  %3335 = vmatpush.msrb.mxu3 %v4172_v32 }
0x126d   :  { %3296 = vmatpush.msrb.mxu1 %v4173_v46  ;;  %3336 = vmatpush.msrb.mxu3 %v4174_v22 }
0x126f   :  { %3297 = vmatpush.msrb.mxu1 %v4175_v61  ;;  %3337 = vmatpush.msrb.mxu3 %v4176_v29 }
0x12ad   :  { %v2884_v9 = vpop.f32.mrf.mxu1 }
0x12ae   :  { %v7826_v42 = vadd.f32 %v2884_v9, %v8571_v21 }
0x12b0   :  { %3791 = vtanh.f32 %v7826_v42 }
0x12b1   :  { %3793 = vpow2.f32 %v3531_v45 }
0x12b3   :  { %v7829_v53 = vpop.f32.mrf.mxu3 }
0x12b5   :  { %v3027_v36 = vpop.f32.mrf.mxu1 }
0x12b6   :  { %v3792_v20 = vpop.eup %3791 }
0x12b7   :  { %2928 = vrot.lane.b32.xlu1 %v3792_v20, %s4186_s13  ;;  %v3794_v57 = vpop.eup %3793 }
0x12b8   :  { %v3119_v18 = vadd.f32 1.0, %v3794_v57 }
0x12ba   :  { %3795 = vrcp.f32 %v3119_v18  ;;  %vm3127_vm7 = vweird.f32 %v3119_v18  ;;  %v3133_v29 = vand.u32 2147483648, %v3119_v18  ;;  %v3131_v34 = vand.u32 2147483647, %v3119_v18 }
0x12bb   :  { %v3007_v12 = vpop.f32.mrf.mxu3 }
0x12bc   :  { %v3008_v56 = vadd.f32 %v3007_v12, %v8573_v62  ;;  %v3134_v19 = vor.u32 1.1754944e-38, %v3133_v29  ;;  %vm3132_vm12 = vcmp.eq.f32.partialorder %v3131_v34, 8.507059e+37 }
0x12bd   :  { %v3067_v50 = vpop.f32.mrf.mxu1 }
0x12be   :  { %v3028_v14 = vadd.f32 %v3027_v36, %v3008_v56  ;;  %v3068_v52 = vadd.f32 %v3067_v50, %v3048_v41 }
0x12c0   :  { %v3532_v63 = vmul.f32 -1.442695, %v3028_v14  ;;  %v3533_v13 = vmul.f32 -1.442695, %v3068_v52  ;;  %v3796_v7 = vpop.eup %3795 }
0x12c1   :  { %v3123_v17 = vmul.f32 %v3796_v7, %v3119_v18  ;;  %vm3128_vm6 = vweird.f32 %v3796_v7 }
0x12c2   :  { %3797 = vpow2.f32 %v3532_v63  ;;  %vm3129_vm9 = vmor %vm3127_vm7, %vm3128_vm6 }
0x12c3   :  { %3799 = vpow2.f32 %v3533_v13  ;;  %v3124_v5 = vsub.f32 1.0, %v3123_v17  ;;  %v3107_v58 = vpop.f32.mrf.mxu3 }
0x12c4   :  { %v3108_v31 = vadd.f32 %v3107_v58, %v3088_v54 }
0x12c5   :  { %v3125_v24 = vmul.f32 %v3796_v7, %v3124_v5 }
0x12c7   :  { %v3126_v22 = vadd.f32 %v3796_v7, %v3125_v24 }
0x12c8   :  { %v3798_v30 = vpop.eup %3797 }
0x12c9   :  { %v3800_v39 = vpop.eup %3799  ;;  %v3120_v35 = vadd.f32 1.0, %v3798_v30  ;;  %v3130_v23 = vsel %vm3129_vm9, %v3796_v7, %v3126_v22 }
0x12ca   :  { %v3121_v3 = vadd.f32 1.0, %v3800_v39  ;;  %v3135_v33 = vsel %vm3132_vm12, %v3134_v19, %v3130_v23 }
0x12cb   :  { %3801 = vrcp.f32 %v3120_v35  ;;  %v3148_v61 = vand.u32 2147483648, %v3120_v35  ;;  %v3146_v28 = vand.u32 2147483647, %v3120_v35  ;;  %vm3142_vm10 = vweird.f32 %v3120_v35 }
0x12cc   :  { %3803 = vrcp.f32 %v3121_v3  ;;  %v3163_v26 = vand.u32 2147483648, %v3121_v3  ;;  %vm3157_vm15 = vweird.f32 %v3121_v3  ;;  %v3161_v9 = vand.u32 2147483647, %v3121_v3 }
0x12cd   :  { %3805 = vtanh.f32 %v3108_v31  ;;  %v3149_v25 = vor.u32 1.1754944e-38, %v3148_v61  ;;  %vm3147_vm13 = vcmp.eq.f32.partialorder %v3146_v28, 8.507059e+37 }
0x12ce   :  { %v3164_v21 = vor.u32 1.1754944e-38, %v3163_v26  ;;  %vm3162_vm2 = vcmp.eq.f32.partialorder %v3161_v9, 8.507059e+37 }
0x12d1   :  { %v3802_v4 = vpop.eup %3801 }
0x12d2   :  { %v3804_v8 = vpop.eup %3803  ;;  %v3138_v59 = vmul.f32 %v3802_v4, %v3120_v35  ;;  %vm3143_vm8 = vweird.f32 %v3802_v4 }
0x12d3   :  { %v3153_v32 = vmul.f32 %v3804_v8, %v3121_v3  ;;  %v3806_v37 = vpop.eup %3805  ;;  %vm3144_vm11 = vmor %vm3142_vm10, %vm3143_vm8  ;;  %vm3158_vm14 = vweird.f32 %v3804_v8 }
0x12d4   :  { %v3139_v46 = vsub.f32 1.0, %v3138_v59  ;;  %v3169_v27 = vmul.f32 %v3806_v37, %v3135_v33  ;;  %vm3159_vm1 = vmor %vm3157_vm15, %vm3158_vm14 }
0x12d5   :  { %v3154_v16 = vsub.f32 1.0, %v3153_v32 }
0x12d6   :  { %v3140_v40 = vmul.f32 %v3802_v4, %v3139_v46 }
0x12d7   :  { %v3155_v60 = vmul.f32 %v3804_v8, %v3154_v16 }
0x12d8   :  { %v3141_v47 = vadd.f32 %v3802_v4, %v3140_v40 }
0x12d9   :  { %v3156_v0 = vadd.f32 %v3804_v8, %v3155_v60 }
0x12da   :  { %v3145_v51 = vsel %vm3144_vm11, %v3802_v4, %v3141_v47 }
0x12db   :  { %v3150_v48 = vsel %vm3147_vm13, %v3149_v25, %v3145_v51  ;;  %v3160_v45 = vsel %vm3159_vm1, %v3804_v8, %v3156_v0 }
0x12dc   :  { %v3168_v38 = vmul.f32 %v3150_v48, %v7532_v2  ;;  %v3165_v20 = vsel %vm3162_vm2, %v3164_v21, %v3160_v45  ;;  %v2865_v2 = vadd.f32 %v7829_v53, %v8560_v15 }
0x12de   :  { %v7836_v10 = vadd.f32 %v3169_v27, %v3168_v38  ;;  %v3525_v11 = vmul.f32 -1.442695, %v2865_v2 }
0x12e0   :  { %3807 = vtanh.f32 %v7836_v10 }
0x12e1   :  { %3809 = vpow2.f32 %v3525_v11 }
0x12e6   :  { %v3808_v36 = vpop.eup %3807 }
0x12e7   :  { %v3172_v57 = vmul.f32 %v3808_v36, %v3165_v20  ;;  %v3810_v18 = vpop.eup %3809 }
0x12e8   :  { %v2893_v12 = vadd.f32 1.0, %v3810_v18 }
0x12e9   :  { %3176 = vrot.lane.b32.xlu1 %v3172_v57, %s4186_s13  ;;  %3534 = vst [vmem:[%s7873_s6 + $0x30] sm:$0xff] %v3172_v57 }
0x12ea   :  { %3811 = vrcp.f32 %v2893_v12  ;;  %v2906_v63 = vand.u32 2147483648, %v2893_v12  ;;  %vm2900_vm4 = vweird.f32 %v2893_v12  ;;  %v2904_v13 = vand.u32 2147483647, %v2893_v12 }
0x12ec   :  { %v2907_v30 = vor.u32 1.1754944e-38, %v2906_v63  ;;  %vm2905_vm7 = vcmp.eq.f32.partialorder %v2904_v13, 8.507059e+37 }
0x12f0   :  { %v3812_v41 = vpop.eup %3811 }
0x12f1   :  { %v2896_v56 = vmul.f32 %v3812_v41, %v2893_v12  ;;  %vm2901_vm3 = vweird.f32 %v3812_v41 }
0x12f2   :  { %vm2902_vm6 = vmor %vm2900_vm4, %vm2901_vm3 }
0x12f3   :  { %v2897_v50 = vsub.f32 1.0, %v2896_v56 }
0x12f5   :  { %v2898_v14 = vmul.f32 %v3812_v41, %v2897_v50 }
0x12f7   :  { %v2899_v52 = vadd.f32 %v3812_v41, %v2898_v14 }
0x12f9   :  { %v2903_v7 = vsel %vm2902_vm6, %v3812_v41, %v2899_v52 }
0x12fa   :  { %v2908_v15 = vsel %vm2905_vm7, %v2907_v30, %v2903_v7 }
0x12fb   :  { %v2926_v35 = vmul.f32 %v2908_v15, %v7547_v43 }
0x1329   :  { %v2929_v17 = vpop.permute.xlu1 %2928 }
0x132a   :  { %v2931_v53 = vmul.f32 %v2929_v17, %v2908_v15 }
0x132c   :  { %2933 = vrot.lane.b32.xlu2 %v2931_v53, %s4186_s13 }
0x1334   :  { %3409 = vrot.lane.b32.xlu2 %v7543_v55, %s4187_s26  ;;  %v3526_v55 = vmul.f32 -1.442695, %v7826_v42 }
0x135b   :  { %v3177_v39 = vpop.permute.xlu1 %3176 }
0x135c   :  { %3535 = vmatmul.msk.f32.vlgmr.msra.gmra.mxu0 %vm30_vm5, %v3177_v39  ;;  %3536 = vmatmul.msk.f32.vlgmr.msra.gmra.mxu2 %vm30_vm5, %v3177_v39 }
0x1386   :  { %v2934_v6 = vpop.permute.xlu2 %2933 }
0x1387   :  { %v2936_v3 = vadd.f32 %v2934_v6, %v2926_v35 }
0x1389   :  { %3813 = vtanh.f32 %v2936_v3 }
0x138a   :  { %3815 = vpow2.f32 %v3526_v55 }
0x138e   :  { %v3410_v5 = vpop.permute.xlu2 %3409 }
0x138f   :  { %v3814_v58 = vpop.eup %3813  ;;  %3412 = vst.msk [vmem:[#allocation3] sm:$0xff] %vm27_vm0, %v3410_v5 }
0x1390   :  { %2939 = vrot.lane.b32.xlu0 %v3814_v58, %s4186_s13  ;;  %v3816_v54 = vpop.eup %3815 }
0x1391   :  { %v2894_v31 = vadd.f32 1.0, %v3816_v54 }
0x1393   :  { %3817 = vrcp.f32 %v2894_v31  ;;  %v2921_v32 = vand.u32 2147483648, %v2894_v31  ;;  %vm2915_vm9 = vweird.f32 %v2894_v31  ;;  %v2919_v46 = vand.u32 2147483647, %v2894_v31 }
0x1395   :  { %v2922_v61 = vor.u32 1.1754944e-38, %v2921_v32  ;;  %vm2920_vm10 = vcmp.eq.f32.partialorder %v2919_v46, 8.507059e+37 }
0x1398   :  { %3415 = vrot.lane.b32.xlu0 %v2936_v3, %s4186_s13 }
0x1399   :  { %v3818_v24 = vpop.eup %3817 }
0x139a   :  { %v2911_v4 = vmul.f32 %v3818_v24, %v2894_v31  ;;  %vm2916_vm8 = vweird.f32 %v3818_v24 }
0x139b   :  { %vm2917_vm0 = vmor %vm2915_vm9, %vm2916_vm8 }
0x139c   :  { %v2912_v43 = vsub.f32 1.0, %v2911_v4 }
0x139e   :  { %v2913_v8 = vmul.f32 %v3818_v24, %v2912_v43 }
0x13a0   :  { %v2914_v59 = vadd.f32 %v3818_v24, %v2913_v8 }
0x13a2   :  { %v2918_v22 = vsel %vm2917_vm0, %v3818_v24, %v2914_v59 }
0x13a3   :  { %v2923_v29 = vsel %vm2920_vm10, %v2922_v61, %v2918_v22 }
0x13d9   :  { %v3219_v16 = vpop.f32.mrf.mxu0 }
0x13df   :  { %v3259_v60 = vpop.f32.mrf.mxu2 }
0x1402   :  { %v2940_v40 = vpop.permute.xlu0 %2939 }
0x1403   :  { %v2942_v42 = vmul.f32 %v2940_v40, %v2923_v29 }
0x1405   :  { %3413 = vst.msk [vmem:[#allocation4] sm:$0xff] %vm30_vm5, %v2942_v42  ;;  %v3179_v34 = vsel %vm30_vm5, %v2942_v42, %v3177_v39 }
0x1406   :  { %3198 = vmatmul.f32.vlgmr.msra.gmra.mxu1 %v3179_v34  ;;  %3238 = vmatmul.f32.vlgmr.msra.gmra.mxu3 %v3179_v34 }
0x1407   :  { %3278 = vmatmul.f32.vlgmr.msrb.gmra.mxu0 %v3179_v34  ;;  %3318 = vmatmul.f32.vlgmr.msrb.gmra.mxu2 %v3179_v34 }
0x140a   :  { %v3416_v28 = vpop.permute.xlu0 %3415 }
0x140b   :  { %3418 = vst.msk [vmem:[#allocation5] sm:$0xff] %vm30_vm5, %v3416_v28 }
0x140e   :  { %3537 = vmatmul.msk.f32.vlgmr.msrb.gmra.mxu1 %vm30_vm5, %v3177_v39  ;;  %3538 = vmatmul.msk.f32.vlgmr.msrb.gmra.mxu3 %vm30_vm5, %v3177_v39 }
0x1483   :  { %v3199_v23 = vpop.f32.mrf.mxu1 }
0x1484   :  { %v3200_v47 = vadd.f32 %v3199_v23, %v8570_v49  ;;  %v3279_v19 = vpop.f32.mrf.mxu0 }
0x1485   :  { %v3280_v33 = vadd.f32 %v3279_v19, %v8572_v1 }
0x1486   :  { %v3220_v37 = vadd.f32 %v3219_v16, %v3200_v47 }
0x1488   :  { %v3539_v25 = vmul.f32 -1.442695, %v3220_v37 }
0x1489   :  { %v3239_v51 = vpop.f32.mrf.mxu3 }
0x148a   :  { %3819 = vpow2.f32 %v3539_v25  ;;  %v3240_v48 = vadd.f32 %v3239_v51, %v8573_v62  ;;  %v3319_v11 = vpop.f32.mrf.mxu2 }
0x148b   :  { %v3299_v38 = vpop.f32.mrf.mxu1  ;;  %v3320_v12 = vadd.f32 %v3319_v11, %v8574_v44 }
0x148c   :  { %v3260_v27 = vadd.f32 %v3259_v60, %v3240_v48  ;;  %v3300_v0 = vadd.f32 %v3299_v38, %v3280_v33 }
0x148e   :  { %v3540_v26 = vmul.f32 -1.442695, %v3260_v27  ;;  %v3541_v9 = vmul.f32 -1.442695, %v3300_v0 }
0x1490   :  { %v3820_v45 = vpop.eup %3819  ;;  %3821 = vpow2.f32 %v3540_v26 }
0x1491   :  { %v3351_v21 = vadd.f32 1.0, %v3820_v45  ;;  %3823 = vpow2.f32 %v3541_v9  ;;  %v3339_v18 = vpop.f32.mrf.mxu3 }
0x1492   :  { %v3340_v50 = vadd.f32 %v3339_v18, %v3320_v12 }
0x1493   :  { %3825 = vrcp.f32 %v3351_v21  ;;  %v3365_v7 = vand.u32 2147483648, %v3351_v21  ;;  %vm3359_vm11 = vweird.f32 %v3351_v21  ;;  %v3363_v17 = vand.u32 2147483647, %v3351_v21 }
0x1495   :  { %v3366_v6 = vor.u32 1.1754944e-38, %v3365_v7  ;;  %vm3364_vm15 = vcmp.eq.f32.partialorder %v3363_v17, 8.507059e+37 }
0x1496   :  { %v3822_v49 = vpop.eup %3821 }
0x1497   :  { %v3824_v36 = vpop.eup %3823  ;;  %v3352_v20 = vadd.f32 1.0, %v3822_v49 }
0x1498   :  { %v3353_v57 = vadd.f32 1.0, %v3824_v36 }
0x1499   :  { %v3826_v2 = vpop.eup %3825  ;;  %3827 = vrcp.f32 %v3352_v20  ;;  %v3380_v15 = vand.u32 2147483648, %v3352_v20  ;;  %v3378_v35 = vand.u32 2147483647, %v3352_v20  ;;  %vm3374_vm14 = vweird.f32 %v3352_v20 }
0x149a   :  { %v3355_v1 = vmul.f32 %v3826_v2, %v3351_v21  ;;  %3829 = vrcp.f32 %v3353_v57  ;;  %vm3360_vm5 = vweird.f32 %v3826_v2  ;;  %v3395_v32 = vand.u32 2147483648, %v3353_v57 }
0x149b   :  { %vm3361_vm12 = vmor %vm3359_vm11, %vm3360_vm5  ;;  %3831 = vtanh.f32 %v3340_v50  ;;  %v3381_v58 = vor.u32 1.1754944e-38, %v3380_v15  ;;  %vm3379_vm2 = vcmp.eq.f32.partialorder %v3378_v35, 8.507059e+37  ;;  %vm3389_vm4 = vweird.f32 %v3353_v57 }
0x149c   :  { %v3356_v62 = vsub.f32 1.0, %v3355_v1  ;;  %v3393_v46 = vand.u32 2147483647, %v3353_v57  ;;  %v3396_v61 = vor.u32 1.1754944e-38, %v3395_v32 }
0x149e   :  { %v3357_v41 = vmul.f32 %v3826_v2, %v3356_v62  ;;  %vm3394_vm7 = vcmp.eq.f32.partialorder %v3393_v46, 8.507059e+37 }
0x149f   :  { %v3828_v56 = vpop.eup %3827 }
0x14a0   :  { %v3830_v14 = vpop.eup %3829  ;;  %v3370_v52 = vmul.f32 %v3828_v56, %v3352_v20  ;;  %v3358_v63 = vadd.f32 %v3826_v2, %v3357_v41  ;;  %vm3375_vm13 = vweird.f32 %v3828_v56 }
0x14a1   :  { %v3385_v13 = vmul.f32 %v3830_v14, %v3353_v57  ;;  %vm3376_vm1 = vmor %vm3374_vm14, %vm3375_vm13  ;;  %v3832_v54 = vpop.eup %3831  ;;  %vm3390_vm3 = vweird.f32 %v3830_v14 }
0x14a2   :  { %v3371_v30 = vsub.f32 1.0, %v3370_v52  ;;  %v3362_v39 = vsel %vm3361_vm12, %v3826_v2, %v3358_v63  ;;  %vm3391_vm6 = vmor %vm3389_vm4, %vm3390_vm3 }
0x14a3   :  { %v3386_v44 = vsub.f32 1.0, %v3385_v13  ;;  %v3367_v5 = vsel %vm3364_vm15, %v3366_v6, %v3362_v39 }
0x14a4   :  { %v3372_v53 = vmul.f32 %v3828_v56, %v3371_v30  ;;  %v3401_v43 = vmul.f32 %v3832_v54, %v3367_v5 }
0x14a5   :  { %v3387_v31 = vmul.f32 %v3830_v14, %v3386_v44 }
0x14a6   :  { %v3373_v3 = vadd.f32 %v3828_v56, %v3372_v53 }
0x14a7   :  { %v3388_v59 = vadd.f32 %v3830_v14, %v3387_v31 }
0x14a8   :  { %v3377_v55 = vsel %vm3376_vm1, %v3828_v56, %v3373_v3 }
0x14a9   :  { %v3382_v24 = vsel %vm3379_vm2, %v3381_v58, %v3377_v55  ;;  %v3392_v22 = vsel %vm3391_vm6, %v3830_v14, %v3388_v59 }
0x14aa   :  { %v3400_v4 = vmul.f32 %v3382_v24, %v7836_v10  ;;  %v3397_v40 = vsel %vm3394_vm7, %v3396_v61, %v3392_v22 }
0x14ac   :  { %v3402_v8 = vadd.f32 %v3401_v43, %v3400_v4 }
0x14ae   :  { %3833 = vtanh.f32 %v3402_v8 }
0x14b4   :  { %v3834_v29 = vpop.eup %3833 }
0x14b5   :  { %v3404_v42 = vmul.f32 %v3834_v29, %v3397_v40 }
0x14b7   :  { %3542 = vst [vmem:[%s7873_s6 + $0x38] sm:$0xff] %v3404_v42 }

</bundles_post_ra>
